<compile_context>
chip_gen: v7x
topology: tpu7x:2x2x1
jax: 0.10.0
libtpu: 0.0.40
codegen_flags: <defaults>
</compile_context>

<pallas_src>
import functools
import numpy as np
import jax
import jax.numpy as jnp
from jax.experimental import pallas as pl
from jax.experimental.pallas import tpu as pltpu

# ----------------------------- configuration -------------------------------
N_LABELS   = 10                                    # unused in forward
LAT_SIZE   = 32
IMAGE_SIZE = 8
HW         = IMAGE_SIZE * IMAGE_SIZE               # 64
OUT_CHAN   = 3                                     # `channels`
N_FILTER   = 8
N_CALLS    = 2
N_SEED     = 1
N_LAYERS   = int(np.ceil(np.log2(IMAGE_SIZE)))     # 3
N_EMBS     = 1 + N_LAYERS * N_CALLS                # 7

# TODO(synk): RandGrads / DynaResidualBlock / LinearResidualBlock sources are not in the
# provided file; they are re-implemented with their standard definitions (perception =
# identity + x/y gradient stencils -> c_factor = 3; Dyna block = per-sample 1x1-conv
# residual MLP whose weights come from `lat`; LinearResidualBlock = skip linear +
# 2-layer leaky-relu MLP).
C_FACTOR = 3
FIN  = N_FILTER * C_FACTOR          # dyna block input channels (24)
FH   = N_FILTER                     # dyna block hidden channels (8)
FOUT = N_FILTER                     # dyna block output channels (gated=False)

# Column-grouped dyna-parameter layout: hypernet output unit index u = c*PARAM_GROUP + r,
# where c is the dyna output/hidden channel and r indexes the fields below.
O_W_IN   = 0
O_B_IN   = O_W_IN + FIN             # 24
O_W_MID  = O_B_IN + 1               # 25
O_B_MID  = O_W_MID + FH             # 33
O_W_OUT  = O_B_MID + 1              # 34
O_B_OUT  = O_W_OUT + FH             # 42
O_W_SKIP = O_B_OUT + 1              # 43
O_B_SKIP = O_W_SKIP + FIN           # 67
PARAM_GROUP   = O_B_SKIP + 1        # 68
N_DYNA_PARAMS = FH * PARAM_GROUP    # 544

LEAKY_SLOPE = 0.2
IN_EPS = 1e-5                       # nn.InstanceNorm2d default eps (affine=False)


def _leaky(x):
    return jnp.where(x > 0, x, LEAKY_SLOPE * x)


# ----------------------- perception stencils as matrices --------------------
def make_grad_kernels(k):
    """Deterministic sobel-like x/y gradient stencils of size k x k (numpy)."""
    c = (k - 1) // 2
    yy, xx = np.meshgrid(np.arange(k) - c, np.arange(k) - c, indexing="ij")
    d2 = (yy ** 2 + xx ** 2).astype(np.float64)
    d2[c, c] = 1.0
    gx = xx / d2
    gy = yy / d2
    gx = gx / np.abs(gx).sum()
    gy = gy / np.abs(gy).sum()
    return gx.astype(np.float32), gy.astype(np.float32)


def make_grad_matrices(k, pad):
    """(HW, HW) operators equal to zero-padded 'same' correlation with the x/y stencils,
    pre-transposed so that grad(C, HW) = state(C, HW) @ K^T."""
    kx, ky = make_grad_kernels(k)
    H = W = IMAGE_SIZE
    Kx = np.zeros((HW, HW), np.float32)
    Ky = np.zeros((HW, HW), np.float32)
    for h in range(H):
        for w in range(W):
            p = h * W + w
            for i in range(k):
                for j in range(k):
                    hh = h + i - pad
                    ww = w + j - pad
                    if 0 <= hh < H and 0 <= ww < W:
                        q = hh * W + ww
                        Kx[p, q] += kx[i, j]
                        Ky[p, q] += ky[i, j]
    return np.ascontiguousarray(Kx.T), np.ascontiguousarray(Ky.T)


# --------------------------- the fused kernel --------------------------------
def decoder_kernel(lat_ref, seed_ref,
                   lws_ref, lbs_ref, lw1_ref, lb1_ref, lw2_ref, lb2_ref,
                   hws_ref, hbs_ref, hw1_ref, hb1_ref, hw2_ref, hb2_ref,
                   kxt_ref, kyt_ref, ow_ref, ob_ref,
                   embs_ref, out_ref, raw_ref):
    """One grid step == one batch sample.  State is channel-major (C, H*W)."""
    lat = lat_ref[0]                 # (1, LAT_SIZE)
    x = seed_ref[...]                # (N_FILTER, HW)  -- initial CA state
    embs_ref[0, 0] = x               # out_embs[0] = seed state
    slot = 1

    for l in range(N_LAYERS):
        Wsl, bsl = lws_ref[l], lbs_ref[l]
        W1l, b1l = lw1_ref[l], lb1_ref[l]
        W2l, b2l = lw2_ref[l], lb2_ref[l]
        Wsh, bsh = hws_ref[l], hbs_ref[l]
        W1h, b1h = hw1_ref[l], hb1_ref[l]
        W2h, b2h = hw2_ref[l], hb2_ref[l]
        KxT, KyT = kxt_ref[l], kyt_ref[l]

        for _c in range(N_CALLS):
            # ---- frac_lat : LinearResidualBlock(L, L) ----
            hlat = _leaky(jnp.dot(lat, W1l, preferred_element_type=jnp.float32) + b1l)
            lat = (jnp.dot(lat, Wsl, preferred_element_type=jnp.float32) + bsl
                   + jnp.dot(hlat, W2l, preferred_element_type=jnp.float32) + b2l)

            # ---- hypernet : LinearResidualBlock(L, 544) -> per-sample dyna params ----
            hh = _leaky(jnp.dot(lat, W1h, preferred_element_type=jnp.float32) + b1h)
            pvec = (jnp.dot(lat, Wsh, preferred_element_type=jnp.float32) + bsh
                    + jnp.dot(hh, W2h, preferred_element_type=jnp.float32) + b2h)  # (1, 544)

            # column-grouped params -> (FH, PARAM_GROUP) transposed weight bank,
            # built with lane slices + a sublane concat (no reshape needed).
            wt = jnp.concatenate(
                [pvec[:, g * PARAM_GROUP:(g + 1) * PARAM_GROUP] for g in range(FH)],
                axis=0)                                             # (8, 68)
            w_inT  = wt[:, O_W_IN:O_W_IN + FIN]                     # (8, 24)
            b_in   = wt[:, O_B_IN:O_B_IN + 1]                       # (8, 1)
            w_midT = wt[:, O_W_MID:O_W_MID + FH]                    # (8, 8)
            b_mid  = wt[:, O_B_MID:O_B_MID + 1]
            w_outT = wt[:, O_W_OUT:O_W_OUT + FH]                    # (8, 8)
            b_out  = wt[:, O_B_OUT:O_B_OUT + 1]
            w_skT  = wt[:, O_W_SKIP:O_W_SKIP + FIN]                 # (8, 24)
            b_sk   = wt[:, O_B_SKIP:O_B_SKIP + 1]

            # ---- frac_sobel (RandGrads) as constant spatial matmuls ----
            gx = jnp.dot(x, KxT, preferred_element_type=jnp.float32)   # (8, 64)
            gy = jnp.dot(x, KyT, preferred_element_type=jnp.float32)
            y = jnp.concatenate([x, gx, gy], axis=0)                   # (24, 64)

            # ---- frac_norm : InstanceNorm2d(affine=False), per channel over H*W ----
            mu = jnp.mean(y, axis=1, keepdims=True)
            var = jnp.mean(y * y, axis=1, keepdims=True) - mu * mu
            y = (y - mu) * jax.lax.rsqrt(var + IN_EPS)

            # ---- frac_dyna_conv : per-sample dynamic 1x1 convs (channel MLP + skip) ----
            hd = _leaky(jnp.dot(w_inT, y, preferred_element_type=jnp.float32) + b_in)
            hd = _leaky(jnp.dot(w_midT, hd, preferred_element_type=jnp.float32) + b_mid)
            ho = jnp.dot(w_outT, hd, preferred_element_type=jnp.float32) + b_out
            sk = jnp.dot(w_skT, y, preferred_element_type=jnp.float32) + b_sk
            x = sk + ho                                                # (8, 64)

            embs_ref[slot, 0] = x
            slot += 1

    # ---- out_conv (1x1) + clamp(-1, 1) ----
    r = jnp.dot(ow_ref[...], x, preferred_element_type=jnp.float32) + ob_ref[...]  # (3, 64)
    raw_ref[0] = r
    out_ref[0] = jnp.clip(r, -1.0, 1.0)


def _whole_spec(shape):
    nd = len(shape)

    def idx(b):
        return (0,) * nd

    return pl.BlockSpec(shape, idx)


# ------------------------------ forward -------------------------------------
def decoder_forward(params, lat):
    B = lat.shape[0]
    seed_state = params["seed"][0].reshape(N_FILTER, HW)   # seed_n = 0, ca_init = None

    in_specs = [
        pl.BlockSpec((1, 1, LAT_SIZE), lambda b: (b, 0, 0)),            # lat
        _whole_spec((N_FILTER, HW)),                                    # seed state
        _whole_spec((N_LAYERS, LAT_SIZE, LAT_SIZE)),                    # lat_ws
        _whole_spec((N_LAYERS, 1, LAT_SIZE)),                           # lat_bs
        _whole_spec((N_LAYERS, LAT_SIZE, LAT_SIZE)),                    # lat_w1
        _whole_spec((N_LAYERS, 1, LAT_SIZE)),                           # lat_b1
        _whole_spec((N_LAYERS, LAT_SIZE, LAT_SIZE)),                    # lat_w2
        _whole_spec((N_LAYERS, 1, LAT_SIZE)),                           # lat_b2
        _whole_spec((N_LAYERS, LAT_SIZE, N_DYNA_PARAMS)),               # hyp_ws
        _whole_spec((N_LAYERS, 1, N_DYNA_PARAMS)),                      # hyp_bs
        _whole_spec((N_LAYERS, LAT_SIZE, 2 * LAT_SIZE)),                # hyp_w1
        _whole_spec((N_LAYERS, 1, 2 * LAT_SIZE)),                       # hyp_b1
        _whole_spec((N_LAYERS, 2 * LAT_SIZE, N_DYNA_PARAMS)),           # hyp_w2
        _whole_spec((N_LAYERS, 1, N_DYNA_PARAMS)),                      # hyp_b2
        _whole_spec((N_LAYERS, HW, HW)),                                # kxT
        _whole_spec((N_LAYERS, HW, HW)),                                # kyT
        _whole_spec((OUT_CHAN, N_FILTER)),                              # out_w
        _whole_spec((OUT_CHAN, 1)),                                     # out_b
    ]
    out_specs = (
        pl.BlockSpec((N_EMBS, 1, N_FILTER, HW), lambda b: (0, b, 0, 0)),
        pl.BlockSpec((1, OUT_CHAN, HW), lambda b: (b, 0, 0)),
        pl.BlockSpec((1, OUT_CHAN, HW), lambda b: (b, 0, 0)),
    )

    embs, out_c, raw = pl.pallas_call(
        decoder_kernel,
        grid=(B,),
        in_specs=in_specs,
        out_specs=out_specs,
        out_shape=(jax.ShapeDtypeStruct((N_EMBS, B, N_FILTER, HW), jnp.float32),
                   jax.ShapeDtypeStruct((B, OUT_CHAN, HW), jnp.float32),
                   jax.ShapeDtypeStruct((B, OUT_CHAN, HW), jnp.float32)),
        compiler_params=pltpu.CompilerParams(dimension_semantics=("parallel",)),
    )(lat.reshape(B, 1, LAT_SIZE), seed_state,
      params["lat_ws"], params["lat_bs"], params["lat_w1"], params["lat_b1"],
      params["lat_w2"], params["lat_b2"],
      params["hyp_ws"], params["hyp_bs"], params["hyp_w1"], params["hyp_b1"],
      params["hyp_w2"], params["hyp_b2"],
      params["kxT"], params["kyT"], params["out_w"], params["out_b"])

    # Kernel layout is already flat NCHW -> only free reshapes here, no transposes.
    out_embs = [embs[i].reshape(B, N_FILTER, IMAGE_SIZE, IMAGE_SIZE) for i in range(N_EMBS)]
    out_final = out_c.reshape(B, OUT_CHAN, IMAGE_SIZE, IMAGE_SIZE)
    out_raw = raw.reshape(B, OUT_CHAN, IMAGE_SIZE, IMAGE_SIZE)
    return out_final, out_embs, out_raw


# --------------------- pure-JAX reference (same math) ------------------------
def decoder_forward_ref(params, lat):
    P = jax.lax.Precision.HIGHEST
    B = lat.shape[0]
    x = jnp.broadcast_to(params["seed"][0].reshape(1, N_FILTER, HW), (B, N_FILTER, HW))
    embs = [x]
    lat_cur = lat
    for l in range(N_LAYERS):
        Wsl, bsl = params["lat_ws"][l], params["lat_bs"][l]
        W1l, b1l = params["lat_w1"][l], params["lat_b1"][l]
        W2l, b2l = params["lat_w2"][l], params["lat_b2"][l]
        Wsh, bsh = params["hyp_ws"][l], params["hyp_bs"][l]
        W1h, b1h = params["hyp_w1"][l], params["hyp_b1"][l]
        W2h, b2h = params["hyp_w2"][l], params["hyp_b2"][l]
        KxT, KyT = params["kxT"][l], params["kyT"][l]
        for _c in range(N_CALLS):
            h = _leaky(jnp.dot(lat_cur, W1l, precision=P) + b1l)
            lat_cur = (jnp.dot(lat_cur, Wsl, precision=P) + bsl
                       + jnp.dot(h, W2l, precision=P) + b2l)
            hh = _leaky(jnp.dot(lat_cur, W1h, precision=P) + b1h)
            pvec = (jnp.dot(lat_cur, Wsh, precision=P) + bsh
                    + jnp.dot(hh, W2h, precision=P) + b2h)
            wt = pvec.reshape(B, FH, PARAM_GROUP)
            w_inT  = wt[:, :, O_W_IN:O_W_IN + FIN]
            b_in   = wt[:, :, O_B_IN:O_B_IN + 1]
            w_midT = wt[:, :, O_W_MID:O_W_MID + FH]
            b_mid  = wt[:, :, O_B_MID:O_B_MID + 1]
            w_outT = wt[:, :, O_W_OUT:O_W_OUT + FH]
            b_out  = wt[:, :, O_B_OUT:O_B_OUT + 1]
            w_skT  = wt[:, :, O_W_SKIP:O_W_SKIP + FIN]
            b_sk   = wt[:, :, O_B_SKIP:O_B_SKIP + 1]
            gx = jnp.einsum("bcq,qp->bcp", x, KxT, precision=P)
            gy = jnp.einsum("bcq,qp->bcp", x, KyT, precision=P)
            y = jnp.concatenate([x, gx, gy], axis=1)
            mu = jnp.mean(y, axis=2, keepdims=True)
            var = jnp.mean(y * y, axis=2, keepdims=True) - mu * mu
            y = (y - mu) * jax.lax.rsqrt(var + IN_EPS)
            hd = _leaky(jnp.einsum("bci,bip->bcp", w_inT, y, precision=P) + b_in)
            hd = _leaky(jnp.einsum("bci,bip->bcp", w_midT, hd, precision=P) + b_mid)
            ho = jnp.einsum("bci,bip->bcp", w_outT, hd, precision=P) + b_out
            sk = jnp.einsum("bci,bip->bcp", w_skT, y, precision=P) + b_sk
            x = sk + ho
            embs.append(x)
    r = jnp.einsum("oc,bcp->bop", params["out_w"], x, precision=P) + params["out_b"][None]
    out_embs = [e.reshape(B, N_FILTER, IMAGE_SIZE, IMAGE_SIZE) for e in embs]
    return (jnp.clip(r, -1.0, 1.0).reshape(B, OUT_CHAN, IMAGE_SIZE, IMAGE_SIZE),
            out_embs,
            r.reshape(B, OUT_CHAN, IMAGE_SIZE, IMAGE_SIZE))


# ------------------------------ parameters -----------------------------------
def _init_linear(key, fan_in, fan_out):
    kw, kb = jax.random.split(key)
    w = jax.random.normal(kw, (fan_in, fan_out), jnp.float32) / np.sqrt(fan_in)
    b = 0.01 * jax.random.normal(kb, (1, fan_out), jnp.float32)
    return w, b


def init_params(key):
    keys = iter(jax.random.split(key, 32))
    params = {}

    # TODO(synk): nn.init.orthogonal_ approximated with row-normalized gaussian rows.
    seed_row = jax.random.normal(next(keys), (N_SEED, N_FILTER), jnp.float32)
    seed_row = seed_row / jnp.linalg.norm(seed_row, axis=1, keepdims=True)
    params["seed"] = jnp.broadcast_to(seed_row[:, :, None, None],
                                      (N_SEED, N_FILTER, IMAGE_SIZE, IMAGE_SIZE))

    names = ("lat_ws", "lat_bs", "lat_w1", "lat_b1", "lat_w2", "lat_b2",
             "hyp_ws", "hyp_bs", "hyp_w1", "hyp_b1", "hyp_w2", "hyp_b2")
    stacks = {n: [] for n in names}
    kxt_l, kyt_l = [], []
    for l in range(N_LAYERS):
        k = 2 ** (N_LAYERS - l) + 1
        pad = 2 ** (N_LAYERS - l - 1)
        kxt, kyt = make_grad_matrices(k, pad)
        kxt_l.append(kxt)
        kyt_l.append(kyt)
        w, b = _init_linear(next(keys), LAT_SIZE, LAT_SIZE)
        stacks["lat_ws"].append(w); stacks["lat_bs"].append(b)
        w, b = _init_linear(next(keys), LAT_SIZE, LAT_SIZE)
        stacks["lat_w1"].append(w); stacks["lat_b1"].append(b)
        w, b = _init_linear(next(keys), LAT_SIZE, LAT_SIZE)
        stacks["lat_w2"].append(w); stacks["lat_b2"].append(b)
        # hypernet: LinearResidualBlock(lat_size, n_dyna_params, 2 * lat_size)
        w, b = _init_linear(next(keys), LAT_SIZE, N_DYNA_PARAMS)
        stacks["hyp_ws"].append(w); stacks["hyp_bs"].append(b)
        w, b = _init_linear(next(keys), LAT_SIZE, 2 * LAT_SIZE)
        stacks["hyp_w1"].append(w); stacks["hyp_b1"].append(b)
        w, b = _init_linear(next(keys), 2 * LAT_SIZE, N_DYNA_PARAMS)
        stacks["hyp_w2"].append(w); stacks["hyp_b2"].append(b)
    for n in names:
        params[n] = jnp.stack(stacks[n], axis=0)
    params["kxT"] = jnp.asarray(np.stack(kxt_l, axis=0))
    params["kyT"] = jnp.asarray(np.stack(kyt_l, axis=0))

    kw, kb = jax.random.split(next(keys))
    params["out_w"] = jax.random.normal(kw, (OUT_CHAN, N_FILTER), jnp.float32) / np.sqrt(N_FILTER)
    params["out_b"] = 0.01 * jax.random.normal(kb, (OUT_CHAN, 1), jnp.float32)
    return params


# -------------------------------- main ---------------------------------------
if __name__ == "__main__":
    key = jax.random.PRNGKey(0)
    k_lat, k_par = jax.random.split(key)
    lat = jax.random.normal(k_lat, (2, LAT_SIZE), jnp.float32)
    params = init_params(k_par)

    fwd = jax.jit(functools.partial(decoder_forward, params))
    out, out_embs, out_raw = fwd(lat)
    jax.block_until_ready(out)
    jax.block_until_ready(out_raw)
    for e in out_embs:
        jax.block_until_ready(e)

    # shape / range sanity
    assert out.shape == (2, OUT_CHAN, IMAGE_SIZE, IMAGE_SIZE)
    assert out_raw.shape == (2, OUT_CHAN, IMAGE_SIZE, IMAGE_SIZE)
    assert len(out_embs) == N_EMBS
    assert all(e.shape == (2, N_FILTER, IMAGE_SIZE, IMAGE_SIZE) for e in out_embs)
    assert bool(jnp.all(jnp.isfinite(out)))
    assert bool(jnp.all(out <= 1.0)) and bool(jnp.all(out >= -1.0))

    # numerics vs. a pure-JAX reference of the same math (loose tolerance: the Pallas
    # MXU matmuls and the HIGHEST-precision XLA reference may round differently, but a
    # layout/indexing bug would produce O(1)-relative errors and fail this check).
    ref_out, ref_embs, ref_raw = jax.jit(functools.partial(decoder_forward_ref, params))(lat)
    np.testing.assert_allclose(np.asarray(out), np.asarray(ref_out), rtol=1e-1, atol=1e-1)
    np.testing.assert_allclose(np.asarray(out_raw), np.asarray(ref_raw), rtol=1e-1, atol=1e-1)
    for a, b in zip(out_embs, ref_embs):
        np.testing.assert_allclose(np.asarray(a), np.asarray(b), rtol=1e-1, atol=1e-1)

    print("KERNEL_OK")
</pallas_src>

<mosaic_0001>
module attributes {stable_mosaic.version = 11 : i64} {
  func.func @decoder_kernel(%arg0: i32, %arg1: memref<1x1x32xf32, #tpu.memory_space<vmem>>, %arg2: memref<8x64xf32, #tpu.memory_space<vmem>>, %arg3: memref<3x32x32xf32, #tpu.memory_space<vmem>>, %arg4: memref<3x1x32xf32, #tpu.memory_space<vmem>>, %arg5: memref<3x32x32xf32, #tpu.memory_space<vmem>>, %arg6: memref<3x1x32xf32, #tpu.memory_space<vmem>>, %arg7: memref<3x32x32xf32, #tpu.memory_space<vmem>>, %arg8: memref<3x1x32xf32, #tpu.memory_space<vmem>>, %arg9: memref<3x32x544xf32, #tpu.memory_space<vmem>>, %arg10: memref<3x1x544xf32, #tpu.memory_space<vmem>>, %arg11: memref<3x32x64xf32, #tpu.memory_space<vmem>>, %arg12: memref<3x1x64xf32, #tpu.memory_space<vmem>>, %arg13: memref<3x64x544xf32, #tpu.memory_space<vmem>>, %arg14: memref<3x1x544xf32, #tpu.memory_space<vmem>>, %arg15: memref<3x64x64xf32, #tpu.memory_space<vmem>>, %arg16: memref<3x64x64xf32, #tpu.memory_space<vmem>>, %arg17: memref<3x8xf32, #tpu.memory_space<vmem>>, %arg18: memref<3x1xf32, #tpu.memory_space<vmem>>, %arg19: memref<7x1x8x64xf32, #tpu.memory_space<vmem>>, %arg20: memref<1x3x64xf32, #tpu.memory_space<vmem>>, %arg21: memref<1x3x64xf32, #tpu.memory_space<vmem>>) attributes {dimension_semantics = [#tpu.dimension_semantics<parallel>], iteration_bounds = array<i64: 2>, scalar_prefetch = 0 : i64, scratch_operands = 0 : i64, tpu.core_type = #tpu.core_type<tc>, window_params = [{transform_indices = @transform_0, window_bounds = array<i64: 1, 1, 32>}, {pipeline_mode = #tpu.pipeline_mode<synchronous>, transform_indices = @transform_1, window_bounds = array<i64: 8, 64>}, {pipeline_mode = #tpu.pipeline_mode<synchronous>, transform_indices = @transform_2, window_bounds = array<i64: 3, 32, 32>}, {pipeline_mode = #tpu.pipeline_mode<synchronous>, transform_indices = @transform_3, window_bounds = array<i64: 3, 1, 32>}, {pipeline_mode = #tpu.pipeline_mode<synchronous>, transform_indices = @transform_4, window_bounds = array<i64: 3, 32, 32>}, {pipeline_mode = #tpu.pipeline_mode<synchronous>, transform_indices = @transform_5, window_bounds = array<i64: 3, 1, 32>}, {pipeline_mode = #tpu.pipeline_mode<synchronous>, transform_indices = @transform_6, window_bounds = array<i64: 3, 32, 32>}, {pipeline_mode = #tpu.pipeline_mode<synchronous>, transform_indices = @transform_7, window_bounds = array<i64: 3, 1, 32>}, {pipeline_mode = #tpu.pipeline_mode<synchronous>, transform_indices = @transform_8, window_bounds = array<i64: 3, 32, 544>}, {pipeline_mode = #tpu.pipeline_mode<synchronous>, transform_indices = @transform_9, window_bounds = array<i64: 3, 1, 544>}, {pipeline_mode = #tpu.pipeline_mode<synchronous>, transform_indices = @transform_10, window_bounds = array<i64: 3, 32, 64>}, {pipeline_mode = #tpu.pipeline_mode<synchronous>, transform_indices = @transform_11, window_bounds = array<i64: 3, 1, 64>}, {pipeline_mode = #tpu.pipeline_mode<synchronous>, transform_indices = @transform_12, window_bounds = array<i64: 3, 64, 544>}, {pipeline_mode = #tpu.pipeline_mode<synchronous>, transform_indices = @transform_13, window_bounds = array<i64: 3, 1, 544>}, {pipeline_mode = #tpu.pipeline_mode<synchronous>, transform_indices = @transform_14, window_bounds = array<i64: 3, 64, 64>}, {pipeline_mode = #tpu.pipeline_mode<synchronous>, transform_indices = @transform_15, window_bounds = array<i64: 3, 64, 64>}, {pipeline_mode = #tpu.pipeline_mode<synchronous>, transform_indices = @transform_16, window_bounds = array<i64: 3, 8>}, {pipeline_mode = #tpu.pipeline_mode<synchronous>, transform_indices = @transform_17, window_bounds = array<i64: 3, 1>}, {transform_indices = @transform_18, window_bounds = array<i64: 7, 1, 8, 64>}, {transform_indices = @transform_19, window_bounds = array<i64: 1, 3, 64>}, {transform_indices = @transform_20, window_bounds = array<i64: 1, 3, 64>}]} {
    %c0 = arith.constant 0 : index
    %c0_0 = arith.constant 0 : index
    %c0_1 = arith.constant 0 : index
    %0 = vector.load %arg1[%c0, %c0_0, %c0_1] : memref<1x1x32xf32, #tpu.memory_space<vmem>>, vector<1x1x32xf32>
    %1 = vector.shape_cast %0 : vector<1x1x32xf32> to vector<1x32xf32>
    %c0_2 = arith.constant 0 : index
    %c0_3 = arith.constant 0 : index
    %2 = vector.load %arg2[%c0_2, %c0_3] : memref<8x64xf32, #tpu.memory_space<vmem>>, vector<8x64xf32>
    %c0_4 = arith.constant 0 : index
    %c0_5 = arith.constant 0 : index
    %c0_6 = arith.constant 0 : index
    %c0_7 = arith.constant 0 : index
    %3 = vector.load %arg19[%c0_4, %c0_5, %c0_6, %c0_7] : memref<7x1x8x64xf32, #tpu.memory_space<vmem>>, vector<1x1x8x64xf32>
    %4 = vector.shape_cast %3 : vector<1x1x8x64xf32> to vector<8x64xf32>
    %5 = vector.shape_cast %2 : vector<8x64xf32> to vector<1x1x8x64xf32>
    tpu.vector_store %arg19[%c0_4, %c0_5, %c0_6, %c0_7], %5 {strides = array<i32>} : memref<7x1x8x64xf32, #tpu.memory_space<vmem>>, vector<1x1x8x64xf32>,
    %c0_8 = arith.constant 0 : index
    %c0_9 = arith.constant 0 : index
    %c0_10 = arith.constant 0 : index
    %6 = vector.load %arg3[%c0_8, %c0_9, %c0_10] : memref<3x32x32xf32, #tpu.memory_space<vmem>>, vector<1x32x32xf32>
    %7 = vector.shape_cast %6 : vector<1x32x32xf32> to vector<32x32xf32>
    %c0_11 = arith.constant 0 : index
    %c0_12 = arith.constant 0 : index
    %c0_13 = arith.constant 0 : index
    %8 = vector.load %arg4[%c0_11, %c0_12, %c0_13] : memref<3x1x32xf32, #tpu.memory_space<vmem>>, vector<1x1x32xf32>
    %9 = vector.shape_cast %8 : vector<1x1x32xf32> to vector<1x32xf32>
    %c0_14 = arith.constant 0 : index
    %c0_15 = arith.constant 0 : index
    %c0_16 = arith.constant 0 : index
    %10 = vector.load %arg5[%c0_14, %c0_15, %c0_16] : memref<3x32x32xf32, #tpu.memory_space<vmem>>, vector<1x32x32xf32>
    %11 = vector.shape_cast %10 : vector<1x32x32xf32> to vector<32x32xf32>
    %c0_17 = arith.constant 0 : index
    %c0_18 = arith.constant 0 : index
    %c0_19 = arith.constant 0 : index
    %12 = vector.load %arg6[%c0_17, %c0_18, %c0_19] : memref<3x1x32xf32, #tpu.memory_space<vmem>>, vector<1x1x32xf32>
    %13 = vector.shape_cast %12 : vector<1x1x32xf32> to vector<1x32xf32>
    %c0_20 = arith.constant 0 : index
    %c0_21 = arith.constant 0 : index
    %c0_22 = arith.constant 0 : index
    %14 = vector.load %arg7[%c0_20, %c0_21, %c0_22] : memref<3x32x32xf32, #tpu.memory_space<vmem>>, vector<1x32x32xf32>
    %15 = vector.shape_cast %14 : vector<1x32x32xf32> to vector<32x32xf32>
    %c0_23 = arith.constant 0 : index
    %c0_24 = arith.constant 0 : index
    %c0_25 = arith.constant 0 : index
    %16 = vector.load %arg8[%c0_23, %c0_24, %c0_25] : memref<3x1x32xf32, #tpu.memory_space<vmem>>, vector<1x1x32xf32>
    %17 = vector.shape_cast %16 : vector<1x1x32xf32> to vector<1x32xf32>
    %c0_26 = arith.constant 0 : index
    %c0_27 = arith.constant 0 : index
    %c0_28 = arith.constant 0 : index
    %18 = vector.load %arg9[%c0_26, %c0_27, %c0_28] : memref<3x32x544xf32, #tpu.memory_space<vmem>>, vector<1x32x544xf32>
    %19 = vector.shape_cast %18 : vector<1x32x544xf32> to vector<32x544xf32>
    %c0_29 = arith.constant 0 : index
    %c0_30 = arith.constant 0 : index
    %c0_31 = arith.constant 0 : index
    %20 = vector.load %arg10[%c0_29, %c0_30, %c0_31] : memref<3x1x544xf32, #tpu.memory_space<vmem>>, vector<1x1x544xf32>
    %21 = vector.shape_cast %20 : vector<1x1x544xf32> to vector<1x544xf32>
    %c0_32 = arith.constant 0 : index
    %c0_33 = arith.constant 0 : index
    %c0_34 = arith.constant 0 : index
    %22 = vector.load %arg11[%c0_32, %c0_33, %c0_34] : memref<3x32x64xf32, #tpu.memory_space<vmem>>, vector<1x32x64xf32>
    %23 = vector.shape_cast %22 : vector<1x32x64xf32> to vector<32x64xf32>
    %c0_35 = arith.constant 0 : index
    %c0_36 = arith.constant 0 : index
    %c0_37 = arith.constant 0 : index
    %24 = vector.load %arg12[%c0_35, %c0_36, %c0_37] : memref<3x1x64xf32, #tpu.memory_space<vmem>>, vector<1x1x64xf32>
    %25 = vector.shape_cast %24 : vector<1x1x64xf32> to vector<1x64xf32>
    %c0_38 = arith.constant 0 : index
    %c0_39 = arith.constant 0 : index
    %c0_40 = arith.constant 0 : index
    %26 = vector.load %arg13[%c0_38, %c0_39, %c0_40] : memref<3x64x544xf32, #tpu.memory_space<vmem>>, vector<1x64x544xf32>
    %27 = vector.shape_cast %26 : vector<1x64x544xf32> to vector<64x544xf32>
    %c0_41 = arith.constant 0 : index
    %c0_42 = arith.constant 0 : index
    %c0_43 = arith.constant 0 : index
    %28 = vector.load %arg14[%c0_41, %c0_42, %c0_43] : memref<3x1x544xf32, #tpu.memory_space<vmem>>, vector<1x1x544xf32>
    %29 = vector.shape_cast %28 : vector<1x1x544xf32> to vector<1x544xf32>
    %c0_44 = arith.constant 0 : index
    %c0_45 = arith.constant 0 : index
    %c0_46 = arith.constant 0 : index
    %30 = vector.load %arg15[%c0_44, %c0_45, %c0_46] : memref<3x64x64xf32, #tpu.memory_space<vmem>>, vector<1x64x64xf32>
    %31 = vector.shape_cast %30 : vector<1x64x64xf32> to vector<64x64xf32>
    %c0_47 = arith.constant 0 : index
    %c0_48 = arith.constant 0 : index
    %c0_49 = arith.constant 0 : index
    %32 = vector.load %arg16[%c0_47, %c0_48, %c0_49] : memref<3x64x64xf32, #tpu.memory_space<vmem>>, vector<1x64x64xf32>
    %33 = vector.shape_cast %32 : vector<1x64x64xf32> to vector<64x64xf32>
    %cst = arith.constant dense<0.000000e+00> : vector<1x32xf32>
    %34 = tpu.matmul %1, %11, %cst {dimension_numbers = #tpu.dot_dimension_numbers<[1], [0], [0], [1], [0, 0, 1, 1], [], []>} : vector<1x32xf32>, vector<32x32xf32>, vector<1x32xf32> -> vector<1x32xf32>
    %35 = arith.addf %34, %13 : vector<1x32xf32>
    %cst_50 = arith.constant 0.000000e+00 : f32
    %36 = vector.broadcast %cst_50 : f32 to vector<1x32xf32>
    %37 = arith.cmpf ogt, %35, %36 : vector<1x32xf32>
    %cst_51 = arith.constant 2.000000e-01 : f32
    %38 = vector.broadcast %cst_51 : f32 to vector<1x32xf32>
    %39 = arith.mulf %38, %35 : vector<1x32xf32>
    %40 = arith.select %37, %35, %39 : vector<1x32xi1>, vector<1x32xf32>
    %cst_52 = arith.constant dense<0.000000e+00> : vector<1x32xf32>
    %41 = tpu.matmul %1, %7, %cst_52 {dimension_numbers = #tpu.dot_dimension_numbers<[1], [0], [0], [1], [0, 0, 1, 1], [], []>} : vector<1x32xf32>, vector<32x32xf32>, vector<1x32xf32> -> vector<1x32xf32>
    %42 = arith.addf %41, %9 : vector<1x32xf32>
    %cst_53 = arith.constant dense<0.000000e+00> : vector<1x32xf32>
    %43 = tpu.matmul %40, %15, %cst_53 {dimension_numbers = #tpu.dot_dimension_numbers<[1], [0], [0], [1], [0, 0, 1, 1], [], []>} : vector<1x32xf32>, vector<32x32xf32>, vector<1x32xf32> -> vector<1x32xf32>
    %44 = arith.addf %42, %43 : vector<1x32xf32>
    %45 = arith.addf %44, %17 : vector<1x32xf32>
    %cst_54 = arith.constant dense<0.000000e+00> : vector<1x64xf32>
    %46 = tpu.matmul %45, %23, %cst_54 {dimension_numbers = #tpu.dot_dimension_numbers<[1], [0], [0], [1], [0, 0, 1, 1], [], []>} : vector<1x32xf32>, vector<32x64xf32>, vector<1x64xf32> -> vector<1x64xf32>
    %47 = arith.addf %46, %25 : vector<1x64xf32>
    %cst_55 = arith.constant 0.000000e+00 : f32
    %48 = vector.broadcast %cst_55 : f32 to vector<1x64xf32>
    %49 = arith.cmpf ogt, %47, %48 : vector<1x64xf32>
    %cst_56 = arith.constant 2.000000e-01 : f32
    %50 = vector.broadcast %cst_56 : f32 to vector<1x64xf32>
    %51 = arith.mulf %50, %47 : vector<1x64xf32>
    %52 = arith.select %49, %47, %51 : vector<1x64xi1>, vector<1x64xf32>
    %cst_57 = arith.constant dense<0.000000e+00> : vector<1x544xf32>
    %53 = tpu.matmul %45, %19, %cst_57 {dimension_numbers = #tpu.dot_dimension_numbers<[1], [0], [0], [1], [0, 0, 1, 1], [], []>} : vector<1x32xf32>, vector<32x544xf32>, vector<1x544xf32> -> vector<1x544xf32>
    %54 = arith.addf %53, %21 : vector<1x544xf32>
    %cst_58 = arith.constant dense<0.000000e+00> : vector<1x544xf32>
    %55 = tpu.matmul %52, %27, %cst_58 {dimension_numbers = #tpu.dot_dimension_numbers<[1], [0], [0], [1], [0, 0, 1, 1], [], []>} : vector<1x64xf32>, vector<64x544xf32>, vector<1x544xf32> -> vector<1x544xf32>
    %56 = arith.addf %54, %55 : vector<1x544xf32>
    %57 = arith.addf %56, %29 : vector<1x544xf32>
    %58 = vector.extract_strided_slice %57 {offsets = [0, 0], sizes = [1, 68], strides = [1, 1]} : vector<1x544xf32> to vector<1x68xf32>
    %59 = vector.extract_strided_slice %57 {offsets = [0, 68], sizes = [1, 68], strides = [1, 1]} : vector<1x544xf32> to vector<1x68xf32>
    %60 = vector.extract_strided_slice %57 {offsets = [0, 136], sizes = [1, 68], strides = [1, 1]} : vector<1x544xf32> to vector<1x68xf32>
    %61 = vector.extract_strided_slice %57 {offsets = [0, 204], sizes = [1, 68], strides = [1, 1]} : vector<1x544xf32> to vector<1x68xf32>
    %62 = vector.extract_strided_slice %57 {offsets = [0, 272], sizes = [1, 68], strides = [1, 1]} : vector<1x544xf32> to vector<1x68xf32>
    %63 = vector.extract_strided_slice %57 {offsets = [0, 340], sizes = [1, 68], strides = [1, 1]} : vector<1x544xf32> to vector<1x68xf32>
    %64 = vector.extract_strided_slice %57 {offsets = [0, 408], sizes = [1, 68], strides = [1, 1]} : vector<1x544xf32> to vector<1x68xf32>
    %65 = vector.extract_strided_slice %57 {offsets = [0, 476], sizes = [1, 68], strides = [1, 1]} : vector<1x544xf32> to vector<1x68xf32>
    %66 = tpu.concatenate %58, %59, %60, %61, %62, %63, %64, %65 in 0 : vector<1x68xf32>, vector<1x68xf32>, vector<1x68xf32>, vector<1x68xf32>, vector<1x68xf32>, vector<1x68xf32>, vector<1x68xf32>, vector<1x68xf32> -> vector<8x68xf32>
    %67 = vector.extract_strided_slice %66 {offsets = [0, 0], sizes = [8, 24], strides = [1, 1]} : vector<8x68xf32> to vector<8x24xf32>
    %68 = vector.extract_strided_slice %66 {offsets = [0, 24], sizes = [8, 1], strides = [1, 1]} : vector<8x68xf32> to vector<8x1xf32>
    %69 = vector.extract_strided_slice %66 {offsets = [0, 25], sizes = [8, 8], strides = [1, 1]} : vector<8x68xf32> to vector<8x8xf32>
    %70 = vector.extract_strided_slice %66 {offsets = [0, 33], sizes = [8, 1], strides = [1, 1]} : vector<8x68xf32> to vector<8x1xf32>
    %71 = vector.extract_strided_slice %66 {offsets = [0, 34], sizes = [8, 8], strides = [1, 1]} : vector<8x68xf32> to vector<8x8xf32>
    %72 = vector.extract_strided_slice %66 {offsets = [0, 42], sizes = [8, 1], strides = [1, 1]} : vector<8x68xf32> to vector<8x1xf32>
    %73 = vector.extract_strided_slice %66 {offsets = [0, 43], sizes = [8, 24], strides = [1, 1]} : vector<8x68xf32> to vector<8x24xf32>
    %74 = vector.extract_strided_slice %66 {offsets = [0, 67], sizes = [8, 1], strides = [1, 1]} : vector<8x68xf32> to vector<8x1xf32>
    %cst_59 = arith.constant dense<0.000000e+00> : vector<8x64xf32>
    %75 = tpu.matmul %2, %31, %cst_59 {dimension_numbers = #tpu.dot_dimension_numbers<[1], [0], [0], [1], [0, 0, 1, 1], [], []>} : vector<8x64xf32>, vector<64x64xf32>, vector<8x64xf32> -> vector<8x64xf32>
    %cst_60 = arith.constant dense<0.000000e+00> : vector<8x64xf32>
    %76 = tpu.matmul %2, %33, %cst_60 {dimension_numbers = #tpu.dot_dimension_numbers<[1], [0], [0], [1], [0, 0, 1, 1], [], []>} : vector<8x64xf32>, vector<64x64xf32>, vector<8x64xf32> -> vector<8x64xf32>
    %77 = tpu.concatenate %2, %75, %76 in 0 : vector<8x64xf32>, vector<8x64xf32>, vector<8x64xf32> -> vector<24x64xf32>
    %cst_61 = arith.constant dense<0.000000e+00> : vector<24xf32>
    %78 = vector.multi_reduction <add>, %77, %cst_61 [1] : vector<24x64xf32> to vector<24xf32>
    %79 = vector.shape_cast %78 : vector<24xf32> to vector<24x1xf32>
    %cst_62 = arith.constant 6.400000e+01 : f32
    %80 = vector.broadcast %cst_62 : f32 to vector<24x1xf32>
    %81 = arith.divf %79, %80 : vector<24x1xf32>
    %82 = arith.mulf %77, %77 : vector<24x64xf32>
    %cst_63 = arith.constant dense<0.000000e+00> : vector<24xf32>
    %83 = vector.multi_reduction <add>, %82, %cst_63 [1] : vector<24x64xf32> to vector<24xf32>
    %84 = vector.shape_cast %83 : vector<24xf32> to vector<24x1xf32>
    %cst_64 = arith.constant 6.400000e+01 : f32
    %85 = vector.broadcast %cst_64 : f32 to vector<24x1xf32>
    %86 = arith.divf %84, %85 : vector<24x1xf32>
    %87 = arith.mulf %81, %81 : vector<24x1xf32>
    %88 = arith.subf %86, %87 : vector<24x1xf32>
    %89 = vector.broadcast %81 : vector<24x1xf32> to vector<24x64xf32>
    %90 = arith.subf %77, %89 : vector<24x64xf32>
    %cst_65 = arith.constant 9.99999974E-6 : f32
    %91 = vector.broadcast %cst_65 : f32 to vector<24x1xf32>
    %92 = arith.addf %88, %91 : vector<24x1xf32>
    %93 = math.rsqrt %92 : vector<24x1xf32>
    %94 = vector.broadcast %93 : vector<24x1xf32> to vector<24x64xf32>
    %95 = arith.mulf %90, %94 : vector<24x64xf32>
    %cst_66 = arith.constant dense<0.000000e+00> : vector<8x64xf32>
    %96 = tpu.matmul %67, %95, %cst_66 {dimension_numbers = #tpu.dot_dimension_numbers<[1], [0], [0], [1], [0, 0, 1, 1], [], []>} : vector<8x24xf32>, vector<24x64xf32>, vector<8x64xf32> -> vector<8x64xf32>
    %97 = vector.broadcast %68 : vector<8x1xf32> to vector<8x64xf32>
    %98 = arith.addf %96, %97 : vector<8x64xf32>
    %cst_67 = arith.constant 0.000000e+00 : f32
    %99 = vector.broadcast %cst_67 : f32 to vector<8x64xf32>
    %100 = arith.cmpf ogt, %98, %99 : vector<8x64xf32>
    %cst_68 = arith.constant 2.000000e-01 : f32
    %101 = vector.broadcast %cst_68 : f32 to vector<8x64xf32>
    %102 = arith.mulf %101, %98 : vector<8x64xf32>
    %103 = arith.select %100, %98, %102 : vector<8x64xi1>, vector<8x64xf32>
    %cst_69 = arith.constant dense<0.000000e+00> : vector<8x64xf32>
    %104 = tpu.matmul %69, %103, %cst_69 {dimension_numbers = #tpu.dot_dimension_numbers<[1], [0], [0], [1], [0, 0, 1, 1], [], []>} : vector<8x8xf32>, vector<8x64xf32>, vector<8x64xf32> -> vector<8x64xf32>
    %105 = vector.broadcast %70 : vector<8x1xf32> to vector<8x64xf32>
    %106 = arith.addf %104, %105 : vector<8x64xf32>
    %cst_70 = arith.constant 0.000000e+00 : f32
    %107 = vector.broadcast %cst_70 : f32 to vector<8x64xf32>
    %108 = arith.cmpf ogt, %106, %107 : vector<8x64xf32>
    %cst_71 = arith.constant 2.000000e-01 : f32
    %109 = vector.broadcast %cst_71 : f32 to vector<8x64xf32>
    %110 = arith.mulf %109, %106 : vector<8x64xf32>
    %111 = arith.select %108, %106, %110 : vector<8x64xi1>, vector<8x64xf32>
    %cst_72 = arith.constant dense<0.000000e+00> : vector<8x64xf32>
    %112 = tpu.matmul %71, %111, %cst_72 {dimension_numbers = #tpu.dot_dimension_numbers<[1], [0], [0], [1], [0, 0, 1, 1], [], []>} : vector<8x8xf32>, vector<8x64xf32>, vector<8x64xf32> -> vector<8x64xf32>
    %113 = vector.broadcast %72 : vector<8x1xf32> to vector<8x64xf32>
    %114 = arith.addf %112, %113 : vector<8x64xf32>
    %cst_73 = arith.constant dense<0.000000e+00> : vector<8x64xf32>
    %115 = tpu.matmul %73, %95, %cst_73 {dimension_numbers = #tpu.dot_dimension_numbers<[1], [0], [0], [1], [0, 0, 1, 1], [], []>} : vector<8x24xf32>, vector<24x64xf32>, vector<8x64xf32> -> vector<8x64xf32>
    %116 = vector.broadcast %74 : vector<8x1xf32> to vector<8x64xf32>
    %117 = arith.addf %115, %116 : vector<8x64xf32>
    %118 = arith.addf %117, %114 : vector<8x64xf32>
    %c1 = arith.constant 1 : index
    %c0_74 = arith.constant 0 : index
    %c0_75 = arith.constant 0 : index
    %c0_76 = arith.constant 0 : index
    %119 = vector.load %arg19[%c1, %c0_74, %c0_75, %c0_76] : memref<7x1x8x64xf32, #tpu.memory_space<vmem>>, vector<1x1x8x64xf32>
    %120 = vector.shape_cast %119 : vector<1x1x8x64xf32> to vector<8x64xf32>
    %121 = vector.shape_cast %118 : vector<8x64xf32> to vector<1x1x8x64xf32>
    tpu.vector_store %arg19[%c1, %c0_74, %c0_75, %c0_76], %121 {strides = array<i32>} : memref<7x1x8x64xf32, #tpu.memory_space<vmem>>, vector<1x1x8x64xf32>,
    %cst_77 = arith.constant dense<0.000000e+00> : vector<1x32xf32>
    %122 = tpu.matmul %45, %11, %cst_77 {dimension_numbers = #tpu.dot_dimension_numbers<[1], [0], [0], [1], [0, 0, 1, 1], [], []>} : vector<1x32xf32>, vector<32x32xf32>, vector<1x32xf32> -> vector<1x32xf32>
    %123 = arith.addf %122, %13 : vector<1x32xf32>
    %cst_78 = arith.constant 0.000000e+00 : f32
    %124 = vector.broadcast %cst_78 : f32 to vector<1x32xf32>
    %125 = arith.cmpf ogt, %123, %124 : vector<1x32xf32>
    %cst_79 = arith.constant 2.000000e-01 : f32
    %126 = vector.broadcast %cst_79 : f32 to vector<1x32xf32>
    %127 = arith.mulf %126, %123 : vector<1x32xf32>
    %128 = arith.select %125, %123, %127 : vector<1x32xi1>, vector<1x32xf32>
    %cst_80 = arith.constant dense<0.000000e+00> : vector<1x32xf32>
    %129 = tpu.matmul %45, %7, %cst_80 {dimension_numbers = #tpu.dot_dimension_numbers<[1], [0], [0], [1], [0, 0, 1, 1], [], []>} : vector<1x32xf32>, vector<32x32xf32>, vector<1x32xf32> -> vector<1x32xf32>
    %130 = arith.addf %129, %9 : vector<1x32xf32>
    %cst_81 = arith.constant dense<0.000000e+00> : vector<1x32xf32>
    %131 = tpu.matmul %128, %15, %cst_81 {dimension_numbers = #tpu.dot_dimension_numbers<[1], [0], [0], [1], [0, 0, 1, 1], [], []>} : vector<1x32xf32>, vector<32x32xf32>, vector<1x32xf32> -> vector<1x32xf32>
    %132 = arith.addf %130, %131 : vector<1x32xf32>
    %133 = arith.addf %132, %17 : vector<1x32xf32>
    %cst_82 = arith.constant dense<0.000000e+00> : vector<1x64xf32>
    %134 = tpu.matmul %133, %23, %cst_82 {dimension_numbers = #tpu.dot_dimension_numbers<[1], [0], [0], [1], [0, 0, 1, 1], [], []>} : vector<1x32xf32>, vector<32x64xf32>, vector<1x64xf32> -> vector<1x64xf32>
    %135 = arith.addf %134, %25 : vector<1x64xf32>
    %cst_83 = arith.constant 0.000000e+00 : f32
    %136 = vector.broadcast %cst_83 : f32 to vector<1x64xf32>
    %137 = arith.cmpf ogt, %135, %136 : vector<1x64xf32>
    %cst_84 = arith.constant 2.000000e-01 : f32
    %138 = vector.broadcast %cst_84 : f32 to vector<1x64xf32>
    %139 = arith.mulf %138, %135 : vector<1x64xf32>
    %140 = arith.select %137, %135, %139 : vector<1x64xi1>, vector<1x64xf32>
    %cst_85 = arith.constant dense<0.000000e+00> : vector<1x544xf32>
    %141 = tpu.matmul %133, %19, %cst_85 {dimension_numbers = #tpu.dot_dimension_numbers<[1], [0], [0], [1], [0, 0, 1, 1], [], []>} : vector<1x32xf32>, vector<32x544xf32>, vector<1x544xf32> -> vector<1x544xf32>
    %142 = arith.addf %141, %21 : vector<1x544xf32>
    %cst_86 = arith.constant dense<0.000000e+00> : vector<1x544xf32>
    %143 = tpu.matmul %140, %27, %cst_86 {dimension_numbers = #tpu.dot_dimension_numbers<[1], [0], [0], [1], [0, 0, 1, 1], [], []>} : vector<1x64xf32>, vector<64x544xf32>, vector<1x544xf32> -> vector<1x544xf32>
    %144 = arith.addf %142, %143 : vector<1x544xf32>
    %145 = arith.addf %144, %29 : vector<1x544xf32>
    %146 = vector.extract_strided_slice %145 {offsets = [0, 0], sizes = [1, 68], strides = [1, 1]} : vector<1x544xf32> to vector<1x68xf32>
    %147 = vector.extract_strided_slice %145 {offsets = [0, 68], sizes = [1, 68], strides = [1, 1]} : vector<1x544xf32> to vector<1x68xf32>
    %148 = vector.extract_strided_slice %145 {offsets = [0, 136], sizes = [1, 68], strides = [1, 1]} : vector<1x544xf32> to vector<1x68xf32>
    %149 = vector.extract_strided_slice %145 {offsets = [0, 204], sizes = [1, 68], strides = [1, 1]} : vector<1x544xf32> to vector<1x68xf32>
    %150 = vector.extract_strided_slice %145 {offsets = [0, 272], sizes = [1, 68], strides = [1, 1]} : vector<1x544xf32> to vector<1x68xf32>
    %151 = vector.extract_strided_slice %145 {offsets = [0, 340], sizes = [1, 68], strides = [1, 1]} : vector<1x544xf32> to vector<1x68xf32>
    %152 = vector.extract_strided_slice %145 {offsets = [0, 408], sizes = [1, 68], strides = [1, 1]} : vector<1x544xf32> to vector<1x68xf32>
    %153 = vector.extract_strided_slice %145 {offsets = [0, 476], sizes = [1, 68], strides = [1, 1]} : vector<1x544xf32> to vector<1x68xf32>
    %154 = tpu.concatenate %146, %147, %148, %149, %150, %151, %152, %153 in 0 : vector<1x68xf32>, vector<1x68xf32>, vector<1x68xf32>, vector<1x68xf32>, vector<1x68xf32>, vector<1x68xf32>, vector<1x68xf32>, vector<1x68xf32> -> vector<8x68xf32>
    %155 = vector.extract_strided_slice %154 {offsets = [0, 0], sizes = [8, 24], strides = [1, 1]} : vector<8x68xf32> to vector<8x24xf32>
    %156 = vector.extract_strided_slice %154 {offsets = [0, 24], sizes = [8, 1], strides = [1, 1]} : vector<8x68xf32> to vector<8x1xf32>
    %157 = vector.extract_strided_slice %154 {offsets = [0, 25], sizes = [8, 8], strides = [1, 1]} : vector<8x68xf32> to vector<8x8xf32>
    %158 = vector.extract_strided_slice %154 {offsets = [0, 33], sizes = [8, 1], strides = [1, 1]} : vector<8x68xf32> to vector<8x1xf32>
    %159 = vector.extract_strided_slice %154 {offsets = [0, 34], sizes = [8, 8], strides = [1, 1]} : vector<8x68xf32> to vector<8x8xf32>
    %160 = vector.extract_strided_slice %154 {offsets = [0, 42], sizes = [8, 1], strides = [1, 1]} : vector<8x68xf32> to vector<8x1xf32>
    %161 = vector.extract_strided_slice %154 {offsets = [0, 43], sizes = [8, 24], strides = [1, 1]} : vector<8x68xf32> to vector<8x24xf32>
    %162 = vector.extract_strided_slice %154 {offsets = [0, 67], sizes = [8, 1], strides = [1, 1]} : vector<8x68xf32> to vector<8x1xf32>
    %cst_87 = arith.constant dense<0.000000e+00> : vector<8x64xf32>
    %163 = tpu.matmul %118, %31, %cst_87 {dimension_numbers = #tpu.dot_dimension_numbers<[1], [0], [0], [1], [0, 0, 1, 1], [], []>} : vector<8x64xf32>, vector<64x64xf32>, vector<8x64xf32> -> vector<8x64xf32>
    %cst_88 = arith.constant dense<0.000000e+00> : vector<8x64xf32>
    %164 = tpu.matmul %118, %33, %cst_88 {dimension_numbers = #tpu.dot_dimension_numbers<[1], [0], [0], [1], [0, 0, 1, 1], [], []>} : vector<8x64xf32>, vector<64x64xf32>, vector<8x64xf32> -> vector<8x64xf32>
    %165 = tpu.concatenate %118, %163, %164 in 0 : vector<8x64xf32>, vector<8x64xf32>, vector<8x64xf32> -> vector<24x64xf32>
    %cst_89 = arith.constant dense<0.000000e+00> : vector<24xf32>
    %166 = vector.multi_reduction <add>, %165, %cst_89 [1] : vector<24x64xf32> to vector<24xf32>
    %167 = vector.shape_cast %166 : vector<24xf32> to vector<24x1xf32>
    %cst_90 = arith.constant 6.400000e+01 : f32
    %168 = vector.broadcast %cst_90 : f32 to vector<24x1xf32>
    %169 = arith.divf %167, %168 : vector<24x1xf32>
    %170 = arith.mulf %165, %165 : vector<24x64xf32>
    %cst_91 = arith.constant dense<0.000000e+00> : vector<24xf32>
    %171 = vector.multi_reduction <add>, %170, %cst_91 [1] : vector<24x64xf32> to vector<24xf32>
    %172 = vector.shape_cast %171 : vector<24xf32> to vector<24x1xf32>
    %cst_92 = arith.constant 6.400000e+01 : f32
    %173 = vector.broadcast %cst_92 : f32 to vector<24x1xf32>
    %174 = arith.divf %172, %173 : vector<24x1xf32>
    %175 = arith.mulf %169, %169 : vector<24x1xf32>
    %176 = arith.subf %174, %175 : vector<24x1xf32>
    %177 = vector.broadcast %169 : vector<24x1xf32> to vector<24x64xf32>
    %178 = arith.subf %165, %177 : vector<24x64xf32>
    %cst_93 = arith.constant 9.99999974E-6 : f32
    %179 = vector.broadcast %cst_93 : f32 to vector<24x1xf32>
    %180 = arith.addf %176, %179 : vector<24x1xf32>
    %181 = math.rsqrt %180 : vector<24x1xf32>
    %182 = vector.broadcast %181 : vector<24x1xf32> to vector<24x64xf32>
    %183 = arith.mulf %178, %182 : vector<24x64xf32>
    %cst_94 = arith.constant dense<0.000000e+00> : vector<8x64xf32>
    %184 = tpu.matmul %155, %183, %cst_94 {dimension_numbers = #tpu.dot_dimension_numbers<[1], [0], [0], [1], [0, 0, 1, 1], [], []>} : vector<8x24xf32>, vector<24x64xf32>, vector<8x64xf32> -> vector<8x64xf32>
    %185 = vector.broadcast %156 : vector<8x1xf32> to vector<8x64xf32>
    %186 = arith.addf %184, %185 : vector<8x64xf32>
    %cst_95 = arith.constant 0.000000e+00 : f32
    %187 = vector.broadcast %cst_95 : f32 to vector<8x64xf32>
    %188 = arith.cmpf ogt, %186, %187 : vector<8x64xf32>
    %cst_96 = arith.constant 2.000000e-01 : f32
    %189 = vector.broadcast %cst_96 : f32 to vector<8x64xf32>
    %190 = arith.mulf %189, %186 : vector<8x64xf32>
    %191 = arith.select %188, %186, %190 : vector<8x64xi1>, vector<8x64xf32>
    %cst_97 = arith.constant dense<0.000000e+00> : vector<8x64xf32>
    %192 = tpu.matmul %157, %191, %cst_97 {dimension_numbers = #tpu.dot_dimension_numbers<[1], [0], [0], [1], [0, 0, 1, 1], [], []>} : vector<8x8xf32>, vector<8x64xf32>, vector<8x64xf32> -> vector<8x64xf32>
    %193 = vector.broadcast %158 : vector<8x1xf32> to vector<8x64xf32>
    %194 = arith.addf %192, %193 : vector<8x64xf32>
    %cst_98 = arith.constant 0.000000e+00 : f32
    %195 = vector.broadcast %cst_98 : f32 to vector<8x64xf32>
    %196 = arith.cmpf ogt, %194, %195 : vector<8x64xf32>
    %cst_99 = arith.constant 2.000000e-01 : f32
    %197 = vector.broadcast %cst_99 : f32 to vector<8x64xf32>
    %198 = arith.mulf %197, %194 : vector<8x64xf32>
    %199 = arith.select %196, %194, %198 : vector<8x64xi1>, vector<8x64xf32>
    %cst_100 = arith.constant dense<0.000000e+00> : vector<8x64xf32>
    %200 = tpu.matmul %159, %199, %cst_100 {dimension_numbers = #tpu.dot_dimension_numbers<[1], [0], [0], [1], [0, 0, 1, 1], [], []>} : vector<8x8xf32>, vector<8x64xf32>, vector<8x64xf32> -> vector<8x64xf32>
    %201 = vector.broadcast %160 : vector<8x1xf32> to vector<8x64xf32>
    %202 = arith.addf %200, %201 : vector<8x64xf32>
    %cst_101 = arith.constant dense<0.000000e+00> : vector<8x64xf32>
    %203 = tpu.matmul %161, %183, %cst_101 {dimension_numbers = #tpu.dot_dimension_numbers<[1], [0], [0], [1], [0, 0, 1, 1], [], []>} : vector<8x24xf32>, vector<24x64xf32>, vector<8x64xf32> -> vector<8x64xf32>
    %204 = vector.broadcast %162 : vector<8x1xf32> to vector<8x64xf32>
    %205 = arith.addf %203, %204 : vector<8x64xf32>
    %206 = arith.addf %205, %202 : vector<8x64xf32>
    %c2 = arith.constant 2 : index
    %c0_102 = arith.constant 0 : index
    %c0_103 = arith.constant 0 : index
    %c0_104 = arith.constant 0 : index
    %207 = vector.load %arg19[%c2, %c0_102, %c0_103, %c0_104] : memref<7x1x8x64xf32, #tpu.memory_space<vmem>>, vector<1x1x8x64xf32>
    %208 = vector.shape_cast %207 : vector<1x1x8x64xf32> to vector<8x64xf32>
    %209 = vector.shape_cast %206 : vector<8x64xf32> to vector<1x1x8x64xf32>
    tpu.vector_store %arg19[%c2, %c0_102, %c0_103, %c0_104], %209 {strides = array<i32>} : memref<7x1x8x64xf32, #tpu.memory_space<vmem>>, vector<1x1x8x64xf32>,
    %c1_105 = arith.constant 1 : index
    %c0_106 = arith.constant 0 : index
    %c0_107 = arith.constant 0 : index
    %210 = vector.load %arg3[%c1_105, %c0_106, %c0_107] : memref<3x32x32xf32, #tpu.memory_space<vmem>>, vector<1x32x32xf32>
    %211 = vector.shape_cast %210 : vector<1x32x32xf32> to vector<32x32xf32>
    %c1_108 = arith.constant 1 : index
    %c0_109 = arith.constant 0 : index
    %c0_110 = arith.constant 0 : index
    %212 = vector.load %arg4[%c1_108, %c0_109, %c0_110] : memref<3x1x32xf32, #tpu.memory_space<vmem>>, vector<1x1x32xf32>
    %213 = vector.shape_cast %212 : vector<1x1x32xf32> to vector<1x32xf32>
    %c1_111 = arith.constant 1 : index
    %c0_112 = arith.constant 0 : index
    %c0_113 = arith.constant 0 : index
    %214 = vector.load %arg5[%c1_111, %c0_112, %c0_113] : memref<3x32x32xf32, #tpu.memory_space<vmem>>, vector<1x32x32xf32>
    %215 = vector.shape_cast %214 : vector<1x32x32xf32> to vector<32x32xf32>
    %c1_114 = arith.constant 1 : index
    %c0_115 = arith.constant 0 : index
    %c0_116 = arith.constant 0 : index
    %216 = vector.load %arg6[%c1_114, %c0_115, %c0_116] : memref<3x1x32xf32, #tpu.memory_space<vmem>>, vector<1x1x32xf32>
    %217 = vector.shape_cast %216 : vector<1x1x32xf32> to vector<1x32xf32>
    %c1_117 = arith.constant 1 : index
    %c0_118 = arith.constant 0 : index
    %c0_119 = arith.constant 0 : index
    %218 = vector.load %arg7[%c1_117, %c0_118, %c0_119] : memref<3x32x32xf32, #tpu.memory_space<vmem>>, vector<1x32x32xf32>
    %219 = vector.shape_cast %218 : vector<1x32x32xf32> to vector<32x32xf32>
    %c1_120 = arith.constant 1 : index
    %c0_121 = arith.constant 0 : index
    %c0_122 = arith.constant 0 : index
    %220 = vector.load %arg8[%c1_120, %c0_121, %c0_122] : memref<3x1x32xf32, #tpu.memory_space<vmem>>, vector<1x1x32xf32>
    %221 = vector.shape_cast %220 : vector<1x1x32xf32> to vector<1x32xf32>
    %c1_123 = arith.constant 1 : index
    %c0_124 = arith.constant 0 : index
    %c0_125 = arith.constant 0 : index
    %222 = vector.load %arg9[%c1_123, %c0_124, %c0_125] : memref<3x32x544xf32, #tpu.memory_space<vmem>>, vector<1x32x544xf32>
    %223 = vector.shape_cast %222 : vector<1x32x544xf32> to vector<32x544xf32>
    %c1_126 = arith.constant 1 : index
    %c0_127 = arith.constant 0 : index
    %c0_128 = arith.constant 0 : index
    %224 = vector.load %arg10[%c1_126, %c0_127, %c0_128] : memref<3x1x544xf32, #tpu.memory_space<vmem>>, vector<1x1x544xf32>
    %225 = vector.shape_cast %224 : vector<1x1x544xf32> to vector<1x544xf32>
    %c1_129 = arith.constant 1 : index
    %c0_130 = arith.constant 0 : index
    %c0_131 = arith.constant 0 : index
    %226 = vector.load %arg11[%c1_129, %c0_130, %c0_131] : memref<3x32x64xf32, #tpu.memory_space<vmem>>, vector<1x32x64xf32>
    %227 = vector.shape_cast %226 : vector<1x32x64xf32> to vector<32x64xf32>
    %c1_132 = arith.constant 1 : index
    %c0_133 = arith.constant 0 : index
    %c0_134 = arith.constant 0 : index
    %228 = vector.load %arg12[%c1_132, %c0_133, %c0_134] : memref<3x1x64xf32, #tpu.memory_space<vmem>>, vector<1x1x64xf32>
    %229 = vector.shape_cast %228 : vector<1x1x64xf32> to vector<1x64xf32>
    %c1_135 = arith.constant 1 : index
    %c0_136 = arith.constant 0 : index
    %c0_137 = arith.constant 0 : index
    %230 = vector.load %arg13[%c1_135, %c0_136, %c0_137] : memref<3x64x544xf32, #tpu.memory_space<vmem>>, vector<1x64x544xf32>
    %231 = vector.shape_cast %230 : vector<1x64x544xf32> to vector<64x544xf32>
    %c1_138 = arith.constant 1 : index
    %c0_139 = arith.constant 0 : index
    %c0_140 = arith.constant 0 : index
    %232 = vector.load %arg14[%c1_138, %c0_139, %c0_140] : memref<3x1x544xf32, #tpu.memory_space<vmem>>, vector<1x1x544xf32>
    %233 = vector.shape_cast %232 : vector<1x1x544xf32> to vector<1x544xf32>
    %c1_141 = arith.constant 1 : index
    %c0_142 = arith.constant 0 : index
    %c0_143 = arith.constant 0 : index
    %234 = vector.load %arg15[%c1_141, %c0_142, %c0_143] : memref<3x64x64xf32, #tpu.memory_space<vmem>>, vector<1x64x64xf32>
    %235 = vector.shape_cast %234 : vector<1x64x64xf32> to vector<64x64xf32>
    %c1_144 = arith.constant 1 : index
    %c0_145 = arith.constant 0 : index
    %c0_146 = arith.constant 0 : index
    %236 = vector.load %arg16[%c1_144, %c0_145, %c0_146] : memref<3x64x64xf32, #tpu.memory_space<vmem>>, vector<1x64x64xf32>
    %237 = vector.shape_cast %236 : vector<1x64x64xf32> to vector<64x64xf32>
    %cst_147 = arith.constant dense<0.000000e+00> : vector<1x32xf32>
    %238 = tpu.matmul %133, %215, %cst_147 {dimension_numbers = #tpu.dot_dimension_numbers<[1], [0], [0], [1], [0, 0, 1, 1], [], []>} : vector<1x32xf32>, vector<32x32xf32>, vector<1x32xf32> -> vector<1x32xf32>
    %239 = arith.addf %238, %217 : vector<1x32xf32>
    %cst_148 = arith.constant 0.000000e+00 : f32
    %240 = vector.broadcast %cst_148 : f32 to vector<1x32xf32>
    %241 = arith.cmpf ogt, %239, %240 : vector<1x32xf32>
    %cst_149 = arith.constant 2.000000e-01 : f32
    %242 = vector.broadcast %cst_149 : f32 to vector<1x32xf32>
    %243 = arith.mulf %242, %239 : vector<1x32xf32>
    %244 = arith.select %241, %239, %243 : vector<1x32xi1>, vector<1x32xf32>
    %cst_150 = arith.constant dense<0.000000e+00> : vector<1x32xf32>
    %245 = tpu.matmul %133, %211, %cst_150 {dimension_numbers = #tpu.dot_dimension_numbers<[1], [0], [0], [1], [0, 0, 1, 1], [], []>} : vector<1x32xf32>, vector<32x32xf32>, vector<1x32xf32> -> vector<1x32xf32>
    %246 = arith.addf %245, %213 : vector<1x32xf32>
    %cst_151 = arith.constant dense<0.000000e+00> : vector<1x32xf32>
    %247 = tpu.matmul %244, %219, %cst_151 {dimension_numbers = #tpu.dot_dimension_numbers<[1], [0], [0], [1], [0, 0, 1, 1], [], []>} : vector<1x32xf32>, vector<32x32xf32>, vector<1x32xf32> -> vector<1x32xf32>
    %248 = arith.addf %246, %247 : vector<1x32xf32>
    %249 = arith.addf %248, %221 : vector<1x32xf32>
    %cst_152 = arith.constant dense<0.000000e+00> : vector<1x64xf32>
    %250 = tpu.matmul %249, %227, %cst_152 {dimension_numbers = #tpu.dot_dimension_numbers<[1], [0], [0], [1], [0, 0, 1, 1], [], []>} : vector<1x32xf32>, vector<32x64xf32>, vector<1x64xf32> -> vector<1x64xf32>
    %251 = arith.addf %250, %229 : vector<1x64xf32>
    %cst_153 = arith.constant 0.000000e+00 : f32
    %252 = vector.broadcast %cst_153 : f32 to vector<1x64xf32>
    %253 = arith.cmpf ogt, %251, %252 : vector<1x64xf32>
    %cst_154 = arith.constant 2.000000e-01 : f32
    %254 = vector.broadcast %cst_154 : f32 to vector<1x64xf32>
    %255 = arith.mulf %254, %251 : vector<1x64xf32>
    %256 = arith.select %253, %251, %255 : vector<1x64xi1>, vector<1x64xf32>
    %cst_155 = arith.constant dense<0.000000e+00> : vector<1x544xf32>
    %257 = tpu.matmul %249, %223, %cst_155 {dimension_numbers = #tpu.dot_dimension_numbers<[1], [0], [0], [1], [0, 0, 1, 1], [], []>} : vector<1x32xf32>, vector<32x544xf32>, vector<1x544xf32> -> vector<1x544xf32>
    %258 = arith.addf %257, %225 : vector<1x544xf32>
    %cst_156 = arith.constant dense<0.000000e+00> : vector<1x544xf32>
    %259 = tpu.matmul %256, %231, %cst_156 {dimension_numbers = #tpu.dot_dimension_numbers<[1], [0], [0], [1], [0, 0, 1, 1], [], []>} : vector<1x64xf32>, vector<64x544xf32>, vector<1x544xf32> -> vector<1x544xf32>
    %260 = arith.addf %258, %259 : vector<1x544xf32>
    %261 = arith.addf %260, %233 : vector<1x544xf32>
    %262 = vector.extract_strided_slice %261 {offsets = [0, 0], sizes = [1, 68], strides = [1, 1]} : vector<1x544xf32> to vector<1x68xf32>
    %263 = vector.extract_strided_slice %261 {offsets = [0, 68], sizes = [1, 68], strides = [1, 1]} : vector<1x544xf32> to vector<1x68xf32>
    %264 = vector.extract_strided_slice %261 {offsets = [0, 136], sizes = [1, 68], strides = [1, 1]} : vector<1x544xf32> to vector<1x68xf32>
    %265 = vector.extract_strided_slice %261 {offsets = [0, 204], sizes = [1, 68], strides = [1, 1]} : vector<1x544xf32> to vector<1x68xf32>
    %266 = vector.extract_strided_slice %261 {offsets = [0, 272], sizes = [1, 68], strides = [1, 1]} : vector<1x544xf32> to vector<1x68xf32>
    %267 = vector.extract_strided_slice %261 {offsets = [0, 340], sizes = [1, 68], strides = [1, 1]} : vector<1x544xf32> to vector<1x68xf32>
    %268 = vector.extract_strided_slice %261 {offsets = [0, 408], sizes = [1, 68], strides = [1, 1]} : vector<1x544xf32> to vector<1x68xf32>
    %269 = vector.extract_strided_slice %261 {offsets = [0, 476], sizes = [1, 68], strides = [1, 1]} : vector<1x544xf32> to vector<1x68xf32>
    %270 = tpu.concatenate %262, %263, %264, %265, %266, %267, %268, %269 in 0 : vector<1x68xf32>, vector<1x68xf32>, vector<1x68xf32>, vector<1x68xf32>, vector<1x68xf32>, vector<1x68xf32>, vector<1x68xf32>, vector<1x68xf32> -> vector<8x68xf32>
    %271 = vector.extract_strided_slice %270 {offsets = [0, 0], sizes = [8, 24], strides = [1, 1]} : vector<8x68xf32> to vector<8x24xf32>
    %272 = vector.extract_strided_slice %270 {offsets = [0, 24], sizes = [8, 1], strides = [1, 1]} : vector<8x68xf32> to vector<8x1xf32>
    %273 = vector.extract_strided_slice %270 {offsets = [0, 25], sizes = [8, 8], strides = [1, 1]} : vector<8x68xf32> to vector<8x8xf32>
    %274 = vector.extract_strided_slice %270 {offsets = [0, 33], sizes = [8, 1], strides = [1, 1]} : vector<8x68xf32> to vector<8x1xf32>
    %275 = vector.extract_strided_slice %270 {offsets = [0, 34], sizes = [8, 8], strides = [1, 1]} : vector<8x68xf32> to vector<8x8xf32>
    %276 = vector.extract_strided_slice %270 {offsets = [0, 42], sizes = [8, 1], strides = [1, 1]} : vector<8x68xf32> to vector<8x1xf32>
    %277 = vector.extract_strided_slice %270 {offsets = [0, 43], sizes = [8, 24], strides = [1, 1]} : vector<8x68xf32> to vector<8x24xf32>
    %278 = vector.extract_strided_slice %270 {offsets = [0, 67], sizes = [8, 1], strides = [1, 1]} : vector<8x68xf32> to vector<8x1xf32>
    %cst_157 = arith.constant dense<0.000000e+00> : vector<8x64xf32>
    %279 = tpu.matmul %206, %235, %cst_157 {dimension_numbers = #tpu.dot_dimension_numbers<[1], [0], [0], [1], [0, 0, 1, 1], [], []>} : vector<8x64xf32>, vector<64x64xf32>, vector<8x64xf32> -> vector<8x64xf32>
    %cst_158 = arith.constant dense<0.000000e+00> : vector<8x64xf32>
    %280 = tpu.matmul %206, %237, %cst_158 {dimension_numbers = #tpu.dot_dimension_numbers<[1], [0], [0], [1], [0, 0, 1, 1], [], []>} : vector<8x64xf32>, vector<64x64xf32>, vector<8x64xf32> -> vector<8x64xf32>
    %281 = tpu.concatenate %206, %279, %280 in 0 : vector<8x64xf32>, vector<8x64xf32>, vector<8x64xf32> -> vector<24x64xf32>
    %cst_159 = arith.constant dense<0.000000e+00> : vector<24xf32>
    %282 = vector.multi_reduction <add>, %281, %cst_159 [1] : vector<24x64xf32> to vector<24xf32>
    %283 = vector.shape_cast %282 : vector<24xf32> to vector<24x1xf32>
    %cst_160 = arith.constant 6.400000e+01 : f32
    %284 = vector.broadcast %cst_160 : f32 to vector<24x1xf32>
    %285 = arith.divf %283, %284 : vector<24x1xf32>
    %286 = arith.mulf %281, %281 : vector<24x64xf32>
    %cst_161 = arith.constant dense<0.000000e+00> : vector<24xf32>
    %287 = vector.multi_reduction <add>, %286, %cst_161 [1] : vector<24x64xf32> to vector<24xf32>
    %288 = vector.shape_cast %287 : vector<24xf32> to vector<24x1xf32>
    %cst_162 = arith.constant 6.400000e+01 : f32
    %289 = vector.broadcast %cst_162 : f32 to vector<24x1xf32>
    %290 = arith.divf %288, %289 : vector<24x1xf32>
    %291 = arith.mulf %285, %285 : vector<24x1xf32>
    %292 = arith.subf %290, %291 : vector<24x1xf32>
    %293 = vector.broadcast %285 : vector<24x1xf32> to vector<24x64xf32>
    %294 = arith.subf %281, %293 : vector<24x64xf32>
    %cst_163 = arith.constant 9.99999974E-6 : f32
    %295 = vector.broadcast %cst_163 : f32 to vector<24x1xf32>
    %296 = arith.addf %292, %295 : vector<24x1xf32>
    %297 = math.rsqrt %296 : vector<24x1xf32>
    %298 = vector.broadcast %297 : vector<24x1xf32> to vector<24x64xf32>
    %299 = arith.mulf %294, %298 : vector<24x64xf32>
    %cst_164 = arith.constant dense<0.000000e+00> : vector<8x64xf32>
    %300 = tpu.matmul %271, %299, %cst_164 {dimension_numbers = #tpu.dot_dimension_numbers<[1], [0], [0], [1], [0, 0, 1, 1], [], []>} : vector<8x24xf32>, vector<24x64xf32>, vector<8x64xf32> -> vector<8x64xf32>
    %301 = vector.broadcast %272 : vector<8x1xf32> to vector<8x64xf32>
    %302 = arith.addf %300, %301 : vector<8x64xf32>
    %cst_165 = arith.constant 0.000000e+00 : f32
    %303 = vector.broadcast %cst_165 : f32 to vector<8x64xf32>
    %304 = arith.cmpf ogt, %302, %303 : vector<8x64xf32>
    %cst_166 = arith.constant 2.000000e-01 : f32
    %305 = vector.broadcast %cst_166 : f32 to vector<8x64xf32>
    %306 = arith.mulf %305, %302 : vector<8x64xf32>
    %307 = arith.select %304, %302, %306 : vector<8x64xi1>, vector<8x64xf32>
    %cst_167 = arith.constant dense<0.000000e+00> : vector<8x64xf32>
    %308 = tpu.matmul %273, %307, %cst_167 {dimension_numbers = #tpu.dot_dimension_numbers<[1], [0], [0], [1], [0, 0, 1, 1], [], []>} : vector<8x8xf32>, vector<8x64xf32>, vector<8x64xf32> -> vector<8x64xf32>
    %309 = vector.broadcast %274 : vector<8x1xf32> to vector<8x64xf32>
    %310 = arith.addf %308, %309 : vector<8x64xf32>
    %cst_168 = arith.constant 0.000000e+00 : f32
    %311 = vector.broadcast %cst_168 : f32 to vector<8x64xf32>
    %312 = arith.cmpf ogt, %310, %311 : vector<8x64xf32>
    %cst_169 = arith.constant 2.000000e-01 : f32
    %313 = vector.broadcast %cst_169 : f32 to vector<8x64xf32>
    %314 = arith.mulf %313, %310 : vector<8x64xf32>
    %315 = arith.select %312, %310, %314 : vector<8x64xi1>, vector<8x64xf32>
    %cst_170 = arith.constant dense<0.000000e+00> : vector<8x64xf32>
    %316 = tpu.matmul %275, %315, %cst_170 {dimension_numbers = #tpu.dot_dimension_numbers<[1], [0], [0], [1], [0, 0, 1, 1], [], []>} : vector<8x8xf32>, vector<8x64xf32>, vector<8x64xf32> -> vector<8x64xf32>
    %317 = vector.broadcast %276 : vector<8x1xf32> to vector<8x64xf32>
    %318 = arith.addf %316, %317 : vector<8x64xf32>
    %cst_171 = arith.constant dense<0.000000e+00> : vector<8x64xf32>
    %319 = tpu.matmul %277, %299, %cst_171 {dimension_numbers = #tpu.dot_dimension_numbers<[1], [0], [0], [1], [0, 0, 1, 1], [], []>} : vector<8x24xf32>, vector<24x64xf32>, vector<8x64xf32> -> vector<8x64xf32>
    %320 = vector.broadcast %278 : vector<8x1xf32> to vector<8x64xf32>
    %321 = arith.addf %319, %320 : vector<8x64xf32>
    %322 = arith.addf %321, %318 : vector<8x64xf32>
    %c3 = arith.constant 3 : index
    %c0_172 = arith.constant 0 : index
    %c0_173 = arith.constant 0 : index
    %c0_174 = arith.constant 0 : index
    %323 = vector.load %arg19[%c3, %c0_172, %c0_173, %c0_174] : memref<7x1x8x64xf32, #tpu.memory_space<vmem>>, vector<1x1x8x64xf32>
    %324 = vector.shape_cast %323 : vector<1x1x8x64xf32> to vector<8x64xf32>
    %325 = vector.shape_cast %322 : vector<8x64xf32> to vector<1x1x8x64xf32>
    tpu.vector_store %arg19[%c3, %c0_172, %c0_173, %c0_174], %325 {strides = array<i32>} : memref<7x1x8x64xf32, #tpu.memory_space<vmem>>, vector<1x1x8x64xf32>,
    %cst_175 = arith.constant dense<0.000000e+00> : vector<1x32xf32>
    %326 = tpu.matmul %249, %215, %cst_175 {dimension_numbers = #tpu.dot_dimension_numbers<[1], [0], [0], [1], [0, 0, 1, 1], [], []>} : vector<1x32xf32>, vector<32x32xf32>, vector<1x32xf32> -> vector<1x32xf32>
    %327 = arith.addf %326, %217 : vector<1x32xf32>
    %cst_176 = arith.constant 0.000000e+00 : f32
    %328 = vector.broadcast %cst_176 : f32 to vector<1x32xf32>
    %329 = arith.cmpf ogt, %327, %328 : vector<1x32xf32>
    %cst_177 = arith.constant 2.000000e-01 : f32
    %330 = vector.broadcast %cst_177 : f32 to vector<1x32xf32>
    %331 = arith.mulf %330, %327 : vector<1x32xf32>
    %332 = arith.select %329, %327, %331 : vector<1x32xi1>, vector<1x32xf32>
    %cst_178 = arith.constant dense<0.000000e+00> : vector<1x32xf32>
    %333 = tpu.matmul %249, %211, %cst_178 {dimension_numbers = #tpu.dot_dimension_numbers<[1], [0], [0], [1], [0, 0, 1, 1], [], []>} : vector<1x32xf32>, vector<32x32xf32>, vector<1x32xf32> -> vector<1x32xf32>
    %334 = arith.addf %333, %213 : vector<1x32xf32>
    %cst_179 = arith.constant dense<0.000000e+00> : vector<1x32xf32>
    %335 = tpu.matmul %332, %219, %cst_179 {dimension_numbers = #tpu.dot_dimension_numbers<[1], [0], [0], [1], [0, 0, 1, 1], [], []>} : vector<1x32xf32>, vector<32x32xf32>, vector<1x32xf32> -> vector<1x32xf32>
    %336 = arith.addf %334, %335 : vector<1x32xf32>
    %337 = arith.addf %336, %221 : vector<1x32xf32>
    %cst_180 = arith.constant dense<0.000000e+00> : vector<1x64xf32>
    %338 = tpu.matmul %337, %227, %cst_180 {dimension_numbers = #tpu.dot_dimension_numbers<[1], [0], [0], [1], [0, 0, 1, 1], [], []>} : vector<1x32xf32>, vector<32x64xf32>, vector<1x64xf32> -> vector<1x64xf32>
    %339 = arith.addf %338, %229 : vector<1x64xf32>
    %cst_181 = arith.constant 0.000000e+00 : f32
    %340 = vector.broadcast %cst_181 : f32 to vector<1x64xf32>
    %341 = arith.cmpf ogt, %339, %340 : vector<1x64xf32>
    %cst_182 = arith.constant 2.000000e-01 : f32
    %342 = vector.broadcast %cst_182 : f32 to vector<1x64xf32>
    %343 = arith.mulf %342, %339 : vector<1x64xf32>
    %344 = arith.select %341, %339, %343 : vector<1x64xi1>, vector<1x64xf32>
    %cst_183 = arith.constant dense<0.000000e+00> : vector<1x544xf32>
    %345 = tpu.matmul %337, %223, %cst_183 {dimension_numbers = #tpu.dot_dimension_numbers<[1], [0], [0], [1], [0, 0, 1, 1], [], []>} : vector<1x32xf32>, vector<32x544xf32>, vector<1x544xf32> -> vector<1x544xf32>
    %346 = arith.addf %345, %225 : vector<1x544xf32>
    %cst_184 = arith.constant dense<0.000000e+00> : vector<1x544xf32>
    %347 = tpu.matmul %344, %231, %cst_184 {dimension_numbers = #tpu.dot_dimension_numbers<[1], [0], [0], [1], [0, 0, 1, 1], [], []>} : vector<1x64xf32>, vector<64x544xf32>, vector<1x544xf32> -> vector<1x544xf32>
    %348 = arith.addf %346, %347 : vector<1x544xf32>
    %349 = arith.addf %348, %233 : vector<1x544xf32>
    %350 = vector.extract_strided_slice %349 {offsets = [0, 0], sizes = [1, 68], strides = [1, 1]} : vector<1x544xf32> to vector<1x68xf32>
    %351 = vector.extract_strided_slice %349 {offsets = [0, 68], sizes = [1, 68], strides = [1, 1]} : vector<1x544xf32> to vector<1x68xf32>
    %352 = vector.extract_strided_slice %349 {offsets = [0, 136], sizes = [1, 68], strides = [1, 1]} : vector<1x544xf32> to vector<1x68xf32>
    %353 = vector.extract_strided_slice %349 {offsets = [0, 204], sizes = [1, 68], strides = [1, 1]} : vector<1x544xf32> to vector<1x68xf32>
    %354 = vector.extract_strided_slice %349 {offsets = [0, 272], sizes = [1, 68], strides = [1, 1]} : vector<1x544xf32> to vector<1x68xf32>
    %355 = vector.extract_strided_slice %349 {offsets = [0, 340], sizes = [1, 68], strides = [1, 1]} : vector<1x544xf32> to vector<1x68xf32>
    %356 = vector.extract_strided_slice %349 {offsets = [0, 408], sizes = [1, 68], strides = [1, 1]} : vector<1x544xf32> to vector<1x68xf32>
    %357 = vector.extract_strided_slice %349 {offsets = [0, 476], sizes = [1, 68], strides = [1, 1]} : vector<1x544xf32> to vector<1x68xf32>
    %358 = tpu.concatenate %350, %351, %352, %353, %354, %355, %356, %357 in 0 : vector<1x68xf32>, vector<1x68xf32>, vector<1x68xf32>, vector<1x68xf32>, vector<1x68xf32>, vector<1x68xf32>, vector<1x68xf32>, vector<1x68xf32> -> vector<8x68xf32>
    %359 = vector.extract_strided_slice %358 {offsets = [0, 0], sizes = [8, 24], strides = [1, 1]} : vector<8x68xf32> to vector<8x24xf32>
    %360 = vector.extract_strided_slice %358 {offsets = [0, 24], sizes = [8, 1], strides = [1, 1]} : vector<8x68xf32> to vector<8x1xf32>
    %361 = vector.extract_strided_slice %358 {offsets = [0, 25], sizes = [8, 8], strides = [1, 1]} : vector<8x68xf32> to vector<8x8xf32>
    %362 = vector.extract_strided_slice %358 {offsets = [0, 33], sizes = [8, 1], strides = [1, 1]} : vector<8x68xf32> to vector<8x1xf32>
    %363 = vector.extract_strided_slice %358 {offsets = [0, 34], sizes = [8, 8], strides = [1, 1]} : vector<8x68xf32> to vector<8x8xf32>
    %364 = vector.extract_strided_slice %358 {offsets = [0, 42], sizes = [8, 1], strides = [1, 1]} : vector<8x68xf32> to vector<8x1xf32>
    %365 = vector.extract_strided_slice %358 {offsets = [0, 43], sizes = [8, 24], strides = [1, 1]} : vector<8x68xf32> to vector<8x24xf32>
    %366 = vector.extract_strided_slice %358 {offsets = [0, 67], sizes = [8, 1], strides = [1, 1]} : vector<8x68xf32> to vector<8x1xf32>
    %cst_185 = arith.constant dense<0.000000e+00> : vector<8x64xf32>
    %367 = tpu.matmul %322, %235, %cst_185 {dimension_numbers = #tpu.dot_dimension_numbers<[1], [0], [0], [1], [0, 0, 1, 1], [], []>} : vector<8x64xf32>, vector<64x64xf32>, vector<8x64xf32> -> vector<8x64xf32>
    %cst_186 = arith.constant dense<0.000000e+00> : vector<8x64xf32>
    %368 = tpu.matmul %322, %237, %cst_186 {dimension_numbers = #tpu.dot_dimension_numbers<[1], [0], [0], [1], [0, 0, 1, 1], [], []>} : vector<8x64xf32>, vector<64x64xf32>, vector<8x64xf32> -> vector<8x64xf32>
    %369 = tpu.concatenate %322, %367, %368 in 0 : vector<8x64xf32>, vector<8x64xf32>, vector<8x64xf32> -> vector<24x64xf32>
    %cst_187 = arith.constant dense<0.000000e+00> : vector<24xf32>
    %370 = vector.multi_reduction <add>, %369, %cst_187 [1] : vector<24x64xf32> to vector<24xf32>
    %371 = vector.shape_cast %370 : vector<24xf32> to vector<24x1xf32>
    %cst_188 = arith.constant 6.400000e+01 : f32
    %372 = vector.broadcast %cst_188 : f32 to vector<24x1xf32>
    %373 = arith.divf %371, %372 : vector<24x1xf32>
    %374 = arith.mulf %369, %369 : vector<24x64xf32>
    %cst_189 = arith.constant dense<0.000000e+00> : vector<24xf32>
    %375 = vector.multi_reduction <add>, %374, %cst_189 [1] : vector<24x64xf32> to vector<24xf32>
    %376 = vector.shape_cast %375 : vector<24xf32> to vector<24x1xf32>
    %cst_190 = arith.constant 6.400000e+01 : f32
    %377 = vector.broadcast %cst_190 : f32 to vector<24x1xf32>
    %378 = arith.divf %376, %377 : vector<24x1xf32>
    %379 = arith.mulf %373, %373 : vector<24x1xf32>
    %380 = arith.subf %378, %379 : vector<24x1xf32>
    %381 = vector.broadcast %373 : vector<24x1xf32> to vector<24x64xf32>
    %382 = arith.subf %369, %381 : vector<24x64xf32>
    %cst_191 = arith.constant 9.99999974E-6 : f32
    %383 = vector.broadcast %cst_191 : f32 to vector<24x1xf32>
    %384 = arith.addf %380, %383 : vector<24x1xf32>
    %385 = math.rsqrt %384 : vector<24x1xf32>
    %386 = vector.broadcast %385 : vector<24x1xf32> to vector<24x64xf32>
    %387 = arith.mulf %382, %386 : vector<24x64xf32>
    %cst_192 = arith.constant dense<0.000000e+00> : vector<8x64xf32>
    %388 = tpu.matmul %359, %387, %cst_192 {dimension_numbers = #tpu.dot_dimension_numbers<[1], [0], [0], [1], [0, 0, 1, 1], [], []>} : vector<8x24xf32>, vector<24x64xf32>, vector<8x64xf32> -> vector<8x64xf32>
    %389 = vector.broadcast %360 : vector<8x1xf32> to vector<8x64xf32>
    %390 = arith.addf %388, %389 : vector<8x64xf32>
    %cst_193 = arith.constant 0.000000e+00 : f32
    %391 = vector.broadcast %cst_193 : f32 to vector<8x64xf32>
    %392 = arith.cmpf ogt, %390, %391 : vector<8x64xf32>
    %cst_194 = arith.constant 2.000000e-01 : f32
    %393 = vector.broadcast %cst_194 : f32 to vector<8x64xf32>
    %394 = arith.mulf %393, %390 : vector<8x64xf32>
    %395 = arith.select %392, %390, %394 : vector<8x64xi1>, vector<8x64xf32>
    %cst_195 = arith.constant dense<0.000000e+00> : vector<8x64xf32>
    %396 = tpu.matmul %361, %395, %cst_195 {dimension_numbers = #tpu.dot_dimension_numbers<[1], [0], [0], [1], [0, 0, 1, 1], [], []>} : vector<8x8xf32>, vector<8x64xf32>, vector<8x64xf32> -> vector<8x64xf32>
    %397 = vector.broadcast %362 : vector<8x1xf32> to vector<8x64xf32>
    %398 = arith.addf %396, %397 : vector<8x64xf32>
    %cst_196 = arith.constant 0.000000e+00 : f32
    %399 = vector.broadcast %cst_196 : f32 to vector<8x64xf32>
    %400 = arith.cmpf ogt, %398, %399 : vector<8x64xf32>
    %cst_197 = arith.constant 2.000000e-01 : f32
    %401 = vector.broadcast %cst_197 : f32 to vector<8x64xf32>
    %402 = arith.mulf %401, %398 : vector<8x64xf32>
    %403 = arith.select %400, %398, %402 : vector<8x64xi1>, vector<8x64xf32>
    %cst_198 = arith.constant dense<0.000000e+00> : vector<8x64xf32>
    %404 = tpu.matmul %363, %403, %cst_198 {dimension_numbers = #tpu.dot_dimension_numbers<[1], [0], [0], [1], [0, 0, 1, 1], [], []>} : vector<8x8xf32>, vector<8x64xf32>, vector<8x64xf32> -> vector<8x64xf32>
    %405 = vector.broadcast %364 : vector<8x1xf32> to vector<8x64xf32>
    %406 = arith.addf %404, %405 : vector<8x64xf32>
    %cst_199 = arith.constant dense<0.000000e+00> : vector<8x64xf32>
    %407 = tpu.matmul %365, %387, %cst_199 {dimension_numbers = #tpu.dot_dimension_numbers<[1], [0], [0], [1], [0, 0, 1, 1], [], []>} : vector<8x24xf32>, vector<24x64xf32>, vector<8x64xf32> -> vector<8x64xf32>
    %408 = vector.broadcast %366 : vector<8x1xf32> to vector<8x64xf32>
    %409 = arith.addf %407, %408 : vector<8x64xf32>
    %410 = arith.addf %409, %406 : vector<8x64xf32>
    %c4 = arith.constant 4 : index
    %c0_200 = arith.constant 0 : index
    %c0_201 = arith.constant 0 : index
    %c0_202 = arith.constant 0 : index
    %411 = vector.load %arg19[%c4, %c0_200, %c0_201, %c0_202] : memref<7x1x8x64xf32, #tpu.memory_space<vmem>>, vector<1x1x8x64xf32>
    %412 = vector.shape_cast %411 : vector<1x1x8x64xf32> to vector<8x64xf32>
    %413 = vector.shape_cast %410 : vector<8x64xf32> to vector<1x1x8x64xf32>
    tpu.vector_store %arg19[%c4, %c0_200, %c0_201, %c0_202], %413 {strides = array<i32>} : memref<7x1x8x64xf32, #tpu.memory_space<vmem>>, vector<1x1x8x64xf32>,
    %c2_203 = arith.constant 2 : index
    %c0_204 = arith.constant 0 : index
    %c0_205 = arith.constant 0 : index
    %414 = vector.load %arg3[%c2_203, %c0_204, %c0_205] : memref<3x32x32xf32, #tpu.memory_space<vmem>>, vector<1x32x32xf32>
    %415 = vector.shape_cast %414 : vector<1x32x32xf32> to vector<32x32xf32>
    %c2_206 = arith.constant 2 : index
    %c0_207 = arith.constant 0 : index
    %c0_208 = arith.constant 0 : index
    %416 = vector.load %arg4[%c2_206, %c0_207, %c0_208] : memref<3x1x32xf32, #tpu.memory_space<vmem>>, vector<1x1x32xf32>
    %417 = vector.shape_cast %416 : vector<1x1x32xf32> to vector<1x32xf32>
    %c2_209 = arith.constant 2 : index
    %c0_210 = arith.constant 0 : index
    %c0_211 = arith.constant 0 : index
    %418 = vector.load %arg5[%c2_209, %c0_210, %c0_211] : memref<3x32x32xf32, #tpu.memory_space<vmem>>, vector<1x32x32xf32>
    %419 = vector.shape_cast %418 : vector<1x32x32xf32> to vector<32x32xf32>
    %c2_212 = arith.constant 2 : index
    %c0_213 = arith.constant 0 : index
    %c0_214 = arith.constant 0 : index
    %420 = vector.load %arg6[%c2_212, %c0_213, %c0_214] : memref<3x1x32xf32, #tpu.memory_space<vmem>>, vector<1x1x32xf32>
    %421 = vector.shape_cast %420 : vector<1x1x32xf32> to vector<1x32xf32>
    %c2_215 = arith.constant 2 : index
    %c0_216 = arith.constant 0 : index
    %c0_217 = arith.constant 0 : index
    %422 = vector.load %arg7[%c2_215, %c0_216, %c0_217] : memref<3x32x32xf32, #tpu.memory_space<vmem>>, vector<1x32x32xf32>
    %423 = vector.shape_cast %422 : vector<1x32x32xf32> to vector<32x32xf32>
    %c2_218 = arith.constant 2 : index
    %c0_219 = arith.constant 0 : index
    %c0_220 = arith.constant 0 : index
    %424 = vector.load %arg8[%c2_218, %c0_219, %c0_220] : memref<3x1x32xf32, #tpu.memory_space<vmem>>, vector<1x1x32xf32>
    %425 = vector.shape_cast %424 : vector<1x1x32xf32> to vector<1x32xf32>
    %c2_221 = arith.constant 2 : index
    %c0_222 = arith.constant 0 : index
    %c0_223 = arith.constant 0 : index
    %426 = vector.load %arg9[%c2_221, %c0_222, %c0_223] : memref<3x32x544xf32, #tpu.memory_space<vmem>>, vector<1x32x544xf32>
    %427 = vector.shape_cast %426 : vector<1x32x544xf32> to vector<32x544xf32>
    %c2_224 = arith.constant 2 : index
    %c0_225 = arith.constant 0 : index
    %c0_226 = arith.constant 0 : index
    %428 = vector.load %arg10[%c2_224, %c0_225, %c0_226] : memref<3x1x544xf32, #tpu.memory_space<vmem>>, vector<1x1x544xf32>
    %429 = vector.shape_cast %428 : vector<1x1x544xf32> to vector<1x544xf32>
    %c2_227 = arith.constant 2 : index
    %c0_228 = arith.constant 0 : index
    %c0_229 = arith.constant 0 : index
    %430 = vector.load %arg11[%c2_227, %c0_228, %c0_229] : memref<3x32x64xf32, #tpu.memory_space<vmem>>, vector<1x32x64xf32>
    %431 = vector.shape_cast %430 : vector<1x32x64xf32> to vector<32x64xf32>
    %c2_230 = arith.constant 2 : index
    %c0_231 = arith.constant 0 : index
    %c0_232 = arith.constant 0 : index
    %432 = vector.load %arg12[%c2_230, %c0_231, %c0_232] : memref<3x1x64xf32, #tpu.memory_space<vmem>>, vector<1x1x64xf32>
    %433 = vector.shape_cast %432 : vector<1x1x64xf32> to vector<1x64xf32>
    %c2_233 = arith.constant 2 : index
    %c0_234 = arith.constant 0 : index
    %c0_235 = arith.constant 0 : index
    %434 = vector.load %arg13[%c2_233, %c0_234, %c0_235] : memref<3x64x544xf32, #tpu.memory_space<vmem>>, vector<1x64x544xf32>
    %435 = vector.shape_cast %434 : vector<1x64x544xf32> to vector<64x544xf32>
    %c2_236 = arith.constant 2 : index
    %c0_237 = arith.constant 0 : index
    %c0_238 = arith.constant 0 : index
    %436 = vector.load %arg14[%c2_236, %c0_237, %c0_238] : memref<3x1x544xf32, #tpu.memory_space<vmem>>, vector<1x1x544xf32>
    %437 = vector.shape_cast %436 : vector<1x1x544xf32> to vector<1x544xf32>
    %c2_239 = arith.constant 2 : index
    %c0_240 = arith.constant 0 : index
    %c0_241 = arith.constant 0 : index
    %438 = vector.load %arg15[%c2_239, %c0_240, %c0_241] : memref<3x64x64xf32, #tpu.memory_space<vmem>>, vector<1x64x64xf32>
    %439 = vector.shape_cast %438 : vector<1x64x64xf32> to vector<64x64xf32>
    %c2_242 = arith.constant 2 : index
    %c0_243 = arith.constant 0 : index
    %c0_244 = arith.constant 0 : index
    %440 = vector.load %arg16[%c2_242, %c0_243, %c0_244] : memref<3x64x64xf32, #tpu.memory_space<vmem>>, vector<1x64x64xf32>
    %441 = vector.shape_cast %440 : vector<1x64x64xf32> to vector<64x64xf32>
    %cst_245 = arith.constant dense<0.000000e+00> : vector<1x32xf32>
    %442 = tpu.matmul %337, %419, %cst_245 {dimension_numbers = #tpu.dot_dimension_numbers<[1], [0], [0], [1], [0, 0, 1, 1], [], []>} : vector<1x32xf32>, vector<32x32xf32>, vector<1x32xf32> -> vector<1x32xf32>
    %443 = arith.addf %442, %421 : vector<1x32xf32>
    %cst_246 = arith.constant 0.000000e+00 : f32
    %444 = vector.broadcast %cst_246 : f32 to vector<1x32xf32>
    %445 = arith.cmpf ogt, %443, %444 : vector<1x32xf32>
    %cst_247 = arith.constant 2.000000e-01 : f32
    %446 = vector.broadcast %cst_247 : f32 to vector<1x32xf32>
    %447 = arith.mulf %446, %443 : vector<1x32xf32>
    %448 = arith.select %445, %443, %447 : vector<1x32xi1>, vector<1x32xf32>
    %cst_248 = arith.constant dense<0.000000e+00> : vector<1x32xf32>
    %449 = tpu.matmul %337, %415, %cst_248 {dimension_numbers = #tpu.dot_dimension_numbers<[1], [0], [0], [1], [0, 0, 1, 1], [], []>} : vector<1x32xf32>, vector<32x32xf32>, vector<1x32xf32> -> vector<1x32xf32>
    %450 = arith.addf %449, %417 : vector<1x32xf32>
    %cst_249 = arith.constant dense<0.000000e+00> : vector<1x32xf32>
    %451 = tpu.matmul %448, %423, %cst_249 {dimension_numbers = #tpu.dot_dimension_numbers<[1], [0], [0], [1], [0, 0, 1, 1], [], []>} : vector<1x32xf32>, vector<32x32xf32>, vector<1x32xf32> -> vector<1x32xf32>
    %452 = arith.addf %450, %451 : vector<1x32xf32>
    %453 = arith.addf %452, %425 : vector<1x32xf32>
    %cst_250 = arith.constant dense<0.000000e+00> : vector<1x64xf32>
    %454 = tpu.matmul %453, %431, %cst_250 {dimension_numbers = #tpu.dot_dimension_numbers<[1], [0], [0], [1], [0, 0, 1, 1], [], []>} : vector<1x32xf32>, vector<32x64xf32>, vector<1x64xf32> -> vector<1x64xf32>
    %455 = arith.addf %454, %433 : vector<1x64xf32>
    %cst_251 = arith.constant 0.000000e+00 : f32
    %456 = vector.broadcast %cst_251 : f32 to vector<1x64xf32>
    %457 = arith.cmpf ogt, %455, %456 : vector<1x64xf32>
    %cst_252 = arith.constant 2.000000e-01 : f32
    %458 = vector.broadcast %cst_252 : f32 to vector<1x64xf32>
    %459 = arith.mulf %458, %455 : vector<1x64xf32>
    %460 = arith.select %457, %455, %459 : vector<1x64xi1>, vector<1x64xf32>
    %cst_253 = arith.constant dense<0.000000e+00> : vector<1x544xf32>
    %461 = tpu.matmul %453, %427, %cst_253 {dimension_numbers = #tpu.dot_dimension_numbers<[1], [0], [0], [1], [0, 0, 1, 1], [], []>} : vector<1x32xf32>, vector<32x544xf32>, vector<1x544xf32> -> vector<1x544xf32>
    %462 = arith.addf %461, %429 : vector<1x544xf32>
    %cst_254 = arith.constant dense<0.000000e+00> : vector<1x544xf32>
    %463 = tpu.matmul %460, %435, %cst_254 {dimension_numbers = #tpu.dot_dimension_numbers<[1], [0], [0], [1], [0, 0, 1, 1], [], []>} : vector<1x64xf32>, vector<64x544xf32>, vector<1x544xf32> -> vector<1x544xf32>
    %464 = arith.addf %462, %463 : vector<1x544xf32>
    %465 = arith.addf %464, %437 : vector<1x544xf32>
    %466 = vector.extract_strided_slice %465 {offsets = [0, 0], sizes = [1, 68], strides = [1, 1]} : vector<1x544xf32> to vector<1x68xf32>
    %467 = vector.extract_strided_slice %465 {offsets = [0, 68], sizes = [1, 68], strides = [1, 1]} : vector<1x544xf32> to vector<1x68xf32>
    %468 = vector.extract_strided_slice %465 {offsets = [0, 136], sizes = [1, 68], strides = [1, 1]} : vector<1x544xf32> to vector<1x68xf32>
    %469 = vector.extract_strided_slice %465 {offsets = [0, 204], sizes = [1, 68], strides = [1, 1]} : vector<1x544xf32> to vector<1x68xf32>
    %470 = vector.extract_strided_slice %465 {offsets = [0, 272], sizes = [1, 68], strides = [1, 1]} : vector<1x544xf32> to vector<1x68xf32>
    %471 = vector.extract_strided_slice %465 {offsets = [0, 340], sizes = [1, 68], strides = [1, 1]} : vector<1x544xf32> to vector<1x68xf32>
    %472 = vector.extract_strided_slice %465 {offsets = [0, 408], sizes = [1, 68], strides = [1, 1]} : vector<1x544xf32> to vector<1x68xf32>
    %473 = vector.extract_strided_slice %465 {offsets = [0, 476], sizes = [1, 68], strides = [1, 1]} : vector<1x544xf32> to vector<1x68xf32>
    %474 = tpu.concatenate %466, %467, %468, %469, %470, %471, %472, %473 in 0 : vector<1x68xf32>, vector<1x68xf32>, vector<1x68xf32>, vector<1x68xf32>, vector<1x68xf32>, vector<1x68xf32>, vector<1x68xf32>, vector<1x68xf32> -> vector<8x68xf32>
    %475 = vector.extract_strided_slice %474 {offsets = [0, 0], sizes = [8, 24], strides = [1, 1]} : vector<8x68xf32> to vector<8x24xf32>
    %476 = vector.extract_strided_slice %474 {offsets = [0, 24], sizes = [8, 1], strides = [1, 1]} : vector<8x68xf32> to vector<8x1xf32>
    %477 = vector.extract_strided_slice %474 {offsets = [0, 25], sizes = [8, 8], strides = [1, 1]} : vector<8x68xf32> to vector<8x8xf32>
    %478 = vector.extract_strided_slice %474 {offsets = [0, 33], sizes = [8, 1], strides = [1, 1]} : vector<8x68xf32> to vector<8x1xf32>
    %479 = vector.extract_strided_slice %474 {offsets = [0, 34], sizes = [8, 8], strides = [1, 1]} : vector<8x68xf32> to vector<8x8xf32>
    %480 = vector.extract_strided_slice %474 {offsets = [0, 42], sizes = [8, 1], strides = [1, 1]} : vector<8x68xf32> to vector<8x1xf32>
    %481 = vector.extract_strided_slice %474 {offsets = [0, 43], sizes = [8, 24], strides = [1, 1]} : vector<8x68xf32> to vector<8x24xf32>
    %482 = vector.extract_strided_slice %474 {offsets = [0, 67], sizes = [8, 1], strides = [1, 1]} : vector<8x68xf32> to vector<8x1xf32>
    %cst_255 = arith.constant dense<0.000000e+00> : vector<8x64xf32>
    %483 = tpu.matmul %410, %439, %cst_255 {dimension_numbers = #tpu.dot_dimension_numbers<[1], [0], [0], [1], [0, 0, 1, 1], [], []>} : vector<8x64xf32>, vector<64x64xf32>, vector<8x64xf32> -> vector<8x64xf32>
    %cst_256 = arith.constant dense<0.000000e+00> : vector<8x64xf32>
    %484 = tpu.matmul %410, %441, %cst_256 {dimension_numbers = #tpu.dot_dimension_numbers<[1], [0], [0], [1], [0, 0, 1, 1], [], []>} : vector<8x64xf32>, vector<64x64xf32>, vector<8x64xf32> -> vector<8x64xf32>
    %485 = tpu.concatenate %410, %483, %484 in 0 : vector<8x64xf32>, vector<8x64xf32>, vector<8x64xf32> -> vector<24x64xf32>
    %cst_257 = arith.constant dense<0.000000e+00> : vector<24xf32>
    %486 = vector.multi_reduction <add>, %485, %cst_257 [1] : vector<24x64xf32> to vector<24xf32>
    %487 = vector.shape_cast %486 : vector<24xf32> to vector<24x1xf32>
    %cst_258 = arith.constant 6.400000e+01 : f32
    %488 = vector.broadcast %cst_258 : f32 to vector<24x1xf32>
    %489 = arith.divf %487, %488 : vector<24x1xf32>
    %490 = arith.mulf %485, %485 : vector<24x64xf32>
    %cst_259 = arith.constant dense<0.000000e+00> : vector<24xf32>
    %491 = vector.multi_reduction <add>, %490, %cst_259 [1] : vector<24x64xf32> to vector<24xf32>
    %492 = vector.shape_cast %491 : vector<24xf32> to vector<24x1xf32>
    %cst_260 = arith.constant 6.400000e+01 : f32
    %493 = vector.broadcast %cst_260 : f32 to vector<24x1xf32>
    %494 = arith.divf %492, %493 : vector<24x1xf32>
    %495 = arith.mulf %489, %489 : vector<24x1xf32>
    %496 = arith.subf %494, %495 : vector<24x1xf32>
    %497 = vector.broadcast %489 : vector<24x1xf32> to vector<24x64xf32>
    %498 = arith.subf %485, %497 : vector<24x64xf32>
    %cst_261 = arith.constant 9.99999974E-6 : f32
    %499 = vector.broadcast %cst_261 : f32 to vector<24x1xf32>
    %500 = arith.addf %496, %499 : vector<24x1xf32>
    %501 = math.rsqrt %500 : vector<24x1xf32>
    %502 = vector.broadcast %501 : vector<24x1xf32> to vector<24x64xf32>
    %503 = arith.mulf %498, %502 : vector<24x64xf32>
    %cst_262 = arith.constant dense<0.000000e+00> : vector<8x64xf32>
    %504 = tpu.matmul %475, %503, %cst_262 {dimension_numbers = #tpu.dot_dimension_numbers<[1], [0], [0], [1], [0, 0, 1, 1], [], []>} : vector<8x24xf32>, vector<24x64xf32>, vector<8x64xf32> -> vector<8x64xf32>
    %505 = vector.broadcast %476 : vector<8x1xf32> to vector<8x64xf32>
    %506 = arith.addf %504, %505 : vector<8x64xf32>
    %cst_263 = arith.constant 0.000000e+00 : f32
    %507 = vector.broadcast %cst_263 : f32 to vector<8x64xf32>
    %508 = arith.cmpf ogt, %506, %507 : vector<8x64xf32>
    %cst_264 = arith.constant 2.000000e-01 : f32
    %509 = vector.broadcast %cst_264 : f32 to vector<8x64xf32>
    %510 = arith.mulf %509, %506 : vector<8x64xf32>
    %511 = arith.select %508, %506, %510 : vector<8x64xi1>, vector<8x64xf32>
    %cst_265 = arith.constant dense<0.000000e+00> : vector<8x64xf32>
    %512 = tpu.matmul %477, %511, %cst_265 {dimension_numbers = #tpu.dot_dimension_numbers<[1], [0], [0], [1], [0, 0, 1, 1], [], []>} : vector<8x8xf32>, vector<8x64xf32>, vector<8x64xf32> -> vector<8x64xf32>
    %513 = vector.broadcast %478 : vector<8x1xf32> to vector<8x64xf32>
    %514 = arith.addf %512, %513 : vector<8x64xf32>
    %cst_266 = arith.constant 0.000000e+00 : f32
    %515 = vector.broadcast %cst_266 : f32 to vector<8x64xf32>
    %516 = arith.cmpf ogt, %514, %515 : vector<8x64xf32>
    %cst_267 = arith.constant 2.000000e-01 : f32
    %517 = vector.broadcast %cst_267 : f32 to vector<8x64xf32>
    %518 = arith.mulf %517, %514 : vector<8x64xf32>
    %519 = arith.select %516, %514, %518 : vector<8x64xi1>, vector<8x64xf32>
    %cst_268 = arith.constant dense<0.000000e+00> : vector<8x64xf32>
    %520 = tpu.matmul %479, %519, %cst_268 {dimension_numbers = #tpu.dot_dimension_numbers<[1], [0], [0], [1], [0, 0, 1, 1], [], []>} : vector<8x8xf32>, vector<8x64xf32>, vector<8x64xf32> -> vector<8x64xf32>
    %521 = vector.broadcast %480 : vector<8x1xf32> to vector<8x64xf32>
    %522 = arith.addf %520, %521 : vector<8x64xf32>
    %cst_269 = arith.constant dense<0.000000e+00> : vector<8x64xf32>
    %523 = tpu.matmul %481, %503, %cst_269 {dimension_numbers = #tpu.dot_dimension_numbers<[1], [0], [0], [1], [0, 0, 1, 1], [], []>} : vector<8x24xf32>, vector<24x64xf32>, vector<8x64xf32> -> vector<8x64xf32>
    %524 = vector.broadcast %482 : vector<8x1xf32> to vector<8x64xf32>
    %525 = arith.addf %523, %524 : vector<8x64xf32>
    %526 = arith.addf %525, %522 : vector<8x64xf32>
    %c5 = arith.constant 5 : index
    %c0_270 = arith.constant 0 : index
    %c0_271 = arith.constant 0 : index
    %c0_272 = arith.constant 0 : index
    %527 = vector.load %arg19[%c5, %c0_270, %c0_271, %c0_272] : memref<7x1x8x64xf32, #tpu.memory_space<vmem>>, vector<1x1x8x64xf32>
    %528 = vector.shape_cast %527 : vector<1x1x8x64xf32> to vector<8x64xf32>
    %529 = vector.shape_cast %526 : vector<8x64xf32> to vector<1x1x8x64xf32>
    tpu.vector_store %arg19[%c5, %c0_270, %c0_271, %c0_272], %529 {strides = array<i32>} : memref<7x1x8x64xf32, #tpu.memory_space<vmem>>, vector<1x1x8x64xf32>,
    %cst_273 = arith.constant dense<0.000000e+00> : vector<1x32xf32>
    %530 = tpu.matmul %453, %419, %cst_273 {dimension_numbers = #tpu.dot_dimension_numbers<[1], [0], [0], [1], [0, 0, 1, 1], [], []>} : vector<1x32xf32>, vector<32x32xf32>, vector<1x32xf32> -> vector<1x32xf32>
    %531 = arith.addf %530, %421 : vector<1x32xf32>
    %cst_274 = arith.constant 0.000000e+00 : f32
    %532 = vector.broadcast %cst_274 : f32 to vector<1x32xf32>
    %533 = arith.cmpf ogt, %531, %532 : vector<1x32xf32>
    %cst_275 = arith.constant 2.000000e-01 : f32
    %534 = vector.broadcast %cst_275 : f32 to vector<1x32xf32>
    %535 = arith.mulf %534, %531 : vector<1x32xf32>
    %536 = arith.select %533, %531, %535 : vector<1x32xi1>, vector<1x32xf32>
    %cst_276 = arith.constant dense<0.000000e+00> : vector<1x32xf32>
    %537 = tpu.matmul %453, %415, %cst_276 {dimension_numbers = #tpu.dot_dimension_numbers<[1], [0], [0], [1], [0, 0, 1, 1], [], []>} : vector<1x32xf32>, vector<32x32xf32>, vector<1x32xf32> -> vector<1x32xf32>
    %538 = arith.addf %537, %417 : vector<1x32xf32>
    %cst_277 = arith.constant dense<0.000000e+00> : vector<1x32xf32>
    %539 = tpu.matmul %536, %423, %cst_277 {dimension_numbers = #tpu.dot_dimension_numbers<[1], [0], [0], [1], [0, 0, 1, 1], [], []>} : vector<1x32xf32>, vector<32x32xf32>, vector<1x32xf32> -> vector<1x32xf32>
    %540 = arith.addf %538, %539 : vector<1x32xf32>
    %541 = arith.addf %540, %425 : vector<1x32xf32>
    %cst_278 = arith.constant dense<0.000000e+00> : vector<1x64xf32>
    %542 = tpu.matmul %541, %431, %cst_278 {dimension_numbers = #tpu.dot_dimension_numbers<[1], [0], [0], [1], [0, 0, 1, 1], [], []>} : vector<1x32xf32>, vector<32x64xf32>, vector<1x64xf32> -> vector<1x64xf32>
    %543 = arith.addf %542, %433 : vector<1x64xf32>
    %cst_279 = arith.constant 0.000000e+00 : f32
    %544 = vector.broadcast %cst_279 : f32 to vector<1x64xf32>
    %545 = arith.cmpf ogt, %543, %544 : vector<1x64xf32>
    %cst_280 = arith.constant 2.000000e-01 : f32
    %546 = vector.broadcast %cst_280 : f32 to vector<1x64xf32>
    %547 = arith.mulf %546, %543 : vector<1x64xf32>
    %548 = arith.select %545, %543, %547 : vector<1x64xi1>, vector<1x64xf32>
    %cst_281 = arith.constant dense<0.000000e+00> : vector<1x544xf32>
    %549 = tpu.matmul %541, %427, %cst_281 {dimension_numbers = #tpu.dot_dimension_numbers<[1], [0], [0], [1], [0, 0, 1, 1], [], []>} : vector<1x32xf32>, vector<32x544xf32>, vector<1x544xf32> -> vector<1x544xf32>
    %550 = arith.addf %549, %429 : vector<1x544xf32>
    %cst_282 = arith.constant dense<0.000000e+00> : vector<1x544xf32>
    %551 = tpu.matmul %548, %435, %cst_282 {dimension_numbers = #tpu.dot_dimension_numbers<[1], [0], [0], [1], [0, 0, 1, 1], [], []>} : vector<1x64xf32>, vector<64x544xf32>, vector<1x544xf32> -> vector<1x544xf32>
    %552 = arith.addf %550, %551 : vector<1x544xf32>
    %553 = arith.addf %552, %437 : vector<1x544xf32>
    %554 = vector.extract_strided_slice %553 {offsets = [0, 0], sizes = [1, 68], strides = [1, 1]} : vector<1x544xf32> to vector<1x68xf32>
    %555 = vector.extract_strided_slice %553 {offsets = [0, 68], sizes = [1, 68], strides = [1, 1]} : vector<1x544xf32> to vector<1x68xf32>
    %556 = vector.extract_strided_slice %553 {offsets = [0, 136], sizes = [1, 68], strides = [1, 1]} : vector<1x544xf32> to vector<1x68xf32>
    %557 = vector.extract_strided_slice %553 {offsets = [0, 204], sizes = [1, 68], strides = [1, 1]} : vector<1x544xf32> to vector<1x68xf32>
    %558 = vector.extract_strided_slice %553 {offsets = [0, 272], sizes = [1, 68], strides = [1, 1]} : vector<1x544xf32> to vector<1x68xf32>
    %559 = vector.extract_strided_slice %553 {offsets = [0, 340], sizes = [1, 68], strides = [1, 1]} : vector<1x544xf32> to vector<1x68xf32>
    %560 = vector.extract_strided_slice %553 {offsets = [0, 408], sizes = [1, 68], strides = [1, 1]} : vector<1x544xf32> to vector<1x68xf32>
    %561 = vector.extract_strided_slice %553 {offsets = [0, 476], sizes = [1, 68], strides = [1, 1]} : vector<1x544xf32> to vector<1x68xf32>
    %562 = tpu.concatenate %554, %555, %556, %557, %558, %559, %560, %561 in 0 : vector<1x68xf32>, vector<1x68xf32>, vector<1x68xf32>, vector<1x68xf32>, vector<1x68xf32>, vector<1x68xf32>, vector<1x68xf32>, vector<1x68xf32> -> vector<8x68xf32>
    %563 = vector.extract_strided_slice %562 {offsets = [0, 0], sizes = [8, 24], strides = [1, 1]} : vector<8x68xf32> to vector<8x24xf32>
    %564 = vector.extract_strided_slice %562 {offsets = [0, 24], sizes = [8, 1], strides = [1, 1]} : vector<8x68xf32> to vector<8x1xf32>
    %565 = vector.extract_strided_slice %562 {offsets = [0, 25], sizes = [8, 8], strides = [1, 1]} : vector<8x68xf32> to vector<8x8xf32>
    %566 = vector.extract_strided_slice %562 {offsets = [0, 33], sizes = [8, 1], strides = [1, 1]} : vector<8x68xf32> to vector<8x1xf32>
    %567 = vector.extract_strided_slice %562 {offsets = [0, 34], sizes = [8, 8], strides = [1, 1]} : vector<8x68xf32> to vector<8x8xf32>
    %568 = vector.extract_strided_slice %562 {offsets = [0, 42], sizes = [8, 1], strides = [1, 1]} : vector<8x68xf32> to vector<8x1xf32>
    %569 = vector.extract_strided_slice %562 {offsets = [0, 43], sizes = [8, 24], strides = [1, 1]} : vector<8x68xf32> to vector<8x24xf32>
    %570 = vector.extract_strided_slice %562 {offsets = [0, 67], sizes = [8, 1], strides = [1, 1]} : vector<8x68xf32> to vector<8x1xf32>
    %cst_283 = arith.constant dense<0.000000e+00> : vector<8x64xf32>
    %571 = tpu.matmul %526, %439, %cst_283 {dimension_numbers = #tpu.dot_dimension_numbers<[1], [0], [0], [1], [0, 0, 1, 1], [], []>} : vector<8x64xf32>, vector<64x64xf32>, vector<8x64xf32> -> vector<8x64xf32>
    %cst_284 = arith.constant dense<0.000000e+00> : vector<8x64xf32>
    %572 = tpu.matmul %526, %441, %cst_284 {dimension_numbers = #tpu.dot_dimension_numbers<[1], [0], [0], [1], [0, 0, 1, 1], [], []>} : vector<8x64xf32>, vector<64x64xf32>, vector<8x64xf32> -> vector<8x64xf32>
    %573 = tpu.concatenate %526, %571, %572 in 0 : vector<8x64xf32>, vector<8x64xf32>, vector<8x64xf32> -> vector<24x64xf32>
    %cst_285 = arith.constant dense<0.000000e+00> : vector<24xf32>
    %574 = vector.multi_reduction <add>, %573, %cst_285 [1] : vector<24x64xf32> to vector<24xf32>
    %575 = vector.shape_cast %574 : vector<24xf32> to vector<24x1xf32>
    %cst_286 = arith.constant 6.400000e+01 : f32
    %576 = vector.broadcast %cst_286 : f32 to vector<24x1xf32>
    %577 = arith.divf %575, %576 : vector<24x1xf32>
    %578 = arith.mulf %573, %573 : vector<24x64xf32>
    %cst_287 = arith.constant dense<0.000000e+00> : vector<24xf32>
    %579 = vector.multi_reduction <add>, %578, %cst_287 [1] : vector<24x64xf32> to vector<24xf32>
    %580 = vector.shape_cast %579 : vector<24xf32> to vector<24x1xf32>
    %cst_288 = arith.constant 6.400000e+01 : f32
    %581 = vector.broadcast %cst_288 : f32 to vector<24x1xf32>
    %582 = arith.divf %580, %581 : vector<24x1xf32>
    %583 = arith.mulf %577, %577 : vector<24x1xf32>
    %584 = arith.subf %582, %583 : vector<24x1xf32>
    %585 = vector.broadcast %577 : vector<24x1xf32> to vector<24x64xf32>
    %586 = arith.subf %573, %585 : vector<24x64xf32>
    %cst_289 = arith.constant 9.99999974E-6 : f32
    %587 = vector.broadcast %cst_289 : f32 to vector<24x1xf32>
    %588 = arith.addf %584, %587 : vector<24x1xf32>
    %589 = math.rsqrt %588 : vector<24x1xf32>
    %590 = vector.broadcast %589 : vector<24x1xf32> to vector<24x64xf32>
    %591 = arith.mulf %586, %590 : vector<24x64xf32>
    %cst_290 = arith.constant dense<0.000000e+00> : vector<8x64xf32>
    %592 = tpu.matmul %563, %591, %cst_290 {dimension_numbers = #tpu.dot_dimension_numbers<[1], [0], [0], [1], [0, 0, 1, 1], [], []>} : vector<8x24xf32>, vector<24x64xf32>, vector<8x64xf32> -> vector<8x64xf32>
    %593 = vector.broadcast %564 : vector<8x1xf32> to vector<8x64xf32>
    %594 = arith.addf %592, %593 : vector<8x64xf32>
    %cst_291 = arith.constant 0.000000e+00 : f32
    %595 = vector.broadcast %cst_291 : f32 to vector<8x64xf32>
    %596 = arith.cmpf ogt, %594, %595 : vector<8x64xf32>
    %cst_292 = arith.constant 2.000000e-01 : f32
    %597 = vector.broadcast %cst_292 : f32 to vector<8x64xf32>
    %598 = arith.mulf %597, %594 : vector<8x64xf32>
    %599 = arith.select %596, %594, %598 : vector<8x64xi1>, vector<8x64xf32>
    %cst_293 = arith.constant dense<0.000000e+00> : vector<8x64xf32>
    %600 = tpu.matmul %565, %599, %cst_293 {dimension_numbers = #tpu.dot_dimension_numbers<[1], [0], [0], [1], [0, 0, 1, 1], [], []>} : vector<8x8xf32>, vector<8x64xf32>, vector<8x64xf32> -> vector<8x64xf32>
    %601 = vector.broadcast %566 : vector<8x1xf32> to vector<8x64xf32>
    %602 = arith.addf %600, %601 : vector<8x64xf32>
    %cst_294 = arith.constant 0.000000e+00 : f32
    %603 = vector.broadcast %cst_294 : f32 to vector<8x64xf32>
    %604 = arith.cmpf ogt, %602, %603 : vector<8x64xf32>
    %cst_295 = arith.constant 2.000000e-01 : f32
    %605 = vector.broadcast %cst_295 : f32 to vector<8x64xf32>
    %606 = arith.mulf %605, %602 : vector<8x64xf32>
    %607 = arith.select %604, %602, %606 : vector<8x64xi1>, vector<8x64xf32>
    %cst_296 = arith.constant dense<0.000000e+00> : vector<8x64xf32>
    %608 = tpu.matmul %567, %607, %cst_296 {dimension_numbers = #tpu.dot_dimension_numbers<[1], [0], [0], [1], [0, 0, 1, 1], [], []>} : vector<8x8xf32>, vector<8x64xf32>, vector<8x64xf32> -> vector<8x64xf32>
    %609 = vector.broadcast %568 : vector<8x1xf32> to vector<8x64xf32>
    %610 = arith.addf %608, %609 : vector<8x64xf32>
    %cst_297 = arith.constant dense<0.000000e+00> : vector<8x64xf32>
    %611 = tpu.matmul %569, %591, %cst_297 {dimension_numbers = #tpu.dot_dimension_numbers<[1], [0], [0], [1], [0, 0, 1, 1], [], []>} : vector<8x24xf32>, vector<24x64xf32>, vector<8x64xf32> -> vector<8x64xf32>
    %612 = vector.broadcast %570 : vector<8x1xf32> to vector<8x64xf32>
    %613 = arith.addf %611, %612 : vector<8x64xf32>
    %614 = arith.addf %613, %610 : vector<8x64xf32>
    %c6 = arith.constant 6 : index
    %c0_298 = arith.constant 0 : index
    %c0_299 = arith.constant 0 : index
    %c0_300 = arith.constant 0 : index
    %615 = vector.load %arg19[%c6, %c0_298, %c0_299, %c0_300] : memref<7x1x8x64xf32, #tpu.memory_space<vmem>>, vector<1x1x8x64xf32>
    %616 = vector.shape_cast %615 : vector<1x1x8x64xf32> to vector<8x64xf32>
    %617 = vector.shape_cast %614 : vector<8x64xf32> to vector<1x1x8x64xf32>
    tpu.vector_store %arg19[%c6, %c0_298, %c0_299, %c0_300], %617 {strides = array<i32>} : memref<7x1x8x64xf32, #tpu.memory_space<vmem>>, vector<1x1x8x64xf32>,
    %c0_301 = arith.constant 0 : index
    %c0_302 = arith.constant 0 : index
    %618 = vector.load %arg17[%c0_301, %c0_302] : memref<3x8xf32, #tpu.memory_space<vmem>>, vector<3x8xf32>
    %cst_303 = arith.constant dense<0.000000e+00> : vector<3x64xf32>
    %619 = tpu.matmul %618, %614, %cst_303 {dimension_numbers = #tpu.dot_dimension_numbers<[1], [0], [0], [1], [0, 0, 1, 1], [], []>} : vector<3x8xf32>, vector<8x64xf32>, vector<3x64xf32> -> vector<3x64xf32>
    %c0_304 = arith.constant 0 : index
    %c0_305 = arith.constant 0 : index
    %620 = vector.load %arg18[%c0_304, %c0_305] : memref<3x1xf32, #tpu.memory_space<vmem>>, vector<3x1xf32>
    %621 = vector.broadcast %620 : vector<3x1xf32> to vector<3x64xf32>
    %622 = arith.addf %619, %621 : vector<3x64xf32>
    %c0_306 = arith.constant 0 : index
    %c0_307 = arith.constant 0 : index
    %c0_308 = arith.constant 0 : index
    %623 = vector.load %arg21[%c0_306, %c0_307, %c0_308] : memref<1x3x64xf32, #tpu.memory_space<vmem>>, vector<1x3x64xf32>
    %624 = vector.shape_cast %623 : vector<1x3x64xf32> to vector<3x64xf32>
    %625 = vector.shape_cast %622 : vector<3x64xf32> to vector<1x3x64xf32>
    tpu.vector_store %arg21[%c0_306, %c0_307, %c0_308], %625 {strides = array<i32>} : memref<1x3x64xf32, #tpu.memory_space<vmem>>, vector<1x3x64xf32>,
    %cst_309 = arith.constant -1.000000e+00 : f32
    %cst_310 = arith.constant 1.000000e+00 : f32
    %626 = vector.broadcast %cst_309 : f32 to vector<3x64xf32>
    %627 = arith.maximumf %626, %622 : vector<3x64xf32>
    %628 = vector.broadcast %cst_310 : f32 to vector<3x64xf32>
    %629 = arith.minimumf %628, %627 : vector<3x64xf32>
    %c0_311 = arith.constant 0 : index
    %c0_312 = arith.constant 0 : index
    %c0_313 = arith.constant 0 : index
    %630 = vector.load %arg20[%c0_311, %c0_312, %c0_313] : memref<1x3x64xf32, #tpu.memory_space<vmem>>, vector<1x3x64xf32>
    %631 = vector.shape_cast %630 : vector<1x3x64xf32> to vector<3x64xf32>
    %632 = vector.shape_cast %629 : vector<3x64xf32> to vector<1x3x64xf32>
    tpu.vector_store %arg20[%c0_311, %c0_312, %c0_313], %632 {strides = array<i32>} : memref<1x3x64xf32, #tpu.memory_space<vmem>>, vector<1x3x64xf32>,
    return
  }
  func.func @transform_0(%arg0: i32) -> (i32, i32, i32) {
    %c0_i32 = arith.constant 0 : i32
    %c0_i32_0 = arith.constant 0 : i32
    %c0_i32_1 = arith.constant 0 : i32
    return %arg0, %c0_i32, %c0_i32_0 : i32, i32, i32
  }
  func.func @transform_1(%arg0: i32) -> (i32, i32) {
    %c0_i32 = arith.constant 0 : i32
    %c0_i32_0 = arith.constant 0 : i32
    %c0_i32_1 = arith.constant 0 : i32
    return %c0_i32, %c0_i32_0 : i32, i32
  }
  func.func @transform_2(%arg0: i32) -> (i32, i32, i32) {
    %c0_i32 = arith.constant 0 : i32
    %c0_i32_0 = arith.constant 0 : i32
    %c0_i32_1 = arith.constant 0 : i32
    %c0_i32_2 = arith.constant 0 : i32
    return %c0_i32, %c0_i32_0, %c0_i32_1 : i32, i32, i32
  }
  func.func @transform_3(%arg0: i32) -> (i32, i32, i32) {
    %c0_i32 = arith.constant 0 : i32
    %c0_i32_0 = arith.constant 0 : i32
    %c0_i32_1 = arith.constant 0 : i32
    %c0_i32_2 = arith.constant 0 : i32
    return %c0_i32, %c0_i32_0, %c0_i32_1 : i32, i32, i32
  }
  func.func @transform_4(%arg0: i32) -> (i32, i32, i32) {
    %c0_i32 = arith.constant 0 : i32
    %c0_i32_0 = arith.constant 0 : i32
    %c0_i32_1 = arith.constant 0 : i32
    %c0_i32_2 = arith.constant 0 : i32
    return %c0_i32, %c0_i32_0, %c0_i32_1 : i32, i32, i32
  }
  func.func @transform_5(%arg0: i32) -> (i32, i32, i32) {
    %c0_i32 = arith.constant 0 : i32
    %c0_i32_0 = arith.constant 0 : i32
    %c0_i32_1 = arith.constant 0 : i32
    %c0_i32_2 = arith.constant 0 : i32
    return %c0_i32, %c0_i32_0, %c0_i32_1 : i32, i32, i32
  }
  func.func @transform_6(%arg0: i32) -> (i32, i32, i32) {
    %c0_i32 = arith.constant 0 : i32
    %c0_i32_0 = arith.constant 0 : i32
    %c0_i32_1 = arith.constant 0 : i32
    %c0_i32_2 = arith.constant 0 : i32
    return %c0_i32, %c0_i32_0, %c0_i32_1 : i32, i32, i32
  }
  func.func @transform_7(%arg0: i32) -> (i32, i32, i32) {
    %c0_i32 = arith.constant 0 : i32
    %c0_i32_0 = arith.constant 0 : i32
    %c0_i32_1 = arith.constant 0 : i32
    %c0_i32_2 = arith.constant 0 : i32
    return %c0_i32, %c0_i32_0, %c0_i32_1 : i32, i32, i32
  }
  func.func @transform_8(%arg0: i32) -> (i32, i32, i32) {
    %c0_i32 = arith.constant 0 : i32
    %c0_i32_0 = arith.constant 0 : i32
    %c0_i32_1 = arith.constant 0 : i32
    %c0_i32_2 = arith.constant 0 : i32
    return %c0_i32, %c0_i32_0, %c0_i32_1 : i32, i32, i32
  }
  func.func @transform_9(%arg0: i32) -> (i32, i32, i32) {
    %c0_i32 = arith.constant 0 : i32
    %c0_i32_0 = arith.constant 0 : i32
    %c0_i32_1 = arith.constant 0 : i32
    %c0_i32_2 = arith.constant 0 : i32
    return %c0_i32, %c0_i32_0, %c0_i32_1 : i32, i32, i32
  }
  func.func @transform_10(%arg0: i32) -> (i32, i32, i32) {
    %c0_i32 = arith.constant 0 : i32
    %c0_i32_0 = arith.constant 0 : i32
    %c0_i32_1 = arith.constant 0 : i32
    %c0_i32_2 = arith.constant 0 : i32
    return %c0_i32, %c0_i32_0, %c0_i32_1 : i32, i32, i32
  }
  func.func @transform_11(%arg0: i32) -> (i32, i32, i32) {
    %c0_i32 = arith.constant 0 : i32
    %c0_i32_0 = arith.constant 0 : i32
    %c0_i32_1 = arith.constant 0 : i32
    %c0_i32_2 = arith.constant 0 : i32
    return %c0_i32, %c0_i32_0, %c0_i32_1 : i32, i32, i32
  }
  func.func @transform_12(%arg0: i32) -> (i32, i32, i32) {
    %c0_i32 = arith.constant 0 : i32
    %c0_i32_0 = arith.constant 0 : i32
    %c0_i32_1 = arith.constant 0 : i32
    %c0_i32_2 = arith.constant 0 : i32
    return %c0_i32, %c0_i32_0, %c0_i32_1 : i32, i32, i32
  }
  func.func @transform_13(%arg0: i32) -> (i32, i32, i32) {
    %c0_i32 = arith.constant 0 : i32
    %c0_i32_0 = arith.constant 0 : i32
    %c0_i32_1 = arith.constant 0 : i32
    %c0_i32_2 = arith.constant 0 : i32
    return %c0_i32, %c0_i32_0, %c0_i32_1 : i32, i32, i32
  }
  func.func @transform_14(%arg0: i32) -> (i32, i32, i32) {
    %c0_i32 = arith.constant 0 : i32
    %c0_i32_0 = arith.constant 0 : i32
    %c0_i32_1 = arith.constant 0 : i32
    %c0_i32_2 = arith.constant 0 : i32
    return %c0_i32, %c0_i32_0, %c0_i32_1 : i32, i32, i32
  }
  func.func @transform_15(%arg0: i32) -> (i32, i32, i32) {
    %c0_i32 = arith.constant 0 : i32
    %c0_i32_0 = arith.constant 0 : i32
    %c0_i32_1 = arith.constant 0 : i32
    %c0_i32_2 = arith.constant 0 : i32
    return %c0_i32, %c0_i32_0, %c0_i32_1 : i32, i32, i32
  }
  func.func @transform_16(%arg0: i32) -> (i32, i32) {
    %c0_i32 = arith.constant 0 : i32
    %c0_i32_0 = arith.constant 0 : i32
    %c0_i32_1 = arith.constant 0 : i32
    return %c0_i32, %c0_i32_0 : i32, i32
  }
  func.func @transform_17(%arg0: i32) -> (i32, i32) {
    %c0_i32 = arith.constant 0 : i32
    %c0_i32_0 = arith.constant 0 : i32
    %c0_i32_1 = arith.constant 0 : i32
    return %c0_i32, %c0_i32_0 : i32, i32
  }
  func.func @transform_18(%arg0: i32) -> (i32, i32, i32, i32) {
    %c0_i32 = arith.constant 0 : i32
    %c0_i32_0 = arith.constant 0 : i32
    %c0_i32_1 = arith.constant 0 : i32
    %c0_i32_2 = arith.constant 0 : i32
    return %c0_i32, %arg0, %c0_i32_0, %c0_i32_1 : i32, i32, i32, i32
  }
  func.func @transform_19(%arg0: i32) -> (i32, i32, i32) {
    %c0_i32 = arith.constant 0 : i32
    %c0_i32_0 = arith.constant 0 : i32
    %c0_i32_1 = arith.constant 0 : i32
    return %arg0, %c0_i32, %c0_i32_0 : i32, i32, i32
  }
  func.func @transform_20(%arg0: i32) -> (i32, i32, i32) {
    %c0_i32 = arith.constant 0 : i32
    %c0_i32_0 = arith.constant 0 : i32
    %c0_i32_1 = arith.constant 0 : i32
    return %arg0, %c0_i32, %c0_i32_0 : i32, i32, i32
  }
}

</mosaic_0001>

<bundles_post_ra>
// kernel: squeeze.10
= control target key start
LH: loop header
LB: loop body
LE: loop exit
PB: predicated region body
PF: predicated region fallthrough
CT: control target
= control target key end

     0   :  { %vm4_vm0 = vcmask 64512   ;;  %s184_s10 = smov 120   ;;  %s251_s0 = inlined_call_operand.vmem [shape: f32[1,2,8,64], index: 0, kind: input, shape index: {}]   ;;  %s252_s1 = inlined_call_operand.hbm [shape: f32[2,8,8,8], index: 1, kind: output, shape index: {}]  }
   0x1   :  { %v31_v0 = vld [vmem:[%s251_s0] sm:$0xff]   ;;  %v145_v1 = vld [vmem:[%s251_s0 + $0x8] sm:$0xff]   ;;  %s183_s0 = smov 112  }
   0x2   :  { %32 = vrot.lane.b32.xlu1 %v31_v0, %s183_s0  ;;  %15 = vrot.lane.b32.xlu0 %v31_v0, %s184_s10 }
   0x3   :  { %2 = vsyncpa [#allocation1], 0  ;;  %5 = vst.msk [vmem:[#allocation0] ss:$8 sm:$0xf] %vm4_vm0, %v31_v0   ;;  %s185_s11 = smov 104  }
   0x4   :  { %6 = vst.msk [vmem:[#allocation0] ss:$8 sm:$0xf0] %vm4_vm0, %v31_v0   ;;  %11 = vst.msk [vmem:[#allocation0 + $0x40] ss:$8 sm:$0xf] %vm4_vm0, %v145_v1  }
   0x5   :  { %13 = vst.msk [vmem:[#allocation0 + $0x40] ss:$8 sm:$0xf0] %vm4_vm0, %v145_v1   ;;  %s186_s12 = smov 96   ;;  %s187_s13 = smov 88  }
   0x6   :  { %41 = vrot.lane.b32.xlu1 %v145_v1, %s183_s0  ;;  %24 = vrot.lane.b32.xlu0 %v145_v1, %s184_s10  ;;  %s188_s14 = smov 80   ;;  %s189_s15 = smov 72  }
   0x7   :  { %s190_s16 = smov [#allocation0]  }
   0x8   :  { %s137_s17 = sshll.u32 %s190_s16, 4  ;;  %s138_s17 = int_to_ptr.vmem [resolvable:$true] %s137_s17 }
   0x9   :  { %s159_s18 = scalar_lea.vmem %s138_s17, 2048  ;;  %p164_p1 = scmp.lt.s32.totalorder %s138_s17, %s138_s17 }
   0xa   :  { %58 = vrot.lane.b32.xlu1 %v145_v1, %s185_s11  ;;  %49 = vrot.lane.b32.xlu0 %v31_v0, %s185_s11  ;;  %p160_p0 = scmp.ne.s32.totalorder %s138_s17, %s159_s18  ;;  %p165_p2 = scmp.lt.s32.totalorder %s159_s18, %s159_s18 }
   0xc   :  { %p166_p3 = por %p165_p2, %p164_p1 }
   0xe   :  { %75 = vrot.lane.b32.xlu1 %v145_v1, %s186_s12  ;;  %66 = vrot.lane.b32.xlu0 %v31_v0, %s186_s12  ;;  %p167_p4 = pnand %p166_p3, %p160_p0 }
  0x12   :  { %92 = vrot.lane.b32.xlu1 %v145_v1, %s187_s13  ;;  %83 = vrot.lane.b32.xlu0 %v31_v0, %s187_s13 }
  0x16   :  { %109 = vrot.lane.b32.xlu1 %v145_v1, %s188_s14  ;;  %100 = vrot.lane.b32.xlu0 %v31_v0, %s188_s14 }
  0x1a   :  { %126 = vrot.lane.b32.xlu1 %v145_v1, %s189_s15  ;;  %117 = vrot.lane.b32.xlu0 %v31_v0, %s189_s15 }
  0x74   :  { %v33_v2 = vpop.permute.xlu1 %32   ;;  %v16_v3 = vpop.permute.xlu0 %15  }
  0x75   :  { %36 = vst.msk [vmem:[#allocation0 + $0x2] ss:$8 sm:$0xf] %vm4_vm0, %v33_v2   ;;  %38 = vst.msk [vmem:[#allocation0 + $0x2] ss:$8 sm:$0xf0] %vm4_vm0, %v33_v2  }
  0x76   :  { %19 = vst.msk [vmem:[#allocation0 + $0x1] ss:$8 sm:$0xf] %vm4_vm0, %v16_v3   ;;  %21 = vst.msk [vmem:[#allocation0 + $0x1] ss:$8 sm:$0xf0] %vm4_vm0, %v16_v3  }
  0x78   :  { %v42_v4 = vpop.permute.xlu1 %41   ;;  %v25_v5 = vpop.permute.xlu0 %24  }
  0x79   :  { %45 = vst.msk [vmem:[#allocation0 + $0x42] ss:$8 sm:$0xf] %vm4_vm0, %v42_v4   ;;  %47 = vst.msk [vmem:[#allocation0 + $0x42] ss:$8 sm:$0xf0] %vm4_vm0, %v42_v4  }
  0x7a   :  { %28 = vst.msk [vmem:[#allocation0 + $0x41] ss:$8 sm:$0xf] %vm4_vm0, %v25_v5   ;;  %30 = vst.msk [vmem:[#allocation0 + $0x41] ss:$8 sm:$0xf0] %vm4_vm0, %v25_v5  }
  0x7c   :  { %v59_v6 = vpop.permute.xlu1 %58   ;;  %v50_v7 = vpop.permute.xlu0 %49  }
  0x7d   :  { %62 = vst.msk [vmem:[#allocation0 + $0x43] ss:$8 sm:$0xf] %vm4_vm0, %v59_v6   ;;  %64 = vst.msk [vmem:[#allocation0 + $0x43] ss:$8 sm:$0xf0] %vm4_vm0, %v59_v6  }
  0x7e   :  { %53 = vst.msk [vmem:[#allocation0 + $0x3] ss:$8 sm:$0xf] %vm4_vm0, %v50_v7   ;;  %55 = vst.msk [vmem:[#allocation0 + $0x3] ss:$8 sm:$0xf0] %vm4_vm0, %v50_v7  }
  0x80   :  { %v76_v8 = vpop.permute.xlu1 %75   ;;  %v67_v9 = vpop.permute.xlu0 %66  }
  0x81   :  { %79 = vst.msk [vmem:[#allocation0 + $0x44] ss:$8 sm:$0xf] %vm4_vm0, %v76_v8   ;;  %81 = vst.msk [vmem:[#allocation0 + $0x44] ss:$8 sm:$0xf0] %vm4_vm0, %v76_v8  }
  0x82   :  { %70 = vst.msk [vmem:[#allocation0 + $0x4] ss:$8 sm:$0xf] %vm4_vm0, %v67_v9   ;;  %72 = vst.msk [vmem:[#allocation0 + $0x4] ss:$8 sm:$0xf0] %vm4_vm0, %v67_v9  }
  0x84   :  { %v93_v10 = vpop.permute.xlu1 %92   ;;  %v84_v11 = vpop.permute.xlu0 %83  }
  0x85   :  { %96 = vst.msk [vmem:[#allocation0 + $0x45] ss:$8 sm:$0xf] %vm4_vm0, %v93_v10   ;;  %98 = vst.msk [vmem:[#allocation0 + $0x45] ss:$8 sm:$0xf0] %vm4_vm0, %v93_v10  }
  0x86   :  { %87 = vst.msk [vmem:[#allocation0 + $0x5] ss:$8 sm:$0xf] %vm4_vm0, %v84_v11   ;;  %89 = vst.msk [vmem:[#allocation0 + $0x5] ss:$8 sm:$0xf0] %vm4_vm0, %v84_v11  }
  0x88   :  { %v110_v12 = vpop.permute.xlu1 %109   ;;  %v101_v13 = vpop.permute.xlu0 %100  }
  0x89   :  { %113 = vst.msk [vmem:[#allocation0 + $0x46] ss:$8 sm:$0xf] %vm4_vm0, %v110_v12   ;;  %115 = vst.msk [vmem:[#allocation0 + $0x46] ss:$8 sm:$0xf0] %vm4_vm0, %v110_v12  }
  0x8a   :  { %104 = vst.msk [vmem:[#allocation0 + $0x6] ss:$8 sm:$0xf] %vm4_vm0, %v101_v13   ;;  %106 = vst.msk [vmem:[#allocation0 + $0x6] ss:$8 sm:$0xf0] %vm4_vm0, %v101_v13  }
  0x8c   :  { %v127_v14 = vpop.permute.xlu1 %126   ;;  %v118_v15 = vpop.permute.xlu0 %117  }
  0x8d   :  { %130 = vst.msk [vmem:[#allocation0 + $0x47] ss:$8 sm:$0xf] %vm4_vm0, %v127_v14   ;;  %132 = vst.msk [vmem:[#allocation0 + $0x47] ss:$8 sm:$0xf0] %vm4_vm0, %v127_v14  }
  0x8e   :  { %121 = vst.msk [vmem:[#allocation0 + $0x7] ss:$8 sm:$0xf] %vm4_vm0, %v118_v15   ;;  %123 = vst.msk [vmem:[#allocation0 + $0x7] ss:$8 sm:$0xf0] %vm4_vm0, %v118_v15  }
  0x8f   :  { %170 = shalt.err (!%p167_p4)
}
  0x90   :  { %s171_s21 = scalar_lea.hbm %s252_s1, 2048 }
  0x91   :  { %p172_p5 = scmp.ne.s32.totalorder %s252_s1, %s171_s21  ;;  %p175_p6 = scmp.lt.u32.totalorder %s171_s21, %s252_s1 }
  0x93   :  { %p177_p7 = pnand %p175_p6, %p172_p5 }
  0x95   :  { %180 = shalt.err (!%p177_p7)
}
  0x96   :  { %140 = dma.vmem_to_hbm [thread:$0]  %s138_s17, 2048, %s252_s1, [#allocation1]  }
  0x97   :  { %181 = dma.done.wait [#allocation1], 2048  }
  0x98   :  { %182 = vsyncadd [#allocation1], 4294965248 }
  0x99   :  { %142 = vsyncpa [#allocation1], 1 }

// kernel: decoder_forward.1
= control target key start
LH: loop header
LB: loop body
LE: loop exit
PB: predicated region body
PF: predicated region fallthrough
CT: control target
= control target key end

     0   :  { %s14633_s0 = inlined_call_operand.hbm [shape: f32[2,1,32], index: 0, kind: input, shape index: {}]   ;;  %s14634_s1 = inlined_call_operand.hbm [shape: f32[8,64], index: 1, kind: input, shape index: {}]   ;;  %s14635_s2 = inlined_call_operand.hbm [shape: f32[3,32,32], index: 2, kind: input, shape index: {}]   ;;  %s14636_s3 = inlined_call_operand.vmem [shape: f32[3,1,32], index: 3, kind: input, shape index: {}]   ;;  %s14637_s4 = inlined_call_operand.hbm [shape: f32[3,32,32], index: 4, kind: input, shape index: {}]   ;;  %s14638_s5 = inlined_call_operand.vmem [shape: f32[3,1,32], index: 5, kind: input, shape index: {}]   ;;  %s14639_s6 = inlined_call_operand.hbm [shape: f32[3,32,32], index: 6, kind: input, shape index: {}]   ;;  %s14640_s7 = inlined_call_operand.vmem [shape: f32[3,1,32], index: 7, kind: input, shape index: {}]   ;;  %s14641_s8 = inlined_call_operand.hbm [shape: f32[3,32,544], index: 8, kind: input, shape index: {}]   ;;  %s14642_s9 = inlined_call_operand.vmem [shape: f32[3,1,544], index: 9, kind: input, shape index: {}]   ;;  %s14643_s10 = inlined_call_operand.hbm [shape: f32[3,32,64], index: 10, kind: input, shape index: {}]   ;;  %s14644_s11 = inlined_call_operand.hbm [shape: f32[3,1,64], index: 11, kind: input, shape index: {}]   ;;  %s14645_s12 = inlined_call_operand.hbm [shape: f32[3,64,544], index: 12, kind: input, shape index: {}]   ;;  %s14646_s13 = inlined_call_operand.vmem [shape: f32[3,1,544], index: 13, kind: input, shape index: {}]   ;;  %s14647_s14 = inlined_call_operand.hbm [shape: f32[3,64,64], index: 14, kind: input, shape index: {}]   ;;  %s14648_s15 = inlined_call_operand.hbm [shape: f32[3,64,64], index: 15, kind: input, shape index: {}]   ;;  %s14649_s16 = inlined_call_operand.hbm [shape: f32[3,8], index: 16, kind: input, shape index: {}]   ;;  %s14650_s17 = inlined_call_operand.hbm [shape: f32[3,1], index: 17, kind: input, shape index: {}]   ;;  %s14651_s18 = inlined_call_operand.vmem [shape: f32[7,2,8,64], index: 18, kind: output, shape index: {0}]   ;;  %s14652_s19 = inlined_call_operand.vmem [shape: f32[2,3,64], index: 19, kind: output, shape index: {1}]   ;;  %s14653_s20 = inlined_call_operand.vmem [shape: f32[2,3,64], index: 20, kind: output, shape index: {2}]  }
   0x1   :  { %14783 = sst [smem:[#allocation62_spill]] %s14633_s0 }
   0x2   :  { %14784 = sst [smem:[#allocation63_spill]] %s14634_s1 }
   0x3   :  { %14785 = sst [smem:[#allocation64_spill]] %s14635_s2 }
   0x4   :  { %14786 = sst [smem:[#allocation65_spill]] %s14636_s3 }
   0x5   :  { %14787 = sst [smem:[#allocation66_spill]] %s14637_s4 }
   0x6   :  { %14788 = sst [smem:[#allocation67_spill]] %s14638_s5 }
   0x7   :  { %14789 = sst [smem:[#allocation68_spill]] %s14639_s6 }
   0x8   :  { %14790 = sst [smem:[#allocation69_spill]] %s14640_s7 }
   0x9   :  { %14791 = sst [smem:[#allocation70_spill]] %s14641_s8 }
   0xa   :  { %14792 = sst [smem:[#allocation71_spill]] %s14642_s9 }
   0xb   :  { %14793 = sst [smem:[#allocation72_spill]] %s14643_s10 }
   0xc   :  { %14794 = sst [smem:[#allocation73_spill]] %s14646_s13 }
   0xd   :  { %14795 = sst [smem:[#allocation74_spill]] %s14651_s18 }
   0xe   :  { %14796 = sst [smem:[#allocation75_spill]] %s14652_s19 }
   0xf   :  { %14797 = sst [smem:[#allocation76_spill]] %s14653_s20 }
  0x10   :  { %26 = vsyncpa [#allocation3], 0 }
  0x11   :  { %28 = vsyncpa [#allocation3 + $0x1], 0 }
  0x12   :  { %29 = vsyncpa [#allocation5], 0 }
  0x13   :  { %30 = vsyncpa [#allocation8], 0 }
  0x14   :  { %31 = vsyncpa [#allocation11], 0 }
  0x15   :  { %32 = vsyncpa [#allocation14], 0 }
  0x16   :  { %33 = vsyncpa [#allocation17], 0 }
  0x17   :  { %34 = vsyncpa [#allocation20], 0  ;;  %s12468_s1 = smov 0   ;;  %s12470_s22 = smov 0  }
  0x18   :  { %s12472_s23 = smov 0   ;;  %s12474_s24 = smov 0  }
  0x19 LB: > { %s12326_s2 = smov [#allocation4]   ;;  %s12489_s3 = sadd.s32 4294967295, %s12324_s24   ;;  %s12324_s24 = sphi %s12474_s24, %s15016_s24   ;;  %s12320_s23 = sphi %s12472_s23, %s15015_s23   ;;  %s12316_s22 = sphi %s12470_s22, %s15014_s22   ;;  %s12312_s1 = sphi %s12468_s1, %s15013_s1  }
  0x1a   : > { %s519_s25 = sshll.u32 %s12326_s2, 4  ;;  %p9483_p0 = scmp.ge.s32.totalorder %s12324_s24, 1  ;;  %s520_s25 = int_to_ptr.vmem [resolvable:$true] %s519_s25 }
  0x1b   : > { %p14660_p1 = scmp.eq.s32.totalorder %s12489_s3, 0  ;;  %p506_p2 = scmp.lt.s32.totalorder %s12324_s24, 3 }
  0x1c   : > { %s12327_s27 = smov [#allocation7]   ;;  %s12328_s29 = smov [#allocation10]  }
  0x1d   : > { %p12494_p3 = pnand %p9483_p0, %p506_p2  ;;  %s545_s28 = sshll.u32 %s12327_s27, 4  ;;  %s12506_s28 = int_to_ptr.vmem [resolvable:$true] %s545_s28 }
  0x1e   : > { %s577_s30 = sshll.u32 %s12328_s29, 4  ;;  %s14800_s2 = sld [smem:[#allocation63_spill]]  ;;  %s12508_s30 = int_to_ptr.vmem [resolvable:$true] %s577_s30 }
  0x1f   : > { %s14798_s26 = scalar_select %p12494_p3, 1, 0 }
  0x20   : > { %p11704_p4 = pneg %p12494_p3 }
  0x22   : > { %p12502_p5 = pnand %p11704_p4, %p14660_p1 }
  0x24   : > { %s11900_s18 = scalar_lea.hbm %s14800_s2, 128  ;;  %p12518_p7 = pneg %p12502_p5 }
  0x25   : > { %p11901_p6 = scmp.ne.s32.totalorder %s14800_s2, %s11900_s18  ;;  %p11907_p10 = scmp.lt.u32.totalorder %s11900_s18, %s14800_s2 }
  0x27   : > { %p11903_p8 = pnand %p12518_p7, %p11901_p6 }
  0x29   : > { %p11904_p9 = pneg %p11903_p8 }
  0x2b   : > { %p11909_p11 = pnand %p11907_p10, %p11904_p9 }
  0x2d   : > { %11912 = shalt.err (!%p11909_p11)
}
  0x2e   : > { %s11913_s0 = scalar_lea.vmem %s520_s25, 128  ;;  %p11921_p2 = scmp.lt.s32.totalorder %s520_s25, %s520_s25 }
  0x2f   : > { %p11914_p12 = scmp.ne.s32.totalorder %s520_s25, %s11913_s0  ;;  %p11922_p4 = scmp.lt.s32.totalorder %s11913_s0, %s11913_s0 }
  0x31   : > { %p11916_p13 = pnand %p11914_p12, %p12518_p7  ;;  %p11923_p1 = por %p11922_p4, %p11921_p2 }
  0x33   : > { %p11917_p0 = pneg %p11916_p13 }
  0x35   : > { %p11924_p3 = pnand %p11923_p1, %p11917_p0 }
  0x37   : > { %11927 = shalt.err (!%p11924_p3)
}
  0x38   : > { %11707 = dma.hbm_to_vmem [thread:$0]  (!%p12502_p5), %s14800_s2, 128, %s520_s25, [#allocation5]  }
  0x39   : > { %s14802_s21 = sld [smem:[#allocation66_spill]] }
  0x3f   : > { %s11928_s29 = scalar_lea.hbm %s14802_s21, 1536 }
  0x40   : > { %p11929_p6 = scmp.ne.s32.totalorder %s14802_s21, %s11928_s29  ;;  %p11935_p1 = scmp.lt.u32.totalorder %s11928_s29, %s14802_s21 }
  0x42   : > { %p11931_p8 = pnand %p11929_p6, %p12518_p7 }
  0x44   : > { %p11932_p9 = pneg %p11931_p8 }
  0x46   : > { %p11937_p3 = pnand %p11935_p1, %p11932_p9 }
  0x48   : > { %11940 = shalt.err (!%p11937_p3)
}
  0x49   : > { %s11941_s25 = scalar_lea.vmem %s12506_s28, 1536  ;;  %p11949_p13 = scmp.lt.s32.totalorder %s12506_s28, %s12506_s28 }
  0x4a   : > { %p11942_p10 = scmp.ne.s32.totalorder %s12506_s28, %s11941_s25  ;;  %p11950_p0 = scmp.lt.s32.totalorder %s11941_s25, %s11941_s25 }
  0x4c   : > { %p11944_p11 = pnand %p11942_p10, %p12518_p7  ;;  %p11951_p2 = por %p11950_p0, %p11949_p13 }
  0x4e   : > { %p11945_p12 = pneg %p11944_p11 }
  0x50   : > { %p11952_p4 = pnand %p11951_p2, %p11945_p12 }
  0x52   : > { %11955 = shalt.err (!%p11952_p4)
}
  0x53   : > { %s14666_s7 = smov 128   ;;  %s14668_s5 = smov 8  }
  0x54   : > { %11713 = dma.hbm_to_vmem [thread:$0]  (!%p12502_p5), %s14802_s21, 1536, %s12506_s28, [#allocation8], %s14666_s7, %s14666_s7, %s14668_s5  }
  0x55   : > { %s14803_s8 = sld [smem:[#allocation70_spill]] }
  0x5b   : > { %s11956_s18 = scalar_lea.hbm %s14803_s8, 7680 }
  0x5c   : > { %p11957_p6 = scmp.ne.s32.totalorder %s14803_s8, %s11956_s18  ;;  %p11963_p1 = scmp.lt.u32.totalorder %s11956_s18, %s14803_s8 }
  0x5e   : > { %p11959_p8 = pnand %p11957_p6, %p12518_p7 }
  0x60   : > { %p11960_p9 = pneg %p11959_p8 }
  0x62   : > { %p11965_p3 = pnand %p11963_p1, %p11960_p9 }
  0x64   : > { %11968 = shalt.err (!%p11965_p3)
}
  0x65   : > { %s11969_s28 = scalar_lea.vmem %s12508_s30, 7680  ;;  %p11977_p13 = scmp.lt.s32.totalorder %s12508_s30, %s12508_s30 }
  0x66   : > { %p11970_p10 = scmp.ne.s32.totalorder %s12508_s30, %s11969_s28  ;;  %p11978_p0 = scmp.lt.s32.totalorder %s11969_s28, %s11969_s28 }
  0x68   : > { %p11972_p11 = pnand %p11970_p10, %p12518_p7  ;;  %p11979_p2 = por %p11978_p0, %p11977_p13 }
  0x6a   : > { %p11973_p12 = pneg %p11972_p11 }
  0x6c   : > { %p11980_p4 = pnand %p11979_p2, %p11973_p12 }
  0x6e   : > { %11983 = shalt.err (!%p11980_p4)
}
  0x6f   : > { %s14671_s9 = smov 640   ;;  %s14672_s2 = smov 40  }
  0x70   : > { %11719 = dma.hbm_to_vmem [thread:$0]  (!%p12502_p5), %s14803_s8, 7680, %s12508_s30, [#allocation11], %s14671_s9, %s14671_s9, %s14672_s2  }
  0x71   : > { %s12333_s13 = smov [#allocation13]   ;;  %s11984_s25 = scalar_lea.hbm %s14644_s11, 48 }
  0x72   : > { %s606_s18 = sshll.u32 %s12333_s13, 4  ;;  %p11985_p6 = scmp.ne.s32.totalorder %s14644_s11, %s11984_s25  ;;  %s607_s18 = int_to_ptr.vmem [resolvable:$true] %s606_s18 }
  0x73   : > { %p11991_p1 = scmp.lt.u32.totalorder %s11984_s25, %s14644_s11 }
  0x74   : > { %p11987_p8 = pnand %p11985_p6, %p12518_p7 }
  0x76   : > { %p11988_p9 = pneg %p11987_p8 }
  0x78   : > { %p11993_p3 = pnand %p11991_p1, %p11988_p9 }
  0x7a   : > { %11996 = shalt.err (!%p11993_p3)
}
  0x7b   : > { %s11997_s30 = scalar_lea.vmem %s607_s18, 48  ;;  %s12004_s19 = scalar_lea.vmem %s607_s18, 64 }
  0x7c   : > { %p11998_p10 = scmp.ne.s32.totalorder %s607_s18, %s11997_s30  ;;  %p12005_p13 = scmp.lt.s32.totalorder %s607_s18, %s607_s18 }
  0x7d   : > { %p12006_p0 = scmp.lt.s32.totalorder %s12004_s19, %s11997_s30 }
  0x7e   : > { %p12000_p11 = pnand %p11998_p10, %p12518_p7 }
  0x7f   : > { %p12007_p2 = por %p12006_p0, %p12005_p13 }
  0x80   : > { %p12001_p12 = pneg %p12000_p11 }
  0x82   : > { %p12008_p4 = pnand %p12007_p2, %p12001_p12 }
  0x84   : > { %12011 = shalt.err (!%p12008_p4)
}
  0x85   : > { %s12334_s7 = smov 16   ;;  %s12335_s20 = smov 1  }
  0x86   : > { %11725 = dma.hbm_to_vmem [thread:$0]  (!%p12502_p5), %s14644_s11, 48, %s607_s18, [#allocation14], %s12334_s7, %s12334_s7, %s12335_s20  }
  0x87   : > { %s12336_s13 = smov [#allocation16]   ;;  %s12337_s0 = smov [#allocation19]  }
  0x88   : > { %s635_s29 = sshll.u32 %s12336_s13, 4  ;;  %s662_s25 = sshll.u32 %s12337_s0, 4  ;;  %s636_s29 = int_to_ptr.vmem [resolvable:$true] %s635_s29  ;;  %s12604_s25 = int_to_ptr.vmem [resolvable:$true] %s662_s25 }
  0x89   : > { %s12012_s19 = scalar_lea.hbm %s14647_s14, 3072 }
  0x8a   : > { %p12013_p6 = scmp.ne.s32.totalorder %s14647_s14, %s12012_s19  ;;  %p12019_p1 = scmp.lt.u32.totalorder %s12012_s19, %s14647_s14 }
  0x8c   : > { %p12015_p8 = pnand %p12013_p6, %p12518_p7 }
  0x8e   : > { %p12016_p9 = pneg %p12015_p8 }
  0x90   : > { %p12021_p3 = pnand %p12019_p1, %p12016_p9 }
  0x92   : > { %12024 = shalt.err (!%p12021_p3)
}
  0x93   : > { %s12025_s7 = scalar_lea.vmem %s636_s29, 3072  ;;  %p12033_p13 = scmp.lt.s32.totalorder %s636_s29, %s636_s29 }
  0x94   : > { %p12026_p10 = scmp.ne.s32.totalorder %s636_s29, %s12025_s7  ;;  %p12034_p0 = scmp.lt.s32.totalorder %s12025_s7, %s12025_s7 }
  0x96   : > { %p12028_p11 = pnand %p12026_p10, %p12518_p7  ;;  %p12035_p2 = por %p12034_p0, %p12033_p13 }
  0x98   : > { %p12029_p12 = pneg %p12028_p11 }
  0x9a   : > { %p12036_p4 = pnand %p12035_p2, %p12029_p12 }
  0x9c   : > { %12039 = shalt.err (!%p12036_p4)
}
  0x9d   : > { %s14804_s9 = smov 8   ;;  %s14805_s2 = smov 128  }
  0x9e   : > { %11731 = dma.hbm_to_vmem [thread:$0]  (!%p12502_p5), %s14647_s14, 3072, %s636_s29, [#allocation17], %s14805_s2, %s14805_s2, %s14804_s9  }
  0x9f   : > { %s12040_s28 = scalar_lea.hbm %s14649_s16, 64 }
  0xa0   : > { %p12041_p6 = scmp.ne.s32.totalorder %s14649_s16, %s12040_s28  ;;  %p12047_p1 = scmp.lt.u32.totalorder %s12040_s28, %s14649_s16 }
  0xa2   : > { %p12043_p8 = pnand %p12041_p6, %p12518_p7 }
  0xa4   : > { %p12044_p9 = pneg %p12043_p8 }
  0xa6   : > { %p12049_p3 = pnand %p12047_p1, %p12044_p9 }
  0xa8   : > { %12052 = shalt.err (!%p12049_p3)
}
  0xa9   : > { %s12053_s29 = scalar_lea.vmem %s12604_s25, 64  ;;  %p12061_p13 = scmp.lt.s32.totalorder %s12604_s25, %s12604_s25 }
  0xaa   : > { %p12054_p10 = scmp.ne.s32.totalorder %s12604_s25, %s12053_s29  ;;  %p12062_p0 = scmp.lt.s32.totalorder %s12053_s29, %s12053_s29 }
  0xac   : > { %p12056_p11 = pnand %p12054_p10, %p12518_p7  ;;  %p12063_p2 = por %p12062_p0, %p12061_p13 }
  0xae   : > { %p12057_p12 = pneg %p12056_p11 }
  0xb0   : > { %p12064_p4 = pnand %p12063_p2, %p12057_p12 }
  0xb2   : > { %12067 = shalt.err (!%p12064_p4)
}
  0xb3   : > { %11737 = dma.hbm_to_vmem [thread:$0]  (!%p12502_p5), %s14649_s16, 64, %s12604_s25, [#allocation20]  }
  0xb4   : > { %s12338_s5 = smov [#allocation6]   ;;  %s12339_s0 = smov [#allocation9]  }
  0xb5   : > { %s529_s13 = sshll.u32 %s12338_s5, 4  ;;  %s561_s28 = sshll.u32 %s12339_s0, 4  ;;  %s530_s13 = int_to_ptr.vmem [resolvable:$true] %s529_s13  ;;  %s12650_s28 = int_to_ptr.vmem [resolvable:$true] %s561_s28 }
  0xb6   : > { %s14806_s21 = sld [smem:[#allocation64_spill]] }
  0xbc   : > { %s12068_s18 = scalar_lea.hbm %s14806_s21, 1536 }
  0xbd   : > { %p12069_p6 = scmp.ne.s32.totalorder %s14806_s21, %s12068_s18  ;;  %p12075_p1 = scmp.lt.u32.totalorder %s12068_s18, %s14806_s21 }
  0xbf   : > { %p12071_p8 = pnand %p12069_p6, %p12518_p7 }
  0xc1   : > { %p12072_p9 = pneg %p12071_p8 }
  0xc3   : > { %p12077_p3 = pnand %p12075_p1, %p12072_p9 }
  0xc5   : > { %12080 = shalt.err (!%p12077_p3)
}
  0xc6   : > { %s12081_s20 = scalar_lea.vmem %s530_s13, 1536  ;;  %p12089_p13 = scmp.lt.s32.totalorder %s530_s13, %s530_s13 }
  0xc7   : > { %p12082_p10 = scmp.ne.s32.totalorder %s530_s13, %s12081_s20  ;;  %p12090_p0 = scmp.lt.s32.totalorder %s12081_s20, %s12081_s20 }
  0xc9   : > { %p12084_p11 = pnand %p12082_p10, %p12518_p7  ;;  %p12091_p2 = por %p12090_p0, %p12089_p13 }
  0xcb   : > { %p12085_p12 = pneg %p12084_p11 }
  0xcd   : > { %p12092_p4 = pnand %p12091_p2, %p12085_p12 }
  0xcf   : > { %12095 = shalt.err (!%p12092_p4)
}
  0xd0   : > { %11710 = dma.hbm_to_vmem [thread:$0]  (!%p12502_p5), %s14806_s21, 1536, %s530_s13, [#allocation5], %s14805_s2, %s14805_s2, %s14804_s9  }
  0xd1   : > { %s14807_s6 = sld [smem:[#allocation68_spill]] }
  0xd7   : > { %s12096_s19 = scalar_lea.hbm %s14807_s6, 1536 }
  0xd8   : > { %p12097_p6 = scmp.ne.s32.totalorder %s14807_s6, %s12096_s19  ;;  %p12103_p1 = scmp.lt.u32.totalorder %s12096_s19, %s14807_s6 }
  0xda   : > { %p12099_p8 = pnand %p12097_p6, %p12518_p7 }
  0xdc   : > { %p12100_p9 = pneg %p12099_p8 }
  0xde   : > { %p12105_p3 = pnand %p12103_p1, %p12100_p9 }
  0xe0   : > { %12108 = shalt.err (!%p12105_p3)
}
  0xe1   : > { %s12109_s13 = scalar_lea.vmem %s12650_s28, 1536  ;;  %p12117_p13 = scmp.lt.s32.totalorder %s12650_s28, %s12650_s28 }
  0xe2   : > { %p12110_p10 = scmp.ne.s32.totalorder %s12650_s28, %s12109_s13  ;;  %p12118_p0 = scmp.lt.s32.totalorder %s12109_s13, %s12109_s13 }
  0xe4   : > { %p12112_p11 = pnand %p12110_p10, %p12518_p7  ;;  %p12119_p2 = por %p12118_p0, %p12117_p13 }
  0xe6   : > { %p12113_p12 = pneg %p12112_p11 }
  0xe8   : > { %p12120_p4 = pnand %p12119_p2, %p12113_p12 }
  0xea   : > { %12123 = shalt.err (!%p12120_p4)
}
  0xeb   : > { %11716 = dma.hbm_to_vmem [thread:$0]  (!%p12502_p5), %s14807_s6, 1536, %s12650_s28, [#allocation8], %s14805_s2, %s14805_s2, %s14804_s9  }
  0xec   : > { %s12340_s5 = smov [#allocation12]   ;;  %s12341_s30 = smov [#allocation15]  }
  0xed   : > { %s593_s0 = sshll.u32 %s12340_s5, 4  ;;  %s619_s19 = sshll.u32 %s12341_s30, 4  ;;  %s594_s0 = int_to_ptr.vmem [resolvable:$true] %s593_s0  ;;  %s12699_s19 = int_to_ptr.vmem [resolvable:$true] %s619_s19 }
  0xee   : > { %s14808_s10 = sld [smem:[#allocation72_spill]] }
  0xf4   : > { %s12124_s7 = scalar_lea.hbm %s14808_s10, 1536 }
  0xf5   : > { %p12125_p6 = scmp.ne.s32.totalorder %s14808_s10, %s12124_s7  ;;  %p12131_p1 = scmp.lt.u32.totalorder %s12124_s7, %s14808_s10 }
  0xf7   : > { %p12127_p8 = pnand %p12125_p6, %p12518_p7 }
  0xf9   : > { %p12128_p9 = pneg %p12127_p8 }
  0xfb   : > { %p12133_p3 = pnand %p12131_p1, %p12128_p9 }
  0xfd   : > { %12136 = shalt.err (!%p12133_p3)
}
  0xfe   : > { %s12137_s8 = scalar_lea.vmem %s594_s0, 1536  ;;  %p12145_p13 = scmp.lt.s32.totalorder %s594_s0, %s594_s0 }
  0xff   : > { %p12138_p10 = scmp.ne.s32.totalorder %s594_s0, %s12137_s8  ;;  %p12146_p0 = scmp.lt.s32.totalorder %s12137_s8, %s12137_s8 }
 0x101   : > { %p12140_p11 = pnand %p12138_p10, %p12518_p7  ;;  %p12147_p2 = por %p12146_p0, %p12145_p13 }
 0x103   : > { %p12141_p12 = pneg %p12140_p11 }
 0x105   : > { %p12148_p4 = pnand %p12147_p2, %p12141_p12 }
 0x107   : > { %12151 = shalt.err (!%p12148_p4)
}
 0x108   : > { %11722 = dma.hbm_to_vmem [thread:$0]  (!%p12502_p5), %s14808_s10, 1536, %s594_s0, [#allocation11], %s14805_s2, %s14805_s2, %s14804_s9  }
 0x109   : > { %s12152_s7 = scalar_lea.hbm %s14645_s12, 15360 }
 0x10a   : > { %p12153_p6 = scmp.ne.s32.totalorder %s14645_s12, %s12152_s7  ;;  %p12159_p1 = scmp.lt.u32.totalorder %s12152_s7, %s14645_s12 }
 0x10c   : > { %p12155_p8 = pnand %p12153_p6, %p12518_p7 }
 0x10e   : > { %p12156_p9 = pneg %p12155_p8 }
 0x110   : > { %p12161_p3 = pnand %p12159_p1, %p12156_p9 }
 0x112   : > { %12164 = shalt.err (!%p12161_p3)
}
 0x113   : > { %s12165_s0 = scalar_lea.vmem %s12699_s19, 15360  ;;  %p12173_p13 = scmp.lt.s32.totalorder %s12699_s19, %s12699_s19 }
 0x114   : > { %p12166_p10 = scmp.ne.s32.totalorder %s12699_s19, %s12165_s0  ;;  %p12174_p0 = scmp.lt.s32.totalorder %s12165_s0, %s12165_s0 }
 0x116   : > { %p12168_p11 = pnand %p12166_p10, %p12518_p7  ;;  %p12175_p2 = por %p12174_p0, %p12173_p13 }
 0x118   : > { %p12169_p12 = pneg %p12168_p11 }
 0x11a   : > { %p12176_p4 = pnand %p12175_p2, %p12169_p12 }
 0x11c   : > { %12179 = shalt.err (!%p12176_p4)
}
 0x11d   : > { %s14809_s8 = smov 40   ;;  %s14810_s5 = smov 640  }
 0x11e   : > { %11728 = dma.hbm_to_vmem [thread:$0]  (!%p12502_p5), %s14645_s12, 15360, %s12699_s19, [#allocation14], %s14810_s5, %s14810_s5, %s14809_s8  }
 0x11f   : > { %s12342_s29 = smov [#allocation18]   ;;  %s12343_s25 = smov [#allocation21]  }
 0x120   : > { %s648_s7 = sshll.u32 %s12342_s29, 4  ;;  %s673_s13 = sshll.u32 %s12343_s25, 4  ;;  %s649_s7 = int_to_ptr.vmem [resolvable:$true] %s648_s7  ;;  %s12748_s13 = int_to_ptr.vmem [resolvable:$true] %s673_s13 }
 0x121   : > { %s12180_s0 = scalar_lea.hbm %s14648_s15, 3072 }
 0x122   : > { %p12181_p6 = scmp.ne.s32.totalorder %s14648_s15, %s12180_s0  ;;  %p12187_p1 = scmp.lt.u32.totalorder %s12180_s0, %s14648_s15 }
 0x124   : > { %p12183_p8 = pnand %p12181_p6, %p12518_p7 }
 0x126   : > { %p12184_p9 = pneg %p12183_p8 }
 0x128   : > { %p12189_p3 = pnand %p12187_p1, %p12184_p9 }
 0x12a   : > { %12192 = shalt.err (!%p12189_p3)
}
 0x12b   : > { %s12193_s8 = scalar_lea.vmem %s649_s7, 3072  ;;  %p12201_p13 = scmp.lt.s32.totalorder %s649_s7, %s649_s7 }
 0x12c   : > { %p12194_p10 = scmp.ne.s32.totalorder %s649_s7, %s12193_s8  ;;  %p12202_p0 = scmp.lt.s32.totalorder %s12193_s8, %s12193_s8 }
 0x12e   : > { %p12196_p11 = pnand %p12194_p10, %p12518_p7  ;;  %p12203_p2 = por %p12202_p0, %p12201_p13 }
 0x130   : > { %p12197_p12 = pneg %p12196_p11 }
 0x132   : > { %p12204_p4 = pnand %p12203_p2, %p12197_p12 }
 0x134   : > { %12207 = shalt.err (!%p12204_p4)
}
 0x135   : > { %11734 = dma.hbm_to_vmem [thread:$0]  (!%p12502_p5), %s14648_s15, 3072, %s649_s7, [#allocation17], %s14805_s2, %s14805_s2, %s14804_s9  }
 0x136   : > { %s12208_s29 = scalar_lea.hbm %s14650_s17, 64 }
 0x137   : > { %p12209_p6 = scmp.ne.s32.totalorder %s14650_s17, %s12208_s29  ;;  %p12215_p1 = scmp.lt.u32.totalorder %s12208_s29, %s14650_s17 }
 0x139   : > { %p12211_p8 = pnand %p12209_p6, %p12518_p7 }
 0x13b   : > { %p12212_p9 = pneg %p12211_p8 }
 0x13d   : > { %p12217_p3 = pnand %p12215_p1, %p12212_p9 }
 0x13f   : > { %12220 = shalt.err (!%p12217_p3)
}
 0x140   : > { %s12221_s9 = scalar_lea.vmem %s12748_s13, 64  ;;  %p12229_p13 = scmp.lt.s32.totalorder %s12748_s13, %s12748_s13 }
 0x141   : > { %p12222_p10 = scmp.ne.s32.totalorder %s12748_s13, %s12221_s9  ;;  %p12230_p0 = scmp.lt.s32.totalorder %s12221_s9, %s12221_s9 }
 0x143   : > { %p12224_p11 = pnand %p12222_p10, %p12518_p7  ;;  %p12231_p2 = por %p12230_p0, %p12229_p13 }
 0x145   : > { %p12225_p12 = pneg %p12224_p11 }
 0x147   : > { %p12232_p4 = pnand %p12231_p2, %p12225_p12 }
 0x149   : > { %12235 = shalt.err (!%p12232_p4)
}
 0x14a   : > { %11740 = dma.hbm_to_vmem [thread:$0]  (!%p12502_p5), %s14650_s17, 64, %s12748_s13, [#allocation20]  }
 0x14b   : > { %s12795_s4 = sadd.s32 1, %s12324_s24   ;;  %s47_s27 = sadd.s32 1, %s12320_s23 }
 0x14c   : > { %s44_s30 = ssub.s32 %s12324_s24, %s12795_s4  ;;  %p54_p7 = scmp.ne.s32.totalorder %s12320_s23, %s12316_s22 }
 0x14d   : > { %p45_p6 = scmp.eq.s32.totalorder %s44_s30, 0  ;;  %p55_p8 = scmp.eq.s32.totalorder %s12324_s24, 0 }
 0x14e   : > { %p60_p9 = scmp.ne.s32.totalorder %s12316_s22, %s12312_s1  ;;  %p441_p1 = scmp.eq.s32.totalorder %s12489_s3, 1 }
 0x14f   : > { %s12807_s19 = scalar_select %p45_p6, %s12320_s23, %s47_s27  }
 0x150   : > { %p56_p3 = por %p55_p8, %p54_p7  ;;  %p14811_p10 = scmp.eq.s32.totalorder %s12489_s3, 0 }
 0x151   : > { %p12815_p12 = por %p441_p1, %p54_p7  ;;  %p11757_p5 = scmp.lt.s32.totalorder %s12324_s24, 2 }
 0x152   : > { %p12811_p11 = por %p14811_p10, %p60_p9  ;;  %s684_s6 = sand.u32 1, %s12320_s23  }
 0x153   : > { %s14813_s13 = scalar_select %p12815_p12, 1, 0 }
 0x154   : > { %s9497_s10 = sshll.u32 %s12324_s24, 4  ;;  %s14814_s29 = sld [smem:[#allocation62_spill]] }
 0x155   : > { %s687_s25 = scalar_lea.vmem [#allocation2], %s684_s6  ;;  %p12829_p13 = pnand %p11757_p5, %p56_p3 }
 0x156   : > { %s694_s20 = sshll.u32 %s687_s25, 4  ;;  %s685_s24 = scalar_lea.sflag [#allocation3], %s684_s6  ;;  %s12827_s20 = int_to_ptr.vmem [resolvable:$true] %s694_s20 }
 0x157   : > { %p12238_p2 = pneg %p12829_p13 }
 0x15a   : > { %s12825_s1 = scalar_lea.hbm %s14814_s29, %s9497_s10  ;;  %s12241_s7 = scalar_lea.hbm %s14814_s29, 32 }
 0x15b   : > { %s12236_s0 = scalar_lea.hbm %s12825_s1, 16  ;;  %p12242_p6 = scmp.lt.u32.totalorder %s12825_s1, %s14814_s29 }
 0x15c   : > { %p12237_p0 = scmp.ne.s32.totalorder %s12825_s1, %s12236_s0  ;;  %p12243_p8 = scmp.lt.u32.totalorder %s12241_s7, %s12236_s0 }
 0x15d   : > { %p12245_p1 = scmp.lt.u32.totalorder %s12236_s0, %s12825_s1 }
 0x15e   : > { %p12239_p4 = pnand %p12238_p2, %p12237_p0  ;;  %p12244_p9 = por %p12243_p8, %p12242_p6 }
 0x160   : > { %p12240_p7 = pneg %p12239_p4  ;;  %p12246_p3 = por %p12245_p1, %p12244_p9 }
 0x162   : > { %p12247_p10 = pnand %p12246_p3, %p12240_p7 }
 0x164   : > { %12250 = shalt.err (!%p12247_p10)
}
 0x165   : > { %s12251_s6 = scalar_lea.vmem %s12827_s20, 16  ;;  %s12344_s10 = smov [#allocation2]  }
 0x166   : > { %p12252_p5 = scmp.ne.s32.totalorder %s12827_s20, %s12251_s6  ;;  %s12256_s5 = sshll.u32 %s12344_s10, 4  ;;  %s12257_s5 = int_to_ptr.vmem [resolvable:$false] %s12256_s5 }
 0x167   : > { %s12258_s18 = scalar_lea.vmem %s12257_s5, 32  ;;  %p12259_p12 = scmp.lt.s32.totalorder %s12827_s20, %s12257_s5 }
 0x168   : > { %p12254_p0 = pnand %p12252_p5, %p12238_p2  ;;  %p12260_p6 = scmp.lt.s32.totalorder %s12258_s18, %s12251_s6 }
 0x16a   : > { %p12255_p4 = pneg %p12254_p0  ;;  %p12261_p8 = por %p12260_p6, %p12259_p12 }
 0x16c   : > { %p12262_p9 = pnand %p12261_p8, %p12255_p4 }
 0x16e   : > { %12265 = shalt.err (!%p12262_p9)
}
 0x16f   : > { %11744 = dma.hbm_to_vmem [thread:$0]  (!%p12829_p13), %s12825_s1, 16, %s12827_s20, %s685_s24  }
 0x170   : > { %p14816_p7 = scmp.ne.s32.totalorder %s14798_s26, 0 }
 0x172   : > { %703 = sbr.rel (%p14816_p7) target bundleno = 9008 (0x2330), region = 92 }
 0x179   : > { %s12861_s25 = sand.u32 1, %s12316_s22  }
 0x17a   : > { %s706_s0 = scalar_lea.sflag [#allocation3], %s12861_s25  ;;  %s708_s9 = scalar_lea.vmem [#allocation2], %s12861_s25 }
 0x17b   : > { %12283 = dma.done.wait (%p12811_p11), %s706_s0, 16  }
 0x17c   : > { %12285 = vsyncadd (%p12811_p11), %s706_s0, 4294967280  ;;  %p14817_p12 = scmp.eq.s32.totalorder %s12489_s3, 0 }
 0x17e   : > { %12287 = dma.done.wait (%p14817_p12), [#allocation5], 1664   ;;  %p14818_p13 = pmov %p14817_p12 }
 0x17f   : > { %p14819_p2 = pmov %p14817_p12 }
 0x180   : > { %12289 = vsyncadd (%p14818_p13), [#allocation5], 4294965632 }
 0x181   : > { %12291 = dma.done.wait (%p14819_p2), [#allocation8], 3072   ;;  %p14820_p1 = pmov %p14819_p2 }
 0x183   : > { %12293 = vsyncadd (%p14820_p1), [#allocation8], 4294964224  ;;  %p14821_p3 = pmov %p14820_p1 }
 0x184   : > { %p14822_p10 = pmov %p14820_p1 }
 0x185   : > { %12295 = dma.done.wait (%p14821_p3), [#allocation11], 9216  }
 0x186   : > { %12297 = vsyncadd (%p14822_p10), [#allocation11], 4294958080  ;;  %p14823_p11 = pmov %p14820_p1 }
 0x187   : > { %p14824_p5 = pmov %p14820_p1 }
 0x188   : > { %12299 = dma.done.wait (%p14823_p11), [#allocation14], 15408  }
 0x189   : > { %12301 = vsyncadd (%p14824_p5), [#allocation14], 4294951888  ;;  %p14825_p0 = pmov %p14820_p1 }
 0x18b   : > { %12303 = dma.done.wait (%p14825_p0), [#allocation17], 6144   ;;  %p14826_p4 = pmov %p14825_p0 }
 0x18c   : > { %p14827_p6 = pmov %p14825_p0 }
 0x18d   : > { %12305 = vsyncadd (%p14826_p4), [#allocation17], 4294961152 }
 0x18e   : > { %12307 = dma.done.wait (%p14827_p6), [#allocation20], 128   ;;  %p14828_p8 = pmov %p14825_p0 }
 0x18f   : > { %v14673_v0 = vmov 0.0|0.0   ;;  %vm12346_vm0 = vmmov 0   ;;  %v14675_v1 = vmov 0.0   ;;  %v836_v2 = vld [vmem:[#allocation7] sm:$0xff]  ;;  %v837_v3 = vld [vmem:[#allocation7 + $0x8] sm:$0xff]  ;;  %v838_v4 = vld [vmem:[#allocation7 + $0x10] sm:$0xff] }
 0x190   : > { %12309 = vsyncadd (%p14828_p8), [#allocation20], 4294967168  ;;  %10861 = vmatprep.subr.bf16.mxu0 %v14673_v0  ;;  %10024 = vmatprep.mubr.msk.f32.mxu0 %vm12346_vm0, %v14675_v1  ;;  %v12899_v5 = vpack.c.bf16 %v837_v3, %v836_v2  ;;  %v839_v6 = vld [vmem:[#allocation7 + $0x18] sm:$0xff]  ;;  %v831_v7 = vld [vmem:[#allocation6] sm:$0xff]  ;;  %vm929_vm1 = vcmask 261120   ;;  %s14829_s1 = sld [smem:[#allocation67_spill]] }
 0x191   : > { %10867 = vmatprep.subr.bf16.mxu1 %v14673_v0  ;;  %10035 = vmatprep.mubr.msk.f32.mxu1 %vm12346_vm0, %v14675_v1  ;;  %v832_v8 = vld [vmem:[#allocation6 + $0x8] sm:$0xff]  ;;  %v12902_v9 = vpack.c.bf16 %v839_v6, %v838_v4  ;;  %v841_v11 = vld [vmem:[#allocation9] sm:$0xff]  ;;  %v827_v13 = vld [vmem:[%s708_s9] sm:$0x1]  ;;  %s14831_s2 = sld [smem:[#allocation65_spill]]  ;;  %s14832_s30 = sld [smem:[#allocation69_spill]] }
 0x192   : > { %10863 = vmatpush3.bf16.msra.mxu0 %v12899_v5  ;;  %v12904_v10 = vpack.c.bf16 %v832_v8, %v831_v7  ;;  %v842_v12 = vld [vmem:[#allocation9 + $0x8] sm:$0xff]  ;;  %v833_v15 = vld [vmem:[#allocation6 + $0x10] sm:$0xff]  ;;  %v834_v16 = vld [vmem:[#allocation6 + $0x18] sm:$0xff]  ;;  %s11653_s6 = smul.u32 56, %s12861_s25  ;;  %vm829_vm3 = vcmask 523264   ;;  %s14853_s25 = sld [smem:[#allocation71_spill]] }
 0x193   : > { %10864 = vmatprep.subr.bf16.mxu0 %v14673_v0  ;;  %v12912_v14 = vpack.c.bf16 %v842_v12, %v841_v11  ;;  %v12920_v17 = vpack.c.bf16 %v834_v16, %v833_v15  ;;  %v843_v18 = vld [vmem:[#allocation9 + $0x10] sm:$0xff]  ;;  %v844_v19 = vld [vmem:[#allocation9 + $0x18] sm:$0xff]  ;;  %v847_v21 = vld [vmem:[#allocation10 + $0x8] sm:$0xff]  ;;  %s14854_s26 = sld [smem:[#allocation73_spill]]  ;;  %s14755_s8 = smov 112   ;;  %vm1724_vm5 = vcmask 490496  }
 0x194   : > { %10869 = vmatpush3.bf16.msra.mxu1 %v12904_v10  ;;  %v12923_v20 = vpack.c.bf16 %v844_v19, %v843_v18  ;;  %v852_v22 = vld [vmem:[#allocation10 + $0x30] sm:$0xff]  ;;  %v867_v24 = vld [vmem:[#allocation12] sm:$0xff]  ;;  %v868_v25 = vld [vmem:[#allocation12 + $0x8] sm:$0xff]  ;;  %s13057_s10 = scalar_lea.vmem [#allocation22], %s11653_s6  ;;  %s12350_s28 = smov 52   ;;  %vm1738_vm6 = vcmask 424960  }
 0x195   : > { %10870 = vmatprep.subr.bf16.mxu1 %v14673_v0  ;;  %v12930_v23 = vpack.c.bf16 %v852_v22, %v847_v21  ;;  %v12933_v26 = vpack.c.bf16 %v868_v25, %v867_v24  ;;  %v846_v29 = vld [vmem:[#allocation10] sm:$0xff]  ;;  %v851_v30 = vld [vmem:[#allocation10 + $0x28] sm:$0xff]  ;;  %v857_v37 = vld [vmem:[#allocation10 + $0x58] sm:$0xff]  ;;  %s12351_s24 = smov 120   ;;  %s12352_s7 = smov 44   ;;  %vm1769_vm7 = vcmask 1040384  }
 0x196   : > { %10866 = vmatpush3.bf16.msra.mxu0 %v12902_v9  ;;  %s14830_s20 = smov %s14829_s1  ;;  %v12940_v27 = vld [vmem:[%s14829_s1] sm:$0x1]  ;;  %v12943_v34 = vpack.c.bf16 %v851_v30, %v846_v29  ;;  %v862_v38 = vld [vmem:[#allocation10 + $0x80] sm:$0xff]  ;;  %v870_v42 = vld [vmem:[#allocation12 + $0x18] sm:$0xff]  ;;  %s14719_s1 = smov 60   ;;  %vm1771_vm8 = vcmask 1041408  }
 0x197   : > { %10873 = vmatprep.subr.bf16.mxu0 %v14673_v0  ;;  %v12948_v40 = vpack.c.bf16 %v862_v38, %v857_v37  ;;  %v869_v41 = vld [vmem:[#allocation12 + $0x10] sm:$0xff]  ;;  %v861_v45 = vld [vmem:[#allocation10 + $0x78] sm:$0xff]  ;;  %v854_v48 = vld [vmem:[#allocation10 + $0x40] sm:$0xff]  ;;  %s14759_s27 = smov 36   ;;  %s12354_s6 = smov 104   ;;  %vm1773_vm9 = vcmask 1042432  }
 0x198   : > { %10872 = vmatpush3.bf16.msra.mxu1 %v12920_v17  ;;  %v856_v43 = vld [vmem:[#allocation10 + $0x50] sm:$0xff]  ;;  %v12950_v44 = vpack.c.bf16 %v870_v42, %v869_v41  ;;  %v849_v47 = vld [vmem:[#allocation10 + $0x18] sm:$0xff]  ;;  %v850_v54 = vld [vmem:[#allocation10 + $0x20] sm:$0xff]  ;;  %vm1752_vm10 = vcmask 359424   ;;  %vm1775_vm11 = vcmask 1043456   ;;  %vm1777_vm12 = vcmask 1044480  }
 0x199   : > { %10025 = vmatmul.mubr.msk.f32.vlgmr.msra.gmra.mrb[0].mxu0 %vm929_vm1, %v827_v13  ;;  %10879 = vmatprep.subr.bf16.mxu1 %v14673_v0  ;;  %v12953_v46 = vpack.c.bf16 %v861_v45, %v856_v43  ;;  %v12957_v49 = vpack.c.bf16 %v854_v48, %v849_v47  ;;  %v12964_v50 = vld [vmem:[%s14831_s2] sm:$0x1]  ;;  %v853_v53 = vld [vmem:[#allocation10 + $0x38] sm:$0xff]  ;;  %v855_v55 = vld [vmem:[#allocation10 + $0x48] sm:$0xff]  ;;  %vm1779_vm13 = vcmask 1045504   ;;  %vm14721_vm14 = vcmask 293888  }
 0x19a   : > { %10875 = vmatpush3.bf16.msra.mxu0 %v12912_v14  ;;  %10046 = vmatprep.mubr.msk.f32.mxu0 %vm12346_vm0, %v14675_v1  ;;  %v848_v52 = vld [vmem:[#allocation10 + $0x10] sm:$0xff]  ;;  %v859_v58 = vld [vmem:[#allocation10 + $0x68] sm:$0xff]  ;;  %v12974_v63 = vpack.c.bf16 %v855_v55, %v850_v54  ;;  %v858_v2 = vld [vmem:[#allocation10 + $0x60] sm:$0xff]  ;;  %vm14718_vm15 = vcmask 1046528   ;;  %s14757_s5 = smov 103   ;;  %s14724_s18 = smov 94  }
 0x19b   : > { %10876 = vmatprep.subr.bf16.mxu0 %v14673_v0  ;;  %10036 = vmatmul.mubr.msk.f32.vlgmr.msra.gmra.mrb[0].mxu1 %vm929_vm1, %v827_v13  ;;  %v12970_v56 = vld [vmem:[%s14832_s30] sm:$0x1]  ;;  %v12972_v62 = vpack.c.bf16 %v853_v53, %v848_v52  ;;  %v863_v3 = vld [vmem:[#allocation10 + $0x88] sm:$0xff]  ;;  %v865_v8 = vld [vmem:[#allocation10 + $0x98] sm:$0xff]  ;;  %s14722_s0 = smov 85   ;;  %p819_p9 = scmp.lt.s32.totalorder %s12489_s3, 1 }
 0x19c   : > { %10057 = vmatprep.mubr.msk.f32.mxu1 %vm12346_vm0, %v14675_v1  ;;  %10881 = vmatpush3.bf16.msra.mxu1 %v12933_v26  ;;  %v864_v59 = vld [vmem:[#allocation10 + $0x90] sm:$0xff]  ;;  %v875_v11 = vld [vmem:[#allocation15 + $0x18] sm:$0xff]  ;;  %v880_v12 = vld [vmem:[#allocation15 + $0x40] sm:$0xff]  ;;  %v12987_v16 = vpack.c.bf16 %v863_v3, %v858_v2  ;;  %p15011_p7 = scmp.ne.s32.totalorder %s14813_s13, 0 }
 0x19d   : > { %10882 = vmatprep.subr.bf16.mxu1 %v14673_v0  ;;  %v12979_v6 = vpack.c.bf16 %v864_v59, %v859_v58  ;;  %v860_v7 = vld [vmem:[#allocation10 + $0x70] sm:$0xff]  ;;  %v879_v21 = vld [vmem:[#allocation15 + $0x38] sm:$0xff]  ;;  %v12993_v22 = vpack.c.bf16 %v880_v12, %v875_v11  ;;  %v872_v25 = vld [vmem:[#allocation15] sm:$0xff] }
 0x19e   : > { %10878 = vmatpush3.bf16.msra.mxu0 %v12923_v20  ;;  %v873_v13 = vld [vmem:[#allocation15 + $0x8] sm:$0xff]  ;;  %v878_v15 = vld [vmem:[#allocation15 + $0x30] sm:$0xff]  ;;  %v12989_v18 = vpack.c.bf16 %v865_v8, %v860_v7  ;;  %v887_v42 = vld [vmem:[#allocation15 + $0x78] sm:$0xff] }
 0x19f   : > { %10886 = vmatprep.subr.bf16.mxu0 %v12930_v23  ;;  %v874_v19 = vld [vmem:[#allocation15 + $0x10] sm:$0xff]  ;;  %v12995_v24 = vpack.c.bf16 %v878_v15, %v873_v13  ;;  %v885_v29 = vld [vmem:[#allocation15 + $0x68] sm:$0xff]  ;;  %v895_v43 = vld [vmem:[#allocation15 + $0xb8] sm:$0xff] }
 0x1a0   : > { %10884 = vmatpush3.bf16.msra.mxu1 %v12950_v44  ;;  %v890_v30 = vld [vmem:[#allocation15 + $0x90] sm:$0xff]  ;;  %v889_v37 = vld [vmem:[#allocation15 + $0x88] sm:$0xff]  ;;  %v900_v45 = vld [vmem:[#allocation15 + $0xe0] sm:$0xff] }
 0x1a1   : > { %10894 = vmatprep.subr.bf16.mxu1 %v12957_v49  ;;  %v13008_v38 = vpack.c.bf16 %v890_v30, %v885_v29  ;;  %v882_v41 = vld [vmem:[#allocation15 + $0x50] sm:$0xff]  ;;  %v893_v47 = vld [vmem:[#allocation15 + $0xa8] sm:$0xff]  ;;  %v13024_v54 = vpack.c.bf16 %v900_v45, %v895_v43  ;;  %v892_v58 = vld [vmem:[#allocation15 + $0xa0] sm:$0xff] }
 0x1a2   : > { %v898_v48 = vld [vmem:[#allocation15 + $0xd0] sm:$0xff]  ;;  %v13020_v52 = vpack.c.bf16 %v887_v42, %v882_v41  ;;  %v897_v59 = vld [vmem:[#allocation15 + $0xc8] sm:$0xff]  ;;  %v903_v8 = vld [vmem:[#allocation15 + $0xf8] sm:$0xff] }
 0x1a3   : > { %v894_v53 = vld [vmem:[#allocation15 + $0xb0] sm:$0xff]  ;;  %v13026_v55 = vpack.c.bf16 %v898_v48, %v893_v47  ;;  %v905_v2 = vld [vmem:[#allocation15 + $0x108] sm:$0xff]  ;;  %v908_v11 = vld [vmem:[#allocation15 + $0x120] sm:$0xff] }
 0x1a4   : > { %v910_v3 = vld [vmem:[#allocation15 + $0x130] sm:$0xff]  ;;  %v904_v12 = vld [vmem:[#allocation15 + $0x100] sm:$0xff]  ;;  %v13042_v13 = vpack.c.bf16 %v908_v11, %v903_v8  ;;  %v909_v15 = vld [vmem:[#allocation15 + $0x128] sm:$0xff] }
 0x1a5   : > { %v13040_v7 = vpack.c.bf16 %v910_v3, %v905_v2  ;;  %v13055_v29 = vld [vmem:[#allocation4] sm:$0xff]  ;;  %v876_v41 = vld [vmem:[#allocation15 + $0x20] sm:$0xff]  ;;  %v881_v42 = vld [vmem:[#allocation15 + $0x48] sm:$0xff] }
 0x1a6   : > { %14834 = vst [vmem:[#allocation31_spill] sm:$0xff] %v13042_v13  ;;  %830 = vst.msk [vmem:[%s13057_s10] sm:$0xff] %vm829_vm3, %v13055_v29  ;;  %v1926_v30 = vsel %vm829_vm3, %v13055_v29, 0.0  ;;  %v913_v47 = vld [vmem:[#allocation16] sm:$0xff]  ;;  %v914_v48 = vld [vmem:[#allocation16 + $0x8] sm:$0xff] }
 0x1a7   : > { %14833 = vst [vmem:[#allocation30_spill] sm:$0xff] %v13040_v7  ;;  %1927 = vadd.xlane.f32.xlu0 %v1926_v30  ;;  %v13072_v2 = vpack.c.bf16 %v914_v48, %v913_v47  ;;  %v915_v8 = vld [vmem:[#allocation16 + $0x10] sm:$0xff]  ;;  %v916_v11 = vld [vmem:[#allocation16 + $0x18] sm:$0xff] }
 0x1a8   : > { %v13085_v30 = vpack.c.bf16 %v916_v11, %v915_v8  ;;  %v919_v47 = vld [vmem:[#allocation16 + $0x30] sm:$0xff]  ;;  %v920_v48 = vld [vmem:[#allocation16 + $0x38] sm:$0xff]  ;;  %v922_v8 = vld [vmem:[#allocation18 + $0x8] sm:$0xff] }
 0x1a9   : > { %14839 = vst [vmem:[#allocation36_spill] sm:$0xff] %v13072_v2 }
 0x1aa   : > { %14841 = vst [vmem:[#allocation38_spill] sm:$0xff] %v13085_v30 }
 0x26c   : > { %v999_v28 = vpop.f32.mrb[0].mxu0 }
 0x26d   : > { %v1000_v31 = vadd.f32 %v999_v28, %v12940_v27  ;;  %v10026_v32 = vpop.f32.mrb[1].mxu0  ;;  %v877_v28 = vld [vmem:[#allocation15 + $0x28] sm:$0xff] }
 0x26e   : > { %v1072_v36 = vpop.f32.mrb[0].mxu1  ;;  %v888_v32 = vld [vmem:[#allocation15 + $0x80] sm:$0xff] }
 0x26f   : > { %vm1003_vm2 = vcmp.gt.f32.partialorder %v1000_v31, 0.0  ;;  %v1004_v33 = vmul.f32 0.2, %v1000_v31  ;;  %v10037_v39 = vpop.f32.mrb[1].mxu1  ;;  %v1073_v51 = vadd.f32 %v1072_v36, %v12964_v50  ;;  %v884_v36 = vld [vmem:[#allocation15 + $0x60] sm:$0xff] }
 0x271   : > { %v1005_v35 = vsel %vm1003_vm2, %v1000_v31, %v1004_v33  ;;  %v883_v31 = vld [vmem:[#allocation15 + $0x58] sm:$0xff]  ;;  %v13002_v33 = vpack.c.bf16 %v879_v21, %v874_v19  ;;  %v902_v19 = vld [vmem:[#allocation15 + $0xf0] sm:$0xff]  ;;  %vm1977_vm2 = vcmask 195584  }
 0x272   : > { %10047 = vmatmul.mubr.msk.f32.vlgmr.msra.gmra.mrb[2].mxu0 %vm929_vm1, %v1005_v35  ;;  %v13004_v35 = vpack.c.bf16 %v877_v28, %v872_v25  ;;  %v13010_v39 = vpack.c.bf16 %v888_v32, %v883_v31  ;;  %v907_v21 = vld [vmem:[#allocation15 + $0x118] sm:$0xff]  ;;  %v13045_v25 = vpack.c.bf16 %v909_v15, %v904_v12  ;;  %v1939_v31 = vmul.f32 %v13055_v29, %v13055_v29 }
 0x273   : > { %10888 = vmatpush1.bf16.msra.mxu0 %v12943_v34  ;;  %1317 = vmatprep.mubr.f32.mxu0 %v14675_v1  ;;  %v13047_v28 = vpack.c.bf16 %v907_v21, %v902_v19  ;;  %v896_v19 = vld [vmem:[#allocation15 + $0xc0] sm:$0xff]  ;;  %v901_v21 = vld [vmem:[#allocation15 + $0xe8] sm:$0xff] }
 0x274   : > { %10890 = vmatprep.subr.bf16.mxu0 %v12948_v40  ;;  %14835 = vst [vmem:[#allocation32_spill] sm:$0xff] %v13045_v25  ;;  %v1942_v32 = vsel %vm829_vm3, %v1939_v31, 0.0 }
 0x275   : > { %14836 = vst [vmem:[#allocation33_spill] sm:$0xff] %v13047_v28  ;;  %1943 = vadd.xlane.f32.xlu1 %v1942_v32  ;;  %v917_v32 = vld [vmem:[#allocation16 + $0x20] sm:$0xff] }
 0x277   : > { %10892 = vmatpush1.bf16.msra.mxu0 %v12953_v46 }
 0x278   : > { %10901 = vmatprep.subr.bf16.mxu0 %v14673_v0 }
 0x345   : > { %v1145_v57 = vpop.f32.mrb[2].mxu0 }
 0x346   : > { %v1149_v60 = vadd.f32 %v1145_v57, %v1073_v51  ;;  %v10048_v61 = vpop.f32.mrb[3].mxu0  ;;  %v13018_v51 = vpack.c.bf16 %v889_v37, %v884_v36  ;;  %v899_v57 = vld [vmem:[#allocation15 + $0xd8] sm:$0xff] }
 0x347   : > { %v13034_v61 = vpack.c.bf16 %v897_v59, %v892_v58  ;;  %v13067_v36 = vld [vmem:[#allocation13] sm:$0x1]  ;;  %v886_v58 = vld [vmem:[#allocation15 + $0x70] sm:$0xff] }
 0x348   : > { %v12977_v4 = vadd.f32 %v1149_v60, %v12970_v56  ;;  %v13032_v60 = vpack.c.bf16 %v899_v57, %v894_v53  ;;  %14837 = vst [vmem:[#allocation34_spill] sm:$0xff] %v13067_v36  ;;  %v13070_v57 = vpack.c.bf16 %v881_v42, %v876_v41  ;;  %v891_v59 = vld [vmem:[#allocation15 + $0x98] sm:$0xff]  ;;  %v13091_v41 = vpack.c.bf16 %v901_v21, %v896_v19  ;;  %v906_v42 = vld [vmem:[#allocation15 + $0x110] sm:$0xff] }
 0x349   : > { %v13077_v12 = vpack.c.bf16 %v891_v59, %v886_v58  ;;  %v13103_v58 = vpack.c.bf16 %v920_v48, %v919_v47  ;;  %v921_v59 = vld [vmem:[#allocation18] sm:$0xff]  ;;  %v923_v19 = vld [vmem:[#allocation18 + $0x10] sm:$0xff]  ;;  %v924_v21 = vld [vmem:[#allocation18 + $0x18] sm:$0xff]  ;;  %v1228_v48 = vlaneseq }
 0x34a   : > { %10058 = vmatmul.mubr.msk.f32.vlgmr.msra.gmra.mrb[2].mxu1 %vm929_vm1, %v12977_v4  ;;  %9517 = vmatmul.mubr.msk.f32.vlgmr.msra.gmra.mrb[4].mxu0 %vm929_vm1, %v12977_v4  ;;  %14838 = vst [vmem:[#allocation35_spill] sm:$0xff] %v13070_v57  ;;  %14842 = vst [vmem:[#allocation39_spill] sm:$0xff] %v13091_v41  ;;  %v13107_v11 = vpack.c.bf16 %v922_v8, %v921_v59 }
 0x34b   : > { %10896 = vmatpush1.bf16.msra.mxu1 %v12972_v62  ;;  %10903 = vmatpush3.bf16.msra.mxu0 %v12974_v63  ;;  %14840 = vst [vmem:[#allocation37_spill] sm:$0xff] %v13077_v12  ;;  %14845 = vst [vmem:[#allocation42_spill] sm:$0xff] %v13103_v58  ;;  %v1229_v59 = vshrl.u32 %v1228_v48, 7 }
 0x34c   : > { %10898 = vmatprep.subr.bf16.mxu1 %v12979_v6  ;;  %10904 = vmatprep.subr.bf16.mxu0 %v14673_v0  ;;  %14846 = vst [vmem:[#allocation43_spill] sm:$0xff] %v13107_v11 }
 0x34d   : > { %1388 = vmatprep.mubr.f32.mxu1 %v14675_v1  ;;  %10068 = vmatprep.mubr.msk.f32.mxu0 %vm12346_vm0, %v14675_v1  ;;  %v13137_v8 = vsub.s32 0, %v1229_v59 }
 0x34f   : > { %10900 = vmatpush1.bf16.msra.mxu1 %v12987_v16  ;;  %10906 = vmatpush3.bf16.msra.mxu0 %v12989_v18  ;;  %14850 = vst [vmem:[#allocation47_spill] sm:$0xff] %v13137_v8 }
 0x350   : > { %10924 = vmatprep.subr.bf16.mxu1 %v12993_v22  ;;  %10908 = vmatprep.subr.bf16.mxu0 %v12995_v24 }
 0x352   : > { %9518 = vmatmul.mubr.msk.f32.vlgmr.msra.gmra.mrb[4].mxu1 %vm929_vm1, %v12977_v4  ;;  %10069 = vmatmul.mubr.msk.f32.vlgmr.msra.gmra.mrb[6].mxu0 %vm929_vm1, %v12977_v4 }
 0x353   : > { %10926 = vmatpush1.bf16.msra.mxu1 %v13002_v33  ;;  %10910 = vmatpush1.bf16.msra.mxu0 %v13004_v35 }
 0x354   : > { %10928 = vmatprep.subr.bf16.mxu1 %v13008_v38  ;;  %10912 = vmatprep.subr.bf16.mxu0 %v13010_v39 }
 0x355   : > { %1532 = vmatprep.mubr.f32.mxu0 %v14675_v1  ;;  %1603 = vmatprep.mubr.f32.mxu1 %v14675_v1 }
 0x357   : > { %10930 = vmatpush1.bf16.msra.mxu1 %v13018_v51  ;;  %10914 = vmatpush1.bf16.msra.mxu0 %v13020_v52 }
 0x358   : > { %10932 = vmatprep.subr.bf16.mxu1 %v13024_v54  ;;  %10916 = vmatprep.subr.bf16.mxu0 %v13026_v55 }
 0x35b   : > { %10934 = vmatpush1.bf16.msra.mxu1 %v13032_v60  ;;  %10918 = vmatpush1.bf16.msra.mxu0 %v13034_v61 }
 0x35c   : > { %10936 = vmatprep.subr.bf16.mxu1 %v13040_v7  ;;  %10920 = vmatprep.subr.bf16.mxu0 %v13042_v13 }
 0x35f   : > { %10938 = vmatpush1.bf16.msra.mxu1 %v13045_v25  ;;  %10922 = vmatpush1.bf16.msra.mxu0 %v13047_v28 }
 0x360   : > { %10939 = vmatprep.subr.bf16.mxu1 %v14673_v0  ;;  %10951 = vmatprep.subr.bf16.mxu0 %v14673_v0 }
 0x41d   : > { %v1220_v37 = vpop.f32.mrb[2].mxu1 }
 0x41e   : > { %v1221_v43 = vadd.f32 %v1220_v37, %v13067_v36  ;;  %v10059_v45 = vpop.f32.mrb[3].mxu1  ;;  %v918_v37 = vld [vmem:[#allocation16 + $0x28] sm:$0xff] }
 0x41f   : > { %v13095_v45 = vpack.c.bf16 %v918_v37, %v917_v32  ;;  %v925_v32 = vld [vmem:[#allocation18 + $0x20] sm:$0xff]  ;;  %v926_v37 = vld [vmem:[#allocation18 + $0x28] sm:$0xff] }
 0x420   : > { %vm1224_vm4 = vcmp.gt.f32.partialorder %v1221_v43, 0.0  ;;  %v1225_v53 = vmul.f32 0.2, %v1221_v43 }
 0x421   : > { %14843 = vst [vmem:[#allocation40_spill] sm:$0xff] %v13095_v45 }
 0x422   : > { %v1226_v3 = vsel %vm1224_vm4, %v1221_v43, %v1225_v53  ;;  %v911_v43 = vld [vmem:[#allocation15 + $0x138] sm:$0xff] }
 0x423   : > { %9520 = vmatmul.mubr.msk.f32.vlgmr.msra.gmra.mrb[4].mxu0 %vm829_vm3, %v1226_v3  ;;  %9521 = vmatmul.mubr.msk.f32.vlgmr.msra.gmra.mrb[4].mxu1 %vm829_vm3, %v1226_v3  ;;  %v13099_v53 = vpack.c.bf16 %v911_v43, %v906_v42  ;;  %v927_v42 = vld [vmem:[#allocation18 + $0x30] sm:$0xff]  ;;  %v928_v43 = vld [vmem:[#allocation18 + $0x38] sm:$0xff] }
 0x424   : > { %10941 = vmatpush3.bf16.msra.mxu1 %v13070_v57  ;;  %10087 = vmatprep.mubr.msk.f32.mxu1 %vm12346_vm0, %v14675_v1  ;;  %v13128_v47 = vpack.c.bf16 %v928_v43, %v927_v42 }
 0x425   : > { %v13081_v15 = vpop.f32.mrb[6].mxu0  ;;  %10942 = vmatprep.subr.bf16.mxu1 %v14673_v0  ;;  %10953 = vmatpush3.bf16.msra.mxu0 %v13072_v2  ;;  %14844 = vst [vmem:[#allocation41_spill] sm:$0xff] %v13099_v53 }
 0x426   : > { %v10070_v31 = vpop.f32.mrb[7].mxu0  ;;  %10954 = vmatprep.subr.bf16.mxu0 %v14673_v0  ;;  %10106 = vmatprep.mubr.msk.f32.mxu0 %vm12346_vm0, %v14675_v1  ;;  %14849 = vst [vmem:[#allocation46_spill] sm:$0xff] %v13128_v47 }
 0x427   : > { %v13116_v31 = vpack.c.bf16 %v924_v21, %v923_v19  ;;  %v13139_v19 = vsub.s32 2, %v1229_v59  ;;  %v13141_v21 = vsub.s32 1, %v1229_v59 }
 0x428   : > { %10944 = vmatpush3.bf16.msra.mxu1 %v13077_v12  ;;  %v13180_v12 = vsub.s32 3, %v1229_v59 }
 0x429   : > { %10945 = vmatprep.subr.bf16.mxu1 %v14673_v0  ;;  %10956 = vmatpush3.bf16.msra.mxu0 %v13085_v30  ;;  %14847 = vst [vmem:[#allocation44_spill] sm:$0xff] %v13116_v31  ;;  %14851 = vst [vmem:[#allocation48_spill] sm:$0xff] %v13139_v19 }
 0x42a   : > { %10957 = vmatprep.subr.bf16.mxu0 %v14673_v0  ;;  %14852 = vst [vmem:[#allocation49_spill] sm:$0xff] %v13141_v21  ;;  %14861 = vst [vmem:[#allocation56_spill] sm:$0xff] %v13180_v12 }
 0x42c   : > { %10947 = vmatpush3.bf16.msra.mxu1 %v13091_v41 }
 0x42d   : > { %10948 = vmatprep.subr.bf16.mxu1 %v14673_v0  ;;  %10959 = vmatpush3.bf16.msra.mxu0 %v13095_v45 }
 0x42e   : > { %10960 = vmatprep.subr.bf16.mxu0 %v14673_v0 }
 0x430   : > { %10950 = vmatpush3.bf16.msra.mxu1 %v13099_v53 }
 0x431   : > { %10962 = vmatpush3.bf16.msra.mxu0 %v13103_v58  ;;  %10963 = vmatprep.subr.bf16.mxu1 %v14673_v0 }
 0x432   : > { %10975 = vmatprep.subr.bf16.mxu0 %v14673_v0 }
 0x433   : > { %10088 = vmatmul.mubr.msk.f32.vlgmr.msra.gmra.mrb[6].mxu1 %vm829_vm3, %v1226_v3  ;;  %v13124_v3 = vpack.c.bf16 %v926_v37, %v925_v32  ;;  %v866_v32 = vld [vmem:[%s14853_s25] sm:$0x1f] }
 0x434   : > { %10107 = vmatmul.mubr.msk.f32.vlgmr.msra.gmra.mrb[8].mxu0 %vm829_vm3, %v13055_v29  ;;  %10965 = vmatpush3.bf16.msra.mxu1 %v13107_v11  ;;  %v13149_v37 = vld [vmem:[%s14854_s26] sm:$0x1f]  ;;  %v13152_v42 = vrot.slane %v866_v32, %v13137_v8  ;;  %v13155_v43 = vrot.slane %v866_v32, %v13139_v19  ;;  %v13158_v48 = vrot.slane %v866_v32, %v13141_v21 }
 0x435   : > { %10966 = vmatprep.subr.bf16.mxu1 %v14673_v0  ;;  %10125 = vmatprep.mubr.msk.f32.mxu1 %vm12346_vm0, %v14675_v1  ;;  %14848 = vst [vmem:[#allocation45_spill] sm:$0xff] %v13124_v3  ;;  %v13172_v53 = vrot.slane %v13149_v37, %v13141_v21 }
 0x436   : > { %10134 = vmatprep.mubr.msk.f32.mxu0 %vm12346_vm0, %v14675_v1  ;;  %14855 = vst [vmem:[#allocation50_spill] sm:$0xff] %v13152_v42  ;;  %14856 = vst [vmem:[#allocation51_spill] sm:$0xff] %v13155_v43 }
 0x437   : > { %14857 = vst [vmem:[#allocation52_spill] sm:$0xff] %v13158_v48  ;;  %14860 = vst [vmem:[#allocation55_spill] sm:$0xff] %v13172_v53 }
 0x438   : > { %10968 = vmatpush3.bf16.msra.mxu1 %v13116_v31 }
 0x439   : > { %10969 = vmatprep.subr.bf16.mxu1 %v14673_v0 }
 0x43c   : > { %10971 = vmatpush3.bf16.msra.mxu1 %v13124_v3 }
 0x43d   : > { %10972 = vmatprep.subr.bf16.mxu1 %v14673_v0  ;;  %v13162_v0 = vrot.slane %v13149_v37, %v13137_v8 }
 0x43f   : > { %14858 = vst [vmem:[#allocation53_spill] sm:$0xff] %v13162_v0 }
 0x440   : > { %10974 = vmatpush3.bf16.msra.mxu1 %v13128_v47 }
 0x441   : > { %10142 = vmatprep.subr.mxu1 %v14675_v1 }
 0x443   : > { %10126 = vmatmul.mubr.msk.f32.vlgmr.msra.gmra.mrb[8].mxu1 %vm829_vm3, %v13055_v29 }
 0x444   : > { %10144 = vmatprep.mubr.msk.f32.mxu1 %vm12346_vm0, %v14675_v1  ;;  %v13166_v1 = vrot.slane %v13149_v37, %v13139_v19 }
 0x446   : > { %14859 = vst [vmem:[#allocation54_spill] sm:$0xff] %v13166_v1 }
 0x4f6   : > { %v1534_v47 = vpop.f32.mrb[4].mxu0  ;;  %v1605_v3 = vpop.f32.mrb[4].mxu1 }
 0x4f7   : > { %v11581_v31 = vadd.f32 %v1534_v47, %v13152_v42  ;;  %v11583_v11 = vadd.f32 %v1605_v3, %v13155_v43  ;;  %v1536_v58 = vpop.f32.mrb[5].mxu0  ;;  %v1607_v45 = vpop.f32.mrb[5].mxu1  ;;  %v13183_v43 = vsub.s32 4, %v1229_v59 }
 0x4f8   : > { %v11582_v41 = vadd.f32 %v1536_v58, %v13158_v48  ;;  %v13188_v58 = vrot.slane %v866_v32, %v13180_v12 }
 0x4f9   : > { %v13176_v8 = vadd.f32 %v11581_v31, %v13162_v0  ;;  %v1713_v19 = vadd.f32 %v11583_v11, %v13166_v1  ;;  %14862 = vst [vmem:[#allocation57_spill] sm:$0xff] %v13183_v43 }
 0x4fa   : > { %v1712_v30 = vadd.f32 %v11582_v41, %v13172_v53  ;;  %14863 = vst [vmem:[#allocation58_spill] sm:$0xff] %v13188_v58  ;;  %v13191_v41 = vrot.slane %v866_v32, %v13183_v43  ;;  %v11584_v59 = vadd.f32 %v1607_v45, %v13188_v58 }
 0x4fb   : > { %v1741_v47 = vrot.slane %v1713_v19, 4  ;;  %v1718_v3 = vrot.slane %v13176_v8, 7  ;;  %v1733_v31 = vrot.slane %v1713_v19, 5 }
 0x4fc   : > { %v1719_v11 = vrot.slane %v1712_v30, 7  ;;  %14864 = vst [vmem:[#allocation59_spill] sm:$0xff] %v13191_v41  ;;  %v1462_v21 = vadd.f32 %v13081_v15, %v13191_v41  ;;  %v1732_v0 = vrot.slane %v1712_v30, 5 }
 0x4fd   : > { %1742 = vrot.lane.b32.xlu1 %v1741_v47, %s14755_s8  ;;  %1720 = vrot.lane.b32.xlu0 %v1718_v3, %s14719_s1  ;;  %v13198_v47 = vrot.slane %v13149_v37, %v13180_v12  ;;  %v1727_v3 = vrot.slane %v1712_v30, 6 }
 0x4ff   : > { %14865 = vst [vmem:[#allocation60_spill] sm:$0xff] %v13198_v47  ;;  %v1714_v53 = vadd.f32 %v11584_v59, %v13198_v47 }
 0x501   : > { %1736 = vrot.lane.b32.xlu0 %v1733_v31, %s12350_s28  ;;  %1722 = vrot.lane.b32.xlu1 %v1719_v11, %s14719_s1  ;;  %v1747_v12 = vrot.slane %v1714_v53, 3 }
 0x505   : > { %1728 = vrot.lane.b32.xlu1 %v1727_v3, %s12351_s24 }
 0x506   : > { %v1676_v32 = vpop.f32.mrb[6].mxu1 }
 0x507   : > { %v1684_v1 = vadd.f32 %v1676_v32, %v1462_v21  ;;  %v10089_v31 = vpop.f32.mrb[7].mxu1  ;;  %v13204_v11 = vpop.f32.mrb[8].mxu0  ;;  %v1746_v32 = vrot.slane %v1713_v19, 3 }
 0x508   : > { %v10108_v45 = vpop.f32.mrb[9].mxu0  ;;  %v1929_v3 = vsel %vm829_vm3, %v13204_v11, 0.0  ;;  %v1940_v21 = vmul.f32 %v13204_v11, %v13204_v11 }
 0x509   : > { %1734 = vrot.lane.b32.xlu1 %v1732_v0, %s12350_s28  ;;  %v13224_v45 = vrot.slane %v13149_v37, %v13183_v43  ;;  %v1928_v37 = vpop.xlane.xlu0 %1927 }
 0x50a   : > { %v1945_v59 = vsel %vm829_vm3, %v1940_v21, 0.0  ;;  %v14705_v21 = vmov 24  }
 0x50b   : > { %14866 = vst [vmem:[#allocation61_spill] sm:$0xff] %v13224_v45  ;;  %11838 = vset.pattern.permute.xlu1 %v14705_v21 }
 0x50d   : > { %1750 = vrot.lane.b32.xlu1 %v1747_v12, %s12352_s7  ;;  %v1760_v12 = vrot.slane %v1714_v53, 1 }
 0x516   : > { %v13208_v58 = vpop.f32.mrb[8].mxu1 }
 0x517   : > { %v10127_v15 = vpop.f32.mrb[9].mxu1  ;;  %v1941_v30 = vmul.f32 %v13208_v58, %v13208_v58  ;;  %v1932_v31 = vsel %vm829_vm3, %v13208_v58, 0.0 }
 0x518   : > { %v1715_v15 = vadd.f32 %v13224_v45, %v1684_v1  ;;  %v1936_v1 = vmul.f32 0.015625, %v1928_v37 }
 0x519   : > { %v1948_v0 = vsel %vm829_vm3, %v1941_v30, 0.0  ;;  %v14710_v30 = vmov 42  }
 0x51a   : > { %v1761_v19 = vrot.slane %v1715_v15, 1  ;;  %11840 = vset.pattern.permute.xlu0 %v14710_v30  ;;  %v1954_v45 = vmul.f32 %v1936_v1, %v1936_v1  ;;  %v1960_v36 = vsub.f32 %v13055_v29, %v1936_v1 }
 0x520   : > { %1930 = vadd.xlane.f32.xlu0 %v1929_v3  ;;  %v1755_v3 = vrot.slane %v1714_v53, 2 }
 0x531   : > { %1946 = vadd.xlane.f32.xlu1 %v1945_v59  ;;  %v1944_v59 = vpop.xlane.xlu1 %1943 }
 0x535   : > { %1949 = vadd.xlane.f32.xlu1 %v1948_v0 }
 0x536   : > { %1748 = vrot.lane.b32.xlu0 %v1746_v32, %s12352_s7 }
 0x546   : > { %1762 = vrot.lane.b32.xlu1 %v1760_v12, %s14759_s27 }
 0x555   : > { %1933 = vadd.xlane.f32.xlu0 %v1932_v31 }
 0x56b   : > { %1756 = vrot.lane.b32.xlu0 %v1755_v3, %s12354_s6  ;;  %v1951_v3 = vmul.f32 0.015625, %v1944_v59 }
 0x56d   : > { %v1957_v41 = vsub.f32 %v1951_v3, %v1954_v45  ;;  %v14867_v45 = vmov 0.0  }
 0x56f   : > { %1764 = vrot.lane.b32.xlu0 %v1761_v19, %s14759_s27  ;;  %v1743_v0 = vpop.permute.xlu1 %1742  ;;  %v1721_v12 = vpop.permute.xlu0 %1720  ;;  %v1963_v19 = vadd.f32 1e-05, %v1957_v41 }
 0x571   : > { %11864 = vrsqrt.f32 %v1963_v19 }
 0x573   : > { %v1723_v32 = vpop.permute.xlu1 %1722  ;;  %v1737_v53 = vpop.permute.xlu0 %1736 }
 0x577   : > { %v1729_v31 = vpop.permute.xlu1 %1728 }
 0x57b   : > { %v1735_v43 = vpop.permute.xlu1 %1734  ;;  %v11865_v25 = vpop.eup %11864 }
 0x57c   : > { %v1969_v7 = vmul.f32 %v11865_v25, %v1960_v36 }
 0x57f   : > { %v1751_v47 = vpop.permute.xlu1 %1750 }
 0x5ad   : > { %v1931_v15 = vpop.xlane.xlu0 %1930 }
 0x5ae   : > { %v1937_v21 = vmul.f32 0.015625, %v1931_v15 }
 0x5b0   : > { %v1955_v42 = vmul.f32 %v1937_v21, %v1937_v21  ;;  %v1961_v37 = vsub.f32 %v13204_v11, %v1937_v21 }
 0x5be   : > { %v1947_v48 = vpop.xlane.xlu1 %1946 }
 0x5bf   : > { %v1952_v2 = vmul.f32 0.015625, %v1947_v48  ;;  %v1749_v48 = vpop.permute.xlu0 %1748 }
 0x5c1   : > { %v1958_v30 = vsub.f32 %v1952_v2, %v1955_v42  ;;  %v1725_v2 = vsel %vm1724_vm5, %v1721_v12, %v1723_v32  ;;  %v1739_v42 = vsel %vm1738_vm6, %v1735_v43, %v1737_v53 }
 0x5c2   : > { %v1950_v29 = vpop.xlane.xlu1 %1949 }
 0x5c3   : > { %v1964_v57 = vadd.f32 1e-05, %v1958_v30  ;;  %v1953_v25 = vmul.f32 0.015625, %v1950_v29  ;;  %v1753_v30 = vsel %vm1752_vm10, %v1749_v48, %v1751_v47  ;;  %v14726_v47 = vmov 33  }
 0x5c5   : > { %11866 = vrsqrt.f32 %v1964_v57 }
 0x5c6   : > { %v1763_v1 = vpop.permute.xlu1 %1762 }
 0x5cf   : > { %v11867_v28 = vpop.eup %11866 }
 0x5d0   : > { %v1970_v59 = vmul.f32 %v11867_v28, %v1961_v37 }
 0x5d2   : > { %v13233_v13 = vpack.c.bf16 %v1970_v59, %v1969_v7  ;;  %v1770_v7 = vsel %vm1769_vm7, %v13176_v8, %v1725_v2  ;;  %v14728_v59 = vmov 67  }
 0x5d3   : > { %v1772_v36 = vsel %vm1771_vm8, %v1770_v7, %v1729_v31  ;;  %v14869_v7 = vmov 0.0|0.0  }
 0x5d4   : > { %10977 = vmatpush3.bf16.msra.mxu0 %v13233_v13  ;;  %v1774_v11 = vsel %vm1773_vm9, %v1772_v36, %v1739_v42 }
 0x5d5   : > { %10132 = vmatprep.subr.mxu0 %v14867_v45  ;;  %v1776_v12 = vsel %vm1775_vm11, %v1774_v11, %v1743_v0 }
 0x5d6   : > { %v1778_v8 = vsel %vm1777_vm12, %v1776_v12, %v1753_v30 }
 0x5e2   : > { %v1934_v57 = vpop.xlane.xlu0 %1933 }
 0x5e3   : > { %v1938_v28 = vmul.f32 0.015625, %v1934_v57 }
 0x5e5   : > { %v1956_v41 = vmul.f32 %v1938_v28, %v1938_v28  ;;  %v1962_v0 = vsub.f32 %v13208_v58, %v1938_v28  ;;  %v14868_v58 = vmov 24  }
 0x5e6   : > { %v1757_v21 = vpop.permute.xlu0 %1756 }
 0x5e7   : > { %v1959_v32 = vsub.f32 %v1953_v25, %v1956_v41  ;;  %v1780_v31 = vsel %vm1779_vm13, %v1778_v8, %v1757_v21 }
 0x5e9   : > { %v1965_v43 = vadd.f32 1e-05, %v1959_v32 }
 0x5ea   : > { %v1765_v53 = vpop.permute.xlu0 %1764 }
 0x5eb   : > { %11868 = vrsqrt.f32 %v1965_v43  ;;  %v1767_v3 = vsel %vm14721_vm14, %v1763_v1, %v1765_v53 }
 0x5ec   : > { %v1782_v15 = vsel %vm14718_vm15, %v1780_v31, %v1767_v3  ;;  %vm2059_vm15 = vcmask 64512  }
 0x5ed   : > { %2057 = vrot.lane.b32.xlu0 %v1782_v15, %s14757_s5  ;;  %1974 = vperm.xlu1 %11838, %v1782_v15  }
 0x5f1   : > { %2139 = vrot.lane.b32.xlu0 %v1782_v15, %s14724_s18  ;;  %11839 = vset.pattern.permute.xlu1 %v14726_v47 }
 0x5f2   : > { %2054 = vperm.xlu1 %11839, %v1782_v15  }
 0x5f5   : > { %v11869_v19 = vpop.eup %11868  ;;  %2136 = vperm.xlu0 %11840, %v1782_v15  }
 0x5f6   : > { %v1971_v37 = vmul.f32 %v11869_v19, %v1962_v0  ;;  %2217 = vrot.lane.b32.xlu1 %v1782_v15, %s14722_s0  ;;  %v14883_v0 = vld [vmem:[#allocation43_spill] sm:$0xff]  ;;  %v14884_v19 = vld [vmem:[#allocation44_spill] sm:$0xff] }
 0x5f7   : > { %11841 = vset.pattern.permute.xlu1 %v14728_v59 }
 0x5f8   : > { %10133 = vmatpush3.msra.mxu0 %v1971_v37 }
 0x5f9   : > { %10135 = vmatmul.mubr.msk.f32.vlgmr.msra.gmra.mrb[10].mxu0 %vm1977_vm2, %v1782_v15  ;;  %10137 = vmatprep.subr.mxu0 %v14867_v45 }
 0x5fa   : > { %2214 = vperm.xlu1 %11841, %v1782_v15   ;;  %10139 = vmatprep.mubr.msk.f32.mxu0 %vm12346_vm0, %v14867_v45  ;;  %v14882_v15 = vld [vmem:[#allocation42_spill] sm:$0xff] }
 0x5fb   : > { %11842 = vset.pattern.permute.xlu0 %v14868_v58 }
 0x5fe   : > { %11843 = vset.pattern.permute.xlu1 %v14726_v47 }
 0x65f   : > { %v2058_v28 = vpop.permute.xlu0 %2057 }
 0x663   : > { %v2140_v11 = vpop.permute.xlu0 %2139 }
 0x66c   : > { %v1975_v48 = vpop.permute.xlu1 %1974 }
 0x6cc   : > { %v2046_v2 = vpop.f32.mrb[10].mxu0 }
 0x6cd   : > { %v2047_v29 = vadd.f32 %v2046_v2, %v1975_v48  ;;  %v10136_v57 = vpop.f32.mrb[11].mxu0  ;;  %v3597_v48 = vld [vmem:[#allocation7 + $0x20] sm:$0xff]  ;;  %v3598_v2 = vld [vmem:[#allocation7 + $0x28] sm:$0xff] }
 0x6ce   : > { %v13396_v57 = vpack.c.bf16 %v3598_v2, %v3597_v48  ;;  %v14894_v48 = vld [vmem:[#allocation58_spill] sm:$0xff] }
 0x6cf   : > { %vm2050_vm4 = vcmp.gt.f32.partialorder %v2047_v29, 0.0  ;;  %v2051_v42 = vmul.f32 0.2, %v2047_v29 }
 0x6d1   : > { %v2052_v25 = vsel %vm2050_vm4, %v2047_v29, %v2051_v42  ;;  %v14886_v29 = vld [vmem:[#allocation46_spill] sm:$0xff]  ;;  %v3599_v42 = vld [vmem:[#allocation7 + $0x30] sm:$0xff] }
 0x6d2   : > { %10138 = vmatpush3.msra.mxu0 %v2052_v25  ;;  %v3600_v25 = vld [vmem:[#allocation7 + $0x38] sm:$0xff] }
 0x6d3   : > { %10140 = vmatmul.mubr.msk.f32.vlgmr.msra.gmra.mrb[12].mxu0 %vm2059_vm15, %v2058_v28  ;;  %10981 = vmatprep.subr.bf16.mxu0 %v14869_v7  ;;  %v13402_v28 = vpack.c.bf16 %v3600_v25, %v3599_v42 }
 0x6d4   : > { %10983 = vmatpush3.bf16.msra.mxu0 %v12899_v5  ;;  %10164 = vmatprep.mubr.msk.f32.mxu0 %vm12346_vm0, %v14867_v45  ;;  %v2055_v5 = vpop.permute.xlu1 %2054 }
 0x6d5   : > { %10984 = vmatprep.subr.bf16.mxu0 %v14869_v7 }
 0x6d8   : > { %10986 = vmatpush3.bf16.msra.mxu0 %v12902_v9 }
 0x6d9   : > { %10987 = vmatprep.subr.bf16.mxu0 %v14869_v7 }
 0x6db   : > { %10165 = vmatmul.mubr.msk.f32.vlgmr.msra.gmra.mrb[14].mxu0 %vm929_vm1, %v12977_v4 }
 0x6dc   : > { %10989 = vmatpush3.bf16.msra.mxu0 %v12904_v10  ;;  %10175 = vmatprep.mubr.msk.f32.mxu0 %vm12346_vm0, %v14867_v45 }
 0x6dd   : > { %10990 = vmatprep.subr.bf16.mxu0 %v14869_v7 }
 0x6e0   : > { %10992 = vmatpush3.bf16.msra.mxu0 %v12920_v17 }
 0x6e1   : > { %10999 = vmatprep.subr.bf16.mxu0 %v14869_v7 }
 0x6e3   : > { %10176 = vmatmul.mubr.msk.f32.vlgmr.msra.gmra.mrb[16].mxu0 %vm929_vm1, %v12977_v4 }
 0x6e4   : > { %11001 = vmatpush3.bf16.msra.mxu0 %v12933_v26  ;;  %10197 = vmatprep.mubr.msk.f32.mxu0 %vm12346_vm0, %v14867_v45 }
 0x6e5   : > { %11002 = vmatprep.subr.bf16.mxu0 %v14869_v7 }
 0x6e8   : > { %11004 = vmatpush3.bf16.msra.mxu0 %v12950_v44 }
 0x6e9   : > { %11014 = vmatprep.subr.bf16.mxu0 %v12957_v49  ;;  %v2218_v49 = vpop.permute.xlu1 %2217 }
 0x7a6   : > { %v2128_v9 = vpop.f32.mrb[12].mxu0 }
 0x7a7   : > { %v2129_v10 = vadd.f32 %v2128_v9, %v2055_v5  ;;  %v10141_v17 = vpop.f32.mrb[13].mxu0  ;;  %v3604_v5 = vld [vmem:[#allocation9 + $0x20] sm:$0xff]  ;;  %v3605_v9 = vld [vmem:[#allocation9 + $0x28] sm:$0xff] }
 0x7a8   : > { %v3606_v17 = vld [vmem:[#allocation9 + $0x30] sm:$0xff] }
 0x7a9   : > { %vm2132_vm4 = vcmp.gt.f32.partialorder %v2129_v10, 0.0  ;;  %v2133_v36 = vmul.f32 0.2, %v2129_v10 }
 0x7ab   : > { %v2134_v41 = vsel %vm2132_vm4, %v2129_v10, %v2133_v36  ;;  %v13413_v10 = vpack.c.bf16 %v3605_v9, %v3604_v5  ;;  %v3607_v36 = vld [vmem:[#allocation9 + $0x38] sm:$0xff] }
 0x7ac   : > { %10143 = vmatpush3.msra.mxu1 %v2134_v41  ;;  %v13417_v41 = vpack.c.bf16 %v3607_v36, %v3606_v17  ;;  %v14896_v5 = vld [vmem:[#allocation61_spill] sm:$0xff] }
 0x7ad   : > { %10145 = vmatmul.mubr.msk.f32.vlgmr.msra.gmra.mrb[10].mxu1 %vm2059_vm15, %v2140_v11  ;;  %10978 = vmatprep.subr.bf16.mxu1 %v14869_v7 }
 0x7ae   : > { %10980 = vmatpush3.bf16.msra.mxu1 %v13233_v13  ;;  %v2360_v26 = vpop.f32.mrb[14].mxu0  ;;  %10153 = vmatprep.mubr.msk.f32.mxu1 %vm12346_vm0, %v14867_v45 }
 0x7af   : > { %v10166_v44 = vpop.f32.mrb[15].mxu0  ;;  %10151 = vmatprep.subr.mxu1 %v14867_v45  ;;  %v2361_v4 = vadd.f32 %v2360_v26, %v12940_v27  ;;  %v2137_v27 = vpop.permute.xlu0 %2136 }
 0x7b0   : > { %v14887_v44 = vld [vmem:[#allocation50_spill] sm:$0xff] }
 0x7b1   : > { %v2365_v30 = vmul.f32 0.2, %v2361_v4  ;;  %vm2364_vm4 = vcmp.gt.f32.partialorder %v2361_v4, 0.0 }
 0x7b2   : > { %10152 = vmatpush3.msra.mxu1 %v1971_v37  ;;  %v14885_v37 = vld [vmem:[#allocation45_spill] sm:$0xff] }
 0x7b3   : > { %10993 = vmatprep.subr.bf16.mxu1 %v14869_v7  ;;  %v2366_v32 = vsel %vm2364_vm4, %v2361_v4, %v2365_v30  ;;  %v14888_v4 = vld [vmem:[#allocation51_spill] sm:$0xff] }
 0x7b5   : > { %10154 = vmatmul.mubr.msk.f32.vlgmr.msra.gmra.mrb[10].mxu1 %vm1977_vm2, %v2218_v49 }
 0x7b6   : > { %10995 = vmatpush3.bf16.msra.mxu1 %v12912_v14  ;;  %v2433_v21 = vpop.f32.mrb[16].mxu0  ;;  %10186 = vmatprep.mubr.msk.f32.mxu1 %vm12346_vm0, %v14867_v45  ;;  %v2215_v14 = vpop.permute.xlu1 %2214 }
 0x7b7   : > { %v10177_v13 = vpop.f32.mrb[17].mxu0  ;;  %10996 = vmatprep.subr.bf16.mxu1 %v14869_v7  ;;  %v11585_v43 = vadd.f32 %v2215_v14, %v2137_v27  ;;  %v2434_v1 = vadd.f32 %v2433_v21, %v12964_v50  ;;  %v14870_v50 = vld [vmem:[#allocation31_spill] sm:$0xff]  ;;  %v14890_v27 = vld [vmem:[#allocation53_spill] sm:$0xff] }
 0x7ba   : > { %10998 = vmatpush3.bf16.msra.mxu1 %v12923_v20 }
 0x7bb   : > { %11006 = vmatprep.subr.bf16.mxu1 %v12930_v23 }
 0x7bd   : > { %10187 = vmatmul.mubr.msk.f32.vlgmr.msra.gmra.mrb[12].mxu1 %vm929_vm1, %v2366_v32  ;;  %v14889_v32 = vld [vmem:[#allocation52_spill] sm:$0xff] }
 0x7be   : > { %11008 = vmatpush1.bf16.msra.mxu1 %v12943_v34  ;;  %2652 = vmatprep.mubr.f32.mxu1 %v14867_v45 }
 0x7bf   : > { %11010 = vmatprep.subr.bf16.mxu1 %v12948_v40 }
 0x7c2   : > { %11012 = vmatpush1.bf16.msra.mxu1 %v12953_v46 }
 0x7c3   : > { %11021 = vmatprep.subr.bf16.mxu1 %v14869_v7 }
 0x888   : > { %v2287_v12 = vpop.f32.mrb[10].mxu1 }
 0x889   : > { %v13306_v20 = vadd.f32 %v11585_v43, %v2287_v12  ;;  %v10155_v23 = vpop.f32.mrb[11].mxu1  ;;  %v14891_v12 = vld [vmem:[#allocation54_spill] sm:$0xff] }
 0x88b   : > { %9529 = vst.msk [vmem:[%s13057_s10 + $0x8] sm:$0xff] %vm829_vm3, %v13306_v20  ;;  %v3224_v34 = vsel %vm829_vm3, %v13306_v20, 0.0  ;;  %v3236_v40 = vmul.f32 %v13306_v20, %v13306_v20 }
 0x88c   : > { %3225 = vadd.xlane.f32.xlu1 %v3224_v34  ;;  %v14892_v34 = vld [vmem:[#allocation55_spill] sm:$0xff] }
 0x88d   : > { %v3239_v46 = vsel %vm829_vm3, %v3236_v40, 0.0 }
 0x88e   : > { %3240 = vadd.xlane.f32.xlu0 %v3239_v46 }
 0x890   : > { %v2506_v8 = vpop.f32.mrb[12].mxu1 }
 0x891   : > { %v2510_v53 = vadd.f32 %v2506_v8, %v2434_v1  ;;  %v10188_v31 = vpop.f32.mrb[13].mxu1 }
 0x893   : > { %v13318_v3 = vadd.f32 %v2510_v53, %v12970_v56  ;;  %v14871_v56 = vld [vmem:[#allocation30_spill] sm:$0xff] }
 0x895   : > { %10198 = vmatmul.mubr.msk.f32.vlgmr.msra.gmra.mrb[18].mxu0 %vm929_vm1, %v13318_v3  ;;  %9534 = vmatmul.mubr.msk.f32.vlgmr.msra.gmra.mrb[14].mxu1 %vm929_vm1, %v13318_v3 }
 0x896   : > { %11016 = vmatpush1.bf16.msra.mxu0 %v12972_v62  ;;  %11023 = vmatpush3.bf16.msra.mxu1 %v12974_v63  ;;  %v14872_v62 = vld [vmem:[#allocation33_spill] sm:$0xff]  ;;  %v14873_v63 = vld [vmem:[#allocation32_spill] sm:$0xff] }
 0x897   : > { %11018 = vmatprep.subr.bf16.mxu0 %v12979_v6  ;;  %11024 = vmatprep.subr.bf16.mxu1 %v14869_v7 }
 0x898   : > { %2723 = vmatprep.mubr.f32.mxu0 %v14867_v45  ;;  %10208 = vmatprep.mubr.msk.f32.mxu1 %vm12346_vm0, %v14867_v45 }
 0x89a   : > { %11020 = vmatpush1.bf16.msra.mxu0 %v12987_v16  ;;  %11026 = vmatpush3.bf16.msra.mxu1 %v12989_v18  ;;  %v14874_v16 = vld [vmem:[#allocation34_spill] sm:$0xff] }
 0x89b   : > { %11028 = vmatprep.subr.bf16.mxu1 %v12995_v24  ;;  %11044 = vmatprep.subr.bf16.mxu0 %v12993_v22 }
 0x89d   : > { %9535 = vmatmul.mubr.msk.f32.vlgmr.msra.gmra.mrb[20].mxu0 %vm929_vm1, %v13318_v3  ;;  %10209 = vmatmul.mubr.msk.f32.vlgmr.msra.gmra.mrb[16].mxu1 %vm929_vm1, %v13318_v3 }
 0x89e   : > { %11030 = vmatpush1.bf16.msra.mxu1 %v13004_v35  ;;  %11046 = vmatpush1.bf16.msra.mxu0 %v13002_v33  ;;  %v14875_v35 = vld [vmem:[#allocation35_spill] sm:$0xff] }
 0x89f   : > { %11032 = vmatprep.subr.bf16.mxu1 %v13010_v39  ;;  %11048 = vmatprep.subr.bf16.mxu0 %v13008_v38  ;;  %v14876_v38 = vld [vmem:[#allocation36_spill] sm:$0xff] }
 0x8a0   : > { %2867 = vmatprep.mubr.f32.mxu1 %v14867_v45  ;;  %2938 = vmatprep.mubr.f32.mxu0 %v14867_v45 }
 0x8a2   : > { %11034 = vmatpush1.bf16.msra.mxu1 %v13020_v52  ;;  %11050 = vmatpush1.bf16.msra.mxu0 %v13018_v51  ;;  %v14877_v52 = vld [vmem:[#allocation37_spill] sm:$0xff] }
 0x8a3   : > { %11036 = vmatprep.subr.bf16.mxu1 %v13026_v55  ;;  %11052 = vmatprep.subr.bf16.mxu0 %v13024_v54  ;;  %v14878_v54 = vld [vmem:[#allocation38_spill] sm:$0xff]  ;;  %v14879_v55 = vld [vmem:[#allocation39_spill] sm:$0xff] }
 0x8a6   : > { %11038 = vmatpush1.bf16.msra.mxu1 %v13034_v61  ;;  %11054 = vmatpush1.bf16.msra.mxu0 %v13032_v60  ;;  %v14880_v60 = vld [vmem:[#allocation40_spill] sm:$0xff]  ;;  %v14881_v61 = vld [vmem:[#allocation41_spill] sm:$0xff] }
 0x8a7   : > { %11040 = vmatprep.subr.bf16.mxu1 %v14870_v50  ;;  %11056 = vmatprep.subr.bf16.mxu0 %v14871_v56  ;;  %v14893_v50 = vld [vmem:[#allocation59_spill] sm:$0xff] }
 0x8aa   : > { %11042 = vmatpush1.bf16.msra.mxu1 %v14872_v62  ;;  %11058 = vmatpush1.bf16.msra.mxu0 %v14873_v63 }
 0x8ab   : > { %11059 = vmatprep.subr.bf16.mxu0 %v14869_v7  ;;  %11071 = vmatprep.subr.bf16.mxu1 %v14869_v7 }
 0x968   : > { %v2581_v6 = vpop.f32.mrb[18].mxu0 }
 0x969   : > { %v2582_v18 = vadd.f32 %v2581_v6, %v14874_v16  ;;  %v10199_v22 = vpop.f32.mrb[19].mxu0 }
 0x96b   : > { %vm2585_vm4 = vcmp.gt.f32.partialorder %v2582_v18, 0.0  ;;  %v2586_v24 = vmul.f32 0.2, %v2582_v18 }
 0x96d   : > { %v2587_v33 = vsel %vm2585_vm4, %v2582_v18, %v2586_v24 }
 0x96e   : > { %9537 = vmatmul.mubr.msk.f32.vlgmr.msra.gmra.mrb[14].mxu1 %vm829_vm3, %v2587_v33  ;;  %9538 = vmatmul.mubr.msk.f32.vlgmr.msra.gmra.mrb[20].mxu0 %vm829_vm3, %v2587_v33 }
 0x96f   : > { %11061 = vmatpush3.bf16.msra.mxu0 %v14875_v35  ;;  %11073 = vmatpush3.bf16.msra.mxu1 %v14876_v38  ;;  %v13445_v38 = vld [vmem:[%s14830_s20 + $0x1] sm:$0x1] }
 0x970   : > { %v13362_v39 = vpop.f32.mrb[16].mxu1  ;;  %11062 = vmatprep.subr.bf16.mxu0 %v14869_v7  ;;  %11074 = vmatprep.subr.bf16.mxu1 %v14869_v7 }
 0x971   : > { %v10210_v51 = vpop.f32.mrb[17].mxu1  ;;  %10227 = vmatprep.mubr.msk.f32.mxu0 %vm12346_vm0, %v14867_v45  ;;  %10246 = vmatprep.mubr.msk.f32.mxu1 %vm12346_vm0, %v14867_v45  ;;  %v2797_v56 = vadd.f32 %v13362_v39, %v14893_v50 }
 0x973   : > { %11064 = vmatpush3.bf16.msra.mxu0 %v14877_v52  ;;  %11076 = vmatpush3.bf16.msra.mxu1 %v14878_v54 }
 0x974   : > { %11065 = vmatprep.subr.bf16.mxu0 %v14869_v7  ;;  %11077 = vmatprep.subr.bf16.mxu1 %v14869_v7 }
 0x977   : > { %11067 = vmatpush3.bf16.msra.mxu0 %v14879_v55  ;;  %11079 = vmatpush3.bf16.msra.mxu1 %v14880_v60 }
 0x978   : > { %11068 = vmatprep.subr.bf16.mxu0 %v14869_v7  ;;  %11080 = vmatprep.subr.bf16.mxu1 %v14869_v7 }
 0x97b   : > { %11070 = vmatpush3.bf16.msra.mxu0 %v14881_v61  ;;  %11082 = vmatpush3.bf16.msra.mxu1 %v14882_v15 }
 0x97c   : > { %11083 = vmatprep.subr.bf16.mxu0 %v14869_v7  ;;  %11095 = vmatprep.subr.bf16.mxu1 %v14869_v7 }
 0x97e   : > { %10228 = vmatmul.mubr.msk.f32.vlgmr.msra.gmra.mrb[22].mxu0 %vm829_vm3, %v2587_v33  ;;  %10247 = vmatmul.mubr.msk.f32.vlgmr.msra.gmra.mrb[18].mxu1 %vm829_vm3, %v13306_v20 }
 0x97f   : > { %11085 = vmatpush3.bf16.msra.mxu0 %v14883_v0  ;;  %10265 = vmatprep.mubr.msk.f32.mxu0 %vm12346_vm0, %v14867_v45 }
 0x980   : > { %11086 = vmatprep.subr.bf16.mxu0 %v14869_v7  ;;  %10274 = vmatprep.mubr.msk.f32.mxu1 %vm12346_vm0, %v14867_v45 }
 0x983   : > { %11088 = vmatpush3.bf16.msra.mxu0 %v14884_v19 }
 0x984   : > { %11089 = vmatprep.subr.bf16.mxu0 %v14869_v7 }
 0x987   : > { %11091 = vmatpush3.bf16.msra.mxu0 %v14885_v37 }
 0x988   : > { %11092 = vmatprep.subr.bf16.mxu0 %v14869_v7 }
 0x98b   : > { %11094 = vmatpush3.bf16.msra.mxu0 %v14886_v29  ;;  %v14895_v29 = vld [vmem:[#allocation60_spill] sm:$0xff] }
 0x98c   : > { %11101 = vmatprep.subr.bf16.mxu0 %v14869_v7 }
 0x98e   : > { %10266 = vmatmul.mubr.msk.f32.vlgmr.msra.gmra.mrb[24].mxu0 %vm829_vm3, %v13306_v20 }
 0x98f   : > { %11103 = vmatpush3.bf16.msra.mxu0 %v13396_v57  ;;  %10304 = vmatprep.mubr.msk.f32.mxu0 %vm12346_vm0, %v14867_v45 }
 0x990   : > { %11104 = vmatprep.subr.bf16.mxu0 %v14869_v7 }
 0x993   : > { %11106 = vmatpush3.bf16.msra.mxu0 %v13402_v28 }
 0x994   : > { %11113 = vmatprep.subr.bf16.mxu0 %v14869_v7 }
 0x996   : > { %10305 = vmatmul.mubr.msk.f32.vlgmr.msra.gmra.mrb[26].mxu0 %vm929_vm1, %v13318_v3 }
 0x997   : > { %10326 = vmatprep.mubr.msk.f32.mxu0 %vm12346_vm0, %v14867_v45  ;;  %11115 = vmatpush3.bf16.msra.mxu0 %v13413_v10 }
 0x998   : > { %11116 = vmatprep.subr.bf16.mxu0 %v14869_v7 }
 0x99b   : > { %11118 = vmatpush3.bf16.msra.mxu0 %v13417_v41 }
 0xa41   : > { %v2869_v11 = vpop.f32.mrb[14].mxu1  ;;  %v2940_v26 = vpop.f32.mrb[20].mxu0 }
 0xa42   : > { %v11587_v49 = vadd.f32 %v2869_v11, %v14887_v44  ;;  %v11589_v21 = vadd.f32 %v2940_v26, %v14888_v4  ;;  %v2871_v13 = vpop.f32.mrb[15].mxu1  ;;  %v2942_v30 = vpop.f32.mrb[21].mxu0 }
 0xa43   : > { %v11588_v14 = vadd.f32 %v2871_v13, %v14889_v32  ;;  %v11590_v2 = vadd.f32 %v2942_v30, %v14894_v48  ;;  %v3226_v26 = vpop.xlane.xlu1 %3225  ;;  %v3241_v44 = vpop.xlane.xlu0 %3240 }
 0xa44   : > { %v13424_v43 = vadd.f32 %v11587_v49, %v14890_v27  ;;  %v3022_v23 = vadd.f32 %v11589_v21, %v14891_v12  ;;  %v3233_v21 = vmul.f32 0.015625, %v3226_v26 }
 0xa45   : > { %v3021_v40 = vadd.f32 %v11588_v14, %v14892_v34  ;;  %v3023_v42 = vadd.f32 %v11590_v2, %v14895_v29  ;;  %v3248_v14 = vmul.f32 0.015625, %v3241_v44 }
 0xa46   : > { %v3027_v46 = vrot.slane %v13424_v43, 7  ;;  %v3048_v1 = vrot.slane %v3022_v23, 4  ;;  %v3041_v53 = vrot.slane %v3022_v23, 5  ;;  %v3053_v31 = vrot.slane %v3022_v23, 3 }
 0xa47   : > { %v3028_v8 = vrot.slane %v3021_v40, 7  ;;  %v3035_v22 = vrot.slane %v3021_v40, 6  ;;  %v3040_v24 = vrot.slane %v3021_v40, 5  ;;  %v3054_v25 = vrot.slane %v3023_v42, 3 }
 0xa48   : > { %3029 = vrot.lane.b32.xlu1 %v3027_v46, %s14719_s1  ;;  %3049 = vrot.lane.b32.xlu0 %v3048_v1, %s14755_s8  ;;  %v3066_v17 = vrot.slane %v3023_v42, 1  ;;  %v3061_v36 = vrot.slane %v3023_v42, 2  ;;  %v3251_v32 = vmul.f32 %v3233_v21, %v3233_v21 }
 0xa4a   : > { %v3254_v12 = vsub.f32 %v3248_v14, %v3251_v32 }
 0xa4c   : > { %3031 = vrot.lane.b32.xlu0 %v3028_v8, %s14719_s1  ;;  %3044 = vrot.lane.b32.xlu1 %v3041_v53, %s12350_s28  ;;  %v3260_v46 = vadd.f32 1e-05, %v3254_v12  ;;  %s14928_s1 = smov 85  }
 0xa4e   : > { %11870 = vrsqrt.f32 %v3260_v46 }
 0xa50   : > { %3055 = vrot.lane.b32.xlu1 %v3053_v31, %s12352_s7 }
 0xa51   : > { %v13436_v62 = vpop.f32.mrb[18].mxu1  ;;  %v3011_v63 = vpop.f32.mrb[22].mxu0 }
 0xa52   : > { %v3019_v6 = vadd.f32 %v3011_v63, %v2797_v56  ;;  %v10229_v16 = vpop.f32.mrb[23].mxu0  ;;  %v10248_v18 = vpop.f32.mrb[19].mxu1  ;;  %v3227_v54 = vsel %vm829_vm3, %v13436_v62, 0.0  ;;  %v3237_v55 = vmul.f32 %v13436_v62, %v13436_v62 }
 0xa54   : > { %3036 = vrot.lane.b32.xlu1 %v3035_v22, %s12351_s24  ;;  %v3242_v15 = vsel %vm829_vm3, %v3237_v55, 0.0  ;;  %v3024_v9 = vadd.f32 %v3019_v6, %v14896_v5 }
 0xa56   : > { %v3067_v11 = vrot.slane %v3024_v9, 1 }
 0xa58   : > { %3042 = vrot.lane.b32.xlu1 %v3040_v24, %s12350_s28  ;;  %v11871_v24 = vpop.eup %11870 }
 0xa61   : > { %v13440_v33 = vpop.f32.mrb[24].mxu0 }
 0xa62   : > { %v10267_v35 = vpop.f32.mrb[25].mxu0  ;;  %v3238_v0 = vmul.f32 %v13440_v33, %v13440_v33  ;;  %v3230_v37 = vsel %vm829_vm3, %v13440_v33, 0.0 }
 0xa63   : > { %v3257_v35 = vsub.f32 %v13306_v20, %v3233_v21 }
 0xa64   : > { %v3245_v19 = vsel %vm829_vm3, %v3238_v0, 0.0 }
 0xa65   : > { %v3266_v48 = vmul.f32 %v11871_v24, %v3257_v35  ;;  %v3634_v35 = vld [vmem:[#allocation12 + $0x20] sm:$0xff] }
 0xa69   : > { %v3767_v39 = vpop.f32.mrb[26].mxu0 }
 0xa6a   : > { %v3768_v51 = vadd.f32 %v13445_v38, %v3767_v39  ;;  %v10306_v52 = vpop.f32.mrb[27].mxu0 }
 0xa6b   : > { %3228 = vadd.xlane.f32.xlu0 %v3227_v54 }
 0xa6c   : > { %vm3771_vm4 = vcmp.gt.f32.partialorder %v3768_v51, 0.0  ;;  %v3772_v60 = vmul.f32 0.2, %v3768_v51 }
 0xa6e   : > { %v3773_v61 = vsel %vm3771_vm4, %v3768_v51, %v3772_v60  ;;  %vm14897_vm4 = vcmask 1046528  }
 0xa6f   : > { %10327 = vmatmul.mubr.msk.f32.vlgmr.msra.gmra.mrb[28].mxu0 %vm929_vm1, %v3773_v61  ;;  %3243 = vadd.xlane.f32.xlu0 %v3242_v15 }
 0xa70   : > { %4085 = vmatprep.mubr.f32.mxu0 %v14867_v45 }
 0xa73   : > { %3246 = vadd.xlane.f32.xlu0 %v3245_v19 }
 0xa7c   : > { %3231 = vadd.xlane.f32.xlu1 %v3230_v37 }
 0xa89   : > { %3057 = vrot.lane.b32.xlu0 %v3054_v25, %s12352_s7 }
 0xa8d   : > { %3068 = vrot.lane.b32.xlu0 %v3066_v17, %s14759_s27  ;;  %3062 = vrot.lane.b32.xlu1 %v3061_v36, %s12354_s6  ;;  %v14898_v36 = vmov 42  }
 0xa91   : > { %3070 = vrot.lane.b32.xlu1 %v3067_v11, %s14759_s27 }
 0xaba   : > { %v3030_v49 = vpop.permute.xlu1 %3029  ;;  %v3050_v4 = vpop.permute.xlu0 %3049 }
 0xabe   : > { %v3045_v13 = vpop.permute.xlu1 %3044  ;;  %v3032_v30 = vpop.permute.xlu0 %3031 }
 0xabf   : > { %v3033_v6 = vsel %vm1724_vm5, %v3030_v49, %v3032_v30 }
 0xac0   : > { %v3074_v39 = vsel %vm1769_vm7, %v13424_v43, %v3033_v6 }
 0xac2   : > { %v3056_v23 = vpop.permute.xlu1 %3055 }
 0xac6   : > { %v3037_v53 = vpop.permute.xlu1 %3036 }
 0xac7   : > { %v3075_v52 = vsel %vm1771_vm8, %v3074_v39, %v3037_v53  ;;  %v3590_v53 = vld [vmem:[#allocation6 + $0x20] sm:$0xff]  ;;  %v3635_v39 = vld [vmem:[#allocation12 + $0x28] sm:$0xff] }
 0xaca   : > { %v3043_v56 = vpop.permute.xlu1 %3042 }
 0xacb   : > { %v3046_v18 = vsel %vm1738_vm6, %v3043_v56, %v3045_v13  ;;  %v3592_v56 = vld [vmem:[#allocation6 + $0x30] sm:$0xff] }
 0xacc   : > { %v3076_v15 = vsel %vm1773_vm9, %v3075_v52, %v3046_v18  ;;  %v3612_v18 = vld [vmem:[#allocation10 + $0xa8] sm:$0xff]  ;;  %v13523_v52 = vpack.c.bf16 %v3635_v39, %v3634_v35  ;;  %v3647_v35 = vld [vmem:[#allocation15 + $0x170] sm:$0xff]  ;;  %v3644_v39 = vld [vmem:[#allocation15 + $0x158] sm:$0xff] }
 0xacd   : > { %v3077_v29 = vsel %vm1775_vm11, %v3076_v15, %v3050_v4  ;;  %v3636_v15 = vld [vmem:[#allocation12 + $0x30] sm:$0xff] }
 0xaf8   : > { %v3229_v27 = vpop.xlane.xlu0 %3228 }
 0xaf9   : > { %v3234_v34 = vmul.f32 0.015625, %v3229_v27 }
 0xafb   : > { %v3252_v1 = vmul.f32 %v3234_v34, %v3234_v34  ;;  %v3258_v54 = vsub.f32 %v13436_v62, %v3234_v34 }
 0xafc   : > { %v3244_v40 = vpop.xlane.xlu0 %3243 }
 0xafd   : > { %v3249_v8 = vmul.f32 0.015625, %v3244_v40 }
 0xaff   : > { %v3255_v31 = vsub.f32 %v3249_v8, %v3252_v1 }
 0xb00   : > { %v3247_v63 = vpop.xlane.xlu0 %3246 }
 0xb01   : > { %v3261_v50 = vadd.f32 1e-05, %v3255_v31  ;;  %v3250_v55 = vmul.f32 0.015625, %v3247_v63  ;;  %v3591_v31 = vld [vmem:[#allocation6 + $0x28] sm:$0xff]  ;;  %v3593_v63 = vld [vmem:[#allocation6 + $0x38] sm:$0xff] }
 0xb03   : > { %11872 = vrsqrt.f32 %v3261_v50  ;;  %v13505_v50 = vpack.c.bf16 %v3591_v31, %v3590_v53 }
 0xb04   : > { %v3058_v51 = vpop.permute.xlu0 %3057 }
 0xb05   : > { %v3059_v19 = vsel %vm1752_vm10, %v3056_v23, %v3058_v51  ;;  %v3611_v51 = vld [vmem:[#allocation10 + $0xa0] sm:$0xff] }
 0xb06   : > { %v3078_v25 = vsel %vm1777_vm12, %v3077_v29, %v3059_v19  ;;  %v3621_v19 = vld [vmem:[#allocation10 + $0xf0] sm:$0xff]  ;;  %v3619_v29 = vld [vmem:[#allocation10 + $0xe0] sm:$0xff] }
 0xb08   : > { %v3069_v42 = vpop.permute.xlu0 %3068 }
 0xb09   : > { %v3232_v16 = vpop.xlane.xlu1 %3231 }
 0xb0a   : > { %v3235_v22 = vmul.f32 0.015625, %v3232_v16  ;;  %v13510_v16 = vpack.c.bf16 %v3593_v63, %v3592_v56  ;;  %v3628_v56 = vld [vmem:[#allocation10 + $0x128] sm:$0xff]  ;;  %v3625_v63 = vld [vmem:[#allocation10 + $0x110] sm:$0xff] }
 0xb0c   : > { %v3253_v60 = vmul.f32 %v3235_v22, %v3235_v22  ;;  %v3259_v11 = vsub.f32 %v13440_v33, %v3235_v22  ;;  %v3617_v22 = vld [vmem:[#allocation10 + $0xd0] sm:$0xff] }
 0xb0d   : > { %v11873_v61 = vpop.eup %11872  ;;  %v3063_v0 = vpop.permute.xlu1 %3062  ;;  %v13521_v24 = vpack.c.bf16 %v3617_v22, %v3612_v18  ;;  %v3642_v22 = vld [vmem:[#allocation15 + $0x148] sm:$0xff] }
 0xb0e   : > { %v3256_v37 = vsub.f32 %v3250_v55, %v3253_v60  ;;  %v3267_v2 = vmul.f32 %v11873_v61, %v3258_v54  ;;  %v3079_v62 = vsel %vm1779_vm13, %v3078_v25, %v3063_v0  ;;  %v3616_v54 = vld [vmem:[#allocation10 + $0xc8] sm:$0xff]  ;;  %v3627_v60 = vld [vmem:[#allocation10 + $0x120] sm:$0xff]  ;;  %v3637_v0 = vld [vmem:[#allocation12 + $0x38] sm:$0xff] }
 0xb0f   : > { %11126 = vmatprep.subr.bf16.mxu0 %v13521_v24  ;;  %v13526_v55 = vpack.c.bf16 %v3616_v54, %v3611_v51  ;;  %v13598_v51 = vpack.c.bf16 %v3647_v35, %v3642_v22  ;;  %v3649_v54 = vld [vmem:[#allocation15 + $0x180] sm:$0xff]  ;;  %v3672_v35 = vld [vmem:[#allocation15 + $0x238] sm:$0xff] }
 0xb10   : > { %v3262_v20 = vadd.f32 1e-05, %v3256_v37  ;;  %v11096_v43 = vpack.c.bf16 %v3267_v2, %v3266_v48  ;;  %v13533_v37 = vpack.c.bf16 %v3637_v0, %v3636_v15  ;;  %v3626_v48 = vld [vmem:[#allocation10 + $0x118] sm:$0xff]  ;;  %v13600_v15 = vpack.c.bf16 %v3649_v54, %v3644_v39  ;;  %v3677_v39 = vld [vmem:[#allocation15 + $0x260] sm:$0xff]  ;;  %v3674_v54 = vld [vmem:[#allocation15 + $0x248] sm:$0xff] }
 0xb11   : > { %v3071_v5 = vpop.permute.xlu1 %3070  ;;  %11128 = vmatpush1.bf16.msra.mxu0 %v13526_v55  ;;  %v13536_v2 = vpack.c.bf16 %v3626_v48, %v3621_v19  ;;  %v3643_v19 = vld [vmem:[#allocation15 + $0x150] sm:$0xff]  ;;  %v3648_v48 = vld [vmem:[#allocation15 + $0x178] sm:$0xff] }
 0xb12   : > { %11874 = vrsqrt.f32 %v3262_v20  ;;  %v3072_v9 = vsel %vm14721_vm14, %v3069_v42, %v3071_v5  ;;  %11097 = vmatpush3.bf16.msra.mxu1 %v11096_v43  ;;  %v3614_v20 = vld [vmem:[#allocation10 + $0xb8] sm:$0xff] }
 0xb13   : > { %v3080_v17 = vsel %vm14897_vm4, %v3079_v62, %v3072_v9  ;;  %10272 = vmatprep.subr.mxu1 %v14867_v45 }
 0xb14   : > { %3353 = vrot.lane.b32.xlu1 %v3080_v17, %s14757_s5  ;;  %3271 = vperm.xlu0 %11842, %v3080_v17  }
 0xb18   : > { %3350 = vperm.xlu1 %11843, %v3080_v17   ;;  %3434 = vrot.lane.b32.xlu0 %v3080_v17, %s14724_s18  ;;  %s14918_s18 = smov 60  }
 0xb19   : > { %11844 = vset.pattern.permute.xlu0 %v14898_v36 }
 0xb1c   : > { %v11875_v26 = vpop.eup %11874  ;;  %3512 = vrot.lane.b32.xlu1 %v3080_v17, %s14722_s0  ;;  %3431 = vperm.xlu0 %11844, %v3080_v17   ;;  %s14927_s0 = smov 94  }
 0xb1d   : > { %v3268_v44 = vmul.f32 %v11875_v26, %v3259_v11  ;;  %11845 = vset.pattern.permute.xlu1 %v14728_v59 }
 0xb1f   : > { %10273 = vmatpush3.msra.mxu1 %v3268_v44 }
 0xb20   : > { %3509 = vperm.xlu1 %11845, %v3080_v17   ;;  %10275 = vmatmul.mubr.msk.f32.vlgmr.msra.gmra.mrb[20].mxu1 %vm1977_vm2, %v3080_v17 }
 0xb21   : > { %10277 = vmatprep.subr.mxu1 %v14867_v45  ;;  %10279 = vmatprep.mubr.msk.f32.mxu1 %vm12346_vm0, %v14867_v45 }
 0xb22   : > { %11846 = vset.pattern.permute.xlu0 %v14868_v58 }
 0xb24   : > { %11847 = vset.pattern.permute.xlu1 %v14726_v47  ;;  %v3696_v47 = vld [vmem:[#allocation18 + $0x58] sm:$0xff] }
 0xb42   : > { %v13494_v33 = vpop.f32.mrb[28].mxu0 }
 0xb43   : > { %v10328_v49 = vpop.f32.mrb[29].mxu0 }
 0xb44   : > { %v13557_v49 = vld [vmem:[%s14831_s2 + $0x1] sm:$0x1] }
 0xb86   : > { %v3354_v27 = vpop.permute.xlu1 %3353 }
 0xb93   : > { %v3272_v4 = vpop.permute.xlu0 %3271 }
 0xb97   : > { %v3351_v12 = vpop.permute.xlu1 %3350  ;;  %v3435_v8 = vpop.permute.xlu0 %3434 }
 0xb9b   : > { %v3513_v6 = vpop.permute.xlu1 %3512  ;;  %v3432_v25 = vpop.permute.xlu0 %3431 }
 0xb9f   : > { %v3510_v42 = vpop.permute.xlu1 %3509 }
 0xba0   : > { %v11591_v5 = vadd.f32 %v3510_v42, %v3432_v25  ;;  %v3657_v42 = vld [vmem:[#allocation15 + $0x1c0] sm:$0xff]  ;;  %v3654_v25 = vld [vmem:[#allocation15 + $0x1a8] sm:$0xff] }
 0xbf3   : > { %v3342_v21 = vpop.f32.mrb[20].mxu1 }
 0xbf4   : > { %v3343_v13 = vadd.f32 %v3342_v21, %v3272_v4  ;;  %v10276_v30 = vpop.f32.mrb[21].mxu1  ;;  %v3613_v21 = vld [vmem:[#allocation10 + $0xb0] sm:$0xff] }
 0xbf6   : > { %vm3346_vm4 = vcmp.gt.f32.partialorder %v3343_v13, 0.0  ;;  %v3347_v32 = vmul.f32 0.2, %v3343_v13 }
 0xbf8   : > { %v3348_v14 = vsel %vm3346_vm4, %v3343_v13, %v3347_v32  ;;  %v3618_v32 = vld [vmem:[#allocation10 + $0xd8] sm:$0xff] }
 0xbf9   : > { %10278 = vmatpush3.msra.mxu1 %v3348_v14  ;;  %v3615_v14 = vld [vmem:[#allocation10 + $0xc0] sm:$0xff] }
 0xbfa   : > { %10280 = vmatmul.mubr.msk.f32.vlgmr.msra.gmra.mrb[22].mxu1 %vm2059_vm15, %v3354_v27  ;;  %10282 = vmatprep.subr.mxu1 %v14867_v45  ;;  %v3620_v27 = vld [vmem:[#allocation10 + $0xe8] sm:$0xff] }
 0xbfb   : > { %10284 = vmatprep.mubr.msk.f32.mxu1 %vm12346_vm0, %v14867_v45 }
 0xccd   : > { %v3423_v23 = vpop.f32.mrb[22].mxu1 }
 0xcce   : > { %v3424_v34 = vadd.f32 %v3423_v23, %v3351_v12  ;;  %v10281_v40 = vpop.f32.mrb[23].mxu1  ;;  %v13563_v12 = vld [vmem:[%s14832_s30 + $0x1] sm:$0x1]  ;;  %v3624_v23 = vld [vmem:[#allocation10 + $0x108] sm:$0xff] }
 0xcd0   : > { %vm3427_vm14 = vcmp.gt.f32.partialorder %v3424_v34, 0.0  ;;  %v3428_v46 = vmul.f32 0.2, %v3424_v34 }
 0xcd2   : > { %v3429_v1 = vsel %vm3427_vm14, %v3424_v34, %v3428_v46  ;;  %v3629_v34 = vld [vmem:[#allocation10 + $0x130] sm:$0xff]  ;;  %v13566_v46 = vpack.c.bf16 %v3618_v32, %v3613_v21 }
 0xcd3   : > { %10283 = vmatpush3.msra.mxu1 %v3429_v1  ;;  %v13568_v1 = vpack.c.bf16 %v3620_v27, %v3615_v14  ;;  %v13573_v31 = vpack.c.bf16 %v3629_v34, %v3624_v23  ;;  %v3658_v21 = vld [vmem:[#allocation15 + $0x1c8] sm:$0xff]  ;;  %v3664_v27 = vld [vmem:[#allocation15 + $0x1f8] sm:$0xff]  ;;  %v3669_v23 = vld [vmem:[#allocation15 + $0x220] sm:$0xff] }
 0xcd4   : > { %10285 = vmatmul.mubr.msk.f32.vlgmr.msra.gmra.mrb[24].mxu1 %vm2059_vm15, %v3435_v8  ;;  %11098 = vmatprep.subr.bf16.mxu1 %v14869_v7  ;;  %v3623_v8 = vld [vmem:[#allocation10 + $0x100] sm:$0xff] }
 0xcd5   : > { %11100 = vmatpush3.bf16.msra.mxu1 %v11096_v43  ;;  %10293 = vmatprep.mubr.msk.f32.mxu1 %vm12346_vm0, %v14867_v45  ;;  %v13540_v43 = vpack.c.bf16 %v3619_v29, %v3614_v20  ;;  %v3652_v20 = vld [vmem:[#allocation15 + $0x198] sm:$0xff]  ;;  %v13605_v29 = vpack.c.bf16 %v3648_v48, %v3643_v19  ;;  %v3661_v34 = vld [vmem:[#allocation15 + $0x1e0] sm:$0xff]  ;;  %v3671_v19 = vld [vmem:[#allocation15 + $0x230] sm:$0xff] }
 0xcd6   : > { %10291 = vmatprep.subr.mxu1 %v14867_v45  ;;  %v3676_v48 = vld [vmem:[#allocation15 + $0x258] sm:$0xff] }
 0xcd9   : > { %10292 = vmatpush3.msra.mxu1 %v3268_v44 }
 0xcda   : > { %11107 = vmatprep.subr.bf16.mxu1 %v14869_v7 }
 0xcdc   : > { %10294 = vmatmul.mubr.msk.f32.vlgmr.msra.gmra.mrb[24].mxu1 %vm1977_vm2, %v3513_v6  ;;  %v3630_v6 = vld [vmem:[#allocation10 + $0x138] sm:$0xff] }
 0xcdd   : > { %11109 = vmatpush3.bf16.msra.mxu1 %v13505_v50  ;;  %10315 = vmatprep.mubr.msk.f32.mxu1 %vm12346_vm0, %v14867_v45  ;;  %v13583_v18 = vpack.c.bf16 %v3630_v6, %v3625_v63  ;;  %v3668_v63 = vld [vmem:[#allocation15 + $0x218] sm:$0xff] }
 0xcde   : > { %11110 = vmatprep.subr.bf16.mxu1 %v14869_v7 }
 0xce1   : > { %11112 = vmatpush3.bf16.msra.mxu1 %v13510_v16 }
 0xce2   : > { %11119 = vmatprep.subr.bf16.mxu1 %v14869_v7 }
 0xce4   : > { %10316 = vmatmul.mubr.msk.f32.vlgmr.msra.gmra.mrb[26].mxu1 %vm929_vm1, %v13318_v3  ;;  %v3622_v3 = vld [vmem:[#allocation10 + $0xf8] sm:$0xff] }
 0xce5   : > { %10337 = vmatprep.mubr.msk.f32.mxu1 %vm12346_vm0, %v14867_v45  ;;  %11121 = vmatpush3.bf16.msra.mxu1 %v13523_v52  ;;  %v13531_v61 = vpack.c.bf16 %v3627_v60, %v3622_v3  ;;  %v3641_v3 = vld [vmem:[#allocation15 + $0x140] sm:$0xff]  ;;  %v3646_v60 = vld [vmem:[#allocation15 + $0x168] sm:$0xff] }
 0xce6   : > { %11122 = vmatprep.subr.bf16.mxu1 %v14869_v7  ;;  %v13602_v0 = vpack.c.bf16 %v3646_v60, %v3641_v3  ;;  %v13634_v3 = vpack.c.bf16 %v3677_v39, %v3672_v35  ;;  %v3679_v60 = vld [vmem:[#allocation15 + $0x270] sm:$0xff]  ;;  %v3660_v39 = vld [vmem:[#allocation15 + $0x1d8] sm:$0xff] }
 0xce7   : > { %11130 = vmatprep.subr.bf16.mxu0 %v13531_v61  ;;  %v3655_v35 = vld [vmem:[#allocation15 + $0x1b0] sm:$0xff] }
 0xce8   : > { %11132 = vmatpush1.bf16.msra.mxu0 %v13536_v2 }
 0xce9   : > { %11124 = vmatpush3.bf16.msra.mxu1 %v13533_v37  ;;  %11141 = vmatprep.subr.bf16.mxu0 %v14869_v7 }
 0xcea   : > { %11134 = vmatprep.subr.bf16.mxu1 %v13540_v43 }
 0xdaf   : > { %v3582_v62 = vpop.f32.mrb[24].mxu1 }
 0xdb0   : > { %v13544_v9 = vadd.f32 %v11591_v5, %v3582_v62  ;;  %v10295_v17 = vpop.f32.mrb[25].mxu1  ;;  %v3659_v5 = vld [vmem:[#allocation15 + $0x1d0] sm:$0xff]  ;;  %v13609_v62 = vpack.c.bf16 %v3657_v42, %v3652_v20  ;;  %v13636_v20 = vpack.c.bf16 %v3679_v60, %v3674_v54  ;;  %v13638_v42 = vpack.c.bf16 %v3676_v48, %v3671_v19  ;;  %v3687_v60 = vld [vmem:[#allocation16 + $0x58] sm:$0xff] }
 0xdb1   : > { %v13611_v17 = vpack.c.bf16 %v3659_v5, %v3654_v25  ;;  %v3673_v25 = vld [vmem:[#allocation15 + $0x240] sm:$0xff]  ;;  %v3678_v5 = vld [vmem:[#allocation15 + $0x268] sm:$0xff]  ;;  %v3686_v54 = vld [vmem:[#allocation16 + $0x50] sm:$0xff]  ;;  %v13659_v48 = vpack.c.bf16 %v3660_v39, %v3655_v35 }
 0xdb2   : > { %9546 = vst.msk [vmem:[%s13057_s10 + $0x10] sm:$0xff] %vm829_vm3, %v13544_v9  ;;  %v4683_v11 = vsel %vm829_vm3, %v13544_v9, 0.0  ;;  %v4695_v26 = vmul.f32 %v13544_v9, %v13544_v9  ;;  %v3680_v35 = vld [vmem:[#allocation15 + $0x278] sm:$0xff]  ;;  %v3690_v39 = vld [vmem:[#allocation16 + $0x70] sm:$0xff] }
 0xdb3   : > { %4684 = vadd.xlane.f32.xlu1 %v4683_v11  ;;  %v3651_v11 = vld [vmem:[#allocation15 + $0x190] sm:$0xff]  ;;  %14899 = vst [vmem:[#allocation31_spill] sm:$0xff] %v13659_v48 }
 0xdb4   : > { %v4698_v44 = vsel %vm829_vm3, %v4695_v26, 0.0  ;;  %v3656_v26 = vld [vmem:[#allocation15 + $0x1b8] sm:$0xff] }
 0xdb5   : > { %4699 = vadd.xlane.f32.xlu0 %v4698_v44  ;;  %v3653_v44 = vld [vmem:[#allocation15 + $0x1a0] sm:$0xff] }
 0xdb6   : > { %v13618_v32 = vpack.c.bf16 %v3658_v21, %v3653_v44  ;;  %v3645_v44 = vld [vmem:[#allocation15 + $0x160] sm:$0xff] }
 0xdb7   : > { %v3840_v4 = vpop.f32.mrb[26].mxu1 }
 0xdb8   : > { %v3841_v13 = vadd.f32 %v13557_v49, %v3840_v4  ;;  %v10317_v30 = vpop.f32.mrb[27].mxu1  ;;  %v13614_v4 = vpack.c.bf16 %v3656_v26, %v3651_v11  ;;  %v13641_v11 = vpack.c.bf16 %v3678_v5, %v3673_v25  ;;  %v13648_v26 = vld [vmem:[#allocation13 + $0x1] sm:$0x1]  ;;  %v13661_v25 = vpack.c.bf16 %v3687_v60, %v3686_v54  ;;  %v3665_v5 = vld [vmem:[#allocation15 + $0x200] sm:$0xff] }
 0xdb9   : > { %v3667_v30 = vld [vmem:[#allocation15 + $0x210] sm:$0xff]  ;;  %v3691_v54 = vld [vmem:[#allocation16 + $0x78] sm:$0xff] }
 0xdba   : > { %v3917_v40 = vadd.f32 %v13494_v33, %v3841_v13  ;;  %v13581_v33 = vpack.c.bf16 %v3628_v56, %v3623_v8  ;;  %v3662_v13 = vld [vmem:[#allocation15 + $0x1e8] sm:$0xff]  ;;  %v3663_v56 = vld [vmem:[#allocation15 + $0x1f0] sm:$0xff]  ;;  %14900 = vst [vmem:[#allocation30_spill] sm:$0xff] %v13661_v25 }
 0xdbb   : > { %v13620_v14 = vpack.c.bf16 %v3667_v30, %v3662_v13  ;;  %v3666_v8 = vld [vmem:[#allocation15 + $0x208] sm:$0xff]  ;;  %v13629_v22 = vpack.c.bf16 %v3668_v63, %v3663_v56  ;;  %v3684_v30 = vld [vmem:[#allocation16 + $0x40] sm:$0xff] }
 0xdbc   : > { %v13571_v53 = vadd.f32 %v13563_v12, %v3917_v40  ;;  %v13622_v40 = vpack.c.bf16 %v3669_v23, %v3664_v27  ;;  %v13625_v6 = vpack.c.bf16 %v3666_v8, %v3661_v34  ;;  %v3650_v13 = vld [vmem:[#allocation15 + $0x188] sm:$0xff] }
 0xdbd   : > { %v3685_v27 = vld [vmem:[#allocation16 + $0x48] sm:$0xff]  ;;  %v13651_v56 = vpack.c.bf16 %v3650_v13, %v3645_v44  ;;  %v3688_v13 = vld [vmem:[#allocation16 + $0x60] sm:$0xff] }
 0xdbe   : > { %10338 = vmatmul.mubr.msk.f32.vlgmr.msra.gmra.mrb[28].mxu1 %vm929_vm1, %v13571_v53  ;;  %9556 = vmatmul.mubr.msk.f32.vlgmr.msra.gmra.mrb[30].mxu0 %vm929_vm1, %v13571_v53  ;;  %v13653_v63 = vpack.c.bf16 %v3685_v27, %v3684_v30  ;;  %v3689_v30 = vld [vmem:[#allocation16 + $0x68] sm:$0xff] }
 0xdbf   : > { %11136 = vmatpush1.bf16.msra.mxu1 %v13566_v46  ;;  %11143 = vmatpush3.bf16.msra.mxu0 %v13568_v1 }
 0xdc0   : > { %11138 = vmatprep.subr.bf16.mxu1 %v13573_v31  ;;  %11144 = vmatprep.subr.bf16.mxu0 %v14869_v7 }
 0xdc1   : > { %4156 = vmatprep.mubr.f32.mxu1 %v14867_v45  ;;  %10348 = vmatprep.mubr.msk.f32.mxu0 %vm12346_vm0, %v14867_v45 }
 0xdc3   : > { %11140 = vmatpush1.bf16.msra.mxu1 %v13581_v33  ;;  %11146 = vmatpush3.bf16.msra.mxu0 %v13583_v18 }
 0xdc4   : > { %11148 = vmatprep.subr.bf16.mxu0 %v13598_v51  ;;  %11164 = vmatprep.subr.bf16.mxu1 %v13600_v15 }
 0xdc6   : > { %9557 = vmatmul.mubr.msk.f32.vlgmr.msra.gmra.mrb[30].mxu1 %vm929_vm1, %v13571_v53  ;;  %10349 = vmatmul.mubr.msk.f32.vlgmr.msra.gmra.mrb[32].mxu0 %vm929_vm1, %v13571_v53 }
 0xdc7   : > { %4300 = vmatprep.mubr.f32.mxu0 %v14867_v45  ;;  %4371 = vmatprep.mubr.f32.mxu1 %v14867_v45 }
 0xdc8   : > { %11150 = vmatpush1.bf16.msra.mxu0 %v13602_v0  ;;  %11166 = vmatpush1.bf16.msra.mxu1 %v13605_v29 }
 0xdc9   : > { %11152 = vmatprep.subr.bf16.mxu0 %v13609_v62  ;;  %11168 = vmatprep.subr.bf16.mxu1 %v13611_v17 }
 0xdcc   : > { %11154 = vmatpush1.bf16.msra.mxu0 %v13614_v4  ;;  %11170 = vmatpush1.bf16.msra.mxu1 %v13618_v32 }
 0xdcd   : > { %11156 = vmatprep.subr.bf16.mxu0 %v13620_v14  ;;  %11172 = vmatprep.subr.bf16.mxu1 %v13622_v40 }
 0xdd0   : > { %11158 = vmatpush1.bf16.msra.mxu0 %v13625_v6  ;;  %11174 = vmatpush1.bf16.msra.mxu1 %v13629_v22 }
 0xdd1   : > { %11160 = vmatprep.subr.bf16.mxu0 %v13634_v3  ;;  %11176 = vmatprep.subr.bf16.mxu1 %v13636_v20 }
 0xdd4   : > { %11162 = vmatpush1.bf16.msra.mxu0 %v13638_v42  ;;  %11178 = vmatpush1.bf16.msra.mxu1 %v13641_v11 }
 0xdd5   : > { %11191 = vmatprep.subr.bf16.mxu0 %v14869_v7  ;;  %11179 = vmatprep.subr.bf16.mxu1 %v14869_v7 }
 0xe91   : > { %v3988_v21 = vpop.f32.mrb[28].mxu1 }
 0xe92   : > { %v3989_v23 = vadd.f32 %v3988_v21, %v13648_v26  ;;  %v10339_v34 = vpop.f32.mrb[29].mxu1  ;;  %v3670_v21 = vld [vmem:[#allocation15 + $0x228] sm:$0xff] }
 0xe93   : > { %v13675_v34 = vpack.c.bf16 %v3689_v30, %v3688_v13  ;;  %v3695_v30 = vld [vmem:[#allocation18 + $0x50] sm:$0xff] }
 0xe94   : > { %vm3992_vm14 = vcmp.gt.f32.partialorder %v3989_v23, 0.0  ;;  %v3993_v8 = vmul.f32 0.2, %v3989_v23 }
 0xe95   : > { %14902 = vst [vmem:[#allocation32_spill] sm:$0xff] %v13675_v34 }
 0xe96   : > { %v3994_v19 = vsel %vm3992_vm14, %v3989_v23, %v3993_v8  ;;  %v13673_v23 = vpack.c.bf16 %v3670_v21, %v3665_v5  ;;  %v3675_v8 = vld [vmem:[#allocation15 + $0x250] sm:$0xff]  ;;  %v3693_v5 = vld [vmem:[#allocation18 + $0x40] sm:$0xff]  ;;  %v3694_v21 = vld [vmem:[#allocation18 + $0x48] sm:$0xff]  ;;  %vm14925_vm14 = vcmask 293888  }
 0xe97   : > { %9559 = vmatmul.mubr.msk.f32.vlgmr.msra.gmra.mrb[30].mxu0 %vm829_vm3, %v3994_v19  ;;  %9560 = vmatmul.mubr.msk.f32.vlgmr.msra.gmra.mrb[30].mxu1 %vm829_vm3, %v3994_v19  ;;  %v13681_v60 = vpack.c.bf16 %v3680_v35, %v3675_v8  ;;  %v13689_v13 = vpack.c.bf16 %v3694_v21, %v3693_v5  ;;  %v13697_v8 = vpack.c.bf16 %v3696_v47, %v3695_v30  ;;  %v3697_v35 = vld [vmem:[#allocation18 + $0x60] sm:$0xff]  ;;  %v3700_v5 = vld [vmem:[#allocation18 + $0x78] sm:$0xff]  ;;  %v14911_v30 = vld [vmem:[#allocation48_spill] sm:$0xff] }
 0xe98   : > { %11181 = vmatpush3.bf16.msra.mxu1 %v13651_v56  ;;  %11193 = vmatpush3.bf16.msra.mxu0 %v13653_v63  ;;  %14901 = vst [vmem:[#allocation33_spill] sm:$0xff] %v13673_v23  ;;  %v14909_v21 = vld [vmem:[#allocation47_spill] sm:$0xff] }
 0xe99   : > { %v13663_v44 = vpop.f32.mrb[32].mxu0  ;;  %11182 = vmatprep.subr.bf16.mxu1 %v14869_v7  ;;  %11194 = vmatprep.subr.bf16.mxu0 %v14869_v7  ;;  %14903 = vst [vmem:[#allocation34_spill] sm:$0xff] %v13681_v60  ;;  %14905 = vst [vmem:[#allocation36_spill] sm:$0xff] %v13689_v13 }
 0xe9a   : > { %v10350_v27 = vpop.f32.mrb[33].mxu0  ;;  %10367 = vmatprep.mubr.msk.f32.mxu1 %vm12346_vm0, %v14867_v45  ;;  %10386 = vmatprep.mubr.msk.f32.mxu0 %vm12346_vm0, %v14867_v45  ;;  %14906 = vst [vmem:[#allocation37_spill] sm:$0xff] %v13697_v8 }
 0xe9b   : > { %v13683_v27 = vpack.c.bf16 %v3691_v54, %v3690_v39  ;;  %v3698_v39 = vld [vmem:[#allocation18 + $0x68] sm:$0xff]  ;;  %v3699_v54 = vld [vmem:[#allocation18 + $0x70] sm:$0xff] }
 0xe9c   : > { %11184 = vmatpush3.bf16.msra.mxu1 %v13659_v48  ;;  %11196 = vmatpush3.bf16.msra.mxu0 %v13661_v25  ;;  %v13709_v47 = vpack.c.bf16 %v3700_v5, %v3699_v54 }
 0xe9d   : > { %11185 = vmatprep.subr.bf16.mxu1 %v14869_v7  ;;  %11197 = vmatprep.subr.bf16.mxu0 %v14869_v7  ;;  %14904 = vst [vmem:[#allocation35_spill] sm:$0xff] %v13683_v27 }
 0xe9e   : > { %14908 = vst [vmem:[#allocation39_spill] sm:$0xff] %v13709_v47 }
 0xea0   : > { %11187 = vmatpush3.bf16.msra.mxu1 %v13673_v23  ;;  %11199 = vmatpush3.bf16.msra.mxu0 %v13675_v34 }
 0xea1   : > { %11188 = vmatprep.subr.bf16.mxu1 %v14869_v7  ;;  %11200 = vmatprep.subr.bf16.mxu0 %v14869_v7 }
 0xea4   : > { %11190 = vmatpush3.bf16.msra.mxu1 %v13681_v60  ;;  %11202 = vmatpush3.bf16.msra.mxu0 %v13683_v27 }
 0xea5   : > { %11203 = vmatprep.subr.bf16.mxu1 %v14869_v7  ;;  %11215 = vmatprep.subr.bf16.mxu0 %v14869_v7 }
 0xea7   : > { %10368 = vmatmul.mubr.msk.f32.vlgmr.msra.gmra.mrb[32].mxu1 %vm829_vm3, %v3994_v19  ;;  %10387 = vmatmul.mubr.msk.f32.vlgmr.msra.gmra.mrb[34].mxu0 %vm829_vm3, %v13544_v9  ;;  %v13705_v19 = vpack.c.bf16 %v3698_v39, %v3697_v35  ;;  %v14913_v39 = vld [vmem:[#allocation49_spill] sm:$0xff] }
 0xea8   : > { %11205 = vmatpush3.bf16.msra.mxu1 %v13689_v13  ;;  %10405 = vmatprep.mubr.msk.f32.mxu1 %vm12346_vm0, %v14867_v45 }
 0xea9   : > { %11206 = vmatprep.subr.bf16.mxu1 %v14869_v7  ;;  %10414 = vmatprep.mubr.msk.f32.mxu0 %vm12346_vm0, %v14867_v45  ;;  %14907 = vst [vmem:[#allocation38_spill] sm:$0xff] %v13705_v19 }
 0xeac   : > { %11208 = vmatpush3.bf16.msra.mxu1 %v13697_v8 }
 0xead   : > { %11209 = vmatprep.subr.bf16.mxu1 %v14869_v7 }
 0xeb0   : > { %11211 = vmatpush3.bf16.msra.mxu1 %v13705_v19 }
 0xeb1   : > { %11212 = vmatprep.subr.bf16.mxu1 %v14869_v7 }
 0xeb4   : > { %11214 = vmatpush3.bf16.msra.mxu1 %v13709_v47 }
 0xeb5   : > { %11221 = vmatprep.subr.bf16.mxu1 %v14869_v7 }
 0xeb7   : > { %10406 = vmatmul.mubr.msk.f32.vlgmr.msra.gmra.mrb[34].mxu1 %vm829_vm3, %v13544_v9 }
 0xeb8   : > { %11223 = vmatpush3.bf16.msra.mxu1 %v13396_v57  ;;  %10444 = vmatprep.mubr.msk.f32.mxu1 %vm12346_vm0, %v14867_v45  ;;  %v9550_v57 = vld [vmem:[%s14853_s25 + $0x5] sm:$0x1f] }
 0xeb9   : > { %11224 = vmatprep.subr.bf16.mxu1 %v14869_v7  ;;  %v13742_v35 = vrot.slane %v9550_v57, %v14911_v30  ;;  %v13745_v54 = vrot.slane %v9550_v57, %v14913_v39 }
 0xebb   : > { %14912 = vst [vmem:[#allocation41_spill] sm:$0xff] %v13742_v35  ;;  %14914 = vst [vmem:[#allocation42_spill] sm:$0xff] %v13745_v54 }
 0xebc   : > { %11226 = vmatpush3.bf16.msra.mxu1 %v13402_v28  ;;  %v13736_v28 = vld [vmem:[%s14854_s26 + $0x5] sm:$0x1f] }
 0xebd   : > { %11233 = vmatprep.subr.bf16.mxu1 %v14869_v7  ;;  %v13759_v13 = vrot.slane %v13736_v28, %v14913_v39 }
 0xebf   : > { %10445 = vmatmul.mubr.msk.f32.vlgmr.msra.gmra.mrb[36].mxu1 %vm929_vm1, %v13571_v53  ;;  %14917 = vst [vmem:[#allocation45_spill] sm:$0xff] %v13759_v13 }
 0xec0   : > { %11235 = vmatpush3.bf16.msra.mxu1 %v13413_v10  ;;  %10466 = vmatprep.mubr.msk.f32.mxu1 %vm12346_vm0, %v14867_v45  ;;  %v13739_v10 = vrot.slane %v9550_v57, %v14909_v21 }
 0xec1   : > { %11236 = vmatprep.subr.bf16.mxu1 %v14869_v7 }
 0xec2   : > { %14910 = vst [vmem:[#allocation40_spill] sm:$0xff] %v13739_v10 }
 0xec4   : > { %11238 = vmatpush3.bf16.msra.mxu1 %v13417_v41  ;;  %v13749_v41 = vrot.slane %v13736_v28, %v14909_v21 }
 0xec5   : > { %11246 = vmatprep.subr.bf16.mxu1 %v13521_v24  ;;  %v13753_v24 = vrot.slane %v13736_v28, %v14911_v30 }
 0xec6   : > { %14915 = vst [vmem:[#allocation43_spill] sm:$0xff] %v13749_v41 }
 0xec7   : > { %14916 = vst [vmem:[#allocation44_spill] sm:$0xff] %v13753_v24 }
 0xf6a   : > { %v4302_v5 = vpop.f32.mrb[30].mxu0  ;;  %v4373_v59 = vpop.f32.mrb[30].mxu1 }
 0xf6b   : > { %v11593_v47 = vadd.f32 %v4302_v5, %v13739_v10  ;;  %v11595_v19 = vadd.f32 %v4373_v59, %v13742_v35  ;;  %v4304_v8 = vpop.f32.mrb[31].mxu0  ;;  %v4375_v27 = vpop.f32.mrb[31].mxu1  ;;  %v14919_v35 = vld [vmem:[#allocation57_spill] sm:$0xff] }
 0xf6c   : > { %v11594_v60 = vadd.f32 %v4304_v8, %v13745_v54  ;;  %v13771_v10 = vrot.slane %v9550_v57, %v14919_v35 }
 0xf6d   : > { %v13763_v21 = vadd.f32 %v11593_v47, %v13749_v41  ;;  %v4481_v30 = vadd.f32 %v11595_v19, %v13753_v24 }
 0xf6e   : > { %v4480_v34 = vadd.f32 %v11594_v60, %v13759_v13  ;;  %14920 = vst [vmem:[#allocation46_spill] sm:$0xff] %v13771_v10  ;;  %v4230_v60 = vadd.f32 %v13663_v44, %v13771_v10 }
 0xf6f   : > { %v4507_v23 = vrot.slane %v4481_v30, 4  ;;  %v4486_v5 = vrot.slane %v13763_v21, 7  ;;  %v4500_v59 = vrot.slane %v4481_v30, 5  ;;  %v4512_v8 = vrot.slane %v4481_v30, 3 }
 0xf70   : > { %v4487_v39 = vrot.slane %v4480_v34, 7  ;;  %v4494_v24 = vrot.slane %v4480_v34, 6  ;;  %v4499_v41 = vrot.slane %v4480_v34, 5 }
 0xf71   : > { %4508 = vrot.lane.b32.xlu0 %v4507_v23, %s14755_s8  ;;  %4488 = vrot.lane.b32.xlu1 %v4486_v5, %s14918_s18 }
 0xf75   : > { %4503 = vrot.lane.b32.xlu1 %v4500_v59, %s12350_s28  ;;  %4490 = vrot.lane.b32.xlu0 %v4487_v39, %s14918_s18 }
 0xf79   : > { %4514 = vrot.lane.b32.xlu1 %v4512_v8, %s12352_s7 }
 0xf7a   : > { %v4444_v19 = vpop.f32.mrb[32].mxu1  ;;  %v13778_v47 = vpop.f32.mrb[34].mxu0 }
 0xf7b   : > { %v4452_v23 = vadd.f32 %v4444_v19, %v4230_v60  ;;  %v10369_v5 = vpop.f32.mrb[33].mxu1  ;;  %v10388_v13 = vpop.f32.mrb[35].mxu0  ;;  %v4686_v8 = vsel %vm829_vm3, %v13778_v47, 0.0  ;;  %v4696_v60 = vmul.f32 %v13778_v47, %v13778_v47 }
 0xf7d   : > { %4495 = vrot.lane.b32.xlu1 %v4494_v24, %s12351_s24  ;;  %v4701_v34 = vsel %vm829_vm3, %v4696_v60, 0.0  ;;  %v4685_v60 = vpop.xlane.xlu1 %4684 }
 0xf81   : > { %4501 = vrot.lane.b32.xlu1 %v4499_v41, %s12350_s28 }
 0xf8a   : > { %v13782_v59 = vpop.f32.mrb[34].mxu1 }
 0xf8b   : > { %v10407_v30 = vpop.f32.mrb[35].mxu1  ;;  %v4697_v41 = vmul.f32 %v13782_v59, %v13782_v59  ;;  %v4689_v5 = vsel %vm829_vm3, %v13782_v59, 0.0 }
 0xf92   : > { %v5114_v39 = vpop.f32.mrb[36].mxu1 }
 0xf93   : > { %v5115_v44 = vadd.f32 %v13445_v38, %v5114_v39  ;;  %v10446_v10 = vpop.f32.mrb[37].mxu1  ;;  %v4704_v38 = vsel %vm829_vm3, %v4697_v41, 0.0 }
 0xf94   : > { %4687 = vadd.xlane.f32.xlu0 %v4686_v8  ;;  %v14921_v10 = vld [vmem:[#allocation56_spill] sm:$0xff] }
 0xf95   : > { %vm5118_vm4 = vcmp.gt.f32.partialorder %v5115_v44, 0.0  ;;  %v5119_v13 = vmul.f32 0.2, %v5115_v44  ;;  %v13800_v19 = vrot.slane %v9550_v57, %v14921_v10  ;;  %v13807_v30 = vrot.slane %v13736_v28, %v14921_v10 }
 0xf97   : > { %v5120_v24 = vsel %vm5118_vm4, %v5115_v44, %v5119_v13  ;;  %14922 = vst [vmem:[#allocation50_spill] sm:$0xff] %v13800_v19  ;;  %14923 = vst [vmem:[#allocation51_spill] sm:$0xff] %v13807_v30  ;;  %v4700_v13 = vpop.xlane.xlu0 %4699  ;;  %vm14926_vm4 = vcmask 1046528  }
 0xf98   : > { %10467 = vmatmul.mubr.msk.f32.vlgmr.msra.gmra.mrb[38].mxu1 %vm929_vm1, %v5120_v24  ;;  %4702 = vadd.xlane.f32.xlu0 %v4701_v34 }
 0xf99   : > { %11248 = vmatpush1.bf16.msra.mxu1 %v13526_v55  ;;  %5406 = vmatprep.mubr.f32.mxu1 %v14867_v45  ;;  %v11596_v55 = vadd.f32 %v4375_v27, %v13800_v19 }
 0xf9a   : > { %11250 = vmatprep.subr.bf16.mxu1 %v13531_v61 }
 0xf9b   : > { %v4482_v61 = vadd.f32 %v11596_v55, %v13807_v30  ;;  %v4707_v55 = vmul.f32 0.015625, %v4700_v13 }
 0xf9c   : > { %4705 = vadd.xlane.f32.xlu0 %v4704_v38 }
 0xf9d   : > { %11252 = vmatpush1.bf16.msra.mxu1 %v13536_v2  ;;  %v13812_v2 = vrot.slane %v13736_v28, %v14919_v35  ;;  %v4513_v39 = vrot.slane %v4482_v61, 3  ;;  %v4520_v44 = vrot.slane %v4482_v61, 2  ;;  %v4525_v8 = vrot.slane %v4482_v61, 1 }
 0xf9e   : > { %11261 = vmatprep.subr.bf16.mxu1 %v14869_v7  ;;  %v4692_v28 = vmul.f32 0.015625, %v4685_v60 }
 0xf9f   : > { %14924 = vst [vmem:[#allocation52_spill] sm:$0xff] %v13812_v2  ;;  %v4483_v57 = vadd.f32 %v13812_v2, %v4452_v23 }
 0xfa1   : > { %v4526_v27 = vrot.slane %v4483_v57, 1 }
 0xfa5   : > { %4690 = vadd.xlane.f32.xlu1 %v4689_v5  ;;  %v4710_v5 = vmul.f32 %v4692_v28, %v4692_v28 }
 0xfa7   : > { %v4713_v23 = vsub.f32 %v4707_v55, %v4710_v5  ;;  %v4716_v55 = vsub.f32 %v13544_v9, %v4692_v28 }
 0xfb2   : > { %4516 = vrot.lane.b32.xlu0 %v4513_v39, %s12352_s7 }
 0xfb6   : > { %4521 = vrot.lane.b32.xlu1 %v4520_v44, %s12354_s6  ;;  %4527 = vrot.lane.b32.xlu0 %v4525_v8, %s14759_s27  ;;  %v4719_v44 = vadd.f32 1e-05, %v4713_v23 }
 0xfb8   : > { %11876 = vrsqrt.f32 %v4719_v44 }
 0xfba   : > { %4529 = vrot.lane.b32.xlu1 %v4526_v27, %s14759_s27 }
 0xfc2   : > { %v11877_v5 = vpop.eup %11876 }
 0xfe3   : > { %v4489_v24 = vpop.permute.xlu1 %4488  ;;  %v4509_v34 = vpop.permute.xlu0 %4508 }
 0xfe7   : > { %v4504_v41 = vpop.permute.xlu1 %4503  ;;  %v4491_v38 = vpop.permute.xlu0 %4490 }
 0xfe8   : > { %v4492_v60 = vsel %vm1724_vm5, %v4489_v24, %v4491_v38 }
 0xfeb   : > { %v4515_v10 = vpop.permute.xlu1 %4514 }
 0xfef   : > { %v4496_v57 = vpop.permute.xlu1 %4495 }
 0xff3   : > { %v4502_v19 = vpop.permute.xlu1 %4501 }
 0xff4   : > { %v4505_v13 = vsel %vm1738_vm6, %v4502_v19, %v4504_v41  ;;  %v4725_v41 = vmul.f32 %v11877_v5, %v4716_v55  ;;  %v14929_v5 = vmov 67   ;;  %v14930_v55 = vmov 33  }
0x1021   : > { %v4688_v39 = vpop.xlane.xlu0 %4687 }
0x1022   : > { %v4693_v61 = vmul.f32 0.015625, %v4688_v39  ;;  %v4533_v39 = vsel %vm1769_vm7, %v13763_v21, %v4492_v60 }
0x1024   : > { %v4711_v2 = vmul.f32 %v4693_v61, %v4693_v61 }
0x1025   : > { %v4703_v35 = vpop.xlane.xlu0 %4702 }
0x1026   : > { %v4708_v8 = vmul.f32 0.015625, %v4703_v35 }
0x1028   : > { %v4714_v30 = vsub.f32 %v4708_v8, %v4711_v2  ;;  %v4534_v2 = vsel %vm1771_vm8, %v4533_v39, %v4496_v57 }
0x1029   : > { %v4706_v54 = vpop.xlane.xlu0 %4705  ;;  %v4535_v24 = vsel %vm1773_vm9, %v4534_v2, %v4505_v13 }
0x102a   : > { %v4720_v27 = vadd.f32 1e-05, %v4714_v30  ;;  %v4717_v30 = vsub.f32 %v13778_v47, %v4693_v61  ;;  %v4709_v23 = vmul.f32 0.015625, %v4706_v54  ;;  %v4536_v28 = vsel %vm1775_vm11, %v4535_v24, %v4509_v34 }
0x102c   : > { %11878 = vrsqrt.f32 %v4720_v27 }
0x102d   : > { %v4517_v35 = vpop.permute.xlu0 %4516 }
0x102e   : > { %v4518_v19 = vsel %vm1752_vm10, %v4515_v10, %v4517_v35 }
0x102f   : > { %v4537_v57 = vsel %vm1777_vm12, %v4536_v28, %v4518_v19 }
0x1031   : > { %v4528_v60 = vpop.permute.xlu0 %4527 }
0x1032   : > { %v4691_v25 = vpop.xlane.xlu1 %4690 }
0x1033   : > { %v4694_v48 = vmul.f32 0.015625, %v4691_v25 }
0x1035   : > { %v4712_v44 = vmul.f32 %v4694_v48, %v4694_v48  ;;  %v4718_v10 = vsub.f32 %v13782_v59, %v4694_v48 }
0x1036   : > { %v11879_v8 = vpop.eup %11878  ;;  %v4522_v38 = vpop.permute.xlu1 %4521 }
0x1037   : > { %v4715_v25 = vsub.f32 %v4709_v23, %v4712_v44  ;;  %v4726_v27 = vmul.f32 %v11879_v8, %v4717_v30  ;;  %v4538_v54 = vsel %vm1779_vm13, %v4537_v57, %v4522_v38 }
0x1039   : > { %v4721_v9 = vadd.f32 1e-05, %v4715_v25  ;;  %v11216_v21 = vpack.c.bf16 %v4726_v27, %v4725_v41 }
0x103a   : > { %v4530_v39 = vpop.permute.xlu1 %4529 }
0x103b   : > { %11880 = vrsqrt.f32 %v4721_v9  ;;  %v4531_v47 = vsel %vm14925_vm14, %v4528_v60, %v4530_v39  ;;  %11217 = vmatpush3.bf16.msra.mxu0 %v11216_v21 }
0x103c   : > { %v4539_v61 = vsel %vm14926_vm4, %v4538_v54, %v4531_v47  ;;  %10412 = vmatprep.subr.mxu0 %v14867_v45 }
0x103d   : > { %4812 = vrot.lane.b32.xlu1 %v4539_v61, %s14757_s5  ;;  %4730 = vperm.xlu0 %11846, %v4539_v61  }
0x1041   : > { %4809 = vperm.xlu1 %11847, %v4539_v61   ;;  %4893 = vrot.lane.b32.xlu0 %v4539_v61, %s14927_s0 }
0x1042   : > { %11848 = vset.pattern.permute.xlu0 %v14898_v36 }
0x1045   : > { %v11881_v34 = vpop.eup %11880  ;;  %4971 = vrot.lane.b32.xlu1 %v4539_v61, %s14928_s1  ;;  %4890 = vperm.xlu0 %11848, %v4539_v61  }
0x1046   : > { %v4727_v13 = vmul.f32 %v11881_v34, %v4718_v10  ;;  %11849 = vset.pattern.permute.xlu1 %v14929_v5 }
0x1048   : > { %10413 = vmatpush3.msra.mxu0 %v4727_v13 }
0x1049   : > { %4968 = vperm.xlu1 %11849, %v4539_v61   ;;  %10415 = vmatmul.mubr.msk.f32.vlgmr.msra.gmra.mrb[36].mxu0 %vm1977_vm2, %v4539_v61 }
0x104a   : > { %10417 = vmatprep.subr.mxu0 %v14867_v45  ;;  %10419 = vmatprep.mubr.msk.f32.mxu0 %vm12346_vm0, %v14867_v45 }
0x104b   : > { %11850 = vset.pattern.permute.xlu0 %v14868_v58 }
0x104d   : > { %11851 = vset.pattern.permute.xlu1 %v14930_v55 }
0x106b   : > { %v5260_v48 = vpop.f32.mrb[38].mxu1 }
0x106c   : > { %v10468_v59 = vpop.f32.mrb[39].mxu1 }
0x10af   : > { %v4813_v24 = vpop.permute.xlu1 %4812 }
0x10bc   : > { %v4731_v35 = vpop.permute.xlu0 %4730 }
0x10c0   : > { %v4810_v38 = vpop.permute.xlu1 %4809  ;;  %v4894_v28 = vpop.permute.xlu0 %4893 }
0x10c4   : > { %v4972_v60 = vpop.permute.xlu1 %4971 }
0x111c   : > { %v4801_v2 = vpop.f32.mrb[36].mxu0 }
0x111d   : > { %v4802_v30 = vadd.f32 %v4801_v2, %v4731_v35  ;;  %v10416_v23 = vpop.f32.mrb[37].mxu0 }
0x111f   : > { %vm4805_vm14 = vcmp.gt.f32.partialorder %v4802_v30, 0.0  ;;  %v4806_v44 = vmul.f32 0.2, %v4802_v30 }
0x1121   : > { %v4807_v8 = vsel %vm4805_vm14, %v4802_v30, %v4806_v44  ;;  %v14941_v30 = vld [vmem:[#allocation40_spill] sm:$0xff]  ;;  %v14942_v44 = vld [vmem:[#allocation41_spill] sm:$0xff] }
0x1122   : > { %10418 = vmatpush3.msra.mxu0 %v4807_v8 }
0x1123   : > { %10420 = vmatmul.mubr.msk.f32.vlgmr.msra.gmra.mrb[38].mxu0 %vm2059_vm15, %v4813_v24  ;;  %10422 = vmatprep.subr.mxu0 %v14867_v45 }
0x1124   : > { %10424 = vmatprep.mubr.msk.f32.mxu0 %vm12346_vm0, %v14867_v45 }
0x11f6   : > { %v4882_v19 = vpop.f32.mrb[38].mxu0 }
0x11f7   : > { %v4883_v25 = vadd.f32 %v4882_v19, %v4810_v38  ;;  %v10421_v41 = vpop.f32.mrb[39].mxu0  ;;  %v14943_v19 = vld [vmem:[#allocation42_spill] sm:$0xff] }
0x11f8   : > { %v14944_v41 = vld [vmem:[#allocation43_spill] sm:$0xff] }
0x11f9   : > { %vm4886_vm4 = vcmp.gt.f32.partialorder %v4883_v25, 0.0  ;;  %v4887_v27 = vmul.f32 0.2, %v4883_v25 }
0x11fb   : > { %v4888_v9 = vsel %vm4886_vm4, %v4883_v25, %v4887_v27 }
0x11fc   : > { %10423 = vmatpush3.msra.mxu0 %v4888_v9  ;;  %v14945_v9 = vld [vmem:[#allocation44_spill] sm:$0xff] }
0x11fd   : > { %10425 = vmatmul.mubr.msk.f32.vlgmr.msra.gmra.mrb[40].mxu0 %vm2059_vm15, %v4894_v28  ;;  %11218 = vmatprep.subr.bf16.mxu0 %v14869_v7 }
0x11fe   : > { %11220 = vmatpush3.bf16.msra.mxu0 %v11216_v21  ;;  %10433 = vmatprep.mubr.msk.f32.mxu0 %vm12346_vm0, %v14867_v45  ;;  %v4891_v21 = vpop.permute.xlu0 %4890 }
0x11ff   : > { %10431 = vmatprep.subr.mxu0 %v14867_v45 }
0x1202   : > { %10432 = vmatpush3.msra.mxu0 %v4727_v13  ;;  %v6360_v13 = vld [vmem:[#allocation9 + $0x50] sm:$0xff] }
0x1203   : > { %11227 = vmatprep.subr.bf16.mxu0 %v14869_v7 }
0x1205   : > { %10434 = vmatmul.mubr.msk.f32.vlgmr.msra.gmra.mrb[40].mxu0 %vm1977_vm2, %v4972_v60  ;;  %v14946_v60 = vld [vmem:[#allocation45_spill] sm:$0xff] }
0x1206   : > { %11229 = vmatpush3.bf16.msra.mxu0 %v13505_v50  ;;  %10455 = vmatprep.mubr.msk.f32.mxu0 %vm12346_vm0, %v14867_v45  ;;  %v4969_v50 = vpop.permute.xlu1 %4968 }
0x1207   : > { %11230 = vmatprep.subr.bf16.mxu0 %v14869_v7  ;;  %v11597_v57 = vadd.f32 %v4969_v50, %v4891_v21 }
0x120a   : > { %11232 = vmatpush3.bf16.msra.mxu0 %v13510_v16 }
0x120b   : > { %11239 = vmatprep.subr.bf16.mxu0 %v14869_v7 }
0x120d   : > { %10456 = vmatmul.mubr.msk.f32.vlgmr.msra.gmra.mrb[42].mxu0 %vm929_vm1, %v13571_v53 }
0x120e   : > { %11241 = vmatpush3.bf16.msra.mxu0 %v13523_v52  ;;  %10477 = vmatprep.mubr.msk.f32.mxu0 %vm12346_vm0, %v14867_v45 }
0x120f   : > { %11242 = vmatprep.subr.bf16.mxu0 %v14869_v7 }
0x1212   : > { %11244 = vmatpush3.bf16.msra.mxu0 %v13533_v37 }
0x1213   : > { %11254 = vmatprep.subr.bf16.mxu0 %v13540_v43 }
0x12d8   : > { %v5041_v16 = vpop.f32.mrb[40].mxu0 }
0x12d9   : > { %v13871_v39 = vadd.f32 %v11597_v57, %v5041_v16  ;;  %v10435_v54 = vpop.f32.mrb[41].mxu0 }
0x12db   : > { %9568 = vst.msk [vmem:[%s13057_s10 + $0x18] sm:$0xff] %vm829_vm3, %v13871_v39  ;;  %v5978_v52 = vsel %vm829_vm3, %v13871_v39, 0.0  ;;  %v5990_v53 = vmul.f32 %v13871_v39, %v13871_v39 }
0x12dc   : > { %5979 = vadd.xlane.f32.xlu1 %v5978_v52 }
0x12dd   : > { %v5993_v37 = vsel %vm829_vm3, %v5990_v53, 0.0  ;;  %v14947_v53 = vld [vmem:[#allocation46_spill] sm:$0xff] }
0x12de   : > { %5994 = vadd.xlane.f32.xlu0 %v5993_v37 }
0x12e0   : > { %v5187_v43 = vpop.f32.mrb[42].mxu0 }
0x12e1   : > { %v5188_v47 = vadd.f32 %v13557_v49, %v5187_v43  ;;  %v10457_v61 = vpop.f32.mrb[43].mxu0 }
0x12e3   : > { %v5264_v10 = vadd.f32 %v5260_v48, %v5188_v47  ;;  %v6361_v48 = vld [vmem:[#allocation9 + $0x58] sm:$0xff] }
0x12e4   : > { %v13982_v59 = vpack.c.bf16 %v6361_v48, %v6360_v13 }
0x12e5   : > { %v13883_v34 = vadd.f32 %v13563_v12, %v5264_v10 }
0x12e7   : > { %10478 = vmatmul.mubr.msk.f32.vlgmr.msra.gmra.mrb[44].mxu0 %vm929_vm1, %v13883_v34  ;;  %9573 = vmatmul.mubr.msk.f32.vlgmr.msra.gmra.mrb[40].mxu1 %vm929_vm1, %v13883_v34 }
0x12e8   : > { %11256 = vmatpush1.bf16.msra.mxu0 %v13566_v46  ;;  %11263 = vmatpush3.bf16.msra.mxu1 %v13568_v1 }
0x12e9   : > { %11258 = vmatprep.subr.bf16.mxu0 %v13573_v31  ;;  %11264 = vmatprep.subr.bf16.mxu1 %v14869_v7 }
0x12ea   : > { %5477 = vmatprep.mubr.f32.mxu0 %v14867_v45  ;;  %10488 = vmatprep.mubr.msk.f32.mxu1 %vm12346_vm0, %v14867_v45 }
0x12ec   : > { %11260 = vmatpush1.bf16.msra.mxu0 %v13581_v33  ;;  %11266 = vmatpush3.bf16.msra.mxu1 %v13583_v18 }
0x12ed   : > { %11268 = vmatprep.subr.bf16.mxu1 %v13598_v51  ;;  %11284 = vmatprep.subr.bf16.mxu0 %v13600_v15  ;;  %v14931_v51 = vld [vmem:[#allocation31_spill] sm:$0xff]  ;;  %v14932_v15 = vld [vmem:[#allocation30_spill] sm:$0xff] }
0x12ef   : > { %9574 = vmatmul.mubr.msk.f32.vlgmr.msra.gmra.mrb[46].mxu0 %vm929_vm1, %v13883_v34  ;;  %10489 = vmatmul.mubr.msk.f32.vlgmr.msra.gmra.mrb[42].mxu1 %vm929_vm1, %v13883_v34 }
0x12f0   : > { %11270 = vmatpush1.bf16.msra.mxu1 %v13602_v0  ;;  %11286 = vmatpush1.bf16.msra.mxu0 %v13605_v29  ;;  %v14933_v0 = vld [vmem:[#allocation33_spill] sm:$0xff]  ;;  %v14934_v29 = vld [vmem:[#allocation32_spill] sm:$0xff] }
0x12f1   : > { %11272 = vmatprep.subr.bf16.mxu1 %v13609_v62  ;;  %11288 = vmatprep.subr.bf16.mxu0 %v13611_v17  ;;  %v14935_v62 = vld [vmem:[#allocation34_spill] sm:$0xff]  ;;  %v14936_v17 = vld [vmem:[#allocation35_spill] sm:$0xff] }
0x12f2   : > { %5621 = vmatprep.mubr.f32.mxu1 %v14867_v45  ;;  %5692 = vmatprep.mubr.f32.mxu0 %v14867_v45 }
0x12f4   : > { %11274 = vmatpush1.bf16.msra.mxu1 %v13614_v4  ;;  %11290 = vmatpush1.bf16.msra.mxu0 %v13618_v32  ;;  %v14937_v4 = vld [vmem:[#allocation36_spill] sm:$0xff]  ;;  %v14938_v32 = vld [vmem:[#allocation37_spill] sm:$0xff] }
0x12f5   : > { %11276 = vmatprep.subr.bf16.mxu1 %v13620_v14  ;;  %11292 = vmatprep.subr.bf16.mxu0 %v13622_v40  ;;  %v14939_v14 = vld [vmem:[#allocation38_spill] sm:$0xff] }
0x12f6   : > { %v6351_v40 = vld [vmem:[#allocation7 + $0x40] sm:$0xff] }
0x12f8   : > { %11278 = vmatpush1.bf16.msra.mxu1 %v13625_v6  ;;  %11294 = vmatpush1.bf16.msra.mxu0 %v13629_v22  ;;  %v6352_v6 = vld [vmem:[#allocation7 + $0x48] sm:$0xff] }
0x12f9   : > { %11280 = vmatprep.subr.bf16.mxu1 %v13634_v3  ;;  %11296 = vmatprep.subr.bf16.mxu0 %v13636_v20  ;;  %v14940_v22 = vld [vmem:[#allocation39_spill] sm:$0xff]  ;;  %v13961_v3 = vpack.c.bf16 %v6352_v6, %v6351_v40  ;;  %v6353_v20 = vld [vmem:[#allocation7 + $0x50] sm:$0xff]  ;;  %v14948_v6 = vld [vmem:[#allocation50_spill] sm:$0xff] }
0x12fc   : > { %11282 = vmatpush1.bf16.msra.mxu1 %v13638_v42  ;;  %11298 = vmatpush1.bf16.msra.mxu0 %v13641_v11  ;;  %v6354_v42 = vld [vmem:[#allocation7 + $0x58] sm:$0xff] }
0x12fd   : > { %11299 = vmatprep.subr.bf16.mxu0 %v14869_v7  ;;  %11311 = vmatprep.subr.bf16.mxu1 %v14869_v7  ;;  %v13967_v11 = vpack.c.bf16 %v6354_v42, %v6353_v20  ;;  %v14949_v20 = vld [vmem:[#allocation51_spill] sm:$0xff] }
0x13ba   : > { %v5335_v49 = vpop.f32.mrb[44].mxu0 }
0x13bb   : > { %v5336_v12 = vadd.f32 %v5335_v49, %v13648_v26  ;;  %v10479_v46 = vpop.f32.mrb[45].mxu0  ;;  %v6358_v26 = vld [vmem:[#allocation9 + $0x40] sm:$0xff] }
0x13bd   : > { %vm5339_vm14 = vcmp.gt.f32.partialorder %v5336_v12, 0.0  ;;  %v5340_v1 = vmul.f32 0.2, %v5336_v12 }
0x13bf   : > { %v5341_v31 = vsel %vm5339_vm14, %v5336_v12, %v5340_v1  ;;  %vm14951_vm14 = vcmask 293888  }
0x13c0   : > { %9576 = vmatmul.mubr.msk.f32.vlgmr.msra.gmra.mrb[40].mxu1 %vm829_vm3, %v5341_v31  ;;  %9577 = vmatmul.mubr.msk.f32.vlgmr.msra.gmra.mrb[46].mxu0 %vm829_vm3, %v5341_v31 }
0x13c1   : > { %11301 = vmatpush3.bf16.msra.mxu0 %v13651_v56  ;;  %11313 = vmatpush3.bf16.msra.mxu1 %v13653_v63  ;;  %v6359_v56 = vld [vmem:[#allocation9 + $0x48] sm:$0xff] }
0x13c2   : > { %v13927_v33 = vpop.f32.mrb[42].mxu1  ;;  %11302 = vmatprep.subr.bf16.mxu0 %v14869_v7  ;;  %11314 = vmatprep.subr.bf16.mxu1 %v14869_v7  ;;  %v13978_v63 = vpack.c.bf16 %v6359_v56, %v6358_v26  ;;  %v14950_v56 = vld [vmem:[#allocation52_spill] sm:$0xff] }
0x13c3   : > { %v10490_v18 = vpop.f32.mrb[43].mxu1  ;;  %10507 = vmatprep.mubr.msk.f32.mxu0 %vm12346_vm0, %v14867_v45  ;;  %10526 = vmatprep.mubr.msk.f32.mxu1 %vm12346_vm0, %v14867_v45  ;;  %v5551_v37 = vadd.f32 %v13927_v33, %v14947_v53  ;;  %v14010_v33 = vld [vmem:[%s14830_s20 + $0x2] sm:$0x1] }
0x13c5   : > { %11304 = vmatpush3.bf16.msra.mxu0 %v14931_v51  ;;  %11316 = vmatpush3.bf16.msra.mxu1 %v14932_v15 }
0x13c6   : > { %11305 = vmatprep.subr.bf16.mxu0 %v14869_v7  ;;  %11317 = vmatprep.subr.bf16.mxu1 %v14869_v7 }
0x13c9   : > { %11307 = vmatpush3.bf16.msra.mxu0 %v14933_v0  ;;  %11319 = vmatpush3.bf16.msra.mxu1 %v14934_v29 }
0x13ca   : > { %11308 = vmatprep.subr.bf16.mxu0 %v14869_v7  ;;  %11320 = vmatprep.subr.bf16.mxu1 %v14869_v7 }
0x13cd   : > { %11310 = vmatpush3.bf16.msra.mxu0 %v14935_v62  ;;  %11322 = vmatpush3.bf16.msra.mxu1 %v14936_v17 }
0x13ce   : > { %11323 = vmatprep.subr.bf16.mxu0 %v14869_v7  ;;  %11335 = vmatprep.subr.bf16.mxu1 %v14869_v7 }
0x13d0   : > { %10508 = vmatmul.mubr.msk.f32.vlgmr.msra.gmra.mrb[48].mxu0 %vm829_vm3, %v5341_v31  ;;  %10527 = vmatmul.mubr.msk.f32.vlgmr.msra.gmra.mrb[44].mxu1 %vm829_vm3, %v13871_v39 }
0x13d1   : > { %11325 = vmatpush3.bf16.msra.mxu0 %v14937_v4  ;;  %10545 = vmatprep.mubr.msk.f32.mxu0 %vm12346_vm0, %v14867_v45 }
0x13d2   : > { %11326 = vmatprep.subr.bf16.mxu0 %v14869_v7  ;;  %10554 = vmatprep.mubr.msk.f32.mxu1 %vm12346_vm0, %v14867_v45 }
0x13d5   : > { %11328 = vmatpush3.bf16.msra.mxu0 %v14938_v32 }
0x13d6   : > { %11329 = vmatprep.subr.bf16.mxu0 %v14869_v7 }
0x13d9   : > { %11331 = vmatpush3.bf16.msra.mxu0 %v14939_v14 }
0x13da   : > { %11332 = vmatprep.subr.bf16.mxu0 %v14869_v7 }
0x13dd   : > { %11334 = vmatpush3.bf16.msra.mxu0 %v14940_v22 }
0x13de   : > { %11341 = vmatprep.subr.bf16.mxu0 %v14869_v7 }
0x13e0   : > { %10546 = vmatmul.mubr.msk.f32.vlgmr.msra.gmra.mrb[50].mxu0 %vm829_vm3, %v13871_v39 }
0x13e1   : > { %11343 = vmatpush3.bf16.msra.mxu0 %v13961_v3  ;;  %10584 = vmatprep.mubr.msk.f32.mxu0 %vm12346_vm0, %v14867_v45 }
0x13e2   : > { %11344 = vmatprep.subr.bf16.mxu0 %v14869_v7 }
0x13e5   : > { %11346 = vmatpush3.bf16.msra.mxu0 %v13967_v11 }
0x13e6   : > { %11353 = vmatprep.subr.bf16.mxu0 %v14869_v7 }
0x13e8   : > { %10585 = vmatmul.mubr.msk.f32.vlgmr.msra.gmra.mrb[52].mxu0 %vm929_vm1, %v13883_v34 }
0x13e9   : > { %10606 = vmatprep.mubr.msk.f32.mxu0 %vm12346_vm0, %v14867_v45  ;;  %11355 = vmatpush3.bf16.msra.mxu0 %v13978_v63 }
0x13ea   : > { %11356 = vmatprep.subr.bf16.mxu0 %v14869_v7 }
0x13ed   : > { %11358 = vmatpush3.bf16.msra.mxu0 %v13982_v59 }
0x1493   : > { %v5623_v35 = vpop.f32.mrb[40].mxu1  ;;  %v5694_v2 = vpop.f32.mrb[46].mxu0 }
0x1494   : > { %v11599_v23 = vadd.f32 %v5623_v35, %v14941_v30  ;;  %v11601_v8 = vadd.f32 %v5694_v2, %v14942_v44  ;;  %v5625_v24 = vpop.f32.mrb[41].mxu1  ;;  %v5696_v38 = vpop.f32.mrb[47].mxu0 }
0x1495   : > { %v11600_v25 = vadd.f32 %v5625_v24, %v14943_v19  ;;  %v11602_v22 = vadd.f32 %v5696_v38, %v14948_v6  ;;  %v5980_v30 = vpop.xlane.xlu1 %5979 }
0x1496   : > { %v13989_v27 = vadd.f32 %v11599_v23, %v14944_v41  ;;  %v5776_v28 = vadd.f32 %v11601_v8, %v14945_v9  ;;  %v5995_v23 = vpop.xlane.xlu0 %5994  ;;  %v5987_v24 = vmul.f32 0.015625, %v5980_v30 }
0x1497   : > { %v5775_v50 = vadd.f32 %v11600_v25, %v14946_v60  ;;  %v5777_v42 = vadd.f32 %v11602_v22, %v14949_v20  ;;  %v6002_v41 = vmul.f32 0.015625, %v5995_v23 }
0x1498   : > { %v5781_v21 = vrot.slane %v13989_v27, 7  ;;  %v5802_v57 = vrot.slane %v5776_v28, 4  ;;  %v5795_v54 = vrot.slane %v5776_v28, 5  ;;  %v5807_v52 = vrot.slane %v5776_v28, 3 }
0x1499   : > { %v5782_v16 = vrot.slane %v5775_v50, 7  ;;  %v5789_v12 = vrot.slane %v5775_v50, 6  ;;  %v5794_v46 = vrot.slane %v5775_v50, 5  ;;  %v5808_v26 = vrot.slane %v5777_v42, 3 }
0x149a   : > { %5783 = vrot.lane.b32.xlu1 %v5781_v21, %s14918_s18  ;;  %5803 = vrot.lane.b32.xlu0 %v5802_v57, %s14755_s8  ;;  %v5820_v48 = vrot.slane %v5777_v42, 1  ;;  %v5815_v35 = vrot.slane %v5777_v42, 2  ;;  %v6005_v25 = vmul.f32 %v5987_v24, %v5987_v24  ;;  %s14984_s8 = smov 103  }
0x149c   : > { %v6008_v28 = vsub.f32 %v6002_v41, %v6005_v25 }
0x149e   : > { %5785 = vrot.lane.b32.xlu0 %v5782_v16, %s14918_s18  ;;  %5798 = vrot.lane.b32.xlu1 %v5795_v54, %s12350_s28  ;;  %v6014_v57 = vadd.f32 1e-05, %v6008_v28 }
0x14a0   : > { %11882 = vrsqrt.f32 %v6014_v57 }
0x14a2   : > { %5809 = vrot.lane.b32.xlu1 %v5807_v52, %s12352_s7 }
0x14a3   : > { %v14001_v43 = vpop.f32.mrb[44].mxu1  ;;  %v5765_v47 = vpop.f32.mrb[48].mxu0 }
0x14a4   : > { %v5773_v61 = vadd.f32 %v5765_v47, %v5551_v37  ;;  %v10509_v10 = vpop.f32.mrb[49].mxu0  ;;  %v10528_v49 = vpop.f32.mrb[45].mxu1  ;;  %v5981_v0 = vsel %vm829_vm3, %v14001_v43, 0.0  ;;  %v5991_v29 = vmul.f32 %v14001_v43, %v14001_v43 }
0x14a6   : > { %5790 = vrot.lane.b32.xlu1 %v5789_v12, %s12351_s24  ;;  %v5996_v4 = vsel %vm829_vm3, %v5991_v29, 0.0  ;;  %v5778_v13 = vadd.f32 %v5773_v61, %v14950_v56 }
0x14a8   : > { %v5821_v2 = vrot.slane %v5778_v13, 1 }
0x14aa   : > { %5796 = vrot.lane.b32.xlu1 %v5794_v46, %s12350_s28 }
0x14b3   : > { %v14005_v1 = vpop.f32.mrb[50].mxu0 }
0x14b4   : > { %v10547_v31 = vpop.f32.mrb[51].mxu0  ;;  %v5992_v32 = vmul.f32 %v14005_v1, %v14005_v1  ;;  %v5984_v40 = vsel %vm829_vm3, %v14005_v1, 0.0 }
0x14b5   : > { %v11883_v31 = vpop.eup %11882 }
0x14b6   : > { %v5999_v14 = vsel %vm829_vm3, %v5992_v32, 0.0 }
0x14bb   : > { %v6521_v18 = vpop.f32.mrb[52].mxu0 }
0x14bc   : > { %v6522_v51 = vadd.f32 %v14010_v33, %v6521_v18  ;;  %v10586_v15 = vpop.f32.mrb[53].mxu0  ;;  %v6011_v18 = vsub.f32 %v13871_v39, %v5987_v24 }
0x14bd   : > { %5982 = vadd.xlane.f32.xlu0 %v5981_v0 }
0x14be   : > { %vm6525_vm4 = vcmp.gt.f32.partialorder %v6522_v51, 0.0  ;;  %v6526_v62 = vmul.f32 0.2, %v6522_v51  ;;  %v6020_v22 = vmul.f32 %v11883_v31, %v6011_v18  ;;  %v6388_v18 = vld [vmem:[#allocation12 + $0x40] sm:$0xff] }
0x14c0   : > { %v6527_v17 = vsel %vm6525_vm4, %v6522_v51, %v6526_v62  ;;  %vm14952_vm4 = vcmask 1046528  }
0x14c1   : > { %10607 = vmatmul.mubr.msk.f32.vlgmr.msra.gmra.mrb[54].mxu0 %vm929_vm1, %v6527_v17  ;;  %5997 = vadd.xlane.f32.xlu0 %v5996_v4 }
0x14c2   : > { %6839 = vmatprep.mubr.f32.mxu0 %v14867_v45 }
0x14c5   : > { %6000 = vadd.xlane.f32.xlu0 %v5999_v14 }
0x14ce   : > { %5985 = vadd.xlane.f32.xlu1 %v5984_v40 }
0x14db   : > { %5811 = vrot.lane.b32.xlu0 %v5808_v26, %s12352_s7 }
0x14df   : > { %5822 = vrot.lane.b32.xlu0 %v5820_v48, %s14759_s27  ;;  %5816 = vrot.lane.b32.xlu1 %v5815_v35, %s12354_s6 }
0x14e3   : > { %5824 = vrot.lane.b32.xlu1 %v5821_v2, %s14759_s27  ;;  %s14974_s27 = smov 112  }
0x150c   : > { %v5784_v44 = vpop.permute.xlu1 %5783  ;;  %v5804_v8 = vpop.permute.xlu0 %5803 }
0x1510   : > { %v5799_v38 = vpop.permute.xlu1 %5798  ;;  %v5786_v19 = vpop.permute.xlu0 %5785 }
0x1511   : > { %v5787_v10 = vsel %vm1724_vm5, %v5784_v44, %v5786_v19 }
0x1512   : > { %v5828_v51 = vsel %vm1769_vm7, %v13989_v27, %v5787_v10 }
0x1514   : > { %v5810_v60 = vpop.permute.xlu1 %5809 }
0x1518   : > { %v5791_v52 = vpop.permute.xlu1 %5790 }
0x1519   : > { %v5829_v0 = vsel %vm1771_vm8, %v5828_v51, %v5791_v52  ;;  %v6344_v52 = vld [vmem:[#allocation6 + $0x40] sm:$0xff]  ;;  %v6389_v51 = vld [vmem:[#allocation12 + $0x48] sm:$0xff] }
0x151c   : > { %v5797_v47 = vpop.permute.xlu1 %5796 }
0x151d   : > { %v5800_v12 = vsel %vm1738_vm6, %v5797_v47, %v5799_v38  ;;  %v6346_v47 = vld [vmem:[#allocation6 + $0x50] sm:$0xff] }
0x151e   : > { %v5830_v32 = vsel %vm1773_vm9, %v5829_v0, %v5800_v12  ;;  %v6366_v12 = vld [vmem:[#allocation10 + $0x148] sm:$0xff]  ;;  %v14088_v0 = vpack.c.bf16 %v6389_v51, %v6388_v18  ;;  %v6401_v18 = vld [vmem:[#allocation15 + $0x2b0] sm:$0xff]  ;;  %v6398_v51 = vld [vmem:[#allocation15 + $0x298] sm:$0xff] }
0x151f   : > { %v5831_v42 = vsel %vm1775_vm11, %v5830_v32, %v5804_v8  ;;  %v6390_v32 = vld [vmem:[#allocation12 + $0x50] sm:$0xff] }
0x154a   : > { %v5983_v9 = vpop.xlane.xlu0 %5982 }
0x154b   : > { %v5988_v50 = vmul.f32 0.015625, %v5983_v9 }
0x154d   : > { %v6006_v16 = vmul.f32 %v5988_v50, %v5988_v50  ;;  %v6012_v29 = vsub.f32 %v14001_v43, %v5988_v50 }
0x154e   : > { %v5998_v21 = vpop.xlane.xlu0 %5997 }
0x154f   : > { %v6003_v54 = vmul.f32 0.015625, %v5998_v21 }
0x1551   : > { %v6009_v53 = vsub.f32 %v6003_v54, %v6006_v16 }
0x1552   : > { %v6001_v61 = vpop.xlane.xlu0 %6000 }
0x1553   : > { %v6015_v37 = vadd.f32 1e-05, %v6009_v53  ;;  %v6004_v62 = vmul.f32 0.015625, %v6001_v61  ;;  %v6345_v53 = vld [vmem:[#allocation6 + $0x48] sm:$0xff]  ;;  %v6347_v61 = vld [vmem:[#allocation6 + $0x58] sm:$0xff] }
0x1555   : > { %11884 = vrsqrt.f32 %v6015_v37  ;;  %v14070_v37 = vpack.c.bf16 %v6345_v53, %v6344_v52 }
0x1556   : > { %v5812_v15 = vpop.permute.xlu0 %5811 }
0x1557   : > { %v5813_v40 = vsel %vm1752_vm10, %v5810_v60, %v5812_v15  ;;  %v6365_v15 = vld [vmem:[#allocation10 + $0x140] sm:$0xff] }
0x1558   : > { %v5832_v56 = vsel %vm1777_vm12, %v5831_v42, %v5813_v40  ;;  %v6375_v40 = vld [vmem:[#allocation10 + $0x190] sm:$0xff]  ;;  %v6373_v42 = vld [vmem:[#allocation10 + $0x180] sm:$0xff] }
0x155a   : > { %v5823_v26 = vpop.permute.xlu0 %5822 }
0x155b   : > { %v5986_v49 = vpop.xlane.xlu1 %5985 }
0x155c   : > { %v5989_v46 = vmul.f32 0.015625, %v5986_v49  ;;  %v14075_v49 = vpack.c.bf16 %v6347_v61, %v6346_v47  ;;  %v6382_v47 = vld [vmem:[#allocation10 + $0x1c8] sm:$0xff]  ;;  %v6379_v61 = vld [vmem:[#allocation10 + $0x1b0] sm:$0xff] }
0x155e   : > { %v6007_v17 = vmul.f32 %v5989_v46, %v5989_v46  ;;  %v6013_v2 = vsub.f32 %v14005_v1, %v5989_v46  ;;  %v6371_v46 = vld [vmem:[#allocation10 + $0x170] sm:$0xff] }
0x155f   : > { %v11885_v4 = vpop.eup %11884  ;;  %v5817_v14 = vpop.permute.xlu1 %5816  ;;  %v14086_v31 = vpack.c.bf16 %v6371_v46, %v6366_v12  ;;  %v6396_v46 = vld [vmem:[#allocation15 + $0x288] sm:$0xff] }
0x1560   : > { %v6010_v6 = vsub.f32 %v6004_v62, %v6007_v17  ;;  %v6021_v20 = vmul.f32 %v11885_v4, %v6012_v29  ;;  %v5833_v43 = vsel %vm1779_vm13, %v5832_v56, %v5817_v14  ;;  %v6370_v29 = vld [vmem:[#allocation10 + $0x168] sm:$0xff]  ;;  %v6381_v17 = vld [vmem:[#allocation10 + $0x1c0] sm:$0xff]  ;;  %v6391_v14 = vld [vmem:[#allocation12 + $0x58] sm:$0xff] }
0x1561   : > { %11366 = vmatprep.subr.bf16.mxu0 %v14086_v31  ;;  %v14091_v62 = vpack.c.bf16 %v6370_v29, %v6365_v15  ;;  %v14163_v15 = vpack.c.bf16 %v6401_v18, %v6396_v46  ;;  %v6403_v29 = vld [vmem:[#allocation15 + $0x2c0] sm:$0xff]  ;;  %v6426_v18 = vld [vmem:[#allocation15 + $0x378] sm:$0xff] }
0x1562   : > { %v6016_v39 = vadd.f32 1e-05, %v6010_v6  ;;  %v11336_v27 = vpack.c.bf16 %v6021_v20, %v6020_v22  ;;  %v14098_v6 = vpack.c.bf16 %v6391_v14, %v6390_v32  ;;  %v6380_v22 = vld [vmem:[#allocation10 + $0x1b8] sm:$0xff]  ;;  %v14165_v32 = vpack.c.bf16 %v6403_v29, %v6398_v51  ;;  %v6431_v51 = vld [vmem:[#allocation15 + $0x3a0] sm:$0xff]  ;;  %v6428_v29 = vld [vmem:[#allocation15 + $0x388] sm:$0xff] }
0x1563   : > { %v5825_v13 = vpop.permute.xlu1 %5824  ;;  %11368 = vmatpush1.bf16.msra.mxu0 %v14091_v62  ;;  %v14101_v20 = vpack.c.bf16 %v6380_v22, %v6375_v40  ;;  %v6397_v40 = vld [vmem:[#allocation15 + $0x290] sm:$0xff]  ;;  %v6402_v22 = vld [vmem:[#allocation15 + $0x2b8] sm:$0xff] }
0x1564   : > { %11886 = vrsqrt.f32 %v6016_v39  ;;  %v5826_v48 = vsel %vm14951_vm14, %v5823_v26, %v5825_v13  ;;  %11337 = vmatpush3.bf16.msra.mxu1 %v11336_v27  ;;  %v6368_v39 = vld [vmem:[#allocation10 + $0x158] sm:$0xff] }
0x1565   : > { %v5834_v35 = vsel %vm14952_vm4, %v5833_v43, %v5826_v48  ;;  %10552 = vmatprep.subr.mxu1 %v14867_v45 }
0x1566   : > { %6107 = vrot.lane.b32.xlu1 %v5834_v35, %s14757_s5  ;;  %6025 = vperm.xlu0 %11850, %v5834_v35   ;;  %s14981_s5 = smov 36  }
0x156a   : > { %6104 = vperm.xlu1 %11851, %v5834_v35   ;;  %6188 = vrot.lane.b32.xlu0 %v5834_v35, %s14927_s0 }
0x156b   : > { %11852 = vset.pattern.permute.xlu0 %v14898_v36 }
0x156e   : > { %v11887_v30 = vpop.eup %11886  ;;  %6266 = vrot.lane.b32.xlu1 %v5834_v35, %s14928_s1  ;;  %6185 = vperm.xlu0 %11852, %v5834_v35  }
0x156f   : > { %v6022_v23 = vmul.f32 %v11887_v30, %v6013_v2  ;;  %11853 = vset.pattern.permute.xlu1 %v14929_v5 }
0x1571   : > { %10553 = vmatpush3.msra.mxu1 %v6022_v23 }
0x1572   : > { %6263 = vperm.xlu1 %11853, %v5834_v35   ;;  %10555 = vmatmul.mubr.msk.f32.vlgmr.msra.gmra.mrb[46].mxu1 %vm1977_vm2, %v5834_v35 }
0x1573   : > { %10557 = vmatprep.subr.mxu1 %v14867_v45  ;;  %10559 = vmatprep.mubr.msk.f32.mxu1 %vm12346_vm0, %v14867_v45 }
0x1574   : > { %11854 = vset.pattern.permute.xlu0 %v14868_v58 }
0x1576   : > { %11855 = vset.pattern.permute.xlu1 %v14930_v55 }
0x1594   : > { %v14059_v1 = vpop.f32.mrb[54].mxu0 }
0x1595   : > { %v10608_v44 = vpop.f32.mrb[55].mxu0 }
0x1596   : > { %v14122_v44 = vld [vmem:[%s14831_s2 + $0x2] sm:$0x1] }
0x15d8   : > { %v6108_v9 = vpop.permute.xlu1 %6107 }
0x15e5   : > { %v6026_v8 = vpop.permute.xlu0 %6025 }
0x15e9   : > { %v6105_v28 = vpop.permute.xlu1 %6104  ;;  %v6189_v54 = vpop.permute.xlu0 %6188 }
0x15ed   : > { %v6267_v10 = vpop.permute.xlu1 %6266  ;;  %v6186_v56 = vpop.permute.xlu0 %6185 }
0x15f1   : > { %v6264_v26 = vpop.permute.xlu1 %6263 }
0x15f2   : > { %v11603_v13 = vadd.f32 %v6264_v26, %v6186_v56  ;;  %v6411_v26 = vld [vmem:[#allocation15 + $0x300] sm:$0xff]  ;;  %v6408_v56 = vld [vmem:[#allocation15 + $0x2e8] sm:$0xff] }
0x1645   : > { %v6096_v24 = vpop.f32.mrb[46].mxu1 }
0x1646   : > { %v6097_v38 = vadd.f32 %v6096_v24, %v6026_v8  ;;  %v10556_v19 = vpop.f32.mrb[47].mxu1  ;;  %v6367_v24 = vld [vmem:[#allocation10 + $0x150] sm:$0xff] }
0x1648   : > { %vm6100_vm14 = vcmp.gt.f32.partialorder %v6097_v38, 0.0  ;;  %v6101_v25 = vmul.f32 0.2, %v6097_v38 }
0x164a   : > { %v6102_v41 = vsel %vm6100_vm14, %v6097_v38, %v6101_v25  ;;  %v6372_v25 = vld [vmem:[#allocation10 + $0x178] sm:$0xff] }
0x164b   : > { %10558 = vmatpush3.msra.mxu1 %v6102_v41  ;;  %v6369_v41 = vld [vmem:[#allocation10 + $0x160] sm:$0xff] }
0x164c   : > { %10560 = vmatmul.mubr.msk.f32.vlgmr.msra.gmra.mrb[48].mxu1 %vm2059_vm15, %v6108_v9  ;;  %10562 = vmatprep.subr.mxu1 %v14867_v45  ;;  %v6374_v9 = vld [vmem:[#allocation10 + $0x188] sm:$0xff] }
0x164d   : > { %10564 = vmatprep.mubr.msk.f32.mxu1 %vm12346_vm0, %v14867_v45 }
0x171f   : > { %v6177_v60 = vpop.f32.mrb[48].mxu1 }
0x1720   : > { %v6178_v50 = vadd.f32 %v6177_v60, %v6105_v28  ;;  %v10561_v21 = vpop.f32.mrb[49].mxu1  ;;  %v14128_v28 = vld [vmem:[%s14832_s30 + $0x2] sm:$0x1]  ;;  %v6378_v60 = vld [vmem:[#allocation10 + $0x1a8] sm:$0xff] }
0x1722   : > { %vm6181_vm4 = vcmp.gt.f32.partialorder %v6178_v50, 0.0  ;;  %v6182_v57 = vmul.f32 0.2, %v6178_v50 }
0x1724   : > { %v6183_v16 = vsel %vm6181_vm4, %v6178_v50, %v6182_v57  ;;  %v6383_v50 = vld [vmem:[#allocation10 + $0x1d0] sm:$0xff]  ;;  %v14131_v57 = vpack.c.bf16 %v6372_v25, %v6367_v24 }
0x1725   : > { %10563 = vmatpush3.msra.mxu1 %v6183_v16  ;;  %v14133_v16 = vpack.c.bf16 %v6374_v9, %v6369_v41  ;;  %v14138_v53 = vpack.c.bf16 %v6383_v50, %v6378_v60  ;;  %v6412_v24 = vld [vmem:[#allocation15 + $0x308] sm:$0xff]  ;;  %v6418_v9 = vld [vmem:[#allocation15 + $0x338] sm:$0xff]  ;;  %v6423_v60 = vld [vmem:[#allocation15 + $0x360] sm:$0xff] }
0x1726   : > { %10565 = vmatmul.mubr.msk.f32.vlgmr.msra.gmra.mrb[50].mxu1 %vm2059_vm15, %v6189_v54  ;;  %11338 = vmatprep.subr.bf16.mxu1 %v14869_v7  ;;  %v6377_v54 = vld [vmem:[#allocation10 + $0x1a0] sm:$0xff] }
0x1727   : > { %11340 = vmatpush3.bf16.msra.mxu1 %v11336_v27  ;;  %10573 = vmatprep.mubr.msk.f32.mxu1 %vm12346_vm0, %v14867_v45  ;;  %v14105_v27 = vpack.c.bf16 %v6373_v42, %v6368_v39  ;;  %v6406_v39 = vld [vmem:[#allocation15 + $0x2d8] sm:$0xff]  ;;  %v14170_v42 = vpack.c.bf16 %v6402_v22, %v6397_v40  ;;  %v6415_v50 = vld [vmem:[#allocation15 + $0x320] sm:$0xff]  ;;  %v6425_v40 = vld [vmem:[#allocation15 + $0x370] sm:$0xff] }
0x1728   : > { %10571 = vmatprep.subr.mxu1 %v14867_v45  ;;  %v6430_v22 = vld [vmem:[#allocation15 + $0x398] sm:$0xff] }
0x172b   : > { %10572 = vmatpush3.msra.mxu1 %v6022_v23 }
0x172c   : > { %11347 = vmatprep.subr.bf16.mxu1 %v14869_v7 }
0x172e   : > { %10574 = vmatmul.mubr.msk.f32.vlgmr.msra.gmra.mrb[50].mxu1 %vm1977_vm2, %v6267_v10  ;;  %v6384_v10 = vld [vmem:[#allocation10 + $0x1d8] sm:$0xff] }
0x172f   : > { %11349 = vmatpush3.bf16.msra.mxu1 %v14070_v37  ;;  %10595 = vmatprep.mubr.msk.f32.mxu1 %vm12346_vm0, %v14867_v45  ;;  %v14148_v12 = vpack.c.bf16 %v6384_v10, %v6379_v61  ;;  %v6422_v61 = vld [vmem:[#allocation15 + $0x358] sm:$0xff] }
0x1730   : > { %11350 = vmatprep.subr.bf16.mxu1 %v14869_v7 }
0x1733   : > { %11352 = vmatpush3.bf16.msra.mxu1 %v14075_v49 }
0x1734   : > { %11359 = vmatprep.subr.bf16.mxu1 %v14869_v7 }
0x1736   : > { %10596 = vmatmul.mubr.msk.f32.vlgmr.msra.gmra.mrb[52].mxu1 %vm929_vm1, %v13883_v34  ;;  %v6376_v34 = vld [vmem:[#allocation10 + $0x198] sm:$0xff] }
0x1737   : > { %10617 = vmatprep.mubr.msk.f32.mxu1 %vm12346_vm0, %v14867_v45  ;;  %11361 = vmatpush3.bf16.msra.mxu1 %v14088_v0  ;;  %v14096_v4 = vpack.c.bf16 %v6381_v17, %v6376_v34  ;;  %v6395_v34 = vld [vmem:[#allocation15 + $0x280] sm:$0xff]  ;;  %v6400_v17 = vld [vmem:[#allocation15 + $0x2a8] sm:$0xff] }
0x1738   : > { %11362 = vmatprep.subr.bf16.mxu1 %v14869_v7  ;;  %v14167_v14 = vpack.c.bf16 %v6400_v17, %v6395_v34  ;;  %v14199_v34 = vpack.c.bf16 %v6431_v51, %v6426_v18  ;;  %v6433_v17 = vld [vmem:[#allocation15 + $0x3b0] sm:$0xff]  ;;  %v6414_v51 = vld [vmem:[#allocation15 + $0x318] sm:$0xff] }
0x1739   : > { %11370 = vmatprep.subr.bf16.mxu0 %v14096_v4  ;;  %v6409_v18 = vld [vmem:[#allocation15 + $0x2f0] sm:$0xff] }
0x173a   : > { %11372 = vmatpush1.bf16.msra.mxu0 %v14101_v20 }
0x173b   : > { %11364 = vmatpush3.bf16.msra.mxu1 %v14098_v6  ;;  %11381 = vmatprep.subr.bf16.mxu0 %v14869_v7 }
0x173c   : > { %11374 = vmatprep.subr.bf16.mxu1 %v14105_v27 }
0x1801   : > { %v6336_v43 = vpop.f32.mrb[50].mxu1 }
0x1802   : > { %v14109_v48 = vadd.f32 %v11603_v13, %v6336_v43  ;;  %v10575_v35 = vpop.f32.mrb[51].mxu1  ;;  %v6413_v13 = vld [vmem:[#allocation15 + $0x310] sm:$0xff]  ;;  %v14174_v43 = vpack.c.bf16 %v6411_v26, %v6406_v39  ;;  %v14201_v39 = vpack.c.bf16 %v6433_v17, %v6428_v29  ;;  %v14203_v26 = vpack.c.bf16 %v6430_v22, %v6425_v40  ;;  %v6441_v17 = vld [vmem:[#allocation16 + $0x98] sm:$0xff] }
0x1803   : > { %v14176_v35 = vpack.c.bf16 %v6413_v13, %v6408_v56  ;;  %v6427_v56 = vld [vmem:[#allocation15 + $0x380] sm:$0xff]  ;;  %v6432_v13 = vld [vmem:[#allocation15 + $0x3a8] sm:$0xff]  ;;  %v6440_v29 = vld [vmem:[#allocation16 + $0x90] sm:$0xff]  ;;  %v14224_v22 = vpack.c.bf16 %v6414_v51, %v6409_v18 }
0x1804   : > { %9585 = vst.msk [vmem:[%s13057_s10 + $0x20] sm:$0xff] %vm829_vm3, %v14109_v48  ;;  %v7437_v2 = vsel %vm829_vm3, %v14109_v48, 0.0  ;;  %v7449_v30 = vmul.f32 %v14109_v48, %v14109_v48  ;;  %v6434_v18 = vld [vmem:[#allocation15 + $0x3b8] sm:$0xff]  ;;  %v6444_v51 = vld [vmem:[#allocation16 + $0xb0] sm:$0xff] }
0x1805   : > { %7438 = vadd.xlane.f32.xlu1 %v7437_v2  ;;  %v6405_v2 = vld [vmem:[#allocation15 + $0x2d0] sm:$0xff]  ;;  %14955 = vst [vmem:[#allocation55_spill] sm:$0xff] %v14224_v22 }
0x1806   : > { %v7452_v23 = vsel %vm829_vm3, %v7449_v30, 0.0  ;;  %v6410_v30 = vld [vmem:[#allocation15 + $0x2f8] sm:$0xff] }
0x1807   : > { %7453 = vadd.xlane.f32.xlu0 %v7452_v23  ;;  %v6407_v23 = vld [vmem:[#allocation15 + $0x2e0] sm:$0xff] }
0x1808   : > { %v14183_v25 = vpack.c.bf16 %v6412_v24, %v6407_v23  ;;  %v6399_v23 = vld [vmem:[#allocation15 + $0x2a0] sm:$0xff] }
0x1809   : > { %v6594_v8 = vpop.f32.mrb[52].mxu1 }
0x180a   : > { %v6595_v38 = vadd.f32 %v14122_v44, %v6594_v8  ;;  %v10597_v19 = vpop.f32.mrb[53].mxu1  ;;  %v14179_v8 = vpack.c.bf16 %v6410_v30, %v6405_v2  ;;  %v14206_v2 = vpack.c.bf16 %v6432_v13, %v6427_v56  ;;  %v14213_v30 = vld [vmem:[#allocation13 + $0x2] sm:$0x1]  ;;  %v14226_v56 = vpack.c.bf16 %v6441_v17, %v6440_v29  ;;  %v6419_v13 = vld [vmem:[#allocation15 + $0x340] sm:$0xff] }
0x180b   : > { %v6421_v19 = vld [vmem:[#allocation15 + $0x350] sm:$0xff]  ;;  %v6445_v29 = vld [vmem:[#allocation16 + $0xb8] sm:$0xff] }
0x180c   : > { %v6671_v21 = vadd.f32 %v14059_v1, %v6595_v38  ;;  %v14146_v1 = vpack.c.bf16 %v6382_v47, %v6377_v54  ;;  %v6416_v38 = vld [vmem:[#allocation15 + $0x328] sm:$0xff]  ;;  %v6417_v47 = vld [vmem:[#allocation15 + $0x330] sm:$0xff]  ;;  %14956 = vst [vmem:[#allocation59_spill] sm:$0xff] %v14226_v56 }
0x180d   : > { %v14185_v41 = vpack.c.bf16 %v6421_v19, %v6416_v38  ;;  %v6420_v54 = vld [vmem:[#allocation15 + $0x348] sm:$0xff]  ;;  %v14194_v46 = vpack.c.bf16 %v6422_v61, %v6417_v47  ;;  %v6438_v19 = vld [vmem:[#allocation16 + $0x80] sm:$0xff] }
0x180e   : > { %v14136_v52 = vadd.f32 %v14128_v28, %v6671_v21  ;;  %v14187_v21 = vpack.c.bf16 %v6423_v60, %v6418_v9  ;;  %v14190_v10 = vpack.c.bf16 %v6420_v54, %v6415_v50  ;;  %v6404_v38 = vld [vmem:[#allocation15 + $0x2c8] sm:$0xff] }
0x180f   : > { %v6439_v9 = vld [vmem:[#allocation16 + $0x88] sm:$0xff]  ;;  %v14216_v47 = vpack.c.bf16 %v6404_v38, %v6399_v23  ;;  %v6442_v38 = vld [vmem:[#allocation16 + $0xa0] sm:$0xff] }
0x1810   : > { %10618 = vmatmul.mubr.msk.f32.vlgmr.msra.gmra.mrb[54].mxu1 %vm929_vm1, %v14136_v52  ;;  %9595 = vmatmul.mubr.msk.f32.vlgmr.msra.gmra.mrb[56].mxu0 %vm929_vm1, %v14136_v52  ;;  %v14218_v61 = vpack.c.bf16 %v6439_v9, %v6438_v19  ;;  %v6443_v19 = vld [vmem:[#allocation16 + $0xa8] sm:$0xff] }
0x1811   : > { %11376 = vmatpush1.bf16.msra.mxu1 %v14131_v57  ;;  %11383 = vmatpush3.bf16.msra.mxu0 %v14133_v16  ;;  %14953 = vst [vmem:[#allocation53_spill] sm:$0xff] %v14216_v47 }
0x1812   : > { %11378 = vmatprep.subr.bf16.mxu1 %v14138_v53  ;;  %11384 = vmatprep.subr.bf16.mxu0 %v14869_v7  ;;  %14954 = vst [vmem:[#allocation54_spill] sm:$0xff] %v14218_v61 }
0x1813   : > { %6910 = vmatprep.mubr.f32.mxu1 %v14867_v45  ;;  %10628 = vmatprep.mubr.msk.f32.mxu0 %vm12346_vm0, %v14867_v45 }
0x1815   : > { %11380 = vmatpush1.bf16.msra.mxu1 %v14146_v1  ;;  %11386 = vmatpush3.bf16.msra.mxu0 %v14148_v12 }
0x1816   : > { %11388 = vmatprep.subr.bf16.mxu0 %v14163_v15  ;;  %11404 = vmatprep.subr.bf16.mxu1 %v14165_v32 }
0x1818   : > { %9596 = vmatmul.mubr.msk.f32.vlgmr.msra.gmra.mrb[56].mxu1 %vm929_vm1, %v14136_v52  ;;  %10629 = vmatmul.mubr.msk.f32.vlgmr.msra.gmra.mrb[58].mxu0 %vm929_vm1, %v14136_v52 }
0x1819   : > { %7054 = vmatprep.mubr.f32.mxu0 %v14867_v45  ;;  %7125 = vmatprep.mubr.f32.mxu1 %v14867_v45 }
0x181a   : > { %11390 = vmatpush1.bf16.msra.mxu0 %v14167_v14  ;;  %11406 = vmatpush1.bf16.msra.mxu1 %v14170_v42 }
0x181b   : > { %11392 = vmatprep.subr.bf16.mxu0 %v14174_v43  ;;  %11408 = vmatprep.subr.bf16.mxu1 %v14176_v35 }
0x181e   : > { %11394 = vmatpush1.bf16.msra.mxu0 %v14179_v8  ;;  %11410 = vmatpush1.bf16.msra.mxu1 %v14183_v25 }
0x181f   : > { %11396 = vmatprep.subr.bf16.mxu0 %v14185_v41  ;;  %11412 = vmatprep.subr.bf16.mxu1 %v14187_v21 }
0x1822   : > { %11398 = vmatpush1.bf16.msra.mxu0 %v14190_v10  ;;  %11414 = vmatpush1.bf16.msra.mxu1 %v14194_v46 }
0x1823   : > { %11400 = vmatprep.subr.bf16.mxu0 %v14199_v34  ;;  %11416 = vmatprep.subr.bf16.mxu1 %v14201_v39 }
0x1826   : > { %11402 = vmatpush1.bf16.msra.mxu0 %v14203_v26  ;;  %11418 = vmatpush1.bf16.msra.mxu1 %v14206_v2 }
0x1827   : > { %11431 = vmatprep.subr.bf16.mxu0 %v14869_v7  ;;  %11419 = vmatprep.subr.bf16.mxu1 %v14869_v7 }
0x18e3   : > { %v6742_v24 = vpop.f32.mrb[54].mxu1 }
0x18e4   : > { %v6743_v60 = vadd.f32 %v6742_v24, %v14213_v30  ;;  %v10619_v50 = vpop.f32.mrb[55].mxu1  ;;  %v6424_v24 = vld [vmem:[#allocation15 + $0x368] sm:$0xff] }
0x18e5   : > { %v14240_v50 = vpack.c.bf16 %v6443_v19, %v6442_v38  ;;  %v6449_v19 = vld [vmem:[#allocation18 + $0x90] sm:$0xff] }
0x18e6   : > { %vm6746_vm14 = vcmp.gt.f32.partialorder %v6743_v60, 0.0  ;;  %v6747_v54 = vmul.f32 0.2, %v6743_v60 }
0x18e7   : > { %14958 = vst [vmem:[#allocation60_spill] sm:$0xff] %v14240_v50 }
0x18e8   : > { %v6748_v40 = vsel %vm6746_vm14, %v6743_v60, %v6747_v54  ;;  %v14238_v60 = vpack.c.bf16 %v6424_v24, %v6419_v13  ;;  %v6429_v54 = vld [vmem:[#allocation15 + $0x390] sm:$0xff]  ;;  %v6447_v13 = vld [vmem:[#allocation18 + $0x80] sm:$0xff]  ;;  %v6448_v24 = vld [vmem:[#allocation18 + $0x88] sm:$0xff]  ;;  %vm14982_vm14 = vcmask 293888  }
0x18e9   : > { %9598 = vmatmul.mubr.msk.f32.vlgmr.msra.gmra.mrb[56].mxu0 %vm829_vm3, %v6748_v40  ;;  %9599 = vmatmul.mubr.msk.f32.vlgmr.msra.gmra.mrb[56].mxu1 %vm829_vm3, %v6748_v40  ;;  %v14246_v17 = vpack.c.bf16 %v6434_v18, %v6429_v54  ;;  %v14254_v38 = vpack.c.bf16 %v6448_v24, %v6447_v13  ;;  %v6451_v18 = vld [vmem:[#allocation18 + $0xa0] sm:$0xff]  ;;  %v6454_v13 = vld [vmem:[#allocation18 + $0xb8] sm:$0xff] }
0x18ea   : > { %11421 = vmatpush3.bf16.msra.mxu1 %v14216_v47  ;;  %11433 = vmatpush3.bf16.msra.mxu0 %v14218_v61  ;;  %14957 = vst [vmem:[#allocation58_spill] sm:$0xff] %v14238_v60  ;;  %v14965_v24 = vld [vmem:[#allocation47_spill] sm:$0xff] }
0x18eb   : > { %v14228_v23 = vpop.f32.mrb[58].mxu0  ;;  %11422 = vmatprep.subr.bf16.mxu1 %v14869_v7  ;;  %11434 = vmatprep.subr.bf16.mxu0 %v14869_v7  ;;  %14959 = vst [vmem:[#allocation61_spill] sm:$0xff] %v14246_v17  ;;  %14961 = vst [vmem:[#allocation30_spill] sm:$0xff] %v14254_v38 }
0x18ec   : > { %v10630_v9 = vpop.f32.mrb[59].mxu0  ;;  %10647 = vmatprep.mubr.msk.f32.mxu1 %vm12346_vm0, %v14867_v45  ;;  %10666 = vmatprep.mubr.msk.f32.mxu0 %vm12346_vm0, %v14867_v45 }
0x18ed   : > { %v14248_v9 = vpack.c.bf16 %v6445_v29, %v6444_v51  ;;  %v6452_v51 = vld [vmem:[#allocation18 + $0xa8] sm:$0xff]  ;;  %v6453_v29 = vld [vmem:[#allocation18 + $0xb0] sm:$0xff] }
0x18ee   : > { %11424 = vmatpush3.bf16.msra.mxu1 %v14224_v22  ;;  %11436 = vmatpush3.bf16.msra.mxu0 %v14226_v56 }
0x18ef   : > { %11425 = vmatprep.subr.bf16.mxu1 %v14869_v7  ;;  %11437 = vmatprep.subr.bf16.mxu0 %v14869_v7  ;;  %14960 = vst [vmem:[#allocation31_spill] sm:$0xff] %v14248_v9 }
0x18f2   : > { %11427 = vmatpush3.bf16.msra.mxu1 %v14238_v60  ;;  %11439 = vmatpush3.bf16.msra.mxu0 %v14240_v50  ;;  %v6450_v50 = vld [vmem:[#allocation18 + $0x98] sm:$0xff] }
0x18f3   : > { %11428 = vmatprep.subr.bf16.mxu1 %v14869_v7  ;;  %11440 = vmatprep.subr.bf16.mxu0 %v14869_v7  ;;  %v14262_v54 = vpack.c.bf16 %v6450_v50, %v6449_v19  ;;  %v14274_v50 = vpack.c.bf16 %v6454_v13, %v6453_v29  ;;  %v14967_v19 = vld [vmem:[#allocation48_spill] sm:$0xff] }
0x18f5   : > { %14962 = vst [vmem:[#allocation33_spill] sm:$0xff] %v14262_v54  ;;  %14964 = vst [vmem:[#allocation34_spill] sm:$0xff] %v14274_v50 }
0x18f6   : > { %11430 = vmatpush3.bf16.msra.mxu1 %v14246_v17  ;;  %11442 = vmatpush3.bf16.msra.mxu0 %v14248_v9 }
0x18f7   : > { %11443 = vmatprep.subr.bf16.mxu1 %v14869_v7  ;;  %11455 = vmatprep.subr.bf16.mxu0 %v14869_v7 }
0x18f9   : > { %10648 = vmatmul.mubr.msk.f32.vlgmr.msra.gmra.mrb[58].mxu1 %vm829_vm3, %v6748_v40  ;;  %10667 = vmatmul.mubr.msk.f32.vlgmr.msra.gmra.mrb[60].mxu0 %vm829_vm3, %v14109_v48  ;;  %v14270_v40 = vpack.c.bf16 %v6452_v51, %v6451_v18  ;;  %v14969_v51 = vld [vmem:[#allocation49_spill] sm:$0xff] }
0x18fa   : > { %11445 = vmatpush3.bf16.msra.mxu1 %v14254_v38  ;;  %10685 = vmatprep.mubr.msk.f32.mxu1 %vm12346_vm0, %v14867_v45 }
0x18fb   : > { %11446 = vmatprep.subr.bf16.mxu1 %v14869_v7  ;;  %10694 = vmatprep.mubr.msk.f32.mxu0 %vm12346_vm0, %v14867_v45  ;;  %14963 = vst [vmem:[#allocation32_spill] sm:$0xff] %v14270_v40 }
0x18fe   : > { %11448 = vmatpush3.bf16.msra.mxu1 %v14262_v54 }
0x18ff   : > { %11449 = vmatprep.subr.bf16.mxu1 %v14869_v7 }
0x1902   : > { %11451 = vmatpush3.bf16.msra.mxu1 %v14270_v40 }
0x1903   : > { %11452 = vmatprep.subr.bf16.mxu1 %v14869_v7 }
0x1906   : > { %11454 = vmatpush3.bf16.msra.mxu1 %v14274_v50 }
0x1907   : > { %11461 = vmatprep.subr.bf16.mxu1 %v14869_v7 }
0x1909   : > { %10686 = vmatmul.mubr.msk.f32.vlgmr.msra.gmra.mrb[60].mxu1 %vm829_vm3, %v14109_v48 }
0x190a   : > { %11463 = vmatpush3.bf16.msra.mxu1 %v13961_v3  ;;  %10724 = vmatprep.mubr.msk.f32.mxu1 %vm12346_vm0, %v14867_v45  ;;  %v9589_v3 = vld [vmem:[%s14853_s25 + $0xa] sm:$0x1f] }
0x190b   : > { %11464 = vmatprep.subr.bf16.mxu1 %v14869_v7  ;;  %v14307_v18 = vrot.slane %v9589_v3, %v14967_v19  ;;  %v14310_v29 = vrot.slane %v9589_v3, %v14969_v51 }
0x190d   : > { %14968 = vst [vmem:[#allocation36_spill] sm:$0xff] %v14307_v18  ;;  %14970 = vst [vmem:[#allocation37_spill] sm:$0xff] %v14310_v29 }
0x190e   : > { %11466 = vmatpush3.bf16.msra.mxu1 %v13967_v11  ;;  %v14301_v11 = vld [vmem:[%s14854_s26 + $0xa] sm:$0x1f] }
0x190f   : > { %11473 = vmatprep.subr.bf16.mxu1 %v14869_v7  ;;  %v14324_v9 = vrot.slane %v14301_v11, %v14969_v51 }
0x1911   : > { %10725 = vmatmul.mubr.msk.f32.vlgmr.msra.gmra.mrb[62].mxu1 %vm929_vm1, %v14136_v52  ;;  %14973 = vst [vmem:[#allocation40_spill] sm:$0xff] %v14324_v9 }
0x1912   : > { %11475 = vmatpush3.bf16.msra.mxu1 %v13978_v63  ;;  %10746 = vmatprep.mubr.msk.f32.mxu1 %vm12346_vm0, %v14867_v45  ;;  %v14304_v63 = vrot.slane %v9589_v3, %v14965_v24 }
0x1913   : > { %11476 = vmatprep.subr.bf16.mxu1 %v14869_v7 }
0x1914   : > { %14966 = vst [vmem:[#allocation35_spill] sm:$0xff] %v14304_v63 }
0x1916   : > { %11478 = vmatpush3.bf16.msra.mxu1 %v13982_v59  ;;  %v14314_v59 = vrot.slane %v14301_v11, %v14965_v24 }
0x1917   : > { %11486 = vmatprep.subr.bf16.mxu1 %v14086_v31  ;;  %v14318_v31 = vrot.slane %v14301_v11, %v14967_v19 }
0x1918   : > { %14971 = vst [vmem:[#allocation38_spill] sm:$0xff] %v14314_v59 }
0x1919   : > { %14972 = vst [vmem:[#allocation39_spill] sm:$0xff] %v14318_v31 }
0x19bc   : > { %v7056_v13 = vpop.f32.mrb[56].mxu0  ;;  %v7127_v50 = vpop.f32.mrb[56].mxu1 }
0x19bd   : > { %v11605_v40 = vadd.f32 %v7056_v13, %v14304_v63  ;;  %v11607_v54 = vadd.f32 %v7127_v50, %v14307_v18  ;;  %v7058_v38 = vpop.f32.mrb[57].mxu0  ;;  %v7129_v17 = vpop.f32.mrb[57].mxu1  ;;  %v14975_v18 = vld [vmem:[#allocation57_spill] sm:$0xff] }
0x19be   : > { %v11606_v60 = vadd.f32 %v7058_v38, %v14310_v29  ;;  %v14336_v63 = vrot.slane %v9589_v3, %v14975_v18 }
0x19bf   : > { %v14328_v24 = vadd.f32 %v11605_v40, %v14314_v59  ;;  %v7235_v19 = vadd.f32 %v11607_v54, %v14318_v31 }
0x19c0   : > { %v7234_v22 = vadd.f32 %v11606_v60, %v14324_v9  ;;  %14976 = vst [vmem:[#allocation41_spill] sm:$0xff] %v14336_v63  ;;  %v6984_v54 = vadd.f32 %v14228_v23, %v14336_v63 }
0x19c1   : > { %v7240_v56 = vrot.slane %v14328_v24, 7  ;;  %v7261_v13 = vrot.slane %v7235_v19, 4  ;;  %v7254_v50 = vrot.slane %v7235_v19, 5  ;;  %v7266_v38 = vrot.slane %v7235_v19, 3 }
0x19c2   : > { %v7241_v51 = vrot.slane %v7234_v22, 7  ;;  %v7253_v59 = vrot.slane %v7234_v22, 5 }
0x19c3   : > { %7262 = vrot.lane.b32.xlu0 %v7261_v13, %s14974_s27  ;;  %7242 = vrot.lane.b32.xlu1 %v7240_v56, %s14918_s18  ;;  %v7248_v13 = vrot.slane %v7234_v22, 6 }
0x19c7   : > { %7257 = vrot.lane.b32.xlu1 %v7254_v50, %s12350_s28  ;;  %7244 = vrot.lane.b32.xlu0 %v7241_v51, %s14918_s18 }
0x19cb   : > { %7268 = vrot.lane.b32.xlu1 %v7266_v38, %s12352_s7 }
0x19cc   : > { %v7198_v60 = vpop.f32.mrb[58].mxu1  ;;  %v14343_v40 = vpop.f32.mrb[60].mxu0 }
0x19cd   : > { %v7206_v56 = vadd.f32 %v7198_v60, %v6984_v54  ;;  %v10649_v9 = vpop.f32.mrb[59].mxu1  ;;  %v10668_v31 = vpop.f32.mrb[61].mxu0  ;;  %v7440_v38 = vsel %vm829_vm3, %v14343_v40, 0.0  ;;  %v7450_v54 = vmul.f32 %v14343_v40, %v14343_v40 }
0x19cf   : > { %7249 = vrot.lane.b32.xlu1 %v7248_v13, %s12351_s24  ;;  %v7455_v31 = vsel %vm829_vm3, %v7450_v54, 0.0  ;;  %v7439_v54 = vpop.xlane.xlu1 %7438 }
0x19d3   : > { %7255 = vrot.lane.b32.xlu1 %v7253_v59, %s12350_s28 }
0x19dc   : > { %v14347_v50 = vpop.f32.mrb[60].mxu1 }
0x19dd   : > { %v10687_v19 = vpop.f32.mrb[61].mxu1  ;;  %v7451_v22 = vmul.f32 %v14347_v50, %v14347_v50  ;;  %v7443_v13 = vsel %vm829_vm3, %v14347_v50, 0.0 }
0x19e4   : > { %v7868_v51 = vpop.f32.mrb[62].mxu1 }
0x19e5   : > { %v7869_v23 = vadd.f32 %v14010_v33, %v7868_v51  ;;  %v10726_v63 = vpop.f32.mrb[63].mxu1  ;;  %v7458_v33 = vsel %vm829_vm3, %v7451_v22, 0.0 }
0x19e6   : > { %7441 = vadd.xlane.f32.xlu0 %v7440_v38  ;;  %v14977_v63 = vld [vmem:[#allocation56_spill] sm:$0xff] }
0x19e7   : > { %vm7872_vm4 = vcmp.gt.f32.partialorder %v7869_v23, 0.0  ;;  %v7873_v9 = vmul.f32 0.2, %v7869_v23  ;;  %v14365_v60 = vrot.slane %v9589_v3, %v14977_v63  ;;  %v14372_v19 = vrot.slane %v14301_v11, %v14977_v63 }
0x19e9   : > { %v7874_v59 = vsel %vm7872_vm4, %v7869_v23, %v7873_v9  ;;  %14978 = vst [vmem:[#allocation42_spill] sm:$0xff] %v14365_v60  ;;  %14979 = vst [vmem:[#allocation43_spill] sm:$0xff] %v14372_v19  ;;  %v7454_v9 = vpop.xlane.xlu0 %7453  ;;  %vm14983_vm4 = vcmask 1046528  }
0x19ea   : > { %10747 = vmatmul.mubr.msk.f32.vlgmr.msra.gmra.mrb[64].mxu1 %vm929_vm1, %v7874_v59  ;;  %7456 = vadd.xlane.f32.xlu0 %v7455_v31  ;;  %v7446_v31 = vmul.f32 0.015625, %v7439_v54  ;;  %v7461_v63 = vmul.f32 0.015625, %v7454_v9 }
0x19eb   : > { %11488 = vmatpush1.bf16.msra.mxu1 %v14091_v62  ;;  %8160 = vmatprep.mubr.f32.mxu1 %v14867_v45  ;;  %v11608_v62 = vadd.f32 %v7129_v17, %v14365_v60 }
0x19ec   : > { %11490 = vmatprep.subr.bf16.mxu1 %v14096_v4 }
0x19ed   : > { %v7236_v4 = vadd.f32 %v11608_v62, %v14372_v19 }
0x19ee   : > { %7459 = vadd.xlane.f32.xlu0 %v7458_v33  ;;  %v7464_v33 = vmul.f32 %v7446_v31, %v7446_v31 }
0x19ef   : > { %11492 = vmatpush1.bf16.msra.mxu1 %v14101_v20  ;;  %v7267_v51 = vrot.slane %v7236_v4, 3  ;;  %v14377_v20 = vrot.slane %v14301_v11, %v14975_v18  ;;  %v7274_v3 = vrot.slane %v7236_v4, 2  ;;  %v7279_v23 = vrot.slane %v7236_v4, 1 }
0x19f0   : > { %11501 = vmatprep.subr.bf16.mxu1 %v14869_v7  ;;  %v7467_v62 = vsub.f32 %v7461_v63, %v7464_v33  ;;  %v7470_v63 = vsub.f32 %v14109_v48, %v7446_v31 }
0x19f1   : > { %14980 = vst [vmem:[#allocation44_spill] sm:$0xff] %v14377_v20  ;;  %v7237_v38 = vadd.f32 %v14377_v20, %v7206_v56 }
0x19f3   : > { %v7280_v17 = vrot.slane %v7237_v38, 1 }
0x19f7   : > { %7444 = vadd.xlane.f32.xlu1 %v7443_v13 }
0x1a04   : > { %7270 = vrot.lane.b32.xlu0 %v7267_v51, %s12352_s7 }
0x1a08   : > { %7275 = vrot.lane.b32.xlu1 %v7274_v3, %s12354_s6  ;;  %7281 = vrot.lane.b32.xlu0 %v7279_v23, %s14981_s5  ;;  %v7473_v3 = vadd.f32 1e-05, %v7467_v62 }
0x1a0a   : > { %11888 = vrsqrt.f32 %v7473_v3 }
0x1a0c   : > { %7283 = vrot.lane.b32.xlu1 %v7280_v17, %s14981_s5 }
0x1a14   : > { %v11889_v33 = vpop.eup %11888 }
0x1a35   : > { %v7243_v22 = vpop.permute.xlu1 %7242  ;;  %v7263_v59 = vpop.permute.xlu0 %7262 }
0x1a39   : > { %v7258_v11 = vpop.permute.xlu1 %7257  ;;  %v7245_v18 = vpop.permute.xlu0 %7244 }
0x1a3a   : > { %v7246_v54 = vsel %vm1724_vm5, %v7243_v22, %v7245_v18 }
0x1a3d   : > { %v7269_v4 = vpop.permute.xlu1 %7268 }
0x1a41   : > { %v7250_v38 = vpop.permute.xlu1 %7249 }
0x1a45   : > { %v7256_v60 = vpop.permute.xlu1 %7255 }
0x1a46   : > { %v7259_v9 = vsel %vm1738_vm6, %v7256_v60, %v7258_v11  ;;  %v7479_v11 = vmul.f32 %v11889_v33, %v7470_v63 }
0x1a73   : > { %v7442_v13 = vpop.xlane.xlu0 %7441 }
0x1a74   : > { %v7447_v56 = vmul.f32 0.015625, %v7442_v13  ;;  %v7287_v13 = vsel %vm1769_vm7, %v14328_v24, %v7246_v54 }
0x1a76   : > { %v7465_v20 = vmul.f32 %v7447_v56, %v7447_v56 }
0x1a77   : > { %v7457_v51 = vpop.xlane.xlu0 %7456 }
0x1a78   : > { %v7462_v23 = vmul.f32 0.015625, %v7457_v51 }
0x1a7a   : > { %v7468_v19 = vsub.f32 %v7462_v23, %v7465_v20  ;;  %v7288_v20 = vsel %vm1771_vm8, %v7287_v13, %v7250_v38 }
0x1a7b   : > { %v7460_v29 = vpop.xlane.xlu0 %7459  ;;  %v7289_v22 = vsel %vm1773_vm9, %v7288_v20, %v7259_v9 }
0x1a7c   : > { %v7474_v17 = vadd.f32 1e-05, %v7468_v19  ;;  %v7471_v19 = vsub.f32 %v14343_v40, %v7447_v56  ;;  %v7463_v51 = vmul.f32 0.015625, %v7460_v29  ;;  %v7290_v31 = vsel %vm1775_vm11, %v7289_v22, %v7263_v59 }
0x1a7e   : > { %11890 = vrsqrt.f32 %v7474_v17 }
0x1a7f   : > { %v7271_v62 = vpop.permute.xlu0 %7270 }
0x1a80   : > { %v7272_v60 = vsel %vm1752_vm10, %v7269_v4, %v7271_v62 }
0x1a81   : > { %v7291_v38 = vsel %vm1777_vm12, %v7290_v31, %v7272_v60 }
0x1a83   : > { %v7282_v54 = vpop.permute.xlu0 %7281 }
0x1a84   : > { %v7445_v61 = vpop.xlane.xlu1 %7444 }
0x1a85   : > { %v7448_v47 = vmul.f32 0.015625, %v7445_v61 }
0x1a87   : > { %v7466_v3 = vmul.f32 %v7448_v47, %v7448_v47  ;;  %v7472_v59 = vsub.f32 %v14347_v50, %v7448_v47 }
0x1a88   : > { %v11891_v23 = vpop.eup %11890  ;;  %v7276_v18 = vpop.permute.xlu1 %7275 }
0x1a89   : > { %v7469_v61 = vsub.f32 %v7463_v51, %v7466_v3  ;;  %v7480_v17 = vmul.f32 %v11891_v23, %v7471_v19  ;;  %v7292_v29 = vsel %vm1779_vm13, %v7291_v38, %v7276_v18 }
0x1a8b   : > { %v7475_v48 = vadd.f32 1e-05, %v7469_v61  ;;  %v11456_v24 = vpack.c.bf16 %v7480_v17, %v7479_v11 }
0x1a8c   : > { %v7284_v13 = vpop.permute.xlu1 %7283 }
0x1a8d   : > { %11892 = vrsqrt.f32 %v7475_v48  ;;  %v7285_v40 = vsel %vm14982_vm14, %v7282_v54, %v7284_v13  ;;  %11457 = vmatpush3.bf16.msra.mxu0 %v11456_v24 }
0x1a8e   : > { %v7293_v56 = vsel %vm14983_vm4, %v7292_v29, %v7285_v40  ;;  %10692 = vmatprep.subr.mxu0 %v14867_v45 }
0x1a8f   : > { %7566 = vrot.lane.b32.xlu1 %v7293_v56, %s14984_s8  ;;  %7484 = vperm.xlu0 %11854, %v7293_v56  }
0x1a93   : > { %7563 = vperm.xlu1 %11855, %v7293_v56   ;;  %7647 = vrot.lane.b32.xlu0 %v7293_v56, %s14927_s0 }
0x1a94   : > { %11856 = vset.pattern.permute.xlu0 %v14898_v36 }
0x1a97   : > { %v11893_v4 = vpop.eup %11892  ;;  %7725 = vrot.lane.b32.xlu1 %v7293_v56, %s14928_s1  ;;  %7644 = vperm.xlu0 %11856, %v7293_v56  }
0x1a98   : > { %v7481_v9 = vmul.f32 %v11893_v4, %v7472_v59  ;;  %11857 = vset.pattern.permute.xlu1 %v14929_v5  ;;  %v14999_v4 = vld [vmem:[#allocation37_spill] sm:$0xff] }
0x1a9a   : > { %10693 = vmatpush3.msra.mxu0 %v7481_v9 }
0x1a9b   : > { %7722 = vperm.xlu1 %11857, %v7293_v56   ;;  %10695 = vmatmul.mubr.msk.f32.vlgmr.msra.gmra.mrb[62].mxu0 %vm1977_vm2, %v7293_v56 }
0x1a9c   : > { %10697 = vmatprep.subr.mxu0 %v14867_v45  ;;  %10699 = vmatprep.mubr.msk.f32.mxu0 %vm12346_vm0, %v14867_v45 }
0x1a9d   : > { %11858 = vset.pattern.permute.xlu0 %v14868_v58 }
0x1a9f   : > { %11859 = vset.pattern.permute.xlu1 %v14930_v55 }
0x1abd   : > { %v8014_v47 = vpop.f32.mrb[64].mxu1 }
0x1abe   : > { %v10748_v50 = vpop.f32.mrb[65].mxu1 }
0x1b01   : > { %v7567_v3 = vpop.permute.xlu1 %7566 }
0x1b0e   : > { %v7485_v33 = vpop.permute.xlu0 %7484 }
0x1b12   : > { %v7564_v58 = vpop.permute.xlu1 %7563  ;;  %v7648_v61 = vpop.permute.xlu0 %7647 }
0x1b16   : > { %v7726_v11 = vpop.permute.xlu1 %7725  ;;  %v7645_v17 = vpop.permute.xlu0 %7644 }
0x1b6e   : > { %v7555_v63 = vpop.f32.mrb[62].mxu0 }
0x1b6f   : > { %v7556_v62 = vadd.f32 %v7555_v63, %v7485_v33  ;;  %v10696_v20 = vpop.f32.mrb[63].mxu0  ;;  %v15001_v33 = vld [vmem:[#allocation39_spill] sm:$0xff] }
0x1b71   : > { %vm7559_vm14 = vcmp.gt.f32.partialorder %v7556_v62, 0.0  ;;  %v7560_v19 = vmul.f32 0.2, %v7556_v62 }
0x1b73   : > { %v7561_v51 = vsel %vm7559_vm14, %v7556_v62, %v7560_v19  ;;  %v15002_v19 = vld [vmem:[#allocation40_spill] sm:$0xff] }
0x1b74   : > { %10698 = vmatpush3.msra.mxu0 %v7561_v51 }
0x1b75   : > { %10700 = vmatmul.mubr.msk.f32.vlgmr.msra.gmra.mrb[64].mxu0 %vm2059_vm15, %v7567_v3  ;;  %10702 = vmatprep.subr.mxu0 %v14867_v45 }
0x1b76   : > { %10704 = vmatprep.mubr.msk.f32.mxu0 %vm12346_vm0, %v14867_v45 }
0x1c48   : > { %v7636_v55 = vpop.f32.mrb[64].mxu0 }
0x1c49   : > { %v7637_v23 = vadd.f32 %v7636_v55, %v7564_v58  ;;  %v10701_v22 = vpop.f32.mrb[65].mxu0 }
0x1c4b   : > { %vm7640_vm4 = vcmp.gt.f32.partialorder %v7637_v23, 0.0  ;;  %v7641_v18 = vmul.f32 0.2, %v7637_v23 }
0x1c4d   : > { %v7642_v60 = vsel %vm7640_vm4, %v7637_v23, %v7641_v18  ;;  %v15003_v23 = vld [vmem:[#allocation41_spill] sm:$0xff] }
0x1c4e   : > { %10703 = vmatpush3.msra.mxu0 %v7642_v60 }
0x1c4f   : > { %10705 = vmatmul.mubr.msk.f32.vlgmr.msra.gmra.mrb[66].mxu0 %vm2059_vm15, %v7648_v61  ;;  %11458 = vmatprep.subr.bf16.mxu0 %v14869_v7 }
0x1c50   : > { %11460 = vmatpush3.bf16.msra.mxu0 %v11456_v24  ;;  %10713 = vmatprep.mubr.msk.f32.mxu0 %vm12346_vm0, %v14867_v45 }
0x1c51   : > { %10711 = vmatprep.subr.mxu0 %v14867_v45 }
0x1c54   : > { %10712 = vmatpush3.msra.mxu0 %v7481_v9 }
0x1c55   : > { %11467 = vmatprep.subr.bf16.mxu0 %v14869_v7 }
0x1c57   : > { %10714 = vmatmul.mubr.msk.f32.vlgmr.msra.gmra.mrb[66].mxu0 %vm1977_vm2, %v7726_v11 }
0x1c58   : > { %11469 = vmatpush3.bf16.msra.mxu0 %v14070_v37  ;;  %10735 = vmatprep.mubr.msk.f32.mxu0 %vm12346_vm0, %v14867_v45  ;;  %v7723_v37 = vpop.permute.xlu1 %7722 }
0x1c59   : > { %11470 = vmatprep.subr.bf16.mxu0 %v14869_v7  ;;  %v11609_v48 = vadd.f32 %v7723_v37, %v7645_v17 }
0x1c5c   : > { %11472 = vmatpush3.bf16.msra.mxu0 %v14075_v49 }
0x1c5d   : > { %11479 = vmatprep.subr.bf16.mxu0 %v14869_v7 }
0x1c5f   : > { %10736 = vmatmul.mubr.msk.f32.vlgmr.msra.gmra.mrb[68].mxu0 %vm929_vm1, %v14136_v52 }
0x1c60   : > { %11481 = vmatpush3.bf16.msra.mxu0 %v14088_v0  ;;  %10757 = vmatprep.mubr.msk.f32.mxu0 %vm12346_vm0, %v14867_v45 }
0x1c61   : > { %11482 = vmatprep.subr.bf16.mxu0 %v14869_v7 }
0x1c64   : > { %11484 = vmatpush3.bf16.msra.mxu0 %v14098_v6 }
0x1c65   : > { %11494 = vmatprep.subr.bf16.mxu0 %v14105_v27 }
0x1d2a   : > { %v7795_v49 = vpop.f32.mrb[66].mxu0 }
0x1d2b   : > { %v14436_v31 = vadd.f32 %v11609_v48, %v7795_v49  ;;  %v10715_v24 = vpop.f32.mrb[67].mxu0 }
0x1d2d   : > { %9607 = vst.msk [vmem:[%s13057_s10 + $0x28] sm:$0xff] %vm829_vm3, %v14436_v31  ;;  %v8732_v0 = vsel %vm829_vm3, %v14436_v31, 0.0  ;;  %v8744_v52 = vmul.f32 %v14436_v31, %v14436_v31 }
0x1d2e   : > { %8733 = vadd.xlane.f32.xlu1 %v8732_v0 }
0x1d2f   : > { %v8747_v6 = vsel %vm829_vm3, %v8744_v52, 0.0 }
0x1d30   : > { %8748 = vadd.xlane.f32.xlu0 %v8747_v6 }
0x1d32   : > { %v7941_v27 = vpop.f32.mrb[68].mxu0 }
0x1d33   : > { %v7942_v54 = vadd.f32 %v14122_v44, %v7941_v27  ;;  %v10737_v38 = vpop.f32.mrb[69].mxu0 }
0x1d35   : > { %v8018_v13 = vadd.f32 %v8014_v47, %v7942_v54  ;;  %v15000_v47 = vld [vmem:[#allocation38_spill] sm:$0xff] }
0x1d37   : > { %v8019_v29 = vadd.f32 %v14128_v28, %v8018_v13  ;;  %v15004_v13 = vld [vmem:[#allocation42_spill] sm:$0xff] }
0x1d39   : > { %10758 = vmatmul.mubr.msk.f32.vlgmr.msra.gmra.mrb[70].mxu0 %vm929_vm1, %v8019_v29  ;;  %9612 = vmatmul.mubr.msk.f32.vlgmr.msra.gmra.mrb[66].mxu1 %vm929_vm1, %v8019_v29 }
0x1d3a   : > { %11496 = vmatpush1.bf16.msra.mxu0 %v14131_v57  ;;  %11503 = vmatpush3.bf16.msra.mxu1 %v14133_v16 }
0x1d3b   : > { %11498 = vmatprep.subr.bf16.mxu0 %v14138_v53  ;;  %11504 = vmatprep.subr.bf16.mxu1 %v14869_v7 }
0x1d3c   : > { %8231 = vmatprep.mubr.f32.mxu0 %v14867_v45  ;;  %10768 = vmatprep.mubr.msk.f32.mxu1 %vm12346_vm0, %v14867_v45 }
0x1d3e   : > { %11500 = vmatpush1.bf16.msra.mxu0 %v14146_v1  ;;  %11506 = vmatpush3.bf16.msra.mxu1 %v14148_v12  ;;  %v14985_v1 = vld [vmem:[#allocation53_spill] sm:$0xff]  ;;  %v14986_v12 = vld [vmem:[#allocation54_spill] sm:$0xff] }
0x1d3f   : > { %11508 = vmatprep.subr.bf16.mxu1 %v14163_v15  ;;  %11524 = vmatprep.subr.bf16.mxu0 %v14165_v32 }
0x1d41   : > { %9613 = vmatmul.mubr.msk.f32.vlgmr.msra.gmra.mrb[72].mxu0 %vm929_vm1, %v8019_v29  ;;  %10769 = vmatmul.mubr.msk.f32.vlgmr.msra.gmra.mrb[68].mxu1 %vm929_vm1, %v8019_v29 }
0x1d42   : > { %11510 = vmatpush1.bf16.msra.mxu1 %v14167_v14  ;;  %11526 = vmatpush1.bf16.msra.mxu0 %v14170_v42  ;;  %v14987_v14 = vld [vmem:[#allocation55_spill] sm:$0xff] }
0x1d43   : > { %11512 = vmatprep.subr.bf16.mxu1 %v14174_v43  ;;  %11528 = vmatprep.subr.bf16.mxu0 %v14176_v35  ;;  %v14988_v42 = vld [vmem:[#allocation59_spill] sm:$0xff]  ;;  %v14989_v43 = vld [vmem:[#allocation58_spill] sm:$0xff]  ;;  %v14990_v35 = vld [vmem:[#allocation60_spill] sm:$0xff] }
0x1d44   : > { %8375 = vmatprep.mubr.f32.mxu1 %v14867_v45  ;;  %8446 = vmatprep.mubr.f32.mxu0 %v14867_v45 }
0x1d46   : > { %11514 = vmatpush1.bf16.msra.mxu1 %v14179_v8  ;;  %11530 = vmatpush1.bf16.msra.mxu0 %v14183_v25  ;;  %v14991_v8 = vld [vmem:[#allocation61_spill] sm:$0xff]  ;;  %v14992_v25 = vld [vmem:[#allocation31_spill] sm:$0xff] }
0x1d47   : > { %11516 = vmatprep.subr.bf16.mxu1 %v14185_v41  ;;  %11532 = vmatprep.subr.bf16.mxu0 %v14187_v21  ;;  %v14993_v41 = vld [vmem:[#allocation30_spill] sm:$0xff]  ;;  %v14994_v21 = vld [vmem:[#allocation33_spill] sm:$0xff] }
0x1d4a   : > { %11518 = vmatpush1.bf16.msra.mxu1 %v14190_v10  ;;  %11534 = vmatpush1.bf16.msra.mxu0 %v14194_v46  ;;  %v14995_v10 = vld [vmem:[#allocation32_spill] sm:$0xff]  ;;  %v14996_v46 = vld [vmem:[#allocation34_spill] sm:$0xff] }
0x1d4b   : > { %11520 = vmatprep.subr.bf16.mxu1 %v14199_v34  ;;  %11536 = vmatprep.subr.bf16.mxu0 %v14201_v39 }
0x1d4e   : > { %11522 = vmatpush1.bf16.msra.mxu1 %v14203_v26  ;;  %11538 = vmatpush1.bf16.msra.mxu0 %v14206_v2  ;;  %v14997_v26 = vld [vmem:[#allocation35_spill] sm:$0xff] }
0x1d4f   : > { %11539 = vmatprep.subr.bf16.mxu0 %v14869_v7  ;;  %11551 = vmatprep.subr.bf16.mxu1 %v14869_v7 }
0x1e0c   : > { %v8089_v44 = vpop.f32.mrb[70].mxu0 }
0x1e0d   : > { %v8090_v28 = vadd.f32 %v8089_v44, %v14213_v30  ;;  %v10759_v57 = vpop.f32.mrb[71].mxu0  ;;  %v14998_v30 = vld [vmem:[#allocation36_spill] sm:$0xff]  ;;  %v15005_v44 = vld [vmem:[#allocation43_spill] sm:$0xff] }
0x1e0f   : > { %vm8093_vm1 = vcmp.gt.f32.partialorder %v8090_v28, 0.0  ;;  %v8094_v16 = vmul.f32 0.2, %v8090_v28 }
0x1e11   : > { %v8095_v53 = vsel %vm8093_vm1, %v8090_v28, %v8094_v16 }
0x1e12   : > { %9615 = vmatmul.mubr.msk.f32.vlgmr.msra.gmra.mrb[66].mxu1 %vm829_vm3, %v8095_v53  ;;  %9616 = vmatmul.mubr.msk.f32.vlgmr.msra.gmra.mrb[72].mxu0 %vm829_vm3, %v8095_v53 }
0x1e13   : > { %11541 = vmatpush3.bf16.msra.mxu0 %v14985_v1  ;;  %11553 = vmatpush3.bf16.msra.mxu1 %v14986_v12  ;;  %v15006_v1 = vld [vmem:[#allocation44_spill] sm:$0xff] }
0x1e14   : > { %v8304_v15 = vpop.f32.mrb[68].mxu1  ;;  %11542 = vmatprep.subr.bf16.mxu0 %v14869_v7  ;;  %11554 = vmatprep.subr.bf16.mxu1 %v14869_v7 }
0x1e15   : > { %v10770_v32 = vpop.f32.mrb[69].mxu1  ;;  %10787 = vmatprep.mubr.msk.f32.mxu0 %vm12346_vm0, %v14867_v45  ;;  %10806 = vmatprep.mubr.msk.f32.mxu1 %vm12346_vm0, %v14867_v45  ;;  %v8305_v22 = vadd.f32 %v8304_v15, %v15003_v23 }
0x1e16   : > { %v8734_v32 = vpop.xlane.xlu1 %8733 }
0x1e17   : > { %11544 = vmatpush3.bf16.msra.mxu0 %v14987_v14  ;;  %11556 = vmatpush3.bf16.msra.mxu1 %v14988_v42  ;;  %v8749_v14 = vpop.xlane.xlu0 %8748 }
0x1e18   : > { %11545 = vmatprep.subr.bf16.mxu0 %v14869_v7  ;;  %11557 = vmatprep.subr.bf16.mxu1 %v14869_v7 }
0x1e1b   : > { %11547 = vmatpush3.bf16.msra.mxu0 %v14989_v43  ;;  %11559 = vmatpush3.bf16.msra.mxu1 %v14990_v35  ;;  %v8741_v35 = vmul.f32 0.015625, %v8734_v32 }
0x1e1c   : > { %11548 = vmatprep.subr.bf16.mxu0 %v14869_v7  ;;  %11560 = vmatprep.subr.bf16.mxu1 %v14869_v7 }
0x1e1f   : > { %11550 = vmatpush3.bf16.msra.mxu0 %v14991_v8  ;;  %11562 = vmatpush3.bf16.msra.mxu1 %v14992_v25 }
0x1e20   : > { %11563 = vmatprep.subr.bf16.mxu0 %v14869_v7  ;;  %11575 = vmatprep.subr.bf16.mxu1 %v14869_v7 }
0x1e22   : > { %10788 = vmatmul.mubr.msk.f32.vlgmr.msra.gmra.mrb[74].mxu0 %vm829_vm3, %v8095_v53  ;;  %10807 = vmatmul.mubr.msk.f32.vlgmr.msra.gmra.mrb[70].mxu1 %vm829_vm3, %v14436_v31 }
0x1e23   : > { %11565 = vmatpush3.bf16.msra.mxu0 %v14993_v41  ;;  %10825 = vmatprep.mubr.msk.f32.mxu0 %vm12346_vm0, %v14867_v45  ;;  %v8759_v41 = vmul.f32 %v8741_v35, %v8741_v35 }
0x1e24   : > { %11566 = vmatprep.subr.bf16.mxu0 %v14869_v7  ;;  %10834 = vmatprep.mubr.msk.f32.mxu1 %vm12346_vm0, %v14867_v45 }
0x1e27   : > { %11568 = vmatpush3.bf16.msra.mxu0 %v14994_v21  ;;  %v8756_v21 = vmul.f32 0.015625, %v8749_v14 }
0x1e28   : > { %11569 = vmatprep.subr.bf16.mxu0 %v14869_v7 }
0x1e2b   : > { %11571 = vmatpush3.bf16.msra.mxu0 %v14995_v10 }
0x1e2c   : > { %11572 = vmatprep.subr.bf16.mxu0 %v14869_v7 }
0x1e2f   : > { %11574 = vmatpush3.bf16.msra.mxu0 %v14996_v46  ;;  %v8762_v46 = vsub.f32 %v8756_v21, %v8759_v41  ;;  %v12362_v41 = vmov 0  }
0x1e30   : > { %10856 = vmatprep.subr.mxu0 %v14867_v45 }
0x1e32   : > { %10826 = vmatmul.mubr.msk.f32.vlgmr.msra.gmra.mrb[76].mxu0 %vm829_vm3, %v14436_v31 }
0x1e33   : > { %10858 = vmatprep.mubr.msk.f32.mxu0 %vm12346_vm0, %v14867_v45 }
0x1ee5   : > { %v8377_v34 = vpop.f32.mrb[66].mxu1  ;;  %v8448_v39 = vpop.f32.mrb[72].mxu0 }
0x1ee6   : > { %v11611_v2 = vadd.f32 %v8377_v34, %v14997_v26  ;;  %v11613_v40 = vadd.f32 %v8448_v39, %v14998_v30  ;;  %v8379_v56 = vpop.f32.mrb[67].mxu1  ;;  %v8450_v59 = vpop.f32.mrb[73].mxu0 }
0x1ee7   : > { %v11612_v9 = vadd.f32 %v8379_v56, %v14999_v4  ;;  %v11614_v29 = vadd.f32 %v8450_v59, %v15004_v13 }
0x1ee8   : > { %v14527_v50 = vadd.f32 %v11611_v2, %v15000_v47  ;;  %v8530_v63 = vadd.f32 %v11613_v40, %v15001_v33  ;;  %v8768_v2 = vadd.f32 1e-05, %v8762_v46 }
0x1ee9   : > { %v8529_v51 = vadd.f32 %v11612_v9, %v15002_v19  ;;  %v8531_v28 = vadd.f32 %v11614_v29, %v15005_v44 }
0x1eea   : > { %v8535_v62 = vrot.slane %v14527_v50, 7  ;;  %v8556_v20 = vrot.slane %v8530_v63, 4  ;;  %v8549_v3 = vrot.slane %v8530_v63, 5  ;;  %v8561_v55 = vrot.slane %v8530_v63, 3 }
0x1eeb   : > { %v8536_v58 = vrot.slane %v8529_v51, 7  ;;  %v8543_v61 = vrot.slane %v8529_v51, 6  ;;  %v8548_v48 = vrot.slane %v8529_v51, 5  ;;  %v8562_v57 = vrot.slane %v8531_v28, 3 }
0x1eec   : > { %8537 = vrot.lane.b32.xlu1 %v8535_v62, %s14918_s18  ;;  %8557 = vrot.lane.b32.xlu0 %v8556_v20, %s14974_s27  ;;  %v8569_v16 = vrot.slane %v8531_v28, 2  ;;  %v8574_v53 = vrot.slane %v8531_v28, 1  ;;  %11894 = vrsqrt.f32 %v8768_v2  ;;  %v8765_v51 = vsub.f32 %v14436_v31, %v8741_v35  ;;  %s15010_s27 = sld [smem:[#allocation75_spill]] }
0x1ef0   : > { %8539 = vrot.lane.b32.xlu0 %v8536_v58, %s14918_s18  ;;  %8552 = vrot.lane.b32.xlu1 %v8549_v3, %s12350_s28  ;;  %s15009_s18 = sld [smem:[#allocation76_spill]] }
0x1ef4   : > { %8563 = vrot.lane.b32.xlu1 %v8561_v55, %s12352_s7 }
0x1ef5   : > { %v14538_v18 = vpop.f32.mrb[70].mxu1  ;;  %v8519_v60 = vpop.f32.mrb[74].mxu0 }
0x1ef6   : > { %v8527_v11 = vadd.f32 %v8519_v60, %v8305_v22  ;;  %v10789_v37 = vpop.f32.mrb[75].mxu0  ;;  %v10808_v17 = vpop.f32.mrb[71].mxu1  ;;  %v8745_v0 = vmul.f32 %v14538_v18, %v14538_v18  ;;  %v8735_v52 = vsel %vm829_vm3, %v14538_v18, 0.0 }
0x1ef7   : > { %v11895_v19 = vpop.eup %11894 }
0x1ef8   : > { %8544 = vrot.lane.b32.xlu1 %v8543_v61, %s12351_s24  ;;  %v8750_v27 = vsel %vm829_vm3, %v8745_v0, 0.0  ;;  %v8532_v12 = vadd.f32 %v8527_v11, %v15006_v1 }
0x1efa   : > { %v8575_v15 = vrot.slane %v8532_v12, 1 }
0x1efc   : > { %8550 = vrot.lane.b32.xlu1 %v8548_v48, %s12350_s28  ;;  %s820_s28 = scalar_select %p819_p9, %s12489_s3, 1 }
0x1efe   : > { %s9511_s24 = sshll.u32 %s820_s28, 2 }
0x1f05   : > { %v14542_v49 = vpop.f32.mrb[76].mxu0 }
0x1f06   : > { %v10827_v24 = vpop.f32.mrb[77].mxu0  ;;  %v8746_v6 = vmul.f32 %v14542_v49, %v14542_v49  ;;  %v8738_v38 = vsel %vm829_vm3, %v14542_v49, 0.0 }
0x1f07   : > { %v8774_v24 = vmul.f32 %v11895_v19, %v8765_v51 }
0x1f08   : > { %v8753_v54 = vsel %vm829_vm3, %v8746_v6, 0.0 }
0x1f0f   : > { %8736 = vadd.xlane.f32.xlu0 %v8735_v52 }
0x1f13   : > { %8751 = vadd.xlane.f32.xlu0 %v8750_v27 }
0x1f17   : > { %8754 = vadd.xlane.f32.xlu0 %v8753_v54 }
0x1f20   : > { %8739 = vadd.xlane.f32.xlu1 %v8738_v38 }
0x1f2d   : > { %8565 = vrot.lane.b32.xlu0 %v8562_v57, %s12352_s7  ;;  %s15012_s7 = sld [smem:[#allocation74_spill]] (%p15011_p7) }
0x1f31   : > { %8576 = vrot.lane.b32.xlu0 %v8574_v53, %s14981_s5  ;;  %8570 = vrot.lane.b32.xlu1 %v8569_v16, %s12354_s6 }
0x1f35   : > { %8578 = vrot.lane.b32.xlu1 %v8575_v15, %s14981_s5  ;;  %s822_s5 = scalar_lea.vmem %s15010_s27, %s9511_s24 }
0x1f5e   : > { %v8538_v42 = vpop.permute.xlu1 %8537  ;;  %v8558_v43 = vpop.permute.xlu0 %8557 }
0x1f62   : > { %v8553_v8 = vpop.permute.xlu1 %8552  ;;  %v8540_v25 = vpop.permute.xlu0 %8539 }
0x1f63   : > { %v8541_v33 = vsel %vm1724_vm5, %v8538_v42, %v8540_v25  ;;  %vm15007_vm5 = vcmask 293888   ;;  %v9098_v25 = vld [vmem:[#allocation21] sm:$0x7] }
0x1f64   : > { %v8582_v3 = vsel %vm1769_vm7, %v14527_v50, %v8541_v33  ;;  %v9246_v33 = vld [vmem:[%s13057_s10 + $0x20] sm:$0xff] (%p15011_p7) }
0x1f66   : > { %v8564_v34 = vpop.permute.xlu1 %8563 }
0x1f6a   : > { %v8545_v56 = vpop.permute.xlu1 %8544 }
0x1f6b   : > { %v8583_v55 = vsel %vm1771_vm8, %v8582_v3, %v8545_v56 }
0x1f6e   : > { %v8551_v9 = vpop.permute.xlu1 %8550 }
0x1f6f   : > { %v8554_v62 = vsel %vm1738_vm6, %v8551_v9, %v8553_v8  ;;  %vm15008_vm6 = vcmask 1046528   ;;  %v9242_v9 = vld [vmem:[%s13057_s10 + $0x10] sm:$0xff] (%p15011_p7) }
0x1f70   : > { %v8584_v11 = vsel %vm1773_vm9, %v8583_v55, %v8554_v62 }
0x1f71   : > { %v8585_v52 = vsel %vm1775_vm11, %v8584_v11, %v8558_v43 }
0x1f9c   : > { %v8737_v10 = vpop.xlane.xlu0 %8736 }
0x1f9d   : > { %v8742_v39 = vmul.f32 0.015625, %v8737_v10 }
0x1f9f   : > { %v8760_v30 = vmul.f32 %v8742_v39, %v8742_v39  ;;  %v8766_v23 = vsub.f32 %v14538_v18, %v8742_v39 }
0x1fa0   : > { %v8752_v26 = vpop.xlane.xlu0 %8751 }
0x1fa1   : > { %v8757_v40 = vmul.f32 0.015625, %v8752_v26  ;;  %v9097_v26 = vld [vmem:[#allocation19] sm:$0x7] }
0x1fa3   : > { %v8763_v59 = vsub.f32 %v8757_v40, %v8760_v30 }
0x1fa4   : > { %v8755_v47 = vpop.xlane.xlu0 %8754 }
0x1fa5   : > { %v8769_v4 = vadd.f32 1e-05, %v8763_v59  ;;  %v8758_v22 = vmul.f32 0.015625, %v8755_v47  ;;  %v9238_v59 = vld [vmem:[%s13057_s10] sm:$0xff] (%p15011_p7)  ;;  %v9244_v47 = vld [vmem:[%s13057_s10 + $0x18] sm:$0xff] (%p15011_p7) }
0x1fa7   : > { %11896 = vrsqrt.f32 %v8769_v4  ;;  %v9240_v4 = vld [vmem:[%s13057_s10 + $0x8] sm:$0xff] (%p15011_p7) }
0x1fa8   : > { %v8566_v58 = vpop.permute.xlu0 %8565 }
0x1fa9   : > { %v8567_v17 = vsel %vm1752_vm10, %v8564_v34, %v8566_v58 }
0x1faa   : > { %v8586_v27 = vsel %vm1777_vm12, %v8585_v52, %v8567_v17 }
0x1fac   : > { %v8577_v6 = vpop.permute.xlu0 %8576 }
0x1fad   : > { %v8740_v63 = vpop.xlane.xlu1 %8739 }
0x1fae   : > { %v8743_v20 = vmul.f32 0.015625, %v8740_v63  ;;  %v9248_v63 = vld [vmem:[%s13057_s10 + $0x28] sm:$0xff] (%p15011_p7) }
0x1fb0   : > { %v8761_v60 = vmul.f32 %v8743_v20, %v8743_v20  ;;  %v8767_v29 = vsub.f32 %v14542_v49, %v8743_v20 }
0x1fb1   : > { %v11897_v61 = vpop.eup %11896  ;;  %v8571_v37 = vpop.permute.xlu1 %8570 }
0x1fb2   : > { %v8764_v48 = vsub.f32 %v8758_v22, %v8761_v60  ;;  %v8775_v0 = vmul.f32 %v11897_v61, %v8766_v23  ;;  %v8587_v18 = vsel %vm1779_vm13, %v8586_v27, %v8571_v37 }
0x1fb4   : > { %v8770_v31 = vadd.f32 1e-05, %v8764_v48  ;;  %v11576_v50 = vpack.c.bf16 %v8775_v0, %v8774_v24 }
0x1fb5   : > { %v8579_v54 = vpop.permute.xlu1 %8578 }
0x1fb6   : > { %11898 = vrsqrt.f32 %v8770_v31  ;;  %v8580_v38 = vsel %vm15007_vm5, %v8577_v6, %v8579_v54  ;;  %11577 = vmatpush3.bf16.msra.mxu1 %v11576_v50 }
0x1fb7   : > { %v8588_v13 = vsel %vm15008_vm6, %v8587_v18, %v8580_v38  ;;  %10832 = vmatprep.subr.mxu1 %v14867_v45 }
0x1fb8   : > { %8861 = vrot.lane.b32.xlu1 %v8588_v13, %s14984_s8  ;;  %8779 = vperm.xlu0 %11858, %v8588_v13   ;;  %s9627_s8 = sshll.u32 (%p15011_p7), %s12489_s3, 3 }
0x1fb9   : > { %s9198_s6 = scalar_lea.vmem (%p15011_p7), %s15012_s7, %s9627_s8 }
0x1fba   : > { %9239 = vst [vmem:[%s9198_s6] sm:$0xff] (%p15011_p7), %v9238_v59  ;;  %9241 = vst [vmem:[%s9198_s6 + $0x10] sm:$0xff] (%p15011_p7), %v9240_v4 }
0x1fbb   : > { %9243 = vst [vmem:[%s9198_s6 + $0x20] sm:$0xff] (%p15011_p7), %v9242_v9  ;;  %9245 = vst [vmem:[%s9198_s6 + $0x30] sm:$0xff] (%p15011_p7), %v9244_v47 }
0x1fbc   : > { %8858 = vperm.xlu1 %11859, %v8588_v13   ;;  %8942 = vrot.lane.b32.xlu0 %v8588_v13, %s14927_s0  ;;  %s826_s0 = scalar_lea.vmem %s15009_s18, %s9511_s24  ;;  %9247 = vst [vmem:[%s9198_s6 + $0x40] sm:$0xff] (%p15011_p7), %v9246_v33  ;;  %9249 = vst [vmem:[%s9198_s6 + $0x50] sm:$0xff] (%p15011_p7), %v9248_v63 }
0x1fbd   : > { %11860 = vset.pattern.permute.xlu0 %v14898_v36 }
0x1fc0   : > { %v11899_v44 = vpop.eup %11898  ;;  %9020 = vrot.lane.b32.xlu1 %v8588_v13, %s14928_s1  ;;  %8939 = vperm.xlu0 %11860, %v8588_v13  }
0x1fc1   : > { %v8776_v28 = vmul.f32 %v11899_v44, %v8767_v29  ;;  %11861 = vset.pattern.permute.xlu1 %v14929_v5 }
0x1fc3   : > { %10833 = vmatpush3.msra.mxu1 %v8776_v28 }
0x1fc4   : > { %9017 = vperm.xlu1 %11861, %v8588_v13   ;;  %10835 = vmatmul.mubr.msk.f32.vlgmr.msra.gmra.mrb[72].mxu1 %vm1977_vm2, %v8588_v13 }
0x1fc5   : > { %10837 = vmatprep.subr.mxu1 %v14867_v45  ;;  %10839 = vmatprep.mubr.msk.f32.mxu1 %vm12346_vm0, %v14867_v45 }
0x1fc6   : > { %11863 = vset.pattern.permute.xlu0 %v12362_v41 }
0x1fc8   : > { %11862 = vset.pattern.permute.xlu1 %v12362_v41 }
0x1fc9   : > { %9101 = vperm.xlu1 %11862, %v9098_v25  }
0x202a   : > { %v8862_v12 = vpop.permute.xlu1 %8861 }
0x2037   : > { %v8780_v57 = vpop.permute.xlu0 %8779 }
0x203b   : > { %v8859_v5 = vpop.permute.xlu1 %8858  ;;  %v8943_v35 = vpop.permute.xlu0 %8942 }
0x203f   : > { %v9021_v8 = vpop.permute.xlu1 %9020 }
0x2043   : > { %v9018_v21 = vpop.permute.xlu1 %9017 }
0x2097   : > { %v8850_v36 = vpop.f32.mrb[72].mxu1 }
0x2098   : > { %v8851_v16 = vadd.f32 %v8850_v36, %v8780_v57  ;;  %v10836_v49 = vpop.f32.mrb[73].mxu1 }
0x209a   : > { %vm8854_vm7 = vcmp.gt.f32.partialorder %v8851_v16, 0.0  ;;  %v8855_v53 = vmul.f32 0.2, %v8851_v16 }
0x209c   : > { %v8856_v1 = vsel %vm8854_vm7, %v8851_v16, %v8855_v53 }
0x209d   : > { %10838 = vmatpush3.msra.mxu1 %v8856_v1 }
0x209e   : > { %10840 = vmatmul.mubr.msk.f32.vlgmr.msra.gmra.mrb[74].mxu1 %vm2059_vm15, %v8862_v12  ;;  %10842 = vmatprep.subr.mxu1 %v14867_v45 }
0x209f   : > { %10844 = vmatprep.mubr.msk.f32.mxu1 %vm12346_vm0, %v14867_v45 }
0x2171   : > { %v8931_v15 = vpop.f32.mrb[74].mxu1 }
0x2172   : > { %v8932_v32 = vadd.f32 %v8931_v15, %v8859_v5  ;;  %v10841_v14 = vpop.f32.mrb[75].mxu1 }
0x2174   : > { %vm8935_vm8 = vcmp.gt.f32.partialorder %v8932_v32, 0.0  ;;  %v8936_v42 = vmul.f32 0.2, %v8932_v32 }
0x2176   : > { %v8937_v43 = vsel %vm8935_vm8, %v8932_v32, %v8936_v42 }
0x2177   : > { %10843 = vmatpush3.msra.mxu1 %v8937_v43 }
0x2178   : > { %10845 = vmatmul.mubr.msk.f32.vlgmr.msra.gmra.mrb[76].mxu1 %vm2059_vm15, %v8943_v35  ;;  %11578 = vmatprep.subr.bf16.mxu1 %v14869_v7  ;;  %v8940_v7 = vpop.permute.xlu0 %8939 }
0x2179   : > { %11580 = vmatpush3.bf16.msra.mxu1 %v11576_v50  ;;  %10853 = vmatprep.mubr.msk.f32.mxu1 %vm12346_vm0, %v14867_v45  ;;  %v11615_v10 = vadd.f32 %v9018_v21, %v8940_v7  ;;  %vm9177_vm0 = vcmask 518144  }
0x217a   : > { %10851 = vmatprep.subr.mxu1 %v14867_v45  ;;  %v9102_v45 = vpop.permute.xlu1 %9101 }
0x217d   : > { %10852 = vmatpush3.msra.mxu1 %v8776_v28 }
0x2180   : > { %10854 = vmatmul.mubr.msk.f32.vlgmr.msra.gmra.mrb[76].mxu1 %vm1977_vm2, %v9021_v8 }
0x2253   : > { %v9090_v46 = vpop.f32.mrb[76].mxu1 }
0x2254   : > { %v11616_v34 = vadd.f32 %v11615_v10, %v9090_v46  ;;  %v10855_v39 = vpop.f32.mrb[77].mxu1 }
0x2256   : > { %9624 = vst.msk [vmem:[%s13057_s10 + $0x30] sm:$0xff] %vm829_vm3, %v11616_v34  ;;  %10857 = vmatpush3.msra.mxu0 %v11616_v34 }
0x2257   : > { %10859 = vmatmul.mubr.msk.f32.vlgmr.msra.gmra.mrb[78].mxu0 %vm2059_vm15, %v9097_v26 }
0x225d   : > { %v9250_v62 = vld [vmem:[%s13057_s10 + $0x30] sm:$0xff] (%p15011_p7) }
0x225e   : > { %9251 = vst [vmem:[%s9198_s6 + $0x60] sm:$0xff] (%p15011_p7), %v9250_v62 }
0x2329   : > { %9196 = sbr.rel (!%p15011_p7) target bundleno = 9008 (0x2330), region = 148 }
0x232a   : > { %v9173_v2 = vpop.f32.mrb[78].mxu0 }
0x232b   : > { %v9174_v30 = vadd.f32 %v9173_v2, %v9102_v45  ;;  %v10860_v40 = vpop.f32.mrb[79].mxu0 }
0x232d   : > { %9178 = vst.msk [vmem:[%s826_s0] sm:$0x7] %vm9177_vm0, %v9174_v30  ;;  %v9626_v56 = vclamps-f32 %v9174_v30, 1.0 }
0x232f   : > { %9181 = vst.msk [vmem:[%s822_s5] sm:$0x7] %vm9177_vm0, %v9626_v56 }
0x2330 PF: > { %p37_p12 = scmp.ge.s32.totalorder %s12795_s4, 4   ;;  %s15013_s1 = smov %s12316_s22 }
0x2331   : > { %s15014_s22 = smov %s12320_s23  ;;  %s15015_s23 = smov %s12807_s19 }
0x2332   : > { %s15016_s24 = smov %s12795_s4  ;;  %39 = sbr.rel (!%p37_p12) target bundleno = 25 (0x19), region = 276 }
0x2339   :  { %9287 = vsyncpa [#allocation3], 1 }
0x233a   :  { %9289 = vsyncpa [#allocation3 + $0x1], 1 }
0x233b   :  { %9290 = vsyncpa [#allocation5], 1 }
0x233c   :  { %9291 = vsyncpa [#allocation8], 1 }
0x233d   :  { %9292 = vsyncpa [#allocation11], 1 }
0x233e   :  { %9293 = vsyncpa [#allocation14], 1 }
0x233f   :  { %9294 = vsyncpa [#allocation17], 1 }
0x2340   :  { %9295 = vsyncpa [#allocation20], 1 }

</bundles_post_ra>
